<compile_context>
chip_gen: v5e
topology: v5e:2x2
jax: 0.10.0
libtpu: 0.0.40
codegen_flags: <defaults>
</compile_context>

<pallas_src>
import jax
import jax.numpy as jnp
from jax.experimental import pallas as pl
from jax.experimental.pallas import tpu as pltpu

HEADS = 10
FIN = 78        # raw node feature dim
FP = 128        # padded node feature dim
HF = 128        # padded per-head output dim of GAT layer 1 (78 -> 128)
G2 = 128        # padded output dim of GAT layer 2 / fc_g1 (64 -> 128)
TGT = 1000
TGTP = 1024


# ----------------------------------------------------------------------------
# Fused kernel: 2 GAT layers + pool + fc per drug branch, then the head MLP.
# One grid step == one graph of the batch.
# ----------------------------------------------------------------------------
def _masked_softmax_attend(h, adj_mask, a_src, a_dst):
    """One attention head.  h: (N, Fh); a_src/a_dst: (1, Fh); adj_mask: (N, N)
    with adj_mask[i, j] == True iff edge j -> i.  Returns (N, Fh)."""
    src = jnp.sum(h * a_src, axis=1, keepdims=True)          # score of source j
    dst = jnp.sum(h * a_dst, axis=1, keepdims=True)          # score of target i
    e = dst + src.T                                          # e[i, j]
    e = jnp.where(e > 0.0, e, 0.2 * e)                       # LeakyReLU(0.2)
    e = jnp.where(adj_mask, e, -1e30)                        # mask non-edges
    e = e - jnp.max(e, axis=1, keepdims=True)
    p = jnp.where(adj_mask, jnp.exp(e), 0.0)
    alpha = p * pl.reciprocal(jnp.sum(p, axis=1, keepdims=True), approx=True)
    return jnp.dot(alpha, h, preferred_element_type=jnp.float32)


def _gatnet_kernel(x_ref, adj_ref, tgt_ref,
                   wg1_ref, as1_ref, ad1_ref, bg1_ref,
                   wg2_ref, as2_ref, ad2_ref, bg2_ref,
                   wfc_ref, bfc_ref,
                   wxt_ref, bxt_ref, w1a_ref, w1b_ref, w1c_ref, b1_ref,
                   w2_ref, b2_ref, wo_ref, bo_ref,
                   o_ref):
    xds = []
    for d in range(2):                                # the two drug branches
        x = x_ref[d, 0]                               # (N, FP)
        adj = adj_ref[d, 0]                           # (N, N)
        mask = adj > 0.0

        # ---- GATConv 1: heads=10, per-head dim padded to 128, then ELU ----
        h = jnp.dot(x, wg1_ref[d], preferred_element_type=jnp.float32)  # (N, HEADS*HF)
        as1 = as1_ref[d]                              # (HEADS, HF)
        ad1 = ad1_ref[d]
        slabs = []
        for hd in range(HEADS):
            hh = h[:, hd * HF:(hd + 1) * HF]          # lane-aligned 128-wide slab
            slabs.append(_masked_softmax_attend(
                hh, mask, as1[hd:hd + 1, :], ad1[hd:hd + 1, :]))
        h1 = jnp.concatenate(slabs, axis=1) + bg1_ref[d]                # (N, HEADS*HF)
        h1 = jnp.where(h1 > 0.0, h1, jnp.exp(jnp.minimum(h1, 0.0)) - 1.0)  # safe ELU

        # ---- GATConv 2: heads=1, out dim padded 64 -> 128, then ReLU ----
        h2 = jnp.dot(h1, wg2_ref[d], preferred_element_type=jnp.float32)  # (N, G2)
        g2 = _masked_softmax_attend(h2, mask, as2_ref[d], ad2_ref[d]) + bg2_ref[d]
        g2 = jnp.maximum(g2, 0.0)

        # ---- global max pool over nodes + fc_g1 + ReLU ----
        pooled = jnp.max(g2, axis=0, keepdims=True)                       # (1, G2)
        xd = jnp.dot(pooled, wfc_ref[d],
                     preferred_element_type=jnp.float32) + bfc_ref[d]
        xds.append(jnp.maximum(xd, 0.0))                                  # (1, G2)

    # ---- head MLP: fc1_xt, fc1 (split over the concat), fc2, out ----
    xt = jnp.dot(tgt_ref[0], wxt_ref[...],
                 preferred_element_type=jnp.float32) + bxt_ref[...]       # (1, 128)
    hc = (jnp.dot(xds[0], w1a_ref[...], preferred_element_type=jnp.float32)
          + jnp.dot(xds[1], w1b_ref[...], preferred_element_type=jnp.float32)
          + jnp.dot(xt, w1c_ref[...], preferred_element_type=jnp.float32)
          + b1_ref[...])
    hc = jnp.maximum(hc, 0.0)                                             # (1, 128)
    hc = jnp.maximum(jnp.dot(hc, w2_ref[...],
                             preferred_element_type=jnp.float32) + b2_ref[...], 0.0)
    o_ref[0] = jnp.dot(hc, wo_ref[...],
                       preferred_element_type=jnp.float32) + bo_ref[...]  # (1, 1)


# ----------------------------------------------------------------------------
# Host-side layout prep (done once): pad / reorder weights into the lane-aligned
# kernel layout.  All padding is with zeros, so results are bit-equivalent.
# ----------------------------------------------------------------------------
def _pad(a, shape):
    out = jnp.zeros(shape, a.dtype)
    return out.at[tuple(slice(0, s) for s in a.shape)].set(a)


def _prepare_params(p):
    def branch(br):
        wg1 = _pad(p[f"{br}_g1_w"].reshape(FIN, HEADS, FIN),
                   (FP, HEADS, HF)).reshape(FP, HEADS * HF)
        bg1 = _pad(p[f"{br}_g1_b"].reshape(1, HEADS, FIN),
                   (1, HEADS, HF)).reshape(1, HEADS * HF)
        # fold head-major reorder + per-head padding into the layer-2 weight:
        wg2 = _pad(p[f"{br}_g2_w"].reshape(HEADS, FIN, 64),
                   (HEADS, HF, G2)).reshape(HEADS * HF, G2)
        return dict(
            wg1=wg1,
            as1=_pad(p[f"{br}_g1_asrc"], (HEADS, HF)),
            ad1=_pad(p[f"{br}_g1_adst"], (HEADS, HF)),
            bg1=bg1,
            wg2=wg2,
            as2=_pad(p[f"{br}_g2_asrc"], (1, G2)),
            ad2=_pad(p[f"{br}_g2_adst"], (1, G2)),
            bg2=_pad(p[f"{br}_g2_b"], (1, G2)),
            wfc=_pad(p[f"{br}_fc_w"], (G2, G2)),
            bfc=_pad(p[f"{br}_fc_b"], (1, G2)),
        )

    bd1, bd2 = branch("d1"), branch("d2")
    stacked = {k: jnp.stack([bd1[k], bd2[k]], axis=0) for k in bd1}
    head = dict(
        wxt=_pad(p["w_xt"], (TGTP, 128)), bxt=p["b_xt"],
        w1a=_pad(p["w1a"], (G2, 128)), w1b=_pad(p["w1b"], (G2, 128)),
        w1c=p["w1c"], b1=p["b1"],
        w2=_pad(p["w2"], (128, 128)), b2=_pad(p["b2"], (1, 128)),
        wo=_pad(p["wo"], (128, 1)), bo=p["bo"],
    )
    return stacked, head


# ----------------------------------------------------------------------------
# Full forward: single pallas_call, grid over the graph batch ("parallel").
# ----------------------------------------------------------------------------
@jax.jit
def gatnet_forward(params, x1, adj1, x2, adj2, target):
    stacked, head = _prepare_params(params)
    B, N, _ = x1.shape
    x_s = jnp.stack([_pad(x1, (B, N, FP)), _pad(x2, (B, N, FP))], axis=0)  # (2,B,N,FP)
    adj_s = jnp.stack([adj1, adj2], axis=0)                                # (2,B,N,N)
    tgt = _pad(target.astype(jnp.float32).reshape(B, 1, TGT), (B, 1, TGTP))

    def const_spec(shape):
        n = len(shape)
        return pl.BlockSpec(shape, lambda b, n=n: (0,) * n)

    s, h = stacked, head
    in_specs = [
        pl.BlockSpec((2, 1, N, FP), lambda b: (0, b, 0, 0)),
        pl.BlockSpec((2, 1, N, N), lambda b: (0, b, 0, 0)),
        pl.BlockSpec((1, 1, TGTP), lambda b: (b, 0, 0)),
    ]
    in_specs += [const_spec(s[k].shape) for k in
                 ("wg1", "as1", "ad1", "bg1", "wg2", "as2", "ad2", "bg2",
                  "wfc", "bfc")]
    in_specs += [const_spec(h[k].shape) for k in
                 ("wxt", "bxt", "w1a", "w1b", "w1c", "b1", "w2", "b2",
                  "wo", "bo")]

    out = pl.pallas_call(
        _gatnet_kernel,
        out_shape=jax.ShapeDtypeStruct((B, 1, 1), jnp.float32),
        grid=(B,),
        in_specs=in_specs,
        out_specs=pl.BlockSpec((1, 1, 1), lambda b: (b, 0, 0)),
        compiler_params=pltpu.CompilerParams(
            dimension_semantics=("parallel",)),
    )(x_s, adj_s, tgt,
      s["wg1"], s["as1"], s["ad1"], s["bg1"],
      s["wg2"], s["as2"], s["ad2"], s["bg2"],
      s["wfc"], s["bfc"],
      h["wxt"], h["bxt"], h["w1a"], h["w1b"], h["w1c"], h["b1"],
      h["w2"], h["b2"], h["wo"], h["bo"])
    return out.reshape(B, 1)


# ----------------------------------------------------------------------------
# Pure-JAX reference (same math, native unpadded layout) for verification.
# ----------------------------------------------------------------------------
def _ref_gat_layer(x, adj, w, a_src, a_dst, bias, heads, f_out, act):
    n = x.shape[0]
    hh = (x @ w).reshape(n, heads, f_out)
    src = jnp.einsum("nhf,hf->nh", hh, a_src)
    dst = jnp.einsum("nhf,hf->nh", hh, a_dst)
    e = dst[:, None, :] + src[None, :, :]          # (i, j, h)
    e = jnp.where(e > 0.0, e, 0.2 * e)
    mask = (adj > 0.0)[:, :, None]
    e = jnp.where(mask, e, -1e30)
    e = e - jnp.max(e, axis=1, keepdims=True)
    p = jnp.where(mask, jnp.exp(e), 0.0)
    alpha = p / jnp.sum(p, axis=1, keepdims=True)
    out = jnp.einsum("ijh,jhf->ihf", alpha, hh).reshape(n, heads * f_out) + bias
    if act == "elu":
        return jnp.where(out > 0.0, out, jnp.exp(jnp.minimum(out, 0.0)) - 1.0)
    return jnp.maximum(out, 0.0)


def _ref_branch(p, br, x, adj):
    l1 = jax.vmap(lambda xb, ab: _ref_gat_layer(
        xb, ab, p[f"{br}_g1_w"], p[f"{br}_g1_asrc"], p[f"{br}_g1_adst"],
        p[f"{br}_g1_b"], HEADS, FIN, "elu"))(x, adj)
    l2 = jax.vmap(lambda xb, ab: _ref_gat_layer(
        xb, ab, p[f"{br}_g2_w"], p[f"{br}_g2_asrc"], p[f"{br}_g2_adst"],
        p[f"{br}_g2_b"], 1, 64, "relu"))(l1, adj)
    pooled = jnp.max(l2, axis=1)
    return jnp.maximum(pooled @ p[f"{br}_fc_w"] + p[f"{br}_fc_b"], 0.0)


def gatnet_reference(p, x1, adj1, x2, adj2, target):
    xd1 = _ref_branch(p, "d1", x1, adj1)
    xd2 = _ref_branch(p, "d2", x2, adj2)
    xt = target @ p["w_xt"] + p["b_xt"]
    hc = jnp.maximum(xd1 @ p["w1a"] + xd2 @ p["w1b"] + xt @ p["w1c"] + p["b1"], 0.0)
    hc = jnp.maximum(hc @ p["w2"] + p["b2"], 0.0)
    return hc @ p["wo"] + p["bo"]


# ----------------------------------------------------------------------------
# Deterministic synthetic parameters / inputs (PyTorch Linear weights stored
# transposed so the kernels compute x @ W + b).
# ----------------------------------------------------------------------------
def init_params(key):
    def nrm(k, shape, scale=0.1):
        return jax.random.normal(k, shape, jnp.float32) * scale

    keys = iter(jax.random.split(key, 64))
    p = {}
    for br in ("d1", "d2"):
        p[f"{br}_g1_w"] = nrm(next(keys), (FIN, HEADS * FIN))
        p[f"{br}_g1_asrc"] = nrm(next(keys), (HEADS, FIN))
        p[f"{br}_g1_adst"] = nrm(next(keys), (HEADS, FIN))
        p[f"{br}_g1_b"] = nrm(next(keys), (1, HEADS * FIN))
        p[f"{br}_g2_w"] = nrm(next(keys), (HEADS * FIN, 64))
        p[f"{br}_g2_asrc"] = nrm(next(keys), (1, 64))
        p[f"{br}_g2_adst"] = nrm(next(keys), (1, 64))
        p[f"{br}_g2_b"] = nrm(next(keys), (1, 64))
        p[f"{br}_fc_w"] = nrm(next(keys), (64, 64))
        p[f"{br}_fc_b"] = nrm(next(keys), (1, 64))
    p["w_xt"] = nrm(next(keys), (TGT, 128))
    p["b_xt"] = nrm(next(keys), (1, 128))
    # fc1 (256 -> 128) split along the input: [xd1(64) | xd2(64) | xt(128)]
    p["w1a"] = nrm(next(keys), (64, 128))
    p["w1b"] = nrm(next(keys), (64, 128))
    p["w1c"] = nrm(next(keys), (128, 128))
    p["b1"] = nrm(next(keys), (1, 128))
    p["w2"] = nrm(next(keys), (128, 32))
    p["b2"] = nrm(next(keys), (1, 32))
    p["wo"] = nrm(next(keys), (32, 1))
    p["bo"] = nrm(next(keys), (1, 1))
    return p


def make_graph_batch(key, B, N, F):
    kx, ka = jax.random.split(key)
    x = jax.random.normal(kx, (B, N, F), jnp.float32)
    a = jax.random.bernoulli(ka, 0.3, (B, N, N)).astype(jnp.float32)
    a = jnp.maximum(a, jnp.transpose(a, (0, 2, 1)))           # undirected edges
    a = jnp.maximum(a, jnp.eye(N, dtype=jnp.float32)[None])   # GATConv self-loops
    return x, a


if __name__ == "__main__":
    B, N = 2, 16
    key = jax.random.PRNGKey(0)
    k_par, k_g1, k_g2, k_t = jax.random.split(key, 4)

    params = init_params(k_par)
    x1, adj1 = make_graph_batch(k_g1, B, N, FIN)
    x2, adj2 = make_graph_batch(k_g2, B, N, FIN)
    target = jax.random.normal(k_t, (B, TGT), jnp.float32)

    out = gatnet_forward(params, x1, adj1, x2, adj2, target)
    out = jax.block_until_ready(out)

    ref = gatnet_reference(params, x1, adj1, x2, adj2, target)
    assert out.shape == (B, 1) and out.dtype == jnp.float32
    assert bool(jnp.all(jnp.isfinite(out)))
    assert bool(jnp.allclose(out, ref, rtol=5e-2, atol=5e-2)), (out, ref)
    print("KERNEL_OK")
</pallas_src>

<mosaic_0001>
module attributes {stable_mosaic.version = 11 : i64} {
  func.func @_gatnet_kernel(%arg0: i32, %arg1: memref<2x1x16x128xf32, #tpu.memory_space<vmem>>, %arg2: memref<2x1x16x16xf32, #tpu.memory_space<vmem>>, %arg3: memref<1x1x1024xf32, #tpu.memory_space<vmem>>, %arg4: memref<2x128x1280xf32, #tpu.memory_space<vmem>>, %arg5: memref<2x10x128xf32, #tpu.memory_space<vmem>>, %arg6: memref<2x10x128xf32, #tpu.memory_space<vmem>>, %arg7: memref<2x1x1280xf32, #tpu.memory_space<vmem>>, %arg8: memref<2x1280x128xf32, #tpu.memory_space<vmem>>, %arg9: memref<2x1x128xf32, #tpu.memory_space<vmem>>, %arg10: memref<2x1x128xf32, #tpu.memory_space<vmem>>, %arg11: memref<2x1x128xf32, #tpu.memory_space<vmem>>, %arg12: memref<2x128x128xf32, #tpu.memory_space<vmem>>, %arg13: memref<2x1x128xf32, #tpu.memory_space<vmem>>, %arg14: memref<1024x128xf32, #tpu.memory_space<vmem>>, %arg15: memref<1x128xf32, #tpu.memory_space<vmem>>, %arg16: memref<128x128xf32, #tpu.memory_space<vmem>>, %arg17: memref<128x128xf32, #tpu.memory_space<vmem>>, %arg18: memref<128x128xf32, #tpu.memory_space<vmem>>, %arg19: memref<1x128xf32, #tpu.memory_space<vmem>>, %arg20: memref<128x128xf32, #tpu.memory_space<vmem>>, %arg21: memref<1x128xf32, #tpu.memory_space<vmem>>, %arg22: memref<128x1xf32, #tpu.memory_space<vmem>>, %arg23: memref<1x1xf32, #tpu.memory_space<vmem>>, %arg24: memref<1x1x1xf32, #tpu.memory_space<vmem>>) attributes {dimension_semantics = [#tpu.dimension_semantics<parallel>], iteration_bounds = array<i64: 2>, scalar_prefetch = 0 : i64, scratch_operands = 0 : i64, tpu.core_type = #tpu.core_type<tc>, window_params = [{transform_indices = @transform_0, window_bounds = array<i64: 2, 1, 16, 128>}, {transform_indices = @transform_1, window_bounds = array<i64: 2, 1, 16, 16>}, {transform_indices = @transform_2, window_bounds = array<i64: 1, 1, 1024>}, {pipeline_mode = #tpu.pipeline_mode<synchronous>, transform_indices = @transform_3, window_bounds = array<i64: 2, 128, 1280>}, {pipeline_mode = #tpu.pipeline_mode<synchronous>, transform_indices = @transform_4, window_bounds = array<i64: 2, 10, 128>}, {pipeline_mode = #tpu.pipeline_mode<synchronous>, transform_indices = @transform_5, window_bounds = array<i64: 2, 10, 128>}, {pipeline_mode = #tpu.pipeline_mode<synchronous>, transform_indices = @transform_6, window_bounds = array<i64: 2, 1, 1280>}, {pipeline_mode = #tpu.pipeline_mode<synchronous>, transform_indices = @transform_7, window_bounds = array<i64: 2, 1280, 128>}, {pipeline_mode = #tpu.pipeline_mode<synchronous>, transform_indices = @transform_8, window_bounds = array<i64: 2, 1, 128>}, {pipeline_mode = #tpu.pipeline_mode<synchronous>, transform_indices = @transform_9, window_bounds = array<i64: 2, 1, 128>}, {pipeline_mode = #tpu.pipeline_mode<synchronous>, transform_indices = @transform_10, window_bounds = array<i64: 2, 1, 128>}, {pipeline_mode = #tpu.pipeline_mode<synchronous>, transform_indices = @transform_11, window_bounds = array<i64: 2, 128, 128>}, {pipeline_mode = #tpu.pipeline_mode<synchronous>, transform_indices = @transform_12, window_bounds = array<i64: 2, 1, 128>}, {pipeline_mode = #tpu.pipeline_mode<synchronous>, transform_indices = @transform_13, window_bounds = array<i64: 1024, 128>}, {pipeline_mode = #tpu.pipeline_mode<synchronous>, transform_indices = @transform_14, window_bounds = array<i64: 1, 128>}, {pipeline_mode = #tpu.pipeline_mode<synchronous>, transform_indices = @transform_15, window_bounds = array<i64: 128, 128>}, {pipeline_mode = #tpu.pipeline_mode<synchronous>, transform_indices = @transform_16, window_bounds = array<i64: 128, 128>}, {pipeline_mode = #tpu.pipeline_mode<synchronous>, transform_indices = @transform_17, window_bounds = array<i64: 128, 128>}, {pipeline_mode = #tpu.pipeline_mode<synchronous>, transform_indices = @transform_18, window_bounds = array<i64: 1, 128>}, {pipeline_mode = #tpu.pipeline_mode<synchronous>, transform_indices = @transform_19, window_bounds = array<i64: 128, 128>}, {pipeline_mode = #tpu.pipeline_mode<synchronous>, transform_indices = @transform_20, window_bounds = array<i64: 1, 128>}, {pipeline_mode = #tpu.pipeline_mode<synchronous>, transform_indices = @transform_21, window_bounds = array<i64: 128, 1>}, {pipeline_mode = #tpu.pipeline_mode<synchronous>, transform_indices = @transform_22, window_bounds = array<i64: 1, 1>}, {transform_indices = @transform_23, window_bounds = array<i64: 1, 1, 1>}]} {
    %c0 = arith.constant 0 : index
    %c0_0 = arith.constant 0 : index
    %c0_1 = arith.constant 0 : index
    %c0_2 = arith.constant 0 : index
    %0 = vector.load %arg1[%c0, %c0_0, %c0_1, %c0_2] : memref<2x1x16x128xf32, #tpu.memory_space<vmem>>, vector<1x1x16x128xf32>
    %1 = vector.shape_cast %0 : vector<1x1x16x128xf32> to vector<16x128xf32>
    %c0_3 = arith.constant 0 : index
    %c0_4 = arith.constant 0 : index
    %c0_5 = arith.constant 0 : index
    %c0_6 = arith.constant 0 : index
    %2 = vector.load %arg2[%c0_3, %c0_4, %c0_5, %c0_6] : memref<2x1x16x16xf32, #tpu.memory_space<vmem>>, vector<1x1x16x16xf32>
    %3 = vector.shape_cast %2 : vector<1x1x16x16xf32> to vector<16x16xf32>
    %cst = arith.constant 0.000000e+00 : f32
    %4 = vector.broadcast %cst : f32 to vector<16x16xf32>
    %5 = arith.cmpf ogt, %3, %4 : vector<16x16xf32>
    %c0_7 = arith.constant 0 : index
    %c0_8 = arith.constant 0 : index
    %c0_9 = arith.constant 0 : index
    %6 = vector.load %arg4[%c0_7, %c0_8, %c0_9] : memref<2x128x1280xf32, #tpu.memory_space<vmem>>, vector<1x128x1280xf32>
    %7 = vector.shape_cast %6 : vector<1x128x1280xf32> to vector<128x1280xf32>
    %cst_10 = arith.constant dense<0.000000e+00> : vector<16x1280xf32>
    %8 = tpu.matmul %1, %7, %cst_10 {dimension_numbers = #tpu.dot_dimension_numbers<[1], [0], [0], [1], [0, 0, 1, 1], [], []>} : vector<16x128xf32>, vector<128x1280xf32>, vector<16x1280xf32> -> vector<16x1280xf32>
    %c0_11 = arith.constant 0 : index
    %c0_12 = arith.constant 0 : index
    %c0_13 = arith.constant 0 : index
    %9 = vector.load %arg5[%c0_11, %c0_12, %c0_13] : memref<2x10x128xf32, #tpu.memory_space<vmem>>, vector<1x10x128xf32>
    %10 = vector.shape_cast %9 : vector<1x10x128xf32> to vector<10x128xf32>
    %c0_14 = arith.constant 0 : index
    %c0_15 = arith.constant 0 : index
    %c0_16 = arith.constant 0 : index
    %11 = vector.load %arg6[%c0_14, %c0_15, %c0_16] : memref<2x10x128xf32, #tpu.memory_space<vmem>>, vector<1x10x128xf32>
    %12 = vector.shape_cast %11 : vector<1x10x128xf32> to vector<10x128xf32>
    %13 = vector.extract_strided_slice %8 {offsets = [0, 0], sizes = [16, 128], strides = [1, 1]} : vector<16x1280xf32> to vector<16x128xf32>
    %14 = vector.extract_strided_slice %10 {offsets = [0, 0], sizes = [1, 128], strides = [1, 1]} : vector<10x128xf32> to vector<1x128xf32>
    %15 = vector.extract_strided_slice %12 {offsets = [0, 0], sizes = [1, 128], strides = [1, 1]} : vector<10x128xf32> to vector<1x128xf32>
    %16 = vector.broadcast %14 : vector<1x128xf32> to vector<16x128xf32>
    %17 = arith.mulf %13, %16 : vector<16x128xf32>
    %cst_17 = arith.constant dense<0.000000e+00> : vector<16xf32>
    %18 = vector.multi_reduction <add>, %17, %cst_17 [1] : vector<16x128xf32> to vector<16xf32>
    %19 = vector.shape_cast %18 : vector<16xf32> to vector<16x1xf32>
    %20 = vector.broadcast %15 : vector<1x128xf32> to vector<16x128xf32>
    %21 = arith.mulf %13, %20 : vector<16x128xf32>
    %cst_18 = arith.constant dense<0.000000e+00> : vector<16xf32>
    %22 = vector.multi_reduction <add>, %21, %cst_18 [1] : vector<16x128xf32> to vector<16xf32>
    %23 = vector.shape_cast %22 : vector<16xf32> to vector<16x1xf32>
    %24 = tpu.transpose %19, [1, 0] : vector<16x1xf32> -> vector<1x16xf32>
    %25 = vector.broadcast %23 : vector<16x1xf32> to vector<16x16xf32>
    %26 = vector.broadcast %24 : vector<1x16xf32> to vector<16x16xf32>
    %27 = arith.addf %25, %26 : vector<16x16xf32>
    %cst_19 = arith.constant 0.000000e+00 : f32
    %28 = vector.broadcast %cst_19 : f32 to vector<16x16xf32>
    %29 = arith.cmpf ogt, %27, %28 : vector<16x16xf32>
    %cst_20 = arith.constant 2.000000e-01 : f32
    %30 = vector.broadcast %cst_20 : f32 to vector<16x16xf32>
    %31 = arith.mulf %30, %27 : vector<16x16xf32>
    %32 = arith.select %29, %27, %31 : vector<16x16xi1>, vector<16x16xf32>
    %cst_21 = arith.constant -1.000000e+30 : f32
    %33 = vector.broadcast %cst_21 : f32 to vector<16x16xf32>
    %34 = arith.select %5, %32, %33 : vector<16x16xi1>, vector<16x16xf32>
    %cst_22 = arith.constant dense<0xFF800000> : vector<16xf32>
    %35 = vector.multi_reduction <maximumf>, %34, %cst_22 [1] : vector<16x16xf32> to vector<16xf32>
    %36 = vector.shape_cast %35 : vector<16xf32> to vector<16x1xf32>
    %37 = vector.broadcast %36 : vector<16x1xf32> to vector<16x16xf32>
    %38 = arith.subf %34, %37 : vector<16x16xf32>
    %39 = math.exp %38 : vector<16x16xf32>
    %cst_23 = arith.constant 0.000000e+00 : f32
    %40 = vector.broadcast %cst_23 : f32 to vector<16x16xf32>
    %41 = arith.select %5, %39, %40 : vector<16x16xi1>, vector<16x16xf32>
    %cst_24 = arith.constant dense<0.000000e+00> : vector<16xf32>
    %42 = vector.multi_reduction <add>, %41, %cst_24 [1] : vector<16x16xf32> to vector<16xf32>
    %43 = vector.shape_cast %42 : vector<16xf32> to vector<16x1xf32>
    %44 = tpu.reciprocal %43 {approx = true} : vector<16x1xf32> -> vector<16x1xf32>
    %45 = vector.broadcast %44 : vector<16x1xf32> to vector<16x16xf32>
    %46 = arith.mulf %41, %45 : vector<16x16xf32>
    %cst_25 = arith.constant dense<0.000000e+00> : vector<16x128xf32>
    %47 = tpu.matmul %46, %13, %cst_25 {dimension_numbers = #tpu.dot_dimension_numbers<[1], [0], [0], [1], [0, 0, 1, 1], [], []>} : vector<16x16xf32>, vector<16x128xf32>, vector<16x128xf32> -> vector<16x128xf32>
    %48 = vector.extract_strided_slice %8 {offsets = [0, 128], sizes = [16, 128], strides = [1, 1]} : vector<16x1280xf32> to vector<16x128xf32>
    %49 = vector.extract_strided_slice %10 {offsets = [1, 0], sizes = [1, 128], strides = [1, 1]} : vector<10x128xf32> to vector<1x128xf32>
    %50 = vector.extract_strided_slice %12 {offsets = [1, 0], sizes = [1, 128], strides = [1, 1]} : vector<10x128xf32> to vector<1x128xf32>
    %51 = vector.broadcast %49 : vector<1x128xf32> to vector<16x128xf32>
    %52 = arith.mulf %48, %51 : vector<16x128xf32>
    %cst_26 = arith.constant dense<0.000000e+00> : vector<16xf32>
    %53 = vector.multi_reduction <add>, %52, %cst_26 [1] : vector<16x128xf32> to vector<16xf32>
    %54 = vector.shape_cast %53 : vector<16xf32> to vector<16x1xf32>
    %55 = vector.broadcast %50 : vector<1x128xf32> to vector<16x128xf32>
    %56 = arith.mulf %48, %55 : vector<16x128xf32>
    %cst_27 = arith.constant dense<0.000000e+00> : vector<16xf32>
    %57 = vector.multi_reduction <add>, %56, %cst_27 [1] : vector<16x128xf32> to vector<16xf32>
    %58 = vector.shape_cast %57 : vector<16xf32> to vector<16x1xf32>
    %59 = tpu.transpose %54, [1, 0] : vector<16x1xf32> -> vector<1x16xf32>
    %60 = vector.broadcast %58 : vector<16x1xf32> to vector<16x16xf32>
    %61 = vector.broadcast %59 : vector<1x16xf32> to vector<16x16xf32>
    %62 = arith.addf %60, %61 : vector<16x16xf32>
    %cst_28 = arith.constant 0.000000e+00 : f32
    %63 = vector.broadcast %cst_28 : f32 to vector<16x16xf32>
    %64 = arith.cmpf ogt, %62, %63 : vector<16x16xf32>
    %cst_29 = arith.constant 2.000000e-01 : f32
    %65 = vector.broadcast %cst_29 : f32 to vector<16x16xf32>
    %66 = arith.mulf %65, %62 : vector<16x16xf32>
    %67 = arith.select %64, %62, %66 : vector<16x16xi1>, vector<16x16xf32>
    %cst_30 = arith.constant -1.000000e+30 : f32
    %68 = vector.broadcast %cst_30 : f32 to vector<16x16xf32>
    %69 = arith.select %5, %67, %68 : vector<16x16xi1>, vector<16x16xf32>
    %cst_31 = arith.constant dense<0xFF800000> : vector<16xf32>
    %70 = vector.multi_reduction <maximumf>, %69, %cst_31 [1] : vector<16x16xf32> to vector<16xf32>
    %71 = vector.shape_cast %70 : vector<16xf32> to vector<16x1xf32>
    %72 = vector.broadcast %71 : vector<16x1xf32> to vector<16x16xf32>
    %73 = arith.subf %69, %72 : vector<16x16xf32>
    %74 = math.exp %73 : vector<16x16xf32>
    %cst_32 = arith.constant 0.000000e+00 : f32
    %75 = vector.broadcast %cst_32 : f32 to vector<16x16xf32>
    %76 = arith.select %5, %74, %75 : vector<16x16xi1>, vector<16x16xf32>
    %cst_33 = arith.constant dense<0.000000e+00> : vector<16xf32>
    %77 = vector.multi_reduction <add>, %76, %cst_33 [1] : vector<16x16xf32> to vector<16xf32>
    %78 = vector.shape_cast %77 : vector<16xf32> to vector<16x1xf32>
    %79 = tpu.reciprocal %78 {approx = true} : vector<16x1xf32> -> vector<16x1xf32>
    %80 = vector.broadcast %79 : vector<16x1xf32> to vector<16x16xf32>
    %81 = arith.mulf %76, %80 : vector<16x16xf32>
    %cst_34 = arith.constant dense<0.000000e+00> : vector<16x128xf32>
    %82 = tpu.matmul %81, %48, %cst_34 {dimension_numbers = #tpu.dot_dimension_numbers<[1], [0], [0], [1], [0, 0, 1, 1], [], []>} : vector<16x16xf32>, vector<16x128xf32>, vector<16x128xf32> -> vector<16x128xf32>
    %83 = vector.extract_strided_slice %8 {offsets = [0, 256], sizes = [16, 128], strides = [1, 1]} : vector<16x1280xf32> to vector<16x128xf32>
    %84 = vector.extract_strided_slice %10 {offsets = [2, 0], sizes = [1, 128], strides = [1, 1]} : vector<10x128xf32> to vector<1x128xf32>
    %85 = vector.extract_strided_slice %12 {offsets = [2, 0], sizes = [1, 128], strides = [1, 1]} : vector<10x128xf32> to vector<1x128xf32>
    %86 = vector.broadcast %84 : vector<1x128xf32> to vector<16x128xf32>
    %87 = arith.mulf %83, %86 : vector<16x128xf32>
    %cst_35 = arith.constant dense<0.000000e+00> : vector<16xf32>
    %88 = vector.multi_reduction <add>, %87, %cst_35 [1] : vector<16x128xf32> to vector<16xf32>
    %89 = vector.shape_cast %88 : vector<16xf32> to vector<16x1xf32>
    %90 = vector.broadcast %85 : vector<1x128xf32> to vector<16x128xf32>
    %91 = arith.mulf %83, %90 : vector<16x128xf32>
    %cst_36 = arith.constant dense<0.000000e+00> : vector<16xf32>
    %92 = vector.multi_reduction <add>, %91, %cst_36 [1] : vector<16x128xf32> to vector<16xf32>
    %93 = vector.shape_cast %92 : vector<16xf32> to vector<16x1xf32>
    %94 = tpu.transpose %89, [1, 0] : vector<16x1xf32> -> vector<1x16xf32>
    %95 = vector.broadcast %93 : vector<16x1xf32> to vector<16x16xf32>
    %96 = vector.broadcast %94 : vector<1x16xf32> to vector<16x16xf32>
    %97 = arith.addf %95, %96 : vector<16x16xf32>
    %cst_37 = arith.constant 0.000000e+00 : f32
    %98 = vector.broadcast %cst_37 : f32 to vector<16x16xf32>
    %99 = arith.cmpf ogt, %97, %98 : vector<16x16xf32>
    %cst_38 = arith.constant 2.000000e-01 : f32
    %100 = vector.broadcast %cst_38 : f32 to vector<16x16xf32>
    %101 = arith.mulf %100, %97 : vector<16x16xf32>
    %102 = arith.select %99, %97, %101 : vector<16x16xi1>, vector<16x16xf32>
    %cst_39 = arith.constant -1.000000e+30 : f32
    %103 = vector.broadcast %cst_39 : f32 to vector<16x16xf32>
    %104 = arith.select %5, %102, %103 : vector<16x16xi1>, vector<16x16xf32>
    %cst_40 = arith.constant dense<0xFF800000> : vector<16xf32>
    %105 = vector.multi_reduction <maximumf>, %104, %cst_40 [1] : vector<16x16xf32> to vector<16xf32>
    %106 = vector.shape_cast %105 : vector<16xf32> to vector<16x1xf32>
    %107 = vector.broadcast %106 : vector<16x1xf32> to vector<16x16xf32>
    %108 = arith.subf %104, %107 : vector<16x16xf32>
    %109 = math.exp %108 : vector<16x16xf32>
    %cst_41 = arith.constant 0.000000e+00 : f32
    %110 = vector.broadcast %cst_41 : f32 to vector<16x16xf32>
    %111 = arith.select %5, %109, %110 : vector<16x16xi1>, vector<16x16xf32>
    %cst_42 = arith.constant dense<0.000000e+00> : vector<16xf32>
    %112 = vector.multi_reduction <add>, %111, %cst_42 [1] : vector<16x16xf32> to vector<16xf32>
    %113 = vector.shape_cast %112 : vector<16xf32> to vector<16x1xf32>
    %114 = tpu.reciprocal %113 {approx = true} : vector<16x1xf32> -> vector<16x1xf32>
    %115 = vector.broadcast %114 : vector<16x1xf32> to vector<16x16xf32>
    %116 = arith.mulf %111, %115 : vector<16x16xf32>
    %cst_43 = arith.constant dense<0.000000e+00> : vector<16x128xf32>
    %117 = tpu.matmul %116, %83, %cst_43 {dimension_numbers = #tpu.dot_dimension_numbers<[1], [0], [0], [1], [0, 0, 1, 1], [], []>} : vector<16x16xf32>, vector<16x128xf32>, vector<16x128xf32> -> vector<16x128xf32>
    %118 = vector.extract_strided_slice %8 {offsets = [0, 384], sizes = [16, 128], strides = [1, 1]} : vector<16x1280xf32> to vector<16x128xf32>
    %119 = vector.extract_strided_slice %10 {offsets = [3, 0], sizes = [1, 128], strides = [1, 1]} : vector<10x128xf32> to vector<1x128xf32>
    %120 = vector.extract_strided_slice %12 {offsets = [3, 0], sizes = [1, 128], strides = [1, 1]} : vector<10x128xf32> to vector<1x128xf32>
    %121 = vector.broadcast %119 : vector<1x128xf32> to vector<16x128xf32>
    %122 = arith.mulf %118, %121 : vector<16x128xf32>
    %cst_44 = arith.constant dense<0.000000e+00> : vector<16xf32>
    %123 = vector.multi_reduction <add>, %122, %cst_44 [1] : vector<16x128xf32> to vector<16xf32>
    %124 = vector.shape_cast %123 : vector<16xf32> to vector<16x1xf32>
    %125 = vector.broadcast %120 : vector<1x128xf32> to vector<16x128xf32>
    %126 = arith.mulf %118, %125 : vector<16x128xf32>
    %cst_45 = arith.constant dense<0.000000e+00> : vector<16xf32>
    %127 = vector.multi_reduction <add>, %126, %cst_45 [1] : vector<16x128xf32> to vector<16xf32>
    %128 = vector.shape_cast %127 : vector<16xf32> to vector<16x1xf32>
    %129 = tpu.transpose %124, [1, 0] : vector<16x1xf32> -> vector<1x16xf32>
    %130 = vector.broadcast %128 : vector<16x1xf32> to vector<16x16xf32>
    %131 = vector.broadcast %129 : vector<1x16xf32> to vector<16x16xf32>
    %132 = arith.addf %130, %131 : vector<16x16xf32>
    %cst_46 = arith.constant 0.000000e+00 : f32
    %133 = vector.broadcast %cst_46 : f32 to vector<16x16xf32>
    %134 = arith.cmpf ogt, %132, %133 : vector<16x16xf32>
    %cst_47 = arith.constant 2.000000e-01 : f32
    %135 = vector.broadcast %cst_47 : f32 to vector<16x16xf32>
    %136 = arith.mulf %135, %132 : vector<16x16xf32>
    %137 = arith.select %134, %132, %136 : vector<16x16xi1>, vector<16x16xf32>
    %cst_48 = arith.constant -1.000000e+30 : f32
    %138 = vector.broadcast %cst_48 : f32 to vector<16x16xf32>
    %139 = arith.select %5, %137, %138 : vector<16x16xi1>, vector<16x16xf32>
    %cst_49 = arith.constant dense<0xFF800000> : vector<16xf32>
    %140 = vector.multi_reduction <maximumf>, %139, %cst_49 [1] : vector<16x16xf32> to vector<16xf32>
    %141 = vector.shape_cast %140 : vector<16xf32> to vector<16x1xf32>
    %142 = vector.broadcast %141 : vector<16x1xf32> to vector<16x16xf32>
    %143 = arith.subf %139, %142 : vector<16x16xf32>
    %144 = math.exp %143 : vector<16x16xf32>
    %cst_50 = arith.constant 0.000000e+00 : f32
    %145 = vector.broadcast %cst_50 : f32 to vector<16x16xf32>
    %146 = arith.select %5, %144, %145 : vector<16x16xi1>, vector<16x16xf32>
    %cst_51 = arith.constant dense<0.000000e+00> : vector<16xf32>
    %147 = vector.multi_reduction <add>, %146, %cst_51 [1] : vector<16x16xf32> to vector<16xf32>
    %148 = vector.shape_cast %147 : vector<16xf32> to vector<16x1xf32>
    %149 = tpu.reciprocal %148 {approx = true} : vector<16x1xf32> -> vector<16x1xf32>
    %150 = vector.broadcast %149 : vector<16x1xf32> to vector<16x16xf32>
    %151 = arith.mulf %146, %150 : vector<16x16xf32>
    %cst_52 = arith.constant dense<0.000000e+00> : vector<16x128xf32>
    %152 = tpu.matmul %151, %118, %cst_52 {dimension_numbers = #tpu.dot_dimension_numbers<[1], [0], [0], [1], [0, 0, 1, 1], [], []>} : vector<16x16xf32>, vector<16x128xf32>, vector<16x128xf32> -> vector<16x128xf32>
    %153 = vector.extract_strided_slice %8 {offsets = [0, 512], sizes = [16, 128], strides = [1, 1]} : vector<16x1280xf32> to vector<16x128xf32>
    %154 = vector.extract_strided_slice %10 {offsets = [4, 0], sizes = [1, 128], strides = [1, 1]} : vector<10x128xf32> to vector<1x128xf32>
    %155 = vector.extract_strided_slice %12 {offsets = [4, 0], sizes = [1, 128], strides = [1, 1]} : vector<10x128xf32> to vector<1x128xf32>
    %156 = vector.broadcast %154 : vector<1x128xf32> to vector<16x128xf32>
    %157 = arith.mulf %153, %156 : vector<16x128xf32>
    %cst_53 = arith.constant dense<0.000000e+00> : vector<16xf32>
    %158 = vector.multi_reduction <add>, %157, %cst_53 [1] : vector<16x128xf32> to vector<16xf32>
    %159 = vector.shape_cast %158 : vector<16xf32> to vector<16x1xf32>
    %160 = vector.broadcast %155 : vector<1x128xf32> to vector<16x128xf32>
    %161 = arith.mulf %153, %160 : vector<16x128xf32>
    %cst_54 = arith.constant dense<0.000000e+00> : vector<16xf32>
    %162 = vector.multi_reduction <add>, %161, %cst_54 [1] : vector<16x128xf32> to vector<16xf32>
    %163 = vector.shape_cast %162 : vector<16xf32> to vector<16x1xf32>
    %164 = tpu.transpose %159, [1, 0] : vector<16x1xf32> -> vector<1x16xf32>
    %165 = vector.broadcast %163 : vector<16x1xf32> to vector<16x16xf32>
    %166 = vector.broadcast %164 : vector<1x16xf32> to vector<16x16xf32>
    %167 = arith.addf %165, %166 : vector<16x16xf32>
    %cst_55 = arith.constant 0.000000e+00 : f32
    %168 = vector.broadcast %cst_55 : f32 to vector<16x16xf32>
    %169 = arith.cmpf ogt, %167, %168 : vector<16x16xf32>
    %cst_56 = arith.constant 2.000000e-01 : f32
    %170 = vector.broadcast %cst_56 : f32 to vector<16x16xf32>
    %171 = arith.mulf %170, %167 : vector<16x16xf32>
    %172 = arith.select %169, %167, %171 : vector<16x16xi1>, vector<16x16xf32>
    %cst_57 = arith.constant -1.000000e+30 : f32
    %173 = vector.broadcast %cst_57 : f32 to vector<16x16xf32>
    %174 = arith.select %5, %172, %173 : vector<16x16xi1>, vector<16x16xf32>
    %cst_58 = arith.constant dense<0xFF800000> : vector<16xf32>
    %175 = vector.multi_reduction <maximumf>, %174, %cst_58 [1] : vector<16x16xf32> to vector<16xf32>
    %176 = vector.shape_cast %175 : vector<16xf32> to vector<16x1xf32>
    %177 = vector.broadcast %176 : vector<16x1xf32> to vector<16x16xf32>
    %178 = arith.subf %174, %177 : vector<16x16xf32>
    %179 = math.exp %178 : vector<16x16xf32>
    %cst_59 = arith.constant 0.000000e+00 : f32
    %180 = vector.broadcast %cst_59 : f32 to vector<16x16xf32>
    %181 = arith.select %5, %179, %180 : vector<16x16xi1>, vector<16x16xf32>
    %cst_60 = arith.constant dense<0.000000e+00> : vector<16xf32>
    %182 = vector.multi_reduction <add>, %181, %cst_60 [1] : vector<16x16xf32> to vector<16xf32>
    %183 = vector.shape_cast %182 : vector<16xf32> to vector<16x1xf32>
    %184 = tpu.reciprocal %183 {approx = true} : vector<16x1xf32> -> vector<16x1xf32>
    %185 = vector.broadcast %184 : vector<16x1xf32> to vector<16x16xf32>
    %186 = arith.mulf %181, %185 : vector<16x16xf32>
    %cst_61 = arith.constant dense<0.000000e+00> : vector<16x128xf32>
    %187 = tpu.matmul %186, %153, %cst_61 {dimension_numbers = #tpu.dot_dimension_numbers<[1], [0], [0], [1], [0, 0, 1, 1], [], []>} : vector<16x16xf32>, vector<16x128xf32>, vector<16x128xf32> -> vector<16x128xf32>
    %188 = vector.extract_strided_slice %8 {offsets = [0, 640], sizes = [16, 128], strides = [1, 1]} : vector<16x1280xf32> to vector<16x128xf32>
    %189 = vector.extract_strided_slice %10 {offsets = [5, 0], sizes = [1, 128], strides = [1, 1]} : vector<10x128xf32> to vector<1x128xf32>
    %190 = vector.extract_strided_slice %12 {offsets = [5, 0], sizes = [1, 128], strides = [1, 1]} : vector<10x128xf32> to vector<1x128xf32>
    %191 = vector.broadcast %189 : vector<1x128xf32> to vector<16x128xf32>
    %192 = arith.mulf %188, %191 : vector<16x128xf32>
    %cst_62 = arith.constant dense<0.000000e+00> : vector<16xf32>
    %193 = vector.multi_reduction <add>, %192, %cst_62 [1] : vector<16x128xf32> to vector<16xf32>
    %194 = vector.shape_cast %193 : vector<16xf32> to vector<16x1xf32>
    %195 = vector.broadcast %190 : vector<1x128xf32> to vector<16x128xf32>
    %196 = arith.mulf %188, %195 : vector<16x128xf32>
    %cst_63 = arith.constant dense<0.000000e+00> : vector<16xf32>
    %197 = vector.multi_reduction <add>, %196, %cst_63 [1] : vector<16x128xf32> to vector<16xf32>
    %198 = vector.shape_cast %197 : vector<16xf32> to vector<16x1xf32>
    %199 = tpu.transpose %194, [1, 0] : vector<16x1xf32> -> vector<1x16xf32>
    %200 = vector.broadcast %198 : vector<16x1xf32> to vector<16x16xf32>
    %201 = vector.broadcast %199 : vector<1x16xf32> to vector<16x16xf32>
    %202 = arith.addf %200, %201 : vector<16x16xf32>
    %cst_64 = arith.constant 0.000000e+00 : f32
    %203 = vector.broadcast %cst_64 : f32 to vector<16x16xf32>
    %204 = arith.cmpf ogt, %202, %203 : vector<16x16xf32>
    %cst_65 = arith.constant 2.000000e-01 : f32
    %205 = vector.broadcast %cst_65 : f32 to vector<16x16xf32>
    %206 = arith.mulf %205, %202 : vector<16x16xf32>
    %207 = arith.select %204, %202, %206 : vector<16x16xi1>, vector<16x16xf32>
    %cst_66 = arith.constant -1.000000e+30 : f32
    %208 = vector.broadcast %cst_66 : f32 to vector<16x16xf32>
    %209 = arith.select %5, %207, %208 : vector<16x16xi1>, vector<16x16xf32>
    %cst_67 = arith.constant dense<0xFF800000> : vector<16xf32>
    %210 = vector.multi_reduction <maximumf>, %209, %cst_67 [1] : vector<16x16xf32> to vector<16xf32>
    %211 = vector.shape_cast %210 : vector<16xf32> to vector<16x1xf32>
    %212 = vector.broadcast %211 : vector<16x1xf32> to vector<16x16xf32>
    %213 = arith.subf %209, %212 : vector<16x16xf32>
    %214 = math.exp %213 : vector<16x16xf32>
    %cst_68 = arith.constant 0.000000e+00 : f32
    %215 = vector.broadcast %cst_68 : f32 to vector<16x16xf32>
    %216 = arith.select %5, %214, %215 : vector<16x16xi1>, vector<16x16xf32>
    %cst_69 = arith.constant dense<0.000000e+00> : vector<16xf32>
    %217 = vector.multi_reduction <add>, %216, %cst_69 [1] : vector<16x16xf32> to vector<16xf32>
    %218 = vector.shape_cast %217 : vector<16xf32> to vector<16x1xf32>
    %219 = tpu.reciprocal %218 {approx = true} : vector<16x1xf32> -> vector<16x1xf32>
    %220 = vector.broadcast %219 : vector<16x1xf32> to vector<16x16xf32>
    %221 = arith.mulf %216, %220 : vector<16x16xf32>
    %cst_70 = arith.constant dense<0.000000e+00> : vector<16x128xf32>
    %222 = tpu.matmul %221, %188, %cst_70 {dimension_numbers = #tpu.dot_dimension_numbers<[1], [0], [0], [1], [0, 0, 1, 1], [], []>} : vector<16x16xf32>, vector<16x128xf32>, vector<16x128xf32> -> vector<16x128xf32>
    %223 = vector.extract_strided_slice %8 {offsets = [0, 768], sizes = [16, 128], strides = [1, 1]} : vector<16x1280xf32> to vector<16x128xf32>
    %224 = vector.extract_strided_slice %10 {offsets = [6, 0], sizes = [1, 128], strides = [1, 1]} : vector<10x128xf32> to vector<1x128xf32>
    %225 = vector.extract_strided_slice %12 {offsets = [6, 0], sizes = [1, 128], strides = [1, 1]} : vector<10x128xf32> to vector<1x128xf32>
    %226 = vector.broadcast %224 : vector<1x128xf32> to vector<16x128xf32>
    %227 = arith.mulf %223, %226 : vector<16x128xf32>
    %cst_71 = arith.constant dense<0.000000e+00> : vector<16xf32>
    %228 = vector.multi_reduction <add>, %227, %cst_71 [1] : vector<16x128xf32> to vector<16xf32>
    %229 = vector.shape_cast %228 : vector<16xf32> to vector<16x1xf32>
    %230 = vector.broadcast %225 : vector<1x128xf32> to vector<16x128xf32>
    %231 = arith.mulf %223, %230 : vector<16x128xf32>
    %cst_72 = arith.constant dense<0.000000e+00> : vector<16xf32>
    %232 = vector.multi_reduction <add>, %231, %cst_72 [1] : vector<16x128xf32> to vector<16xf32>
    %233 = vector.shape_cast %232 : vector<16xf32> to vector<16x1xf32>
    %234 = tpu.transpose %229, [1, 0] : vector<16x1xf32> -> vector<1x16xf32>
    %235 = vector.broadcast %233 : vector<16x1xf32> to vector<16x16xf32>
    %236 = vector.broadcast %234 : vector<1x16xf32> to vector<16x16xf32>
    %237 = arith.addf %235, %236 : vector<16x16xf32>
    %cst_73 = arith.constant 0.000000e+00 : f32
    %238 = vector.broadcast %cst_73 : f32 to vector<16x16xf32>
    %239 = arith.cmpf ogt, %237, %238 : vector<16x16xf32>
    %cst_74 = arith.constant 2.000000e-01 : f32
    %240 = vector.broadcast %cst_74 : f32 to vector<16x16xf32>
    %241 = arith.mulf %240, %237 : vector<16x16xf32>
    %242 = arith.select %239, %237, %241 : vector<16x16xi1>, vector<16x16xf32>
    %cst_75 = arith.constant -1.000000e+30 : f32
    %243 = vector.broadcast %cst_75 : f32 to vector<16x16xf32>
    %244 = arith.select %5, %242, %243 : vector<16x16xi1>, vector<16x16xf32>
    %cst_76 = arith.constant dense<0xFF800000> : vector<16xf32>
    %245 = vector.multi_reduction <maximumf>, %244, %cst_76 [1] : vector<16x16xf32> to vector<16xf32>
    %246 = vector.shape_cast %245 : vector<16xf32> to vector<16x1xf32>
    %247 = vector.broadcast %246 : vector<16x1xf32> to vector<16x16xf32>
    %248 = arith.subf %244, %247 : vector<16x16xf32>
    %249 = math.exp %248 : vector<16x16xf32>
    %cst_77 = arith.constant 0.000000e+00 : f32
    %250 = vector.broadcast %cst_77 : f32 to vector<16x16xf32>
    %251 = arith.select %5, %249, %250 : vector<16x16xi1>, vector<16x16xf32>
    %cst_78 = arith.constant dense<0.000000e+00> : vector<16xf32>
    %252 = vector.multi_reduction <add>, %251, %cst_78 [1] : vector<16x16xf32> to vector<16xf32>
    %253 = vector.shape_cast %252 : vector<16xf32> to vector<16x1xf32>
    %254 = tpu.reciprocal %253 {approx = true} : vector<16x1xf32> -> vector<16x1xf32>
    %255 = vector.broadcast %254 : vector<16x1xf32> to vector<16x16xf32>
    %256 = arith.mulf %251, %255 : vector<16x16xf32>
    %cst_79 = arith.constant dense<0.000000e+00> : vector<16x128xf32>
    %257 = tpu.matmul %256, %223, %cst_79 {dimension_numbers = #tpu.dot_dimension_numbers<[1], [0], [0], [1], [0, 0, 1, 1], [], []>} : vector<16x16xf32>, vector<16x128xf32>, vector<16x128xf32> -> vector<16x128xf32>
    %258 = vector.extract_strided_slice %8 {offsets = [0, 896], sizes = [16, 128], strides = [1, 1]} : vector<16x1280xf32> to vector<16x128xf32>
    %259 = vector.extract_strided_slice %10 {offsets = [7, 0], sizes = [1, 128], strides = [1, 1]} : vector<10x128xf32> to vector<1x128xf32>
    %260 = vector.extract_strided_slice %12 {offsets = [7, 0], sizes = [1, 128], strides = [1, 1]} : vector<10x128xf32> to vector<1x128xf32>
    %261 = vector.broadcast %259 : vector<1x128xf32> to vector<16x128xf32>
    %262 = arith.mulf %258, %261 : vector<16x128xf32>
    %cst_80 = arith.constant dense<0.000000e+00> : vector<16xf32>
    %263 = vector.multi_reduction <add>, %262, %cst_80 [1] : vector<16x128xf32> to vector<16xf32>
    %264 = vector.shape_cast %263 : vector<16xf32> to vector<16x1xf32>
    %265 = vector.broadcast %260 : vector<1x128xf32> to vector<16x128xf32>
    %266 = arith.mulf %258, %265 : vector<16x128xf32>
    %cst_81 = arith.constant dense<0.000000e+00> : vector<16xf32>
    %267 = vector.multi_reduction <add>, %266, %cst_81 [1] : vector<16x128xf32> to vector<16xf32>
    %268 = vector.shape_cast %267 : vector<16xf32> to vector<16x1xf32>
    %269 = tpu.transpose %264, [1, 0] : vector<16x1xf32> -> vector<1x16xf32>
    %270 = vector.broadcast %268 : vector<16x1xf32> to vector<16x16xf32>
    %271 = vector.broadcast %269 : vector<1x16xf32> to vector<16x16xf32>
    %272 = arith.addf %270, %271 : vector<16x16xf32>
    %cst_82 = arith.constant 0.000000e+00 : f32
    %273 = vector.broadcast %cst_82 : f32 to vector<16x16xf32>
    %274 = arith.cmpf ogt, %272, %273 : vector<16x16xf32>
    %cst_83 = arith.constant 2.000000e-01 : f32
    %275 = vector.broadcast %cst_83 : f32 to vector<16x16xf32>
    %276 = arith.mulf %275, %272 : vector<16x16xf32>
    %277 = arith.select %274, %272, %276 : vector<16x16xi1>, vector<16x16xf32>
    %cst_84 = arith.constant -1.000000e+30 : f32
    %278 = vector.broadcast %cst_84 : f32 to vector<16x16xf32>
    %279 = arith.select %5, %277, %278 : vector<16x16xi1>, vector<16x16xf32>
    %cst_85 = arith.constant dense<0xFF800000> : vector<16xf32>
    %280 = vector.multi_reduction <maximumf>, %279, %cst_85 [1] : vector<16x16xf32> to vector<16xf32>
    %281 = vector.shape_cast %280 : vector<16xf32> to vector<16x1xf32>
    %282 = vector.broadcast %281 : vector<16x1xf32> to vector<16x16xf32>
    %283 = arith.subf %279, %282 : vector<16x16xf32>
    %284 = math.exp %283 : vector<16x16xf32>
    %cst_86 = arith.constant 0.000000e+00 : f32
    %285 = vector.broadcast %cst_86 : f32 to vector<16x16xf32>
    %286 = arith.select %5, %284, %285 : vector<16x16xi1>, vector<16x16xf32>
    %cst_87 = arith.constant dense<0.000000e+00> : vector<16xf32>
    %287 = vector.multi_reduction <add>, %286, %cst_87 [1] : vector<16x16xf32> to vector<16xf32>
    %288 = vector.shape_cast %287 : vector<16xf32> to vector<16x1xf32>
    %289 = tpu.reciprocal %288 {approx = true} : vector<16x1xf32> -> vector<16x1xf32>
    %290 = vector.broadcast %289 : vector<16x1xf32> to vector<16x16xf32>
    %291 = arith.mulf %286, %290 : vector<16x16xf32>
    %cst_88 = arith.constant dense<0.000000e+00> : vector<16x128xf32>
    %292 = tpu.matmul %291, %258, %cst_88 {dimension_numbers = #tpu.dot_dimension_numbers<[1], [0], [0], [1], [0, 0, 1, 1], [], []>} : vector<16x16xf32>, vector<16x128xf32>, vector<16x128xf32> -> vector<16x128xf32>
    %293 = vector.extract_strided_slice %8 {offsets = [0, 1024], sizes = [16, 128], strides = [1, 1]} : vector<16x1280xf32> to vector<16x128xf32>
    %294 = vector.extract_strided_slice %10 {offsets = [8, 0], sizes = [1, 128], strides = [1, 1]} : vector<10x128xf32> to vector<1x128xf32>
    %295 = vector.extract_strided_slice %12 {offsets = [8, 0], sizes = [1, 128], strides = [1, 1]} : vector<10x128xf32> to vector<1x128xf32>
    %296 = vector.broadcast %294 : vector<1x128xf32> to vector<16x128xf32>
    %297 = arith.mulf %293, %296 : vector<16x128xf32>
    %cst_89 = arith.constant dense<0.000000e+00> : vector<16xf32>
    %298 = vector.multi_reduction <add>, %297, %cst_89 [1] : vector<16x128xf32> to vector<16xf32>
    %299 = vector.shape_cast %298 : vector<16xf32> to vector<16x1xf32>
    %300 = vector.broadcast %295 : vector<1x128xf32> to vector<16x128xf32>
    %301 = arith.mulf %293, %300 : vector<16x128xf32>
    %cst_90 = arith.constant dense<0.000000e+00> : vector<16xf32>
    %302 = vector.multi_reduction <add>, %301, %cst_90 [1] : vector<16x128xf32> to vector<16xf32>
    %303 = vector.shape_cast %302 : vector<16xf32> to vector<16x1xf32>
    %304 = tpu.transpose %299, [1, 0] : vector<16x1xf32> -> vector<1x16xf32>
    %305 = vector.broadcast %303 : vector<16x1xf32> to vector<16x16xf32>
    %306 = vector.broadcast %304 : vector<1x16xf32> to vector<16x16xf32>
    %307 = arith.addf %305, %306 : vector<16x16xf32>
    %cst_91 = arith.constant 0.000000e+00 : f32
    %308 = vector.broadcast %cst_91 : f32 to vector<16x16xf32>
    %309 = arith.cmpf ogt, %307, %308 : vector<16x16xf32>
    %cst_92 = arith.constant 2.000000e-01 : f32
    %310 = vector.broadcast %cst_92 : f32 to vector<16x16xf32>
    %311 = arith.mulf %310, %307 : vector<16x16xf32>
    %312 = arith.select %309, %307, %311 : vector<16x16xi1>, vector<16x16xf32>
    %cst_93 = arith.constant -1.000000e+30 : f32
    %313 = vector.broadcast %cst_93 : f32 to vector<16x16xf32>
    %314 = arith.select %5, %312, %313 : vector<16x16xi1>, vector<16x16xf32>
    %cst_94 = arith.constant dense<0xFF800000> : vector<16xf32>
    %315 = vector.multi_reduction <maximumf>, %314, %cst_94 [1] : vector<16x16xf32> to vector<16xf32>
    %316 = vector.shape_cast %315 : vector<16xf32> to vector<16x1xf32>
    %317 = vector.broadcast %316 : vector<16x1xf32> to vector<16x16xf32>
    %318 = arith.subf %314, %317 : vector<16x16xf32>
    %319 = math.exp %318 : vector<16x16xf32>
    %cst_95 = arith.constant 0.000000e+00 : f32
    %320 = vector.broadcast %cst_95 : f32 to vector<16x16xf32>
    %321 = arith.select %5, %319, %320 : vector<16x16xi1>, vector<16x16xf32>
    %cst_96 = arith.constant dense<0.000000e+00> : vector<16xf32>
    %322 = vector.multi_reduction <add>, %321, %cst_96 [1] : vector<16x16xf32> to vector<16xf32>
    %323 = vector.shape_cast %322 : vector<16xf32> to vector<16x1xf32>
    %324 = tpu.reciprocal %323 {approx = true} : vector<16x1xf32> -> vector<16x1xf32>
    %325 = vector.broadcast %324 : vector<16x1xf32> to vector<16x16xf32>
    %326 = arith.mulf %321, %325 : vector<16x16xf32>
    %cst_97 = arith.constant dense<0.000000e+00> : vector<16x128xf32>
    %327 = tpu.matmul %326, %293, %cst_97 {dimension_numbers = #tpu.dot_dimension_numbers<[1], [0], [0], [1], [0, 0, 1, 1], [], []>} : vector<16x16xf32>, vector<16x128xf32>, vector<16x128xf32> -> vector<16x128xf32>
    %328 = vector.extract_strided_slice %8 {offsets = [0, 1152], sizes = [16, 128], strides = [1, 1]} : vector<16x1280xf32> to vector<16x128xf32>
    %329 = vector.extract_strided_slice %10 {offsets = [9, 0], sizes = [1, 128], strides = [1, 1]} : vector<10x128xf32> to vector<1x128xf32>
    %330 = vector.extract_strided_slice %12 {offsets = [9, 0], sizes = [1, 128], strides = [1, 1]} : vector<10x128xf32> to vector<1x128xf32>
    %331 = vector.broadcast %329 : vector<1x128xf32> to vector<16x128xf32>
    %332 = arith.mulf %328, %331 : vector<16x128xf32>
    %cst_98 = arith.constant dense<0.000000e+00> : vector<16xf32>
    %333 = vector.multi_reduction <add>, %332, %cst_98 [1] : vector<16x128xf32> to vector<16xf32>
    %334 = vector.shape_cast %333 : vector<16xf32> to vector<16x1xf32>
    %335 = vector.broadcast %330 : vector<1x128xf32> to vector<16x128xf32>
    %336 = arith.mulf %328, %335 : vector<16x128xf32>
    %cst_99 = arith.constant dense<0.000000e+00> : vector<16xf32>
    %337 = vector.multi_reduction <add>, %336, %cst_99 [1] : vector<16x128xf32> to vector<16xf32>
    %338 = vector.shape_cast %337 : vector<16xf32> to vector<16x1xf32>
    %339 = tpu.transpose %334, [1, 0] : vector<16x1xf32> -> vector<1x16xf32>
    %340 = vector.broadcast %338 : vector<16x1xf32> to vector<16x16xf32>
    %341 = vector.broadcast %339 : vector<1x16xf32> to vector<16x16xf32>
    %342 = arith.addf %340, %341 : vector<16x16xf32>
    %cst_100 = arith.constant 0.000000e+00 : f32
    %343 = vector.broadcast %cst_100 : f32 to vector<16x16xf32>
    %344 = arith.cmpf ogt, %342, %343 : vector<16x16xf32>
    %cst_101 = arith.constant 2.000000e-01 : f32
    %345 = vector.broadcast %cst_101 : f32 to vector<16x16xf32>
    %346 = arith.mulf %345, %342 : vector<16x16xf32>
    %347 = arith.select %344, %342, %346 : vector<16x16xi1>, vector<16x16xf32>
    %cst_102 = arith.constant -1.000000e+30 : f32
    %348 = vector.broadcast %cst_102 : f32 to vector<16x16xf32>
    %349 = arith.select %5, %347, %348 : vector<16x16xi1>, vector<16x16xf32>
    %cst_103 = arith.constant dense<0xFF800000> : vector<16xf32>
    %350 = vector.multi_reduction <maximumf>, %349, %cst_103 [1] : vector<16x16xf32> to vector<16xf32>
    %351 = vector.shape_cast %350 : vector<16xf32> to vector<16x1xf32>
    %352 = vector.broadcast %351 : vector<16x1xf32> to vector<16x16xf32>
    %353 = arith.subf %349, %352 : vector<16x16xf32>
    %354 = math.exp %353 : vector<16x16xf32>
    %cst_104 = arith.constant 0.000000e+00 : f32
    %355 = vector.broadcast %cst_104 : f32 to vector<16x16xf32>
    %356 = arith.select %5, %354, %355 : vector<16x16xi1>, vector<16x16xf32>
    %cst_105 = arith.constant dense<0.000000e+00> : vector<16xf32>
    %357 = vector.multi_reduction <add>, %356, %cst_105 [1] : vector<16x16xf32> to vector<16xf32>
    %358 = vector.shape_cast %357 : vector<16xf32> to vector<16x1xf32>
    %359 = tpu.reciprocal %358 {approx = true} : vector<16x1xf32> -> vector<16x1xf32>
    %360 = vector.broadcast %359 : vector<16x1xf32> to vector<16x16xf32>
    %361 = arith.mulf %356, %360 : vector<16x16xf32>
    %cst_106 = arith.constant dense<0.000000e+00> : vector<16x128xf32>
    %362 = tpu.matmul %361, %328, %cst_106 {dimension_numbers = #tpu.dot_dimension_numbers<[1], [0], [0], [1], [0, 0, 1, 1], [], []>} : vector<16x16xf32>, vector<16x128xf32>, vector<16x128xf32> -> vector<16x128xf32>
    %363 = tpu.concatenate %47, %82, %117, %152, %187, %222, %257, %292, %327, %362 in 1 : vector<16x128xf32>, vector<16x128xf32>, vector<16x128xf32>, vector<16x128xf32>, vector<16x128xf32>, vector<16x128xf32>, vector<16x128xf32>, vector<16x128xf32>, vector<16x128xf32>, vector<16x128xf32> -> vector<16x1280xf32>
    %c0_107 = arith.constant 0 : index
    %c0_108 = arith.constant 0 : index
    %c0_109 = arith.constant 0 : index
    %364 = vector.load %arg7[%c0_107, %c0_108, %c0_109] : memref<2x1x1280xf32, #tpu.memory_space<vmem>>, vector<1x1x1280xf32>
    %365 = vector.shape_cast %364 : vector<1x1x1280xf32> to vector<1x1280xf32>
    %366 = vector.broadcast %365 : vector<1x1280xf32> to vector<16x1280xf32>
    %367 = arith.addf %363, %366 : vector<16x1280xf32>
    %cst_110 = arith.constant 0.000000e+00 : f32
    %368 = vector.broadcast %cst_110 : f32 to vector<16x1280xf32>
    %369 = arith.cmpf ogt, %367, %368 : vector<16x1280xf32>
    %cst_111 = arith.constant 0.000000e+00 : f32
    %370 = vector.broadcast %cst_111 : f32 to vector<16x1280xf32>
    %371 = arith.minimumf %367, %370 : vector<16x1280xf32>
    %372 = math.exp %371 : vector<16x1280xf32>
    %cst_112 = arith.constant 1.000000e+00 : f32
    %373 = vector.broadcast %cst_112 : f32 to vector<16x1280xf32>
    %374 = arith.subf %372, %373 : vector<16x1280xf32>
    %375 = arith.select %369, %367, %374 : vector<16x1280xi1>, vector<16x1280xf32>
    %c0_113 = arith.constant 0 : index
    %c0_114 = arith.constant 0 : index
    %c0_115 = arith.constant 0 : index
    %376 = vector.load %arg8[%c0_113, %c0_114, %c0_115] : memref<2x1280x128xf32, #tpu.memory_space<vmem>>, vector<1x1280x128xf32>
    %377 = vector.shape_cast %376 : vector<1x1280x128xf32> to vector<1280x128xf32>
    %cst_116 = arith.constant dense<0.000000e+00> : vector<16x128xf32>
    %378 = tpu.matmul %375, %377, %cst_116 {dimension_numbers = #tpu.dot_dimension_numbers<[1], [0], [0], [1], [0, 0, 1, 1], [], []>} : vector<16x1280xf32>, vector<1280x128xf32>, vector<16x128xf32> -> vector<16x128xf32>
    %c0_117 = arith.constant 0 : index
    %c0_118 = arith.constant 0 : index
    %c0_119 = arith.constant 0 : index
    %379 = vector.load %arg9[%c0_117, %c0_118, %c0_119] : memref<2x1x128xf32, #tpu.memory_space<vmem>>, vector<1x1x128xf32>
    %380 = vector.shape_cast %379 : vector<1x1x128xf32> to vector<1x128xf32>
    %c0_120 = arith.constant 0 : index
    %c0_121 = arith.constant 0 : index
    %c0_122 = arith.constant 0 : index
    %381 = vector.load %arg10[%c0_120, %c0_121, %c0_122] : memref<2x1x128xf32, #tpu.memory_space<vmem>>, vector<1x1x128xf32>
    %382 = vector.shape_cast %381 : vector<1x1x128xf32> to vector<1x128xf32>
    %383 = vector.broadcast %380 : vector<1x128xf32> to vector<16x128xf32>
    %384 = arith.mulf %378, %383 : vector<16x128xf32>
    %cst_123 = arith.constant dense<0.000000e+00> : vector<16xf32>
    %385 = vector.multi_reduction <add>, %384, %cst_123 [1] : vector<16x128xf32> to vector<16xf32>
    %386 = vector.shape_cast %385 : vector<16xf32> to vector<16x1xf32>
    %387 = vector.broadcast %382 : vector<1x128xf32> to vector<16x128xf32>
    %388 = arith.mulf %378, %387 : vector<16x128xf32>
    %cst_124 = arith.constant dense<0.000000e+00> : vector<16xf32>
    %389 = vector.multi_reduction <add>, %388, %cst_124 [1] : vector<16x128xf32> to vector<16xf32>
    %390 = vector.shape_cast %389 : vector<16xf32> to vector<16x1xf32>
    %391 = tpu.transpose %386, [1, 0] : vector<16x1xf32> -> vector<1x16xf32>
    %392 = vector.broadcast %390 : vector<16x1xf32> to vector<16x16xf32>
    %393 = vector.broadcast %391 : vector<1x16xf32> to vector<16x16xf32>
    %394 = arith.addf %392, %393 : vector<16x16xf32>
    %cst_125 = arith.constant 0.000000e+00 : f32
    %395 = vector.broadcast %cst_125 : f32 to vector<16x16xf32>
    %396 = arith.cmpf ogt, %394, %395 : vector<16x16xf32>
    %cst_126 = arith.constant 2.000000e-01 : f32
    %397 = vector.broadcast %cst_126 : f32 to vector<16x16xf32>
    %398 = arith.mulf %397, %394 : vector<16x16xf32>
    %399 = arith.select %396, %394, %398 : vector<16x16xi1>, vector<16x16xf32>
    %cst_127 = arith.constant -1.000000e+30 : f32
    %400 = vector.broadcast %cst_127 : f32 to vector<16x16xf32>
    %401 = arith.select %5, %399, %400 : vector<16x16xi1>, vector<16x16xf32>
    %cst_128 = arith.constant dense<0xFF800000> : vector<16xf32>
    %402 = vector.multi_reduction <maximumf>, %401, %cst_128 [1] : vector<16x16xf32> to vector<16xf32>
    %403 = vector.shape_cast %402 : vector<16xf32> to vector<16x1xf32>
    %404 = vector.broadcast %403 : vector<16x1xf32> to vector<16x16xf32>
    %405 = arith.subf %401, %404 : vector<16x16xf32>
    %406 = math.exp %405 : vector<16x16xf32>
    %cst_129 = arith.constant 0.000000e+00 : f32
    %407 = vector.broadcast %cst_129 : f32 to vector<16x16xf32>
    %408 = arith.select %5, %406, %407 : vector<16x16xi1>, vector<16x16xf32>
    %cst_130 = arith.constant dense<0.000000e+00> : vector<16xf32>
    %409 = vector.multi_reduction <add>, %408, %cst_130 [1] : vector<16x16xf32> to vector<16xf32>
    %410 = vector.shape_cast %409 : vector<16xf32> to vector<16x1xf32>
    %411 = tpu.reciprocal %410 {approx = true} : vector<16x1xf32> -> vector<16x1xf32>
    %412 = vector.broadcast %411 : vector<16x1xf32> to vector<16x16xf32>
    %413 = arith.mulf %408, %412 : vector<16x16xf32>
    %cst_131 = arith.constant dense<0.000000e+00> : vector<16x128xf32>
    %414 = tpu.matmul %413, %378, %cst_131 {dimension_numbers = #tpu.dot_dimension_numbers<[1], [0], [0], [1], [0, 0, 1, 1], [], []>} : vector<16x16xf32>, vector<16x128xf32>, vector<16x128xf32> -> vector<16x128xf32>
    %c0_132 = arith.constant 0 : index
    %c0_133 = arith.constant 0 : index
    %c0_134 = arith.constant 0 : index
    %415 = vector.load %arg11[%c0_132, %c0_133, %c0_134] : memref<2x1x128xf32, #tpu.memory_space<vmem>>, vector<1x1x128xf32>
    %416 = vector.shape_cast %415 : vector<1x1x128xf32> to vector<1x128xf32>
    %417 = vector.broadcast %416 : vector<1x128xf32> to vector<16x128xf32>
    %418 = arith.addf %414, %417 : vector<16x128xf32>
    %cst_135 = arith.constant 0.000000e+00 : f32
    %419 = vector.broadcast %cst_135 : f32 to vector<16x128xf32>
    %420 = arith.maximumf %418, %419 : vector<16x128xf32>
    %cst_136 = arith.constant dense<0xFF800000> : vector<128xf32>
    %421 = vector.multi_reduction <maximumf>, %420, %cst_136 [0] : vector<16x128xf32> to vector<128xf32>
    %422 = vector.shape_cast %421 : vector<128xf32> to vector<1x128xf32>
    %c0_137 = arith.constant 0 : index
    %c0_138 = arith.constant 0 : index
    %c0_139 = arith.constant 0 : index
    %423 = vector.load %arg12[%c0_137, %c0_138, %c0_139] : memref<2x128x128xf32, #tpu.memory_space<vmem>>, vector<1x128x128xf32>
    %424 = vector.shape_cast %423 : vector<1x128x128xf32> to vector<128x128xf32>
    %cst_140 = arith.constant dense<0.000000e+00> : vector<1x128xf32>
    %425 = tpu.matmul %422, %424, %cst_140 {dimension_numbers = #tpu.dot_dimension_numbers<[1], [0], [0], [1], [0, 0, 1, 1], [], []>} : vector<1x128xf32>, vector<128x128xf32>, vector<1x128xf32> -> vector<1x128xf32>
    %c0_141 = arith.constant 0 : index
    %c0_142 = arith.constant 0 : index
    %c0_143 = arith.constant 0 : index
    %426 = vector.load %arg13[%c0_141, %c0_142, %c0_143] : memref<2x1x128xf32, #tpu.memory_space<vmem>>, vector<1x1x128xf32>
    %427 = vector.shape_cast %426 : vector<1x1x128xf32> to vector<1x128xf32>
    %428 = arith.addf %425, %427 : vector<1x128xf32>
    %cst_144 = arith.constant 0.000000e+00 : f32
    %429 = vector.broadcast %cst_144 : f32 to vector<1x128xf32>
    %430 = arith.maximumf %428, %429 : vector<1x128xf32>
    %c1 = arith.constant 1 : index
    %c0_145 = arith.constant 0 : index
    %c0_146 = arith.constant 0 : index
    %c0_147 = arith.constant 0 : index
    %431 = vector.load %arg1[%c1, %c0_145, %c0_146, %c0_147] : memref<2x1x16x128xf32, #tpu.memory_space<vmem>>, vector<1x1x16x128xf32>
    %432 = vector.shape_cast %431 : vector<1x1x16x128xf32> to vector<16x128xf32>
    %c1_148 = arith.constant 1 : index
    %c0_149 = arith.constant 0 : index
    %c0_150 = arith.constant 0 : index
    %c0_151 = arith.constant 0 : index
    %433 = vector.load %arg2[%c1_148, %c0_149, %c0_150, %c0_151] : memref<2x1x16x16xf32, #tpu.memory_space<vmem>>, vector<1x1x16x16xf32>
    %434 = vector.shape_cast %433 : vector<1x1x16x16xf32> to vector<16x16xf32>
    %cst_152 = arith.constant 0.000000e+00 : f32
    %435 = vector.broadcast %cst_152 : f32 to vector<16x16xf32>
    %436 = arith.cmpf ogt, %434, %435 : vector<16x16xf32>
    %c1_153 = arith.constant 1 : index
    %c0_154 = arith.constant 0 : index
    %c0_155 = arith.constant 0 : index
    %437 = vector.load %arg4[%c1_153, %c0_154, %c0_155] : memref<2x128x1280xf32, #tpu.memory_space<vmem>>, vector<1x128x1280xf32>
    %438 = vector.shape_cast %437 : vector<1x128x1280xf32> to vector<128x1280xf32>
    %cst_156 = arith.constant dense<0.000000e+00> : vector<16x1280xf32>
    %439 = tpu.matmul %432, %438, %cst_156 {dimension_numbers = #tpu.dot_dimension_numbers<[1], [0], [0], [1], [0, 0, 1, 1], [], []>} : vector<16x128xf32>, vector<128x1280xf32>, vector<16x1280xf32> -> vector<16x1280xf32>
    %c1_157 = arith.constant 1 : index
    %c0_158 = arith.constant 0 : index
    %c0_159 = arith.constant 0 : index
    %440 = vector.load %arg5[%c1_157, %c0_158, %c0_159] : memref<2x10x128xf32, #tpu.memory_space<vmem>>, vector<1x10x128xf32>
    %441 = vector.shape_cast %440 : vector<1x10x128xf32> to vector<10x128xf32>
    %c1_160 = arith.constant 1 : index
    %c0_161 = arith.constant 0 : index
    %c0_162 = arith.constant 0 : index
    %442 = vector.load %arg6[%c1_160, %c0_161, %c0_162] : memref<2x10x128xf32, #tpu.memory_space<vmem>>, vector<1x10x128xf32>
    %443 = vector.shape_cast %442 : vector<1x10x128xf32> to vector<10x128xf32>
    %444 = vector.extract_strided_slice %439 {offsets = [0, 0], sizes = [16, 128], strides = [1, 1]} : vector<16x1280xf32> to vector<16x128xf32>
    %445 = vector.extract_strided_slice %441 {offsets = [0, 0], sizes = [1, 128], strides = [1, 1]} : vector<10x128xf32> to vector<1x128xf32>
    %446 = vector.extract_strided_slice %443 {offsets = [0, 0], sizes = [1, 128], strides = [1, 1]} : vector<10x128xf32> to vector<1x128xf32>
    %447 = vector.broadcast %445 : vector<1x128xf32> to vector<16x128xf32>
    %448 = arith.mulf %444, %447 : vector<16x128xf32>
    %cst_163 = arith.constant dense<0.000000e+00> : vector<16xf32>
    %449 = vector.multi_reduction <add>, %448, %cst_163 [1] : vector<16x128xf32> to vector<16xf32>
    %450 = vector.shape_cast %449 : vector<16xf32> to vector<16x1xf32>
    %451 = vector.broadcast %446 : vector<1x128xf32> to vector<16x128xf32>
    %452 = arith.mulf %444, %451 : vector<16x128xf32>
    %cst_164 = arith.constant dense<0.000000e+00> : vector<16xf32>
    %453 = vector.multi_reduction <add>, %452, %cst_164 [1] : vector<16x128xf32> to vector<16xf32>
    %454 = vector.shape_cast %453 : vector<16xf32> to vector<16x1xf32>
    %455 = tpu.transpose %450, [1, 0] : vector<16x1xf32> -> vector<1x16xf32>
    %456 = vector.broadcast %454 : vector<16x1xf32> to vector<16x16xf32>
    %457 = vector.broadcast %455 : vector<1x16xf32> to vector<16x16xf32>
    %458 = arith.addf %456, %457 : vector<16x16xf32>
    %cst_165 = arith.constant 0.000000e+00 : f32
    %459 = vector.broadcast %cst_165 : f32 to vector<16x16xf32>
    %460 = arith.cmpf ogt, %458, %459 : vector<16x16xf32>
    %cst_166 = arith.constant 2.000000e-01 : f32
    %461 = vector.broadcast %cst_166 : f32 to vector<16x16xf32>
    %462 = arith.mulf %461, %458 : vector<16x16xf32>
    %463 = arith.select %460, %458, %462 : vector<16x16xi1>, vector<16x16xf32>
    %cst_167 = arith.constant -1.000000e+30 : f32
    %464 = vector.broadcast %cst_167 : f32 to vector<16x16xf32>
    %465 = arith.select %436, %463, %464 : vector<16x16xi1>, vector<16x16xf32>
    %cst_168 = arith.constant dense<0xFF800000> : vector<16xf32>
    %466 = vector.multi_reduction <maximumf>, %465, %cst_168 [1] : vector<16x16xf32> to vector<16xf32>
    %467 = vector.shape_cast %466 : vector<16xf32> to vector<16x1xf32>
    %468 = vector.broadcast %467 : vector<16x1xf32> to vector<16x16xf32>
    %469 = arith.subf %465, %468 : vector<16x16xf32>
    %470 = math.exp %469 : vector<16x16xf32>
    %cst_169 = arith.constant 0.000000e+00 : f32
    %471 = vector.broadcast %cst_169 : f32 to vector<16x16xf32>
    %472 = arith.select %436, %470, %471 : vector<16x16xi1>, vector<16x16xf32>
    %cst_170 = arith.constant dense<0.000000e+00> : vector<16xf32>
    %473 = vector.multi_reduction <add>, %472, %cst_170 [1] : vector<16x16xf32> to vector<16xf32>
    %474 = vector.shape_cast %473 : vector<16xf32> to vector<16x1xf32>
    %475 = tpu.reciprocal %474 {approx = true} : vector<16x1xf32> -> vector<16x1xf32>
    %476 = vector.broadcast %475 : vector<16x1xf32> to vector<16x16xf32>
    %477 = arith.mulf %472, %476 : vector<16x16xf32>
    %cst_171 = arith.constant dense<0.000000e+00> : vector<16x128xf32>
    %478 = tpu.matmul %477, %444, %cst_171 {dimension_numbers = #tpu.dot_dimension_numbers<[1], [0], [0], [1], [0, 0, 1, 1], [], []>} : vector<16x16xf32>, vector<16x128xf32>, vector<16x128xf32> -> vector<16x128xf32>
    %479 = vector.extract_strided_slice %439 {offsets = [0, 128], sizes = [16, 128], strides = [1, 1]} : vector<16x1280xf32> to vector<16x128xf32>
    %480 = vector.extract_strided_slice %441 {offsets = [1, 0], sizes = [1, 128], strides = [1, 1]} : vector<10x128xf32> to vector<1x128xf32>
    %481 = vector.extract_strided_slice %443 {offsets = [1, 0], sizes = [1, 128], strides = [1, 1]} : vector<10x128xf32> to vector<1x128xf32>
    %482 = vector.broadcast %480 : vector<1x128xf32> to vector<16x128xf32>
    %483 = arith.mulf %479, %482 : vector<16x128xf32>
    %cst_172 = arith.constant dense<0.000000e+00> : vector<16xf32>
    %484 = vector.multi_reduction <add>, %483, %cst_172 [1] : vector<16x128xf32> to vector<16xf32>
    %485 = vector.shape_cast %484 : vector<16xf32> to vector<16x1xf32>
    %486 = vector.broadcast %481 : vector<1x128xf32> to vector<16x128xf32>
    %487 = arith.mulf %479, %486 : vector<16x128xf32>
    %cst_173 = arith.constant dense<0.000000e+00> : vector<16xf32>
    %488 = vector.multi_reduction <add>, %487, %cst_173 [1] : vector<16x128xf32> to vector<16xf32>
    %489 = vector.shape_cast %488 : vector<16xf32> to vector<16x1xf32>
    %490 = tpu.transpose %485, [1, 0] : vector<16x1xf32> -> vector<1x16xf32>
    %491 = vector.broadcast %489 : vector<16x1xf32> to vector<16x16xf32>
    %492 = vector.broadcast %490 : vector<1x16xf32> to vector<16x16xf32>
    %493 = arith.addf %491, %492 : vector<16x16xf32>
    %cst_174 = arith.constant 0.000000e+00 : f32
    %494 = vector.broadcast %cst_174 : f32 to vector<16x16xf32>
    %495 = arith.cmpf ogt, %493, %494 : vector<16x16xf32>
    %cst_175 = arith.constant 2.000000e-01 : f32
    %496 = vector.broadcast %cst_175 : f32 to vector<16x16xf32>
    %497 = arith.mulf %496, %493 : vector<16x16xf32>
    %498 = arith.select %495, %493, %497 : vector<16x16xi1>, vector<16x16xf32>
    %cst_176 = arith.constant -1.000000e+30 : f32
    %499 = vector.broadcast %cst_176 : f32 to vector<16x16xf32>
    %500 = arith.select %436, %498, %499 : vector<16x16xi1>, vector<16x16xf32>
    %cst_177 = arith.constant dense<0xFF800000> : vector<16xf32>
    %501 = vector.multi_reduction <maximumf>, %500, %cst_177 [1] : vector<16x16xf32> to vector<16xf32>
    %502 = vector.shape_cast %501 : vector<16xf32> to vector<16x1xf32>
    %503 = vector.broadcast %502 : vector<16x1xf32> to vector<16x16xf32>
    %504 = arith.subf %500, %503 : vector<16x16xf32>
    %505 = math.exp %504 : vector<16x16xf32>
    %cst_178 = arith.constant 0.000000e+00 : f32
    %506 = vector.broadcast %cst_178 : f32 to vector<16x16xf32>
    %507 = arith.select %436, %505, %506 : vector<16x16xi1>, vector<16x16xf32>
    %cst_179 = arith.constant dense<0.000000e+00> : vector<16xf32>
    %508 = vector.multi_reduction <add>, %507, %cst_179 [1] : vector<16x16xf32> to vector<16xf32>
    %509 = vector.shape_cast %508 : vector<16xf32> to vector<16x1xf32>
    %510 = tpu.reciprocal %509 {approx = true} : vector<16x1xf32> -> vector<16x1xf32>
    %511 = vector.broadcast %510 : vector<16x1xf32> to vector<16x16xf32>
    %512 = arith.mulf %507, %511 : vector<16x16xf32>
    %cst_180 = arith.constant dense<0.000000e+00> : vector<16x128xf32>
    %513 = tpu.matmul %512, %479, %cst_180 {dimension_numbers = #tpu.dot_dimension_numbers<[1], [0], [0], [1], [0, 0, 1, 1], [], []>} : vector<16x16xf32>, vector<16x128xf32>, vector<16x128xf32> -> vector<16x128xf32>
    %514 = vector.extract_strided_slice %439 {offsets = [0, 256], sizes = [16, 128], strides = [1, 1]} : vector<16x1280xf32> to vector<16x128xf32>
    %515 = vector.extract_strided_slice %441 {offsets = [2, 0], sizes = [1, 128], strides = [1, 1]} : vector<10x128xf32> to vector<1x128xf32>
    %516 = vector.extract_strided_slice %443 {offsets = [2, 0], sizes = [1, 128], strides = [1, 1]} : vector<10x128xf32> to vector<1x128xf32>
    %517 = vector.broadcast %515 : vector<1x128xf32> to vector<16x128xf32>
    %518 = arith.mulf %514, %517 : vector<16x128xf32>
    %cst_181 = arith.constant dense<0.000000e+00> : vector<16xf32>
    %519 = vector.multi_reduction <add>, %518, %cst_181 [1] : vector<16x128xf32> to vector<16xf32>
    %520 = vector.shape_cast %519 : vector<16xf32> to vector<16x1xf32>
    %521 = vector.broadcast %516 : vector<1x128xf32> to vector<16x128xf32>
    %522 = arith.mulf %514, %521 : vector<16x128xf32>
    %cst_182 = arith.constant dense<0.000000e+00> : vector<16xf32>
    %523 = vector.multi_reduction <add>, %522, %cst_182 [1] : vector<16x128xf32> to vector<16xf32>
    %524 = vector.shape_cast %523 : vector<16xf32> to vector<16x1xf32>
    %525 = tpu.transpose %520, [1, 0] : vector<16x1xf32> -> vector<1x16xf32>
    %526 = vector.broadcast %524 : vector<16x1xf32> to vector<16x16xf32>
    %527 = vector.broadcast %525 : vector<1x16xf32> to vector<16x16xf32>
    %528 = arith.addf %526, %527 : vector<16x16xf32>
    %cst_183 = arith.constant 0.000000e+00 : f32
    %529 = vector.broadcast %cst_183 : f32 to vector<16x16xf32>
    %530 = arith.cmpf ogt, %528, %529 : vector<16x16xf32>
    %cst_184 = arith.constant 2.000000e-01 : f32
    %531 = vector.broadcast %cst_184 : f32 to vector<16x16xf32>
    %532 = arith.mulf %531, %528 : vector<16x16xf32>
    %533 = arith.select %530, %528, %532 : vector<16x16xi1>, vector<16x16xf32>
    %cst_185 = arith.constant -1.000000e+30 : f32
    %534 = vector.broadcast %cst_185 : f32 to vector<16x16xf32>
    %535 = arith.select %436, %533, %534 : vector<16x16xi1>, vector<16x16xf32>
    %cst_186 = arith.constant dense<0xFF800000> : vector<16xf32>
    %536 = vector.multi_reduction <maximumf>, %535, %cst_186 [1] : vector<16x16xf32> to vector<16xf32>
    %537 = vector.shape_cast %536 : vector<16xf32> to vector<16x1xf32>
    %538 = vector.broadcast %537 : vector<16x1xf32> to vector<16x16xf32>
    %539 = arith.subf %535, %538 : vector<16x16xf32>
    %540 = math.exp %539 : vector<16x16xf32>
    %cst_187 = arith.constant 0.000000e+00 : f32
    %541 = vector.broadcast %cst_187 : f32 to vector<16x16xf32>
    %542 = arith.select %436, %540, %541 : vector<16x16xi1>, vector<16x16xf32>
    %cst_188 = arith.constant dense<0.000000e+00> : vector<16xf32>
    %543 = vector.multi_reduction <add>, %542, %cst_188 [1] : vector<16x16xf32> to vector<16xf32>
    %544 = vector.shape_cast %543 : vector<16xf32> to vector<16x1xf32>
    %545 = tpu.reciprocal %544 {approx = true} : vector<16x1xf32> -> vector<16x1xf32>
    %546 = vector.broadcast %545 : vector<16x1xf32> to vector<16x16xf32>
    %547 = arith.mulf %542, %546 : vector<16x16xf32>
    %cst_189 = arith.constant dense<0.000000e+00> : vector<16x128xf32>
    %548 = tpu.matmul %547, %514, %cst_189 {dimension_numbers = #tpu.dot_dimension_numbers<[1], [0], [0], [1], [0, 0, 1, 1], [], []>} : vector<16x16xf32>, vector<16x128xf32>, vector<16x128xf32> -> vector<16x128xf32>
    %549 = vector.extract_strided_slice %439 {offsets = [0, 384], sizes = [16, 128], strides = [1, 1]} : vector<16x1280xf32> to vector<16x128xf32>
    %550 = vector.extract_strided_slice %441 {offsets = [3, 0], sizes = [1, 128], strides = [1, 1]} : vector<10x128xf32> to vector<1x128xf32>
    %551 = vector.extract_strided_slice %443 {offsets = [3, 0], sizes = [1, 128], strides = [1, 1]} : vector<10x128xf32> to vector<1x128xf32>
    %552 = vector.broadcast %550 : vector<1x128xf32> to vector<16x128xf32>
    %553 = arith.mulf %549, %552 : vector<16x128xf32>
    %cst_190 = arith.constant dense<0.000000e+00> : vector<16xf32>
    %554 = vector.multi_reduction <add>, %553, %cst_190 [1] : vector<16x128xf32> to vector<16xf32>
    %555 = vector.shape_cast %554 : vector<16xf32> to vector<16x1xf32>
    %556 = vector.broadcast %551 : vector<1x128xf32> to vector<16x128xf32>
    %557 = arith.mulf %549, %556 : vector<16x128xf32>
    %cst_191 = arith.constant dense<0.000000e+00> : vector<16xf32>
    %558 = vector.multi_reduction <add>, %557, %cst_191 [1] : vector<16x128xf32> to vector<16xf32>
    %559 = vector.shape_cast %558 : vector<16xf32> to vector<16x1xf32>
    %560 = tpu.transpose %555, [1, 0] : vector<16x1xf32> -> vector<1x16xf32>
    %561 = vector.broadcast %559 : vector<16x1xf32> to vector<16x16xf32>
    %562 = vector.broadcast %560 : vector<1x16xf32> to vector<16x16xf32>
    %563 = arith.addf %561, %562 : vector<16x16xf32>
    %cst_192 = arith.constant 0.000000e+00 : f32
    %564 = vector.broadcast %cst_192 : f32 to vector<16x16xf32>
    %565 = arith.cmpf ogt, %563, %564 : vector<16x16xf32>
    %cst_193 = arith.constant 2.000000e-01 : f32
    %566 = vector.broadcast %cst_193 : f32 to vector<16x16xf32>
    %567 = arith.mulf %566, %563 : vector<16x16xf32>
    %568 = arith.select %565, %563, %567 : vector<16x16xi1>, vector<16x16xf32>
    %cst_194 = arith.constant -1.000000e+30 : f32
    %569 = vector.broadcast %cst_194 : f32 to vector<16x16xf32>
    %570 = arith.select %436, %568, %569 : vector<16x16xi1>, vector<16x16xf32>
    %cst_195 = arith.constant dense<0xFF800000> : vector<16xf32>
    %571 = vector.multi_reduction <maximumf>, %570, %cst_195 [1] : vector<16x16xf32> to vector<16xf32>
    %572 = vector.shape_cast %571 : vector<16xf32> to vector<16x1xf32>
    %573 = vector.broadcast %572 : vector<16x1xf32> to vector<16x16xf32>
    %574 = arith.subf %570, %573 : vector<16x16xf32>
    %575 = math.exp %574 : vector<16x16xf32>
    %cst_196 = arith.constant 0.000000e+00 : f32
    %576 = vector.broadcast %cst_196 : f32 to vector<16x16xf32>
    %577 = arith.select %436, %575, %576 : vector<16x16xi1>, vector<16x16xf32>
    %cst_197 = arith.constant dense<0.000000e+00> : vector<16xf32>
    %578 = vector.multi_reduction <add>, %577, %cst_197 [1] : vector<16x16xf32> to vector<16xf32>
    %579 = vector.shape_cast %578 : vector<16xf32> to vector<16x1xf32>
    %580 = tpu.reciprocal %579 {approx = true} : vector<16x1xf32> -> vector<16x1xf32>
    %581 = vector.broadcast %580 : vector<16x1xf32> to vector<16x16xf32>
    %582 = arith.mulf %577, %581 : vector<16x16xf32>
    %cst_198 = arith.constant dense<0.000000e+00> : vector<16x128xf32>
    %583 = tpu.matmul %582, %549, %cst_198 {dimension_numbers = #tpu.dot_dimension_numbers<[1], [0], [0], [1], [0, 0, 1, 1], [], []>} : vector<16x16xf32>, vector<16x128xf32>, vector<16x128xf32> -> vector<16x128xf32>
    %584 = vector.extract_strided_slice %439 {offsets = [0, 512], sizes = [16, 128], strides = [1, 1]} : vector<16x1280xf32> to vector<16x128xf32>
    %585 = vector.extract_strided_slice %441 {offsets = [4, 0], sizes = [1, 128], strides = [1, 1]} : vector<10x128xf32> to vector<1x128xf32>
    %586 = vector.extract_strided_slice %443 {offsets = [4, 0], sizes = [1, 128], strides = [1, 1]} : vector<10x128xf32> to vector<1x128xf32>
    %587 = vector.broadcast %585 : vector<1x128xf32> to vector<16x128xf32>
    %588 = arith.mulf %584, %587 : vector<16x128xf32>
    %cst_199 = arith.constant dense<0.000000e+00> : vector<16xf32>
    %589 = vector.multi_reduction <add>, %588, %cst_199 [1] : vector<16x128xf32> to vector<16xf32>
    %590 = vector.shape_cast %589 : vector<16xf32> to vector<16x1xf32>
    %591 = vector.broadcast %586 : vector<1x128xf32> to vector<16x128xf32>
    %592 = arith.mulf %584, %591 : vector<16x128xf32>
    %cst_200 = arith.constant dense<0.000000e+00> : vector<16xf32>
    %593 = vector.multi_reduction <add>, %592, %cst_200 [1] : vector<16x128xf32> to vector<16xf32>
    %594 = vector.shape_cast %593 : vector<16xf32> to vector<16x1xf32>
    %595 = tpu.transpose %590, [1, 0] : vector<16x1xf32> -> vector<1x16xf32>
    %596 = vector.broadcast %594 : vector<16x1xf32> to vector<16x16xf32>
    %597 = vector.broadcast %595 : vector<1x16xf32> to vector<16x16xf32>
    %598 = arith.addf %596, %597 : vector<16x16xf32>
    %cst_201 = arith.constant 0.000000e+00 : f32
    %599 = vector.broadcast %cst_201 : f32 to vector<16x16xf32>
    %600 = arith.cmpf ogt, %598, %599 : vector<16x16xf32>
    %cst_202 = arith.constant 2.000000e-01 : f32
    %601 = vector.broadcast %cst_202 : f32 to vector<16x16xf32>
    %602 = arith.mulf %601, %598 : vector<16x16xf32>
    %603 = arith.select %600, %598, %602 : vector<16x16xi1>, vector<16x16xf32>
    %cst_203 = arith.constant -1.000000e+30 : f32
    %604 = vector.broadcast %cst_203 : f32 to vector<16x16xf32>
    %605 = arith.select %436, %603, %604 : vector<16x16xi1>, vector<16x16xf32>
    %cst_204 = arith.constant dense<0xFF800000> : vector<16xf32>
    %606 = vector.multi_reduction <maximumf>, %605, %cst_204 [1] : vector<16x16xf32> to vector<16xf32>
    %607 = vector.shape_cast %606 : vector<16xf32> to vector<16x1xf32>
    %608 = vector.broadcast %607 : vector<16x1xf32> to vector<16x16xf32>
    %609 = arith.subf %605, %608 : vector<16x16xf32>
    %610 = math.exp %609 : vector<16x16xf32>
    %cst_205 = arith.constant 0.000000e+00 : f32
    %611 = vector.broadcast %cst_205 : f32 to vector<16x16xf32>
    %612 = arith.select %436, %610, %611 : vector<16x16xi1>, vector<16x16xf32>
    %cst_206 = arith.constant dense<0.000000e+00> : vector<16xf32>
    %613 = vector.multi_reduction <add>, %612, %cst_206 [1] : vector<16x16xf32> to vector<16xf32>
    %614 = vector.shape_cast %613 : vector<16xf32> to vector<16x1xf32>
    %615 = tpu.reciprocal %614 {approx = true} : vector<16x1xf32> -> vector<16x1xf32>
    %616 = vector.broadcast %615 : vector<16x1xf32> to vector<16x16xf32>
    %617 = arith.mulf %612, %616 : vector<16x16xf32>
    %cst_207 = arith.constant dense<0.000000e+00> : vector<16x128xf32>
    %618 = tpu.matmul %617, %584, %cst_207 {dimension_numbers = #tpu.dot_dimension_numbers<[1], [0], [0], [1], [0, 0, 1, 1], [], []>} : vector<16x16xf32>, vector<16x128xf32>, vector<16x128xf32> -> vector<16x128xf32>
    %619 = vector.extract_strided_slice %439 {offsets = [0, 640], sizes = [16, 128], strides = [1, 1]} : vector<16x1280xf32> to vector<16x128xf32>
    %620 = vector.extract_strided_slice %441 {offsets = [5, 0], sizes = [1, 128], strides = [1, 1]} : vector<10x128xf32> to vector<1x128xf32>
    %621 = vector.extract_strided_slice %443 {offsets = [5, 0], sizes = [1, 128], strides = [1, 1]} : vector<10x128xf32> to vector<1x128xf32>
    %622 = vector.broadcast %620 : vector<1x128xf32> to vector<16x128xf32>
    %623 = arith.mulf %619, %622 : vector<16x128xf32>
    %cst_208 = arith.constant dense<0.000000e+00> : vector<16xf32>
    %624 = vector.multi_reduction <add>, %623, %cst_208 [1] : vector<16x128xf32> to vector<16xf32>
    %625 = vector.shape_cast %624 : vector<16xf32> to vector<16x1xf32>
    %626 = vector.broadcast %621 : vector<1x128xf32> to vector<16x128xf32>
    %627 = arith.mulf %619, %626 : vector<16x128xf32>
    %cst_209 = arith.constant dense<0.000000e+00> : vector<16xf32>
    %628 = vector.multi_reduction <add>, %627, %cst_209 [1] : vector<16x128xf32> to vector<16xf32>
    %629 = vector.shape_cast %628 : vector<16xf32> to vector<16x1xf32>
    %630 = tpu.transpose %625, [1, 0] : vector<16x1xf32> -> vector<1x16xf32>
    %631 = vector.broadcast %629 : vector<16x1xf32> to vector<16x16xf32>
    %632 = vector.broadcast %630 : vector<1x16xf32> to vector<16x16xf32>
    %633 = arith.addf %631, %632 : vector<16x16xf32>
    %cst_210 = arith.constant 0.000000e+00 : f32
    %634 = vector.broadcast %cst_210 : f32 to vector<16x16xf32>
    %635 = arith.cmpf ogt, %633, %634 : vector<16x16xf32>
    %cst_211 = arith.constant 2.000000e-01 : f32
    %636 = vector.broadcast %cst_211 : f32 to vector<16x16xf32>
    %637 = arith.mulf %636, %633 : vector<16x16xf32>
    %638 = arith.select %635, %633, %637 : vector<16x16xi1>, vector<16x16xf32>
    %cst_212 = arith.constant -1.000000e+30 : f32
    %639 = vector.broadcast %cst_212 : f32 to vector<16x16xf32>
    %640 = arith.select %436, %638, %639 : vector<16x16xi1>, vector<16x16xf32>
    %cst_213 = arith.constant dense<0xFF800000> : vector<16xf32>
    %641 = vector.multi_reduction <maximumf>, %640, %cst_213 [1] : vector<16x16xf32> to vector<16xf32>
    %642 = vector.shape_cast %641 : vector<16xf32> to vector<16x1xf32>
    %643 = vector.broadcast %642 : vector<16x1xf32> to vector<16x16xf32>
    %644 = arith.subf %640, %643 : vector<16x16xf32>
    %645 = math.exp %644 : vector<16x16xf32>
    %cst_214 = arith.constant 0.000000e+00 : f32
    %646 = vector.broadcast %cst_214 : f32 to vector<16x16xf32>
    %647 = arith.select %436, %645, %646 : vector<16x16xi1>, vector<16x16xf32>
    %cst_215 = arith.constant dense<0.000000e+00> : vector<16xf32>
    %648 = vector.multi_reduction <add>, %647, %cst_215 [1] : vector<16x16xf32> to vector<16xf32>
    %649 = vector.shape_cast %648 : vector<16xf32> to vector<16x1xf32>
    %650 = tpu.reciprocal %649 {approx = true} : vector<16x1xf32> -> vector<16x1xf32>
    %651 = vector.broadcast %650 : vector<16x1xf32> to vector<16x16xf32>
    %652 = arith.mulf %647, %651 : vector<16x16xf32>
    %cst_216 = arith.constant dense<0.000000e+00> : vector<16x128xf32>
    %653 = tpu.matmul %652, %619, %cst_216 {dimension_numbers = #tpu.dot_dimension_numbers<[1], [0], [0], [1], [0, 0, 1, 1], [], []>} : vector<16x16xf32>, vector<16x128xf32>, vector<16x128xf32> -> vector<16x128xf32>
    %654 = vector.extract_strided_slice %439 {offsets = [0, 768], sizes = [16, 128], strides = [1, 1]} : vector<16x1280xf32> to vector<16x128xf32>
    %655 = vector.extract_strided_slice %441 {offsets = [6, 0], sizes = [1, 128], strides = [1, 1]} : vector<10x128xf32> to vector<1x128xf32>
    %656 = vector.extract_strided_slice %443 {offsets = [6, 0], sizes = [1, 128], strides = [1, 1]} : vector<10x128xf32> to vector<1x128xf32>
    %657 = vector.broadcast %655 : vector<1x128xf32> to vector<16x128xf32>
    %658 = arith.mulf %654, %657 : vector<16x128xf32>
    %cst_217 = arith.constant dense<0.000000e+00> : vector<16xf32>
    %659 = vector.multi_reduction <add>, %658, %cst_217 [1] : vector<16x128xf32> to vector<16xf32>
    %660 = vector.shape_cast %659 : vector<16xf32> to vector<16x1xf32>
    %661 = vector.broadcast %656 : vector<1x128xf32> to vector<16x128xf32>
    %662 = arith.mulf %654, %661 : vector<16x128xf32>
    %cst_218 = arith.constant dense<0.000000e+00> : vector<16xf32>
    %663 = vector.multi_reduction <add>, %662, %cst_218 [1] : vector<16x128xf32> to vector<16xf32>
    %664 = vector.shape_cast %663 : vector<16xf32> to vector<16x1xf32>
    %665 = tpu.transpose %660, [1, 0] : vector<16x1xf32> -> vector<1x16xf32>
    %666 = vector.broadcast %664 : vector<16x1xf32> to vector<16x16xf32>
    %667 = vector.broadcast %665 : vector<1x16xf32> to vector<16x16xf32>
    %668 = arith.addf %666, %667 : vector<16x16xf32>
    %cst_219 = arith.constant 0.000000e+00 : f32
    %669 = vector.broadcast %cst_219 : f32 to vector<16x16xf32>
    %670 = arith.cmpf ogt, %668, %669 : vector<16x16xf32>
    %cst_220 = arith.constant 2.000000e-01 : f32
    %671 = vector.broadcast %cst_220 : f32 to vector<16x16xf32>
    %672 = arith.mulf %671, %668 : vector<16x16xf32>
    %673 = arith.select %670, %668, %672 : vector<16x16xi1>, vector<16x16xf32>
    %cst_221 = arith.constant -1.000000e+30 : f32
    %674 = vector.broadcast %cst_221 : f32 to vector<16x16xf32>
    %675 = arith.select %436, %673, %674 : vector<16x16xi1>, vector<16x16xf32>
    %cst_222 = arith.constant dense<0xFF800000> : vector<16xf32>
    %676 = vector.multi_reduction <maximumf>, %675, %cst_222 [1] : vector<16x16xf32> to vector<16xf32>
    %677 = vector.shape_cast %676 : vector<16xf32> to vector<16x1xf32>
    %678 = vector.broadcast %677 : vector<16x1xf32> to vector<16x16xf32>
    %679 = arith.subf %675, %678 : vector<16x16xf32>
    %680 = math.exp %679 : vector<16x16xf32>
    %cst_223 = arith.constant 0.000000e+00 : f32
    %681 = vector.broadcast %cst_223 : f32 to vector<16x16xf32>
    %682 = arith.select %436, %680, %681 : vector<16x16xi1>, vector<16x16xf32>
    %cst_224 = arith.constant dense<0.000000e+00> : vector<16xf32>
    %683 = vector.multi_reduction <add>, %682, %cst_224 [1] : vector<16x16xf32> to vector<16xf32>
    %684 = vector.shape_cast %683 : vector<16xf32> to vector<16x1xf32>
    %685 = tpu.reciprocal %684 {approx = true} : vector<16x1xf32> -> vector<16x1xf32>
    %686 = vector.broadcast %685 : vector<16x1xf32> to vector<16x16xf32>
    %687 = arith.mulf %682, %686 : vector<16x16xf32>
    %cst_225 = arith.constant dense<0.000000e+00> : vector<16x128xf32>
    %688 = tpu.matmul %687, %654, %cst_225 {dimension_numbers = #tpu.dot_dimension_numbers<[1], [0], [0], [1], [0, 0, 1, 1], [], []>} : vector<16x16xf32>, vector<16x128xf32>, vector<16x128xf32> -> vector<16x128xf32>
    %689 = vector.extract_strided_slice %439 {offsets = [0, 896], sizes = [16, 128], strides = [1, 1]} : vector<16x1280xf32> to vector<16x128xf32>
    %690 = vector.extract_strided_slice %441 {offsets = [7, 0], sizes = [1, 128], strides = [1, 1]} : vector<10x128xf32> to vector<1x128xf32>
    %691 = vector.extract_strided_slice %443 {offsets = [7, 0], sizes = [1, 128], strides = [1, 1]} : vector<10x128xf32> to vector<1x128xf32>
    %692 = vector.broadcast %690 : vector<1x128xf32> to vector<16x128xf32>
    %693 = arith.mulf %689, %692 : vector<16x128xf32>
    %cst_226 = arith.constant dense<0.000000e+00> : vector<16xf32>
    %694 = vector.multi_reduction <add>, %693, %cst_226 [1] : vector<16x128xf32> to vector<16xf32>
    %695 = vector.shape_cast %694 : vector<16xf32> to vector<16x1xf32>
    %696 = vector.broadcast %691 : vector<1x128xf32> to vector<16x128xf32>
    %697 = arith.mulf %689, %696 : vector<16x128xf32>
    %cst_227 = arith.constant dense<0.000000e+00> : vector<16xf32>
    %698 = vector.multi_reduction <add>, %697, %cst_227 [1] : vector<16x128xf32> to vector<16xf32>
    %699 = vector.shape_cast %698 : vector<16xf32> to vector<16x1xf32>
    %700 = tpu.transpose %695, [1, 0] : vector<16x1xf32> -> vector<1x16xf32>
    %701 = vector.broadcast %699 : vector<16x1xf32> to vector<16x16xf32>
    %702 = vector.broadcast %700 : vector<1x16xf32> to vector<16x16xf32>
    %703 = arith.addf %701, %702 : vector<16x16xf32>
    %cst_228 = arith.constant 0.000000e+00 : f32
    %704 = vector.broadcast %cst_228 : f32 to vector<16x16xf32>
    %705 = arith.cmpf ogt, %703, %704 : vector<16x16xf32>
    %cst_229 = arith.constant 2.000000e-01 : f32
    %706 = vector.broadcast %cst_229 : f32 to vector<16x16xf32>
    %707 = arith.mulf %706, %703 : vector<16x16xf32>
    %708 = arith.select %705, %703, %707 : vector<16x16xi1>, vector<16x16xf32>
    %cst_230 = arith.constant -1.000000e+30 : f32
    %709 = vector.broadcast %cst_230 : f32 to vector<16x16xf32>
    %710 = arith.select %436, %708, %709 : vector<16x16xi1>, vector<16x16xf32>
    %cst_231 = arith.constant dense<0xFF800000> : vector<16xf32>
    %711 = vector.multi_reduction <maximumf>, %710, %cst_231 [1] : vector<16x16xf32> to vector<16xf32>
    %712 = vector.shape_cast %711 : vector<16xf32> to vector<16x1xf32>
    %713 = vector.broadcast %712 : vector<16x1xf32> to vector<16x16xf32>
    %714 = arith.subf %710, %713 : vector<16x16xf32>
    %715 = math.exp %714 : vector<16x16xf32>
    %cst_232 = arith.constant 0.000000e+00 : f32
    %716 = vector.broadcast %cst_232 : f32 to vector<16x16xf32>
    %717 = arith.select %436, %715, %716 : vector<16x16xi1>, vector<16x16xf32>
    %cst_233 = arith.constant dense<0.000000e+00> : vector<16xf32>
    %718 = vector.multi_reduction <add>, %717, %cst_233 [1] : vector<16x16xf32> to vector<16xf32>
    %719 = vector.shape_cast %718 : vector<16xf32> to vector<16x1xf32>
    %720 = tpu.reciprocal %719 {approx = true} : vector<16x1xf32> -> vector<16x1xf32>
    %721 = vector.broadcast %720 : vector<16x1xf32> to vector<16x16xf32>
    %722 = arith.mulf %717, %721 : vector<16x16xf32>
    %cst_234 = arith.constant dense<0.000000e+00> : vector<16x128xf32>
    %723 = tpu.matmul %722, %689, %cst_234 {dimension_numbers = #tpu.dot_dimension_numbers<[1], [0], [0], [1], [0, 0, 1, 1], [], []>} : vector<16x16xf32>, vector<16x128xf32>, vector<16x128xf32> -> vector<16x128xf32>
    %724 = vector.extract_strided_slice %439 {offsets = [0, 1024], sizes = [16, 128], strides = [1, 1]} : vector<16x1280xf32> to vector<16x128xf32>
    %725 = vector.extract_strided_slice %441 {offsets = [8, 0], sizes = [1, 128], strides = [1, 1]} : vector<10x128xf32> to vector<1x128xf32>
    %726 = vector.extract_strided_slice %443 {offsets = [8, 0], sizes = [1, 128], strides = [1, 1]} : vector<10x128xf32> to vector<1x128xf32>
    %727 = vector.broadcast %725 : vector<1x128xf32> to vector<16x128xf32>
    %728 = arith.mulf %724, %727 : vector<16x128xf32>
    %cst_235 = arith.constant dense<0.000000e+00> : vector<16xf32>
    %729 = vector.multi_reduction <add>, %728, %cst_235 [1] : vector<16x128xf32> to vector<16xf32>
    %730 = vector.shape_cast %729 : vector<16xf32> to vector<16x1xf32>
    %731 = vector.broadcast %726 : vector<1x128xf32> to vector<16x128xf32>
    %732 = arith.mulf %724, %731 : vector<16x128xf32>
    %cst_236 = arith.constant dense<0.000000e+00> : vector<16xf32>
    %733 = vector.multi_reduction <add>, %732, %cst_236 [1] : vector<16x128xf32> to vector<16xf32>
    %734 = vector.shape_cast %733 : vector<16xf32> to vector<16x1xf32>
    %735 = tpu.transpose %730, [1, 0] : vector<16x1xf32> -> vector<1x16xf32>
    %736 = vector.broadcast %734 : vector<16x1xf32> to vector<16x16xf32>
    %737 = vector.broadcast %735 : vector<1x16xf32> to vector<16x16xf32>
    %738 = arith.addf %736, %737 : vector<16x16xf32>
    %cst_237 = arith.constant 0.000000e+00 : f32
    %739 = vector.broadcast %cst_237 : f32 to vector<16x16xf32>
    %740 = arith.cmpf ogt, %738, %739 : vector<16x16xf32>
    %cst_238 = arith.constant 2.000000e-01 : f32
    %741 = vector.broadcast %cst_238 : f32 to vector<16x16xf32>
    %742 = arith.mulf %741, %738 : vector<16x16xf32>
    %743 = arith.select %740, %738, %742 : vector<16x16xi1>, vector<16x16xf32>
    %cst_239 = arith.constant -1.000000e+30 : f32
    %744 = vector.broadcast %cst_239 : f32 to vector<16x16xf32>
    %745 = arith.select %436, %743, %744 : vector<16x16xi1>, vector<16x16xf32>
    %cst_240 = arith.constant dense<0xFF800000> : vector<16xf32>
    %746 = vector.multi_reduction <maximumf>, %745, %cst_240 [1] : vector<16x16xf32> to vector<16xf32>
    %747 = vector.shape_cast %746 : vector<16xf32> to vector<16x1xf32>
    %748 = vector.broadcast %747 : vector<16x1xf32> to vector<16x16xf32>
    %749 = arith.subf %745, %748 : vector<16x16xf32>
    %750 = math.exp %749 : vector<16x16xf32>
    %cst_241 = arith.constant 0.000000e+00 : f32
    %751 = vector.broadcast %cst_241 : f32 to vector<16x16xf32>
    %752 = arith.select %436, %750, %751 : vector<16x16xi1>, vector<16x16xf32>
    %cst_242 = arith.constant dense<0.000000e+00> : vector<16xf32>
    %753 = vector.multi_reduction <add>, %752, %cst_242 [1] : vector<16x16xf32> to vector<16xf32>
    %754 = vector.shape_cast %753 : vector<16xf32> to vector<16x1xf32>
    %755 = tpu.reciprocal %754 {approx = true} : vector<16x1xf32> -> vector<16x1xf32>
    %756 = vector.broadcast %755 : vector<16x1xf32> to vector<16x16xf32>
    %757 = arith.mulf %752, %756 : vector<16x16xf32>
    %cst_243 = arith.constant dense<0.000000e+00> : vector<16x128xf32>
    %758 = tpu.matmul %757, %724, %cst_243 {dimension_numbers = #tpu.dot_dimension_numbers<[1], [0], [0], [1], [0, 0, 1, 1], [], []>} : vector<16x16xf32>, vector<16x128xf32>, vector<16x128xf32> -> vector<16x128xf32>
    %759 = vector.extract_strided_slice %439 {offsets = [0, 1152], sizes = [16, 128], strides = [1, 1]} : vector<16x1280xf32> to vector<16x128xf32>
    %760 = vector.extract_strided_slice %441 {offsets = [9, 0], sizes = [1, 128], strides = [1, 1]} : vector<10x128xf32> to vector<1x128xf32>
    %761 = vector.extract_strided_slice %443 {offsets = [9, 0], sizes = [1, 128], strides = [1, 1]} : vector<10x128xf32> to vector<1x128xf32>
    %762 = vector.broadcast %760 : vector<1x128xf32> to vector<16x128xf32>
    %763 = arith.mulf %759, %762 : vector<16x128xf32>
    %cst_244 = arith.constant dense<0.000000e+00> : vector<16xf32>
    %764 = vector.multi_reduction <add>, %763, %cst_244 [1] : vector<16x128xf32> to vector<16xf32>
    %765 = vector.shape_cast %764 : vector<16xf32> to vector<16x1xf32>
    %766 = vector.broadcast %761 : vector<1x128xf32> to vector<16x128xf32>
    %767 = arith.mulf %759, %766 : vector<16x128xf32>
    %cst_245 = arith.constant dense<0.000000e+00> : vector<16xf32>
    %768 = vector.multi_reduction <add>, %767, %cst_245 [1] : vector<16x128xf32> to vector<16xf32>
    %769 = vector.shape_cast %768 : vector<16xf32> to vector<16x1xf32>
    %770 = tpu.transpose %765, [1, 0] : vector<16x1xf32> -> vector<1x16xf32>
    %771 = vector.broadcast %769 : vector<16x1xf32> to vector<16x16xf32>
    %772 = vector.broadcast %770 : vector<1x16xf32> to vector<16x16xf32>
    %773 = arith.addf %771, %772 : vector<16x16xf32>
    %cst_246 = arith.constant 0.000000e+00 : f32
    %774 = vector.broadcast %cst_246 : f32 to vector<16x16xf32>
    %775 = arith.cmpf ogt, %773, %774 : vector<16x16xf32>
    %cst_247 = arith.constant 2.000000e-01 : f32
    %776 = vector.broadcast %cst_247 : f32 to vector<16x16xf32>
    %777 = arith.mulf %776, %773 : vector<16x16xf32>
    %778 = arith.select %775, %773, %777 : vector<16x16xi1>, vector<16x16xf32>
    %cst_248 = arith.constant -1.000000e+30 : f32
    %779 = vector.broadcast %cst_248 : f32 to vector<16x16xf32>
    %780 = arith.select %436, %778, %779 : vector<16x16xi1>, vector<16x16xf32>
    %cst_249 = arith.constant dense<0xFF800000> : vector<16xf32>
    %781 = vector.multi_reduction <maximumf>, %780, %cst_249 [1] : vector<16x16xf32> to vector<16xf32>
    %782 = vector.shape_cast %781 : vector<16xf32> to vector<16x1xf32>
    %783 = vector.broadcast %782 : vector<16x1xf32> to vector<16x16xf32>
    %784 = arith.subf %780, %783 : vector<16x16xf32>
    %785 = math.exp %784 : vector<16x16xf32>
    %cst_250 = arith.constant 0.000000e+00 : f32
    %786 = vector.broadcast %cst_250 : f32 to vector<16x16xf32>
    %787 = arith.select %436, %785, %786 : vector<16x16xi1>, vector<16x16xf32>
    %cst_251 = arith.constant dense<0.000000e+00> : vector<16xf32>
    %788 = vector.multi_reduction <add>, %787, %cst_251 [1] : vector<16x16xf32> to vector<16xf32>
    %789 = vector.shape_cast %788 : vector<16xf32> to vector<16x1xf32>
    %790 = tpu.reciprocal %789 {approx = true} : vector<16x1xf32> -> vector<16x1xf32>
    %791 = vector.broadcast %790 : vector<16x1xf32> to vector<16x16xf32>
    %792 = arith.mulf %787, %791 : vector<16x16xf32>
    %cst_252 = arith.constant dense<0.000000e+00> : vector<16x128xf32>
    %793 = tpu.matmul %792, %759, %cst_252 {dimension_numbers = #tpu.dot_dimension_numbers<[1], [0], [0], [1], [0, 0, 1, 1], [], []>} : vector<16x16xf32>, vector<16x128xf32>, vector<16x128xf32> -> vector<16x128xf32>
    %794 = tpu.concatenate %478, %513, %548, %583, %618, %653, %688, %723, %758, %793 in 1 : vector<16x128xf32>, vector<16x128xf32>, vector<16x128xf32>, vector<16x128xf32>, vector<16x128xf32>, vector<16x128xf32>, vector<16x128xf32>, vector<16x128xf32>, vector<16x128xf32>, vector<16x128xf32> -> vector<16x1280xf32>
    %c1_253 = arith.constant 1 : index
    %c0_254 = arith.constant 0 : index
    %c0_255 = arith.constant 0 : index
    %795 = vector.load %arg7[%c1_253, %c0_254, %c0_255] : memref<2x1x1280xf32, #tpu.memory_space<vmem>>, vector<1x1x1280xf32>
    %796 = vector.shape_cast %795 : vector<1x1x1280xf32> to vector<1x1280xf32>
    %797 = vector.broadcast %796 : vector<1x1280xf32> to vector<16x1280xf32>
    %798 = arith.addf %794, %797 : vector<16x1280xf32>
    %cst_256 = arith.constant 0.000000e+00 : f32
    %799 = vector.broadcast %cst_256 : f32 to vector<16x1280xf32>
    %800 = arith.cmpf ogt, %798, %799 : vector<16x1280xf32>
    %cst_257 = arith.constant 0.000000e+00 : f32
    %801 = vector.broadcast %cst_257 : f32 to vector<16x1280xf32>
    %802 = arith.minimumf %798, %801 : vector<16x1280xf32>
    %803 = math.exp %802 : vector<16x1280xf32>
    %cst_258 = arith.constant 1.000000e+00 : f32
    %804 = vector.broadcast %cst_258 : f32 to vector<16x1280xf32>
    %805 = arith.subf %803, %804 : vector<16x1280xf32>
    %806 = arith.select %800, %798, %805 : vector<16x1280xi1>, vector<16x1280xf32>
    %c1_259 = arith.constant 1 : index
    %c0_260 = arith.constant 0 : index
    %c0_261 = arith.constant 0 : index
    %807 = vector.load %arg8[%c1_259, %c0_260, %c0_261] : memref<2x1280x128xf32, #tpu.memory_space<vmem>>, vector<1x1280x128xf32>
    %808 = vector.shape_cast %807 : vector<1x1280x128xf32> to vector<1280x128xf32>
    %cst_262 = arith.constant dense<0.000000e+00> : vector<16x128xf32>
    %809 = tpu.matmul %806, %808, %cst_262 {dimension_numbers = #tpu.dot_dimension_numbers<[1], [0], [0], [1], [0, 0, 1, 1], [], []>} : vector<16x1280xf32>, vector<1280x128xf32>, vector<16x128xf32> -> vector<16x128xf32>
    %c1_263 = arith.constant 1 : index
    %c0_264 = arith.constant 0 : index
    %c0_265 = arith.constant 0 : index
    %810 = vector.load %arg9[%c1_263, %c0_264, %c0_265] : memref<2x1x128xf32, #tpu.memory_space<vmem>>, vector<1x1x128xf32>
    %811 = vector.shape_cast %810 : vector<1x1x128xf32> to vector<1x128xf32>
    %c1_266 = arith.constant 1 : index
    %c0_267 = arith.constant 0 : index
    %c0_268 = arith.constant 0 : index
    %812 = vector.load %arg10[%c1_266, %c0_267, %c0_268] : memref<2x1x128xf32, #tpu.memory_space<vmem>>, vector<1x1x128xf32>
    %813 = vector.shape_cast %812 : vector<1x1x128xf32> to vector<1x128xf32>
    %814 = vector.broadcast %811 : vector<1x128xf32> to vector<16x128xf32>
    %815 = arith.mulf %809, %814 : vector<16x128xf32>
    %cst_269 = arith.constant dense<0.000000e+00> : vector<16xf32>
    %816 = vector.multi_reduction <add>, %815, %cst_269 [1] : vector<16x128xf32> to vector<16xf32>
    %817 = vector.shape_cast %816 : vector<16xf32> to vector<16x1xf32>
    %818 = vector.broadcast %813 : vector<1x128xf32> to vector<16x128xf32>
    %819 = arith.mulf %809, %818 : vector<16x128xf32>
    %cst_270 = arith.constant dense<0.000000e+00> : vector<16xf32>
    %820 = vector.multi_reduction <add>, %819, %cst_270 [1] : vector<16x128xf32> to vector<16xf32>
    %821 = vector.shape_cast %820 : vector<16xf32> to vector<16x1xf32>
    %822 = tpu.transpose %817, [1, 0] : vector<16x1xf32> -> vector<1x16xf32>
    %823 = vector.broadcast %821 : vector<16x1xf32> to vector<16x16xf32>
    %824 = vector.broadcast %822 : vector<1x16xf32> to vector<16x16xf32>
    %825 = arith.addf %823, %824 : vector<16x16xf32>
    %cst_271 = arith.constant 0.000000e+00 : f32
    %826 = vector.broadcast %cst_271 : f32 to vector<16x16xf32>
    %827 = arith.cmpf ogt, %825, %826 : vector<16x16xf32>
    %cst_272 = arith.constant 2.000000e-01 : f32
    %828 = vector.broadcast %cst_272 : f32 to vector<16x16xf32>
    %829 = arith.mulf %828, %825 : vector<16x16xf32>
    %830 = arith.select %827, %825, %829 : vector<16x16xi1>, vector<16x16xf32>
    %cst_273 = arith.constant -1.000000e+30 : f32
    %831 = vector.broadcast %cst_273 : f32 to vector<16x16xf32>
    %832 = arith.select %436, %830, %831 : vector<16x16xi1>, vector<16x16xf32>
    %cst_274 = arith.constant dense<0xFF800000> : vector<16xf32>
    %833 = vector.multi_reduction <maximumf>, %832, %cst_274 [1] : vector<16x16xf32> to vector<16xf32>
    %834 = vector.shape_cast %833 : vector<16xf32> to vector<16x1xf32>
    %835 = vector.broadcast %834 : vector<16x1xf32> to vector<16x16xf32>
    %836 = arith.subf %832, %835 : vector<16x16xf32>
    %837 = math.exp %836 : vector<16x16xf32>
    %cst_275 = arith.constant 0.000000e+00 : f32
    %838 = vector.broadcast %cst_275 : f32 to vector<16x16xf32>
    %839 = arith.select %436, %837, %838 : vector<16x16xi1>, vector<16x16xf32>
    %cst_276 = arith.constant dense<0.000000e+00> : vector<16xf32>
    %840 = vector.multi_reduction <add>, %839, %cst_276 [1] : vector<16x16xf32> to vector<16xf32>
    %841 = vector.shape_cast %840 : vector<16xf32> to vector<16x1xf32>
    %842 = tpu.reciprocal %841 {approx = true} : vector<16x1xf32> -> vector<16x1xf32>
    %843 = vector.broadcast %842 : vector<16x1xf32> to vector<16x16xf32>
    %844 = arith.mulf %839, %843 : vector<16x16xf32>
    %cst_277 = arith.constant dense<0.000000e+00> : vector<16x128xf32>
    %845 = tpu.matmul %844, %809, %cst_277 {dimension_numbers = #tpu.dot_dimension_numbers<[1], [0], [0], [1], [0, 0, 1, 1], [], []>} : vector<16x16xf32>, vector<16x128xf32>, vector<16x128xf32> -> vector<16x128xf32>
    %c1_278 = arith.constant 1 : index
    %c0_279 = arith.constant 0 : index
    %c0_280 = arith.constant 0 : index
    %846 = vector.load %arg11[%c1_278, %c0_279, %c0_280] : memref<2x1x128xf32, #tpu.memory_space<vmem>>, vector<1x1x128xf32>
    %847 = vector.shape_cast %846 : vector<1x1x128xf32> to vector<1x128xf32>
    %848 = vector.broadcast %847 : vector<1x128xf32> to vector<16x128xf32>
    %849 = arith.addf %845, %848 : vector<16x128xf32>
    %cst_281 = arith.constant 0.000000e+00 : f32
    %850 = vector.broadcast %cst_281 : f32 to vector<16x128xf32>
    %851 = arith.maximumf %849, %850 : vector<16x128xf32>
    %cst_282 = arith.constant dense<0xFF800000> : vector<128xf32>
    %852 = vector.multi_reduction <maximumf>, %851, %cst_282 [0] : vector<16x128xf32> to vector<128xf32>
    %853 = vector.shape_cast %852 : vector<128xf32> to vector<1x128xf32>
    %c1_283 = arith.constant 1 : index
    %c0_284 = arith.constant 0 : index
    %c0_285 = arith.constant 0 : index
    %854 = vector.load %arg12[%c1_283, %c0_284, %c0_285] : memref<2x128x128xf32, #tpu.memory_space<vmem>>, vector<1x128x128xf32>
    %855 = vector.shape_cast %854 : vector<1x128x128xf32> to vector<128x128xf32>
    %cst_286 = arith.constant dense<0.000000e+00> : vector<1x128xf32>
    %856 = tpu.matmul %853, %855, %cst_286 {dimension_numbers = #tpu.dot_dimension_numbers<[1], [0], [0], [1], [0, 0, 1, 1], [], []>} : vector<1x128xf32>, vector<128x128xf32>, vector<1x128xf32> -> vector<1x128xf32>
    %c1_287 = arith.constant 1 : index
    %c0_288 = arith.constant 0 : index
    %c0_289 = arith.constant 0 : index
    %857 = vector.load %arg13[%c1_287, %c0_288, %c0_289] : memref<2x1x128xf32, #tpu.memory_space<vmem>>, vector<1x1x128xf32>
    %858 = vector.shape_cast %857 : vector<1x1x128xf32> to vector<1x128xf32>
    %859 = arith.addf %856, %858 : vector<1x128xf32>
    %cst_290 = arith.constant 0.000000e+00 : f32
    %860 = vector.broadcast %cst_290 : f32 to vector<1x128xf32>
    %861 = arith.maximumf %859, %860 : vector<1x128xf32>
    %c0_291 = arith.constant 0 : index
    %c0_292 = arith.constant 0 : index
    %c0_293 = arith.constant 0 : index
    %862 = vector.load %arg3[%c0_291, %c0_292, %c0_293] : memref<1x1x1024xf32, #tpu.memory_space<vmem>>, vector<1x1x1024xf32>
    %863 = vector.shape_cast %862 : vector<1x1x1024xf32> to vector<1x1024xf32>
    %c0_294 = arith.constant 0 : index
    %c0_295 = arith.constant 0 : index
    %864 = vector.load %arg14[%c0_294, %c0_295] : memref<1024x128xf32, #tpu.memory_space<vmem>>, vector<1024x128xf32>
    %cst_296 = arith.constant dense<0.000000e+00> : vector<1x128xf32>
    %865 = tpu.matmul %863, %864, %cst_296 {dimension_numbers = #tpu.dot_dimension_numbers<[1], [0], [0], [1], [0, 0, 1, 1], [], []>} : vector<1x1024xf32>, vector<1024x128xf32>, vector<1x128xf32> -> vector<1x128xf32>
    %c0_297 = arith.constant 0 : index
    %c0_298 = arith.constant 0 : index
    %866 = vector.load %arg15[%c0_297, %c0_298] : memref<1x128xf32, #tpu.memory_space<vmem>>, vector<1x128xf32>
    %867 = arith.addf %865, %866 : vector<1x128xf32>
    %c0_299 = arith.constant 0 : index
    %c0_300 = arith.constant 0 : index
    %868 = vector.load %arg16[%c0_299, %c0_300] : memref<128x128xf32, #tpu.memory_space<vmem>>, vector<128x128xf32>
    %cst_301 = arith.constant dense<0.000000e+00> : vector<1x128xf32>
    %869 = tpu.matmul %430, %868, %cst_301 {dimension_numbers = #tpu.dot_dimension_numbers<[1], [0], [0], [1], [0, 0, 1, 1], [], []>} : vector<1x128xf32>, vector<128x128xf32>, vector<1x128xf32> -> vector<1x128xf32>
    %c0_302 = arith.constant 0 : index
    %c0_303 = arith.constant 0 : index
    %870 = vector.load %arg17[%c0_302, %c0_303] : memref<128x128xf32, #tpu.memory_space<vmem>>, vector<128x128xf32>
    %cst_304 = arith.constant dense<0.000000e+00> : vector<1x128xf32>
    %871 = tpu.matmul %861, %870, %cst_304 {dimension_numbers = #tpu.dot_dimension_numbers<[1], [0], [0], [1], [0, 0, 1, 1], [], []>} : vector<1x128xf32>, vector<128x128xf32>, vector<1x128xf32> -> vector<1x128xf32>
    %872 = arith.addf %869, %871 : vector<1x128xf32>
    %c0_305 = arith.constant 0 : index
    %c0_306 = arith.constant 0 : index
    %873 = vector.load %arg18[%c0_305, %c0_306] : memref<128x128xf32, #tpu.memory_space<vmem>>, vector<128x128xf32>
    %cst_307 = arith.constant dense<0.000000e+00> : vector<1x128xf32>
    %874 = tpu.matmul %867, %873, %cst_307 {dimension_numbers = #tpu.dot_dimension_numbers<[1], [0], [0], [1], [0, 0, 1, 1], [], []>} : vector<1x128xf32>, vector<128x128xf32>, vector<1x128xf32> -> vector<1x128xf32>
    %875 = arith.addf %872, %874 : vector<1x128xf32>
    %c0_308 = arith.constant 0 : index
    %c0_309 = arith.constant 0 : index
    %876 = vector.load %arg19[%c0_308, %c0_309] : memref<1x128xf32, #tpu.memory_space<vmem>>, vector<1x128xf32>
    %877 = arith.addf %875, %876 : vector<1x128xf32>
    %cst_310 = arith.constant 0.000000e+00 : f32
    %878 = vector.broadcast %cst_310 : f32 to vector<1x128xf32>
    %879 = arith.maximumf %877, %878 : vector<1x128xf32>
    %c0_311 = arith.constant 0 : index
    %c0_312 = arith.constant 0 : index
    %880 = vector.load %arg20[%c0_311, %c0_312] : memref<128x128xf32, #tpu.memory_space<vmem>>, vector<128x128xf32>
    %cst_313 = arith.constant dense<0.000000e+00> : vector<1x128xf32>
    %881 = tpu.matmul %879, %880, %cst_313 {dimension_numbers = #tpu.dot_dimension_numbers<[1], [0], [0], [1], [0, 0, 1, 1], [], []>} : vector<1x128xf32>, vector<128x128xf32>, vector<1x128xf32> -> vector<1x128xf32>
    %c0_314 = arith.constant 0 : index
    %c0_315 = arith.constant 0 : index
    %882 = vector.load %arg21[%c0_314, %c0_315] : memref<1x128xf32, #tpu.memory_space<vmem>>, vector<1x128xf32>
    %883 = arith.addf %881, %882 : vector<1x128xf32>
    %cst_316 = arith.constant 0.000000e+00 : f32
    %884 = vector.broadcast %cst_316 : f32 to vector<1x128xf32>
    %885 = arith.maximumf %883, %884 : vector<1x128xf32>
    %c0_317 = arith.constant 0 : index
    %c0_318 = arith.constant 0 : index
    %886 = vector.load %arg22[%c0_317, %c0_318] : memref<128x1xf32, #tpu.memory_space<vmem>>, vector<128x1xf32>
    %cst_319 = arith.constant dense<0.000000e+00> : vector<1x1xf32>
    %887 = tpu.matmul %885, %886, %cst_319 {dimension_numbers = #tpu.dot_dimension_numbers<[1], [0], [0], [1], [0, 0, 1, 1], [], []>} : vector<1x128xf32>, vector<128x1xf32>, vector<1x1xf32> -> vector<1x1xf32>
    %c0_320 = arith.constant 0 : index
    %c0_321 = arith.constant 0 : index
    %888 = vector.load %arg23[%c0_320, %c0_321] : memref<1x1xf32, #tpu.memory_space<vmem>>, vector<1x1xf32>
    %889 = arith.addf %887, %888 : vector<1x1xf32>
    %c0_322 = arith.constant 0 : index
    %c0_323 = arith.constant 0 : index
    %c0_324 = arith.constant 0 : index
    %890 = vector.load %arg24[%c0_322, %c0_323, %c0_324] : memref<1x1x1xf32, #tpu.memory_space<vmem>>, vector<1x1x1xf32>
    %891 = vector.shape_cast %890 : vector<1x1x1xf32> to vector<1x1xf32>
    %892 = vector.shape_cast %889 : vector<1x1xf32> to vector<1x1x1xf32>
    tpu.vector_store %arg24[%c0_322, %c0_323, %c0_324], %892 {strides = array<i32>} : memref<1x1x1xf32, #tpu.memory_space<vmem>>, vector<1x1x1xf32>,
    return
  }
  func.func @transform_0(%arg0: i32) -> (i32, i32, i32, i32) {
    %c0_i32 = arith.constant 0 : i32
    %c0_i32_0 = arith.constant 0 : i32
    %c0_i32_1 = arith.constant 0 : i32
    %c0_i32_2 = arith.constant 0 : i32
    return %c0_i32, %arg0, %c0_i32_0, %c0_i32_1 : i32, i32, i32, i32
  }
  func.func @transform_1(%arg0: i32) -> (i32, i32, i32, i32) {
    %c0_i32 = arith.constant 0 : i32
    %c0_i32_0 = arith.constant 0 : i32
    %c0_i32_1 = arith.constant 0 : i32
    %c0_i32_2 = arith.constant 0 : i32
    return %c0_i32, %arg0, %c0_i32_0, %c0_i32_1 : i32, i32, i32, i32
  }
  func.func @transform_2(%arg0: i32) -> (i32, i32, i32) {
    %c0_i32 = arith.constant 0 : i32
    %c0_i32_0 = arith.constant 0 : i32
    %c0_i32_1 = arith.constant 0 : i32
    return %arg0, %c0_i32, %c0_i32_0 : i32, i32, i32
  }
  func.func @transform_3(%arg0: i32) -> (i32, i32, i32) {
    %c0_i32 = arith.constant 0 : i32
    %c0_i32_0 = arith.constant 0 : i32
    %c0_i32_1 = arith.constant 0 : i32
    %c0_i32_2 = arith.constant 0 : i32
    return %c0_i32, %c0_i32_0, %c0_i32_1 : i32, i32, i32
  }
  func.func @transform_4(%arg0: i32) -> (i32, i32, i32) {
    %c0_i32 = arith.constant 0 : i32
    %c0_i32_0 = arith.constant 0 : i32
    %c0_i32_1 = arith.constant 0 : i32
    %c0_i32_2 = arith.constant 0 : i32
    return %c0_i32, %c0_i32_0, %c0_i32_1 : i32, i32, i32
  }
  func.func @transform_5(%arg0: i32) -> (i32, i32, i32) {
    %c0_i32 = arith.constant 0 : i32
    %c0_i32_0 = arith.constant 0 : i32
    %c0_i32_1 = arith.constant 0 : i32
    %c0_i32_2 = arith.constant 0 : i32
    return %c0_i32, %c0_i32_0, %c0_i32_1 : i32, i32, i32
  }
  func.func @transform_6(%arg0: i32) -> (i32, i32, i32) {
    %c0_i32 = arith.constant 0 : i32
    %c0_i32_0 = arith.constant 0 : i32
    %c0_i32_1 = arith.constant 0 : i32
    %c0_i32_2 = arith.constant 0 : i32
    return %c0_i32, %c0_i32_0, %c0_i32_1 : i32, i32, i32
  }
  func.func @transform_7(%arg0: i32) -> (i32, i32, i32) {
    %c0_i32 = arith.constant 0 : i32
    %c0_i32_0 = arith.constant 0 : i32
    %c0_i32_1 = arith.constant 0 : i32
    %c0_i32_2 = arith.constant 0 : i32
    return %c0_i32, %c0_i32_0, %c0_i32_1 : i32, i32, i32
  }
  func.func @transform_8(%arg0: i32) -> (i32, i32, i32) {
    %c0_i32 = arith.constant 0 : i32
    %c0_i32_0 = arith.constant 0 : i32
    %c0_i32_1 = arith.constant 0 : i32
    %c0_i32_2 = arith.constant 0 : i32
    return %c0_i32, %c0_i32_0, %c0_i32_1 : i32, i32, i32
  }
  func.func @transform_9(%arg0: i32) -> (i32, i32, i32) {
    %c0_i32 = arith.constant 0 : i32
    %c0_i32_0 = arith.constant 0 : i32
    %c0_i32_1 = arith.constant 0 : i32
    %c0_i32_2 = arith.constant 0 : i32
    return %c0_i32, %c0_i32_0, %c0_i32_1 : i32, i32, i32
  }
  func.func @transform_10(%arg0: i32) -> (i32, i32, i32) {
    %c0_i32 = arith.constant 0 : i32
    %c0_i32_0 = arith.constant 0 : i32
    %c0_i32_1 = arith.constant 0 : i32
    %c0_i32_2 = arith.constant 0 : i32
    return %c0_i32, %c0_i32_0, %c0_i32_1 : i32, i32, i32
  }
  func.func @transform_11(%arg0: i32) -> (i32, i32, i32) {
    %c0_i32 = arith.constant 0 : i32
    %c0_i32_0 = arith.constant 0 : i32
    %c0_i32_1 = arith.constant 0 : i32
    %c0_i32_2 = arith.constant 0 : i32
    return %c0_i32, %c0_i32_0, %c0_i32_1 : i32, i32, i32
  }
  func.func @transform_12(%arg0: i32) -> (i32, i32, i32) {
    %c0_i32 = arith.constant 0 : i32
    %c0_i32_0 = arith.constant 0 : i32
    %c0_i32_1 = arith.constant 0 : i32
    %c0_i32_2 = arith.constant 0 : i32
    return %c0_i32, %c0_i32_0, %c0_i32_1 : i32, i32, i32
  }
  func.func @transform_13(%arg0: i32) -> (i32, i32) {
    %c0_i32 = arith.constant 0 : i32
    %c0_i32_0 = arith.constant 0 : i32
    %c0_i32_1 = arith.constant 0 : i32
    return %c0_i32, %c0_i32_0 : i32, i32
  }
  func.func @transform_14(%arg0: i32) -> (i32, i32) {
    %c0_i32 = arith.constant 0 : i32
    %c0_i32_0 = arith.constant 0 : i32
    %c0_i32_1 = arith.constant 0 : i32
    return %c0_i32, %c0_i32_0 : i32, i32
  }
  func.func @transform_15(%arg0: i32) -> (i32, i32) {
    %c0_i32 = arith.constant 0 : i32
    %c0_i32_0 = arith.constant 0 : i32
    %c0_i32_1 = arith.constant 0 : i32
    return %c0_i32, %c0_i32_0 : i32, i32
  }
  func.func @transform_16(%arg0: i32) -> (i32, i32) {
    %c0_i32 = arith.constant 0 : i32
    %c0_i32_0 = arith.constant 0 : i32
    %c0_i32_1 = arith.constant 0 : i32
    return %c0_i32, %c0_i32_0 : i32, i32
  }
  func.func @transform_17(%arg0: i32) -> (i32, i32) {
    %c0_i32 = arith.constant 0 : i32
    %c0_i32_0 = arith.constant 0 : i32
    %c0_i32_1 = arith.constant 0 : i32
    return %c0_i32, %c0_i32_0 : i32, i32
  }
  func.func @transform_18(%arg0: i32) -> (i32, i32) {
    %c0_i32 = arith.constant 0 : i32
    %c0_i32_0 = arith.constant 0 : i32
    %c0_i32_1 = arith.constant 0 : i32
    return %c0_i32, %c0_i32_0 : i32, i32
  }
  func.func @transform_19(%arg0: i32) -> (i32, i32) {
    %c0_i32 = arith.constant 0 : i32
    %c0_i32_0 = arith.constant 0 : i32
    %c0_i32_1 = arith.constant 0 : i32
    return %c0_i32, %c0_i32_0 : i32, i32
  }
  func.func @transform_20(%arg0: i32) -> (i32, i32) {
    %c0_i32 = arith.constant 0 : i32
    %c0_i32_0 = arith.constant 0 : i32
    %c0_i32_1 = arith.constant 0 : i32
    return %c0_i32, %c0_i32_0 : i32, i32
  }
  func.func @transform_21(%arg0: i32) -> (i32, i32) {
    %c0_i32 = arith.constant 0 : i32
    %c0_i32_0 = arith.constant 0 : i32
    %c0_i32_1 = arith.constant 0 : i32
    return %c0_i32, %c0_i32_0 : i32, i32
  }
  func.func @transform_22(%arg0: i32) -> (i32, i32) {
    %c0_i32 = arith.constant 0 : i32
    %c0_i32_0 = arith.constant 0 : i32
    %c0_i32_1 = arith.constant 0 : i32
    return %c0_i32, %c0_i32_0 : i32, i32
  }
  func.func @transform_23(%arg0: i32) -> (i32, i32, i32) {
    %c0_i32 = arith.constant 0 : i32
    %c0_i32_0 = arith.constant 0 : i32
    %c0_i32_1 = arith.constant 0 : i32
    return %arg0, %c0_i32, %c0_i32_0 : i32, i32, i32
  }
}

</mosaic_0001>

<bundles_post_ra>
// kernel: gatnet_forward.1
= control target key start
LH: loop header
LB: loop body
LE: loop exit
PB: predicated region body
PF: predicated region fallthrough
CT: control target
= control target key end

     0   :  { %s10834_s0 = inlined_call_operand.vmem [shape: f32[2,2,16,128], index: 0, kind: input, shape index: {}]   ;;  %s10835_s1 = inlined_call_operand.vmem [shape: f32[2,2,16,16], index: 1, kind: input, shape index: {}]   ;;  %s10836_s2 = inlined_call_operand.vmem [shape: f32[2,1,1024], index: 2, kind: input, shape index: {}]   ;;  %s10837_s3 = inlined_call_operand.vmem [shape: f32[2,128,1280], index: 3, kind: input, shape index: {}]   ;;  %s10838_s4 = inlined_call_operand.vmem [shape: f32[2,10,128], index: 4, kind: input, shape index: {}]   ;;  %s10839_s5 = inlined_call_operand.vmem [shape: f32[2,10,128], index: 5, kind: input, shape index: {}]   ;;  %s10840_s6 = inlined_call_operand.vmem [shape: f32[2,1,1280], index: 6, kind: input, shape index: {}]   ;;  %s10841_s7 = inlined_call_operand.vmem [shape: f32[2,1280,128], index: 7, kind: input, shape index: {}]   ;;  %s10842_s8 = inlined_call_operand.vmem [shape: f32[2,1,128], index: 8, kind: input, shape index: {}]   ;;  %s10843_s9 = inlined_call_operand.vmem [shape: f32[2,1,128], index: 9, kind: input, shape index: {}]   ;;  %s10844_s10 = inlined_call_operand.vmem [shape: f32[2,1,128], index: 10, kind: input, shape index: {}]   ;;  %s10845_s11 = inlined_call_operand.vmem [shape: f32[2,128,128], index: 11, kind: input, shape index: {}]   ;;  %s10846_s12 = inlined_call_operand.vmem [shape: f32[2,1,128], index: 12, kind: input, shape index: {}]   ;;  %s10847_s13 = inlined_call_operand.vmem [shape: f32[1024,128], index: 13, kind: input, shape index: {}]   ;;  %s10848_s14 = inlined_call_operand.vmem [shape: f32[1,128], index: 14, kind: input, shape index: {}]   ;;  %s10849_s15 = inlined_call_operand.vmem [shape: f32[128,128], index: 15, kind: input, shape index: {}]   ;;  %s10850_s16 = inlined_call_operand.vmem [shape: f32[128,128], index: 16, kind: input, shape index: {}]   ;;  %s10851_s17 = inlined_call_operand.vmem [shape: f32[128,128], index: 17, kind: input, shape index: {}]   ;;  %s10852_s18 = inlined_call_operand.vmem [shape: f32[1,128], index: 18, kind: input, shape index: {}]   ;;  %s10853_s19 = inlined_call_operand.vmem [shape: f32[128,128], index: 19, kind: input, shape index: {}]   ;;  %s10854_s20 = inlined_call_operand.vmem [shape: f32[1,128], index: 20, kind: input, shape index: {}]   ;;  %s10855_s21 = inlined_call_operand.vmem [shape: f32[128,1], index: 21, kind: input, shape index: {}]   ;;  %s10856_s22 = inlined_call_operand.<no memory space> [shape: f32[1,1], index: 22, kind: input, shape index: {}]   ;;  %s10857_s23 = inlined_call_operand.vmem [shape: f32[2,1,1], index: 23, kind: output, shape index: {}]  }
   0x1   :  { %10866 = sst [smem:[#allocation8_spill]] %s10834_s0  ;;  %v28_v0 = vstv %s10856_s22 }
   0x2   :  { %10867 = sst [smem:[#allocation9_spill]] %s10835_s1  ;;  %29 = vst [vmem:[#allocation2] sm:$0x1] %v28_v0 }
   0x3   :  { %10868 = sst [smem:[#allocation10_spill]] %s10836_s2 }
   0x4   :  { %10869 = sst [smem:[#allocation11_spill]] %s10837_s3 }
   0x5   :  { %10870 = sst [smem:[#allocation12_spill]] %s10838_s4 }
   0x6   :  { %10871 = sst [smem:[#allocation13_spill]] %s10839_s5 }
   0x7   :  { %10872 = sst [smem:[#allocation14_spill]] %s10840_s6 }
   0x8   :  { %10873 = sst [smem:[#allocation15_spill]] %s10841_s7 }
   0x9   :  { %10874 = sst [smem:[#allocation16_spill]] %s10854_s20 }
   0xa   :  { %10875 = sst [smem:[#allocation17_spill]] %s10857_s23 }
   0xb   :  { %s6763_s24 = smov 0   ;;  %s6765_s25 = smov 0  }
   0xc   :  { %s6767_s5 = smov 0  }
   0xd LB: > { %10876 = sst [smem:[#allocation5_spill]] %s6634_s25  ;;  %s6780_s1 = sadd.s32 1, %s6638_s5   ;;  %s6638_s5 = sphi %s6767_s5, %s10893_s5   ;;  %s6634_s25 = sphi %s6765_s25, %s10895_s25   ;;  %s6630_s24 = sphi %s6763_s24, %s10894_s24  }
   0xe   : > { %10877 = sst [smem:[#allocation6_spill]] %s6780_s1  ;;  %s39_s26 = ssub.s32 %s6638_s5, %s6780_s1 }
   0xf   : > { %s42_s2 = sadd.s32 1, %s6634_s25  ;;  %p40_p0 = scmp.eq.s32.totalorder %s39_s26, 0 }
  0x10   : > { %p49_p1 = scmp.ne.s32.totalorder %s6634_s25, %s6630_s24  ;;  %p50_p2 = scmp.eq.s32.totalorder %s6638_s5, 0 }
  0x11   : > { %s6789_s6 = scalar_select %p40_p0, %s6634_s25, %s42_s2  }
  0x12   : > { %p6791_p3 = por %p50_p2, %p49_p1  ;;  %p5879_p4 = scmp.ge.s32.totalorder %s6638_s5, 2 }
  0x13   : > { %10878 = sst [smem:[#allocation7_spill]] %s6789_s6 }
  0x14   : > { %633 = sbr.rel (%p5879_p4) target bundleno = 53 (0x35), region = 96 }
  0x19   : > { %636 = sbr.rel (!%p6791_p3) target bundleno = 39 (0x27), region = 100  ;;  %s638_s7 = sand.u32 (%p6791_p3), 1, %s6634_s25  }
  0x1a   : > { %s6326_s28 = sshll.u32 (%p6791_p3), %s6638_s5, 4  ;;  %s5880_s29 = sshll.u32 (%p6791_p3), %s638_s7, 5 }
  0x1b   : > { %s10880_s4 = sld [smem:[#allocation8_spill]] (%p6791_p3)  ;;  %s640_s26 = scalar_lea.vmem (%p6791_p3), [#allocation3], %s5880_s29 }
  0x21   : > { %s643_s30 = scalar_lea.vmem %s10880_s4, %s6326_s28 }
  0x22   : > { %v678_v1 = vld [vmem:[%s643_s30] sm:$0xff]  ;;  %v680_v2 = vld [vmem:[%s643_s30 + $0x8] sm:$0xff] }
  0x23   : > { %v682_v3 = vld [vmem:[%s643_s30 + $0x20] sm:$0xff]  ;;  %679 = vst [vmem:[%s640_s26] sm:$0xff] %v678_v1  ;;  %v684_v4 = vld [vmem:[%s643_s30 + $0x28] sm:$0xff] }
  0x24   : > { %681 = vst [vmem:[%s640_s26 + $0x8] sm:$0xff] %v680_v2 }
  0x25   : > { %683 = vst [vmem:[%s640_s26 + $0x10] sm:$0xff] %v682_v3 }
  0x26   : > { %685 = vst [vmem:[%s640_s26 + $0x18] sm:$0xff] %v684_v4 }
  0x27 PF: > { %691 = sbr.rel (!%p6791_p3) target bundleno = 53 (0x35), region = 138  ;;  %s693_s2 = sand.u32 (%p6791_p3), 1, %s6634_s25  }
  0x28   : > { %s6327_s7 = sshll.u32 (%p6791_p3), %s6638_s5, 4  ;;  %s5883_s22 = sshll.u32 (%p6791_p3), %s693_s2, 5 }
  0x29   : > { %s10881_s0 = sld [smem:[#allocation9_spill]] (%p6791_p3)  ;;  %s695_s29 = scalar_lea.vmem (%p6791_p3), [#allocation4], %s5883_s22 }
  0x2f   : > { %s698_s4 = scalar_lea.vmem %s10881_s0, %s6327_s7 }
  0x30   : > { %v733_v5 = vld [vmem:[%s698_s4] sm:$0xff]  ;;  %v735_v6 = vld [vmem:[%s698_s4 + $0x8] sm:$0xff] }
  0x31   : > { %v737_v7 = vld [vmem:[%s698_s4 + $0x20] sm:$0xff]  ;;  %734 = vst [vmem:[%s695_s29] sm:$0xff] %v733_v5  ;;  %v739_v8 = vld [vmem:[%s698_s4 + $0x28] sm:$0xff] }
  0x32   : > { %736 = vst [vmem:[%s695_s29 + $0x8] sm:$0xff] %v735_v6 }
  0x33   : > { %738 = vst [vmem:[%s695_s29 + $0x10] sm:$0xff] %v737_v7 }
  0x34   : > { %740 = vst [vmem:[%s695_s29 + $0x18] sm:$0xff] %v739_v8 }
  0x35 PF: > { %p5886_p5 = scmp.ge.s32.totalorder %s6638_s5, 1  ;;  %p752_p6 = scmp.lt.s32.totalorder %s6638_s5, 3 }
  0x37   : > { %p753_p7 = pnand %p5886_p5, %p752_p6 }
  0x38   : > { %s10882_s26 = sld [smem:[#allocation11_spill]] (!%p753_p7)  ;;  %s759_s2 = sand.u32 (!%p753_p7), 1, %s6630_s24  }
  0x39   : > { %756 = sbr.rel (%p753_p7) target bundleno = 4781 (0x12ad), region = 180  ;;  %s6969_s3 = sshll.u32 (!%p753_p7), %s759_s2, 5 }
  0x3a   : > { %s7005_s4 = scalar_lea.vmem (!%p753_p7), [#allocation3], %s6969_s3  ;;  %s10883_s6 = sld [smem:[#allocation12_spill]] (!%p753_p7) }
  0x3b   : > { %s10884_s29 = sld [smem:[#allocation13_spill]] (!%p753_p7)  ;;  %s7450_s2 = scalar_lea.vmem (!%p753_p7), [#allocation4], %s6969_s3 }
  0x3c   : > { %s10885_s28 = sld [smem:[#allocation15_spill]] (!%p753_p7)  ;;  %s10887_s22 = sadd.s32 (!%p753_p7), 4294967295, %s6638_s5  }
  0x3d   : > { %s10886_s1 = sld [smem:[#allocation14_spill]] (!%p753_p7)  ;;  %p10125_p8 = scmp.lt.s32.totalorder (!%p753_p7), %s10887_s22, 1 }
  0x3e   : > { %v998_v9 = vld [vmem:[%s10882_s26 + $0x4b0] sm:$0xff]  ;;  %v999_v10 = vld [vmem:[%s10882_s26 + $0x4b8] sm:$0xff]  ;;  %v1001_v11 = vld [vmem:[%s10882_s26 + $0x4c8] sm:$0xff]  ;;  %vm1299_vm2 = vcmask 130048   ;;  %s10889_s30 = smov %s10887_s22  ;;  %s10890_s27 = sld [smem:[#allocation10_spill]] }
  0x3f   : > { %1008 = vmatpush.msra.mxu0 %v998_v9  ;;  %1031 = vmatpush.msra.mxu1 %v999_v10  ;;  %v988_v12 = vld [vmem:[%s10882_s26 + $0x460] sm:$0xff]  ;;  %v989_v13 = vld [vmem:[%s10882_s26 + $0x468] sm:$0xff]  ;;  %v991_v15 = vld [vmem:[%s10882_s26 + $0x478] sm:$0xff]  ;;  %s10897_s30 = smov (!%p10125_p8, %s10889_s30), 1  ;;  %s10891_s25 = sld [smem:[#allocation16_spill]] }
  0x40   : > { %v1000_v14 = vld [vmem:[%s10882_s26 + $0x4c0] sm:$0xff]  ;;  %1077 = vmatpush.msra.mxu3 %v1001_v11  ;;  %v978_v16 = vld [vmem:[%s10882_s26 + $0x410] sm:$0xff]  ;;  %v979_v17 = vld [vmem:[%s10882_s26 + $0x418] sm:$0xff]  ;;  %s5889_s20 = sshll.u32 %s10897_s30, 3 }
  0x41   : > { %1054 = vmatpush.msra.mxu2 %v1000_v14  ;;  %1009 = vmatpush.msra.mxu0 %v988_v12  ;;  %v990_v18 = vld [vmem:[%s10882_s26 + $0x470] sm:$0xff]  ;;  %v981_v19 = vld [vmem:[%s10882_s26 + $0x428] sm:$0xff]  ;;  %v968_v20 = vld [vmem:[%s10882_s26 + $0x3c0] sm:$0xff] }
  0x42   : > { %1032 = vmatpush.msra.mxu1 %v989_v13  ;;  %1078 = vmatpush.msra.mxu3 %v991_v15  ;;  %v969_v21 = vld [vmem:[%s10882_s26 + $0x3c8] sm:$0xff]  ;;  %v980_v22 = vld [vmem:[%s10882_s26 + $0x420] sm:$0xff]  ;;  %v971_v23 = vld [vmem:[%s10882_s26 + $0x3d8] sm:$0xff] }
  0x43   : > { %1055 = vmatpush.msra.mxu2 %v990_v18  ;;  %1010 = vmatpush.msra.mxu0 %v978_v16  ;;  %v970_v24 = vld [vmem:[%s10882_s26 + $0x3d0] sm:$0xff]  ;;  %v959_v26 = vld [vmem:[%s10882_s26 + $0x378] sm:$0xff]  ;;  %v961_v27 = vld [vmem:[%s10882_s26 + $0x388] sm:$0xff] }
  0x44   : > { %1033 = vmatpush.msra.mxu1 %v979_v17  ;;  %1079 = vmatpush.msra.mxu3 %v981_v19  ;;  %v958_v25 = vld [vmem:[%s10882_s26 + $0x370] sm:$0xff]  ;;  %v960_v28 = vld [vmem:[%s10882_s26 + $0x380] sm:$0xff]  ;;  %v949_v30 = vld [vmem:[%s10882_s26 + $0x328] sm:$0xff] }
  0x45   : > { %1056 = vmatpush.msra.mxu2 %v980_v22  ;;  %1011 = vmatpush.msra.mxu0 %v968_v20  ;;  %v948_v29 = vld [vmem:[%s10882_s26 + $0x320] sm:$0xff]  ;;  %v951_v31 = vld [vmem:[%s10882_s26 + $0x338] sm:$0xff]  ;;  %v950_v32 = vld [vmem:[%s10882_s26 + $0x330] sm:$0xff] }
  0x46   : > { %1034 = vmatpush.msra.mxu1 %v969_v21  ;;  %1080 = vmatpush.msra.mxu3 %v971_v23  ;;  %v938_v33 = vld [vmem:[%s10882_s26 + $0x2d0] sm:$0xff]  ;;  %v939_v34 = vld [vmem:[%s10882_s26 + $0x2d8] sm:$0xff]  ;;  %v941_v35 = vld [vmem:[%s10882_s26 + $0x2e8] sm:$0xff] }
  0x47   : > { %1057 = vmatpush.msra.mxu2 %v970_v24  ;;  %1012 = vmatpush.msra.mxu0 %v958_v25  ;;  %v940_v36 = vld [vmem:[%s10882_s26 + $0x2e0] sm:$0xff]  ;;  %v929_v38 = vld [vmem:[%s10882_s26 + $0x288] sm:$0xff]  ;;  %v931_v39 = vld [vmem:[%s10882_s26 + $0x298] sm:$0xff] }
  0x48   : > { %1035 = vmatpush.msra.mxu1 %v959_v26  ;;  %1081 = vmatpush.msra.mxu3 %v961_v27  ;;  %v928_v37 = vld [vmem:[%s10882_s26 + $0x280] sm:$0xff]  ;;  %v930_v40 = vld [vmem:[%s10882_s26 + $0x290] sm:$0xff]  ;;  %v919_v42 = vld [vmem:[%s10882_s26 + $0x238] sm:$0xff] }
  0x49   : > { %1058 = vmatpush.msra.mxu2 %v960_v28  ;;  %1013 = vmatpush.msra.mxu0 %v948_v29  ;;  %v918_v41 = vld [vmem:[%s10882_s26 + $0x230] sm:$0xff]  ;;  %v921_v43 = vld [vmem:[%s10882_s26 + $0x248] sm:$0xff]  ;;  %v920_v44 = vld [vmem:[%s10882_s26 + $0x240] sm:$0xff] }
  0x4a   : > { %1036 = vmatpush.msra.mxu1 %v949_v30  ;;  %1082 = vmatpush.msra.mxu3 %v951_v31  ;;  %v908_v45 = vld [vmem:[%s10882_s26 + $0x1e0] sm:$0xff]  ;;  %v909_v46 = vld [vmem:[%s10882_s26 + $0x1e8] sm:$0xff]  ;;  %v911_v47 = vld [vmem:[%s10882_s26 + $0x1f8] sm:$0xff] }
  0x4b   : > { %1059 = vmatpush.msra.mxu2 %v950_v32  ;;  %1014 = vmatpush.msra.mxu0 %v938_v33  ;;  %v910_v48 = vld [vmem:[%s10882_s26 + $0x1f0] sm:$0xff]  ;;  %v899_v50 = vld [vmem:[%s10882_s26 + $0x198] sm:$0xff]  ;;  %v901_v51 = vld [vmem:[%s10882_s26 + $0x1a8] sm:$0xff] }
  0x4c   : > { %1037 = vmatpush.msra.mxu1 %v939_v34  ;;  %1083 = vmatpush.msra.mxu3 %v941_v35  ;;  %v898_v49 = vld [vmem:[%s10882_s26 + $0x190] sm:$0xff]  ;;  %v900_v52 = vld [vmem:[%s10882_s26 + $0x1a0] sm:$0xff]  ;;  %v889_v54 = vld [vmem:[%s10882_s26 + $0x148] sm:$0xff] }
  0x4d   : > { %1060 = vmatpush.msra.mxu2 %v940_v36  ;;  %1015 = vmatpush.msra.mxu0 %v928_v37  ;;  %v888_v53 = vld [vmem:[%s10882_s26 + $0x140] sm:$0xff]  ;;  %v891_v55 = vld [vmem:[%s10882_s26 + $0x158] sm:$0xff]  ;;  %v890_v56 = vld [vmem:[%s10882_s26 + $0x150] sm:$0xff] }
  0x4e   : > { %1038 = vmatpush.msra.mxu1 %v929_v38  ;;  %1084 = vmatpush.msra.mxu3 %v931_v39  ;;  %v878_v57 = vld [vmem:[%s10882_s26 + $0xf0] sm:$0xff]  ;;  %v879_v58 = vld [vmem:[%s10882_s26 + $0xf8] sm:$0xff]  ;;  %v881_v59 = vld [vmem:[%s10882_s26 + $0x108] sm:$0xff] }
  0x4f   : > { %1061 = vmatpush.msra.mxu2 %v930_v40  ;;  %1016 = vmatpush.msra.mxu0 %v918_v41  ;;  %v880_v60 = vld [vmem:[%s10882_s26 + $0x100] sm:$0xff]  ;;  %v869_v62 = vld [vmem:[%s10882_s26 + $0xa8] sm:$0xff]  ;;  %v871_v63 = vld [vmem:[%s10882_s26 + $0xb8] sm:$0xff] }
  0x50   : > { %1039 = vmatpush.msra.mxu1 %v919_v42  ;;  %1085 = vmatpush.msra.mxu3 %v921_v43  ;;  %v868_v61 = vld [vmem:[%s10882_s26 + $0xa0] sm:$0xff]  ;;  %v870_v0 = vld [vmem:[%s10882_s26 + $0xb0] sm:$0xff]  ;;  %v859_v2 = vld [vmem:[%s10882_s26 + $0x58] sm:$0xff] }
  0x51   : > { %1062 = vmatpush.msra.mxu2 %v920_v44  ;;  %1017 = vmatpush.msra.mxu0 %v908_v45  ;;  %v858_v1 = vld [vmem:[%s10882_s26 + $0x50] sm:$0xff]  ;;  %v861_v3 = vld [vmem:[%s10882_s26 + $0x68] sm:$0xff]  ;;  %v860_v4 = vld [vmem:[%s10882_s26 + $0x60] sm:$0xff] }
  0x52   : > { %1040 = vmatpush.msra.mxu1 %v909_v46  ;;  %1086 = vmatpush.msra.mxu3 %v911_v47  ;;  %v848_v5 = vld [vmem:[%s10882_s26] sm:$0xff]  ;;  %v849_v6 = vld [vmem:[%s10882_s26 + $0x8] sm:$0xff]  ;;  %v851_v7 = vld [vmem:[%s10882_s26 + $0x18] sm:$0xff] }
  0x53   : > { %1063 = vmatpush.msra.mxu2 %v910_v48  ;;  %1018 = vmatpush.msra.mxu0 %v898_v49  ;;  %v7008_v8 = vld [vmem:[%s7005_s4] sm:$0xff]  ;;  %v850_v9 = vld [vmem:[%s10882_s26 + $0x10] sm:$0xff]  ;;  %v1003_v10 = vld [vmem:[%s10882_s26 + $0x4d8] sm:$0xff] }
  0x54   : > { %1041 = vmatpush.msra.mxu1 %v899_v50  ;;  %1087 = vmatpush.msra.mxu3 %v901_v51  ;;  %v1002_v11 = vld [vmem:[%s10882_s26 + $0x4d0] sm:$0xff]  ;;  %v993_v12 = vld [vmem:[%s10882_s26 + $0x488] sm:$0xff]  ;;  %v992_v14 = vld [vmem:[%s10882_s26 + $0x480] sm:$0xff] }
  0x55   : > { %1064 = vmatpush.msra.mxu2 %v900_v52  ;;  %1019 = vmatpush.msra.mxu0 %v888_v53  ;;  %v1005_v13 = vld [vmem:[%s10882_s26 + $0x4e8] sm:$0xff]  ;;  %v1004_v15 = vld [vmem:[%s10882_s26 + $0x4e0] sm:$0xff]  ;;  %v983_v16 = vld [vmem:[%s10882_s26 + $0x438] sm:$0xff] }
  0x56   : > { %1042 = vmatpush.msra.mxu1 %v889_v54  ;;  %1088 = vmatpush.msra.mxu3 %v891_v55  ;;  %v995_v17 = vld [vmem:[%s10882_s26 + $0x498] sm:$0xff]  ;;  %v982_v18 = vld [vmem:[%s10882_s26 + $0x430] sm:$0xff]  ;;  %v973_v20 = vld [vmem:[%s10882_s26 + $0x3e8] sm:$0xff] }
  0x57   : > { %1065 = vmatpush.msra.mxu2 %v890_v56  ;;  %1020 = vmatpush.msra.mxu0 %v878_v57  ;;  %v994_v19 = vld [vmem:[%s10882_s26 + $0x490] sm:$0xff]  ;;  %v963_v22 = vld [vmem:[%s10882_s26 + $0x398] sm:$0xff]  ;;  %v972_v23 = vld [vmem:[%s10882_s26 + $0x3e0] sm:$0xff] }
  0x58   : > { %1043 = vmatpush.msra.mxu1 %v879_v58  ;;  %1089 = vmatpush.msra.mxu3 %v881_v59  ;;  %v7051_v21 = vld [vmem:[%s7005_s4 + $0x8] sm:$0xff]  ;;  %v975_v27 = vld [vmem:[%s10882_s26 + $0x3f8] sm:$0xff]  ;;  %v984_v28 = vld [vmem:[%s10882_s26 + $0x440] sm:$0xff] }
  0x59   : > { %1066 = vmatpush.msra.mxu2 %v880_v60  ;;  %1021 = vmatpush.msra.mxu0 %v868_v61  ;;  %v985_v24 = vld [vmem:[%s10882_s26 + $0x448] sm:$0xff]  ;;  %v962_v26 = vld [vmem:[%s10882_s26 + $0x390] sm:$0xff]  ;;  %v943_v29 = vld [vmem:[%s10882_s26 + $0x2f8] sm:$0xff] }
  0x5a   : > { %1044 = vmatpush.msra.mxu1 %v869_v62  ;;  %1090 = vmatpush.msra.mxu3 %v871_v63  ;;  %v953_v25 = vld [vmem:[%s10882_s26 + $0x348] sm:$0xff]  ;;  %v952_v30 = vld [vmem:[%s10882_s26 + $0x340] sm:$0xff]  ;;  %v974_v32 = vld [vmem:[%s10882_s26 + $0x3f0] sm:$0xff] }
  0x5b   : > { %1067 = vmatpush.msra.mxu2 %v870_v0  ;;  %1022 = vmatpush.msra.mxu0 %v858_v1  ;;  %v965_v31 = vld [vmem:[%s10882_s26 + $0x3a8] sm:$0xff]  ;;  %v923_v34 = vld [vmem:[%s10882_s26 + $0x258] sm:$0xff]  ;;  %v942_v35 = vld [vmem:[%s10882_s26 + $0x2f0] sm:$0xff] }
  0x5c   : > { %1045 = vmatpush.msra.mxu1 %v859_v2  ;;  %1091 = vmatpush.msra.mxu3 %v861_v3  ;;  %v933_v33 = vld [vmem:[%s10882_s26 + $0x2a8] sm:$0xff]  ;;  %v932_v36 = vld [vmem:[%s10882_s26 + $0x2a0] sm:$0xff]  ;;  %v955_v37 = vld [vmem:[%s10882_s26 + $0x358] sm:$0xff] }
  0x5d   : > { %1068 = vmatpush.msra.mxu2 %v860_v4  ;;  %1023 = vmatpush.msra.mxu0 %v848_v5  ;;  %v964_v38 = vld [vmem:[%s10882_s26 + $0x3a0] sm:$0xff]  ;;  %v913_v39 = vld [vmem:[%s10882_s26 + $0x208] sm:$0xff]  ;;  %v922_v40 = vld [vmem:[%s10882_s26 + $0x250] sm:$0xff] }
  0x5e   : > { %1046 = vmatpush.msra.mxu1 %v849_v6  ;;  %1092 = vmatpush.msra.mxu3 %v851_v7  ;;  %v945_v41 = vld [vmem:[%s10882_s26 + $0x308] sm:$0xff]  ;;  %v954_v42 = vld [vmem:[%s10882_s26 + $0x350] sm:$0xff]  ;;  %v935_v43 = vld [vmem:[%s10882_s26 + $0x2b8] sm:$0xff] }
  0x5f   : > { %1024 = vmatmul.f32.vlgmr.msra.gmra.mxu0 %v7008_v8  ;;  %1047 = vmatmul.f32.vlgmr.msra.gmra.mxu1 %v7008_v8  ;;  %v944_v44 = vld [vmem:[%s10882_s26 + $0x300] sm:$0xff]  ;;  %v903_v45 = vld [vmem:[%s10882_s26 + $0x1b8] sm:$0xff]  ;;  %v925_v47 = vld [vmem:[%s10882_s26 + $0x268] sm:$0xff] }
  0x60   : > { %1093 = vmatmul.f32.vlgmr.msra.gmra.mxu3 %v7008_v8  ;;  %1069 = vmatpush.msra.mxu2 %v850_v9  ;;  %v912_v46 = vld [vmem:[%s10882_s26 + $0x200] sm:$0xff]  ;;  %v934_v48 = vld [vmem:[%s10882_s26 + $0x2b0] sm:$0xff]  ;;  %v893_v49 = vld [vmem:[%s10882_s26 + $0x168] sm:$0xff] }
  0x61   : > { %1123 = vmatpush.msrb.mxu1 %v1003_v10  ;;  %1070 = vmatmul.f32.vlgmr.msra.gmra.mxu2 %v7008_v8  ;;  %v902_v50 = vld [vmem:[%s10882_s26 + $0x1b0] sm:$0xff]  ;;  %v915_v51 = vld [vmem:[%s10882_s26 + $0x218] sm:$0xff]  ;;  %v924_v52 = vld [vmem:[%s10882_s26 + $0x260] sm:$0xff] }
  0x62   : > { %1100 = vmatpush.msrb.mxu0 %v1002_v11  ;;  %1169 = vmatpush.msrb.mxu3 %v1005_v13  ;;  %v883_v53 = vld [vmem:[%s10882_s26 + $0x118] sm:$0xff]  ;;  %v892_v54 = vld [vmem:[%s10882_s26 + $0x160] sm:$0xff]  ;;  %v905_v55 = vld [vmem:[%s10882_s26 + $0x1c8] sm:$0xff] }
  0x63   : > { %1124 = vmatpush.msrb.mxu1 %v993_v12  ;;  %1146 = vmatpush.msrb.mxu2 %v1004_v15  ;;  %v914_v56 = vld [vmem:[%s10882_s26 + $0x210] sm:$0xff]  ;;  %v873_v57 = vld [vmem:[%s10882_s26 + $0xc8] sm:$0xff]  ;;  %v895_v59 = vld [vmem:[%s10882_s26 + $0x178] sm:$0xff] }
  0x64   : > { %1101 = vmatpush.msrb.mxu0 %v992_v14  ;;  %1170 = vmatpush.msrb.mxu3 %v995_v17  ;;  %v882_v58 = vld [vmem:[%s10882_s26 + $0x110] sm:$0xff]  ;;  %v904_v60 = vld [vmem:[%s10882_s26 + $0x1c0] sm:$0xff]  ;;  %v863_v61 = vld [vmem:[%s10882_s26 + $0x78] sm:$0xff] }
  0x65   : > { %1125 = vmatpush.msrb.mxu1 %v983_v16  ;;  %1147 = vmatpush.msrb.mxu2 %v994_v19  ;;  %v872_v62 = vld [vmem:[%s10882_s26 + $0xc0] sm:$0xff]  ;;  %v885_v63 = vld [vmem:[%s10882_s26 + $0x128] sm:$0xff]  ;;  %v894_v0 = vld [vmem:[%s10882_s26 + $0x170] sm:$0xff] }
  0x66   : > { %1102 = vmatpush.msrb.mxu0 %v982_v18  ;;  %1171 = vmatpush.msrb.mxu3 %v985_v24  ;;  %v853_v1 = vld [vmem:[%s10882_s26 + $0x28] sm:$0xff]  ;;  %v862_v2 = vld [vmem:[%s10882_s26 + $0x70] sm:$0xff]  ;;  %v875_v3 = vld [vmem:[%s10882_s26 + $0xd8] sm:$0xff] }
  0x67   : > { %1126 = vmatpush.msrb.mxu1 %v973_v20  ;;  %1027 = vmatmul.f32.gmra.mxu0 %v7051_v21  ;;  %v852_v4 = vld [vmem:[%s10882_s26 + $0x20] sm:$0xff]  ;;  %v1007_v5 = vld [vmem:[%s10882_s26 + $0x4f8] sm:$0xff]  ;;  %v865_v6 = vld [vmem:[%s10882_s26 + $0x88] sm:$0xff] }
  0x68   : > { %1096 = vmatmul.f32.gmra.mxu3 %v7051_v21  ;;  %1050 = vmatmul.f32.gmra.mxu1 %v7051_v21  ;;  %v1006_v7 = vld [vmem:[%s10882_s26 + $0x4f0] sm:$0xff]  ;;  %v884_v9 = vld [vmem:[%s10882_s26 + $0x120] sm:$0xff]  ;;  %v855_v10 = vld [vmem:[%s10882_s26 + $0x38] sm:$0xff] }
  0x69   : > { %1127 = vmatpush.msrb.mxu1 %v963_v22  ;;  %1103 = vmatpush.msrb.mxu0 %v972_v23  ;;  %v997_v11 = vld [vmem:[%s10882_s26 + $0x4a8] sm:$0xff]  ;;  %v996_v12 = vld [vmem:[%s10882_s26 + $0x4a0] sm:$0xff]  ;;  %v874_v13 = vld [vmem:[%s10882_s26 + $0xd0] sm:$0xff] }
  0x6a   : > { %1073 = vmatmul.f32.gmra.mxu2 %v7051_v21  ;;  %1172 = vmatpush.msrb.mxu3 %v975_v27  ;;  %v987_v14 = vld [vmem:[%s10882_s26 + $0x458] sm:$0xff]  ;;  %v986_v15 = vld [vmem:[%s10882_s26 + $0x450] sm:$0xff]  ;;  %v864_v16 = vld [vmem:[%s10882_s26 + $0x80] sm:$0xff] }
  0x6b   : > { %1128 = vmatpush.msrb.mxu1 %v953_v25  ;;  %1104 = vmatpush.msrb.mxu0 %v962_v26  ;;  %v977_v17 = vld [vmem:[%s10882_s26 + $0x408] sm:$0xff]  ;;  %v976_v18 = vld [vmem:[%s10882_s26 + $0x400] sm:$0xff]  ;;  %v854_v19 = vld [vmem:[%s10882_s26 + $0x30] sm:$0xff] }
  0x6c   : > { %1148 = vmatpush.msrb.mxu2 %v984_v28  ;;  %1173 = vmatpush.msrb.mxu3 %v965_v31  ;;  %v966_v20 = vld [vmem:[%s10882_s26 + $0x3b0] sm:$0xff]  ;;  %v967_v22 = vld [vmem:[%s10882_s26 + $0x3b8] sm:$0xff]  ;;  %v956_v23 = vld [vmem:[%s10882_s26 + $0x360] sm:$0xff] }
  0x6d   : > { %1129 = vmatpush.msrb.mxu1 %v943_v29  ;;  %1105 = vmatpush.msrb.mxu0 %v952_v30  ;;  %v957_v24 = vld [vmem:[%s10882_s26 + $0x368] sm:$0xff]  ;;  %v946_v25 = vld [vmem:[%s10882_s26 + $0x310] sm:$0xff]  ;;  %v947_v26 = vld [vmem:[%s10882_s26 + $0x318] sm:$0xff] }
  0x6e   : > { %1149 = vmatpush.msrb.mxu2 %v974_v32  ;;  %1174 = vmatpush.msrb.mxu3 %v955_v37  ;;  %v936_v27 = vld [vmem:[%s10882_s26 + $0x2c0] sm:$0xff]  ;;  %v937_v28 = vld [vmem:[%s10882_s26 + $0x2c8] sm:$0xff]  ;;  %v926_v29 = vld [vmem:[%s10882_s26 + $0x270] sm:$0xff] }
  0x6f   : > { %1130 = vmatpush.msrb.mxu1 %v933_v33  ;;  %1106 = vmatpush.msrb.mxu0 %v942_v35  ;;  %v927_v30 = vld [vmem:[%s10882_s26 + $0x278] sm:$0xff]  ;;  %v916_v31 = vld [vmem:[%s10882_s26 + $0x220] sm:$0xff]  ;;  %v917_v32 = vld [vmem:[%s10882_s26 + $0x228] sm:$0xff] }
  0x70   : > { %1150 = vmatpush.msrb.mxu2 %v964_v38  ;;  %1175 = vmatpush.msrb.mxu3 %v945_v41  ;;  %v906_v33 = vld [vmem:[%s10882_s26 + $0x1d0] sm:$0xff]  ;;  %v896_v35 = vld [vmem:[%s10882_s26 + $0x180] sm:$0xff]  ;;  %v887_v38 = vld [vmem:[%s10882_s26 + $0x138] sm:$0xff] }
  0x71   : > { %1131 = vmatpush.msrb.mxu1 %v923_v34  ;;  %1107 = vmatpush.msrb.mxu0 %v932_v36  ;;  %v907_v34 = vld [vmem:[%s10882_s26 + $0x1d8] sm:$0xff]  ;;  %v897_v36 = vld [vmem:[%s10882_s26 + $0x188] sm:$0xff]  ;;  %v886_v37 = vld [vmem:[%s10882_s26 + $0x130] sm:$0xff] }
  0x72   : > { %1151 = vmatpush.msrb.mxu2 %v954_v42  ;;  %1176 = vmatpush.msrb.mxu3 %v935_v43  ;;  %v866_v41 = vld [vmem:[%s10882_s26 + $0x90] sm:$0xff]  ;;  %v867_v42 = vld [vmem:[%s10882_s26 + $0x98] sm:$0xff]  ;;  %v856_v43 = vld [vmem:[%s10882_s26 + $0x40] sm:$0xff] }
  0x73   : > { %1132 = vmatpush.msrb.mxu1 %v913_v39  ;;  %1108 = vmatpush.msrb.mxu0 %v922_v40  ;;  %v876_v39 = vld [vmem:[%s10882_s26 + $0xe0] sm:$0xff]  ;;  %v877_v40 = vld [vmem:[%s10882_s26 + $0xe8] sm:$0xff] }
  0x74   : > { %1152 = vmatpush.msrb.mxu2 %v944_v44  ;;  %1177 = vmatpush.msrb.mxu3 %v925_v47  ;;  %v857_v44 = vld [vmem:[%s10882_s26 + $0x48] sm:$0xff] }
  0x75   : > { %1133 = vmatpush.msrb.mxu1 %v903_v45  ;;  %1109 = vmatpush.msrb.mxu0 %v912_v46  ;;  %v7327_v45 = vld [vmem:[%s10883_s6] sm:$0xff] }
  0x76   : > { %1153 = vmatpush.msrb.mxu2 %v934_v48  ;;  %1178 = vmatpush.msrb.mxu3 %v915_v51  ;;  %v1242_v46 = vperm.slane %v7327_v45, 0  ;;  %v1353_v47 = vperm.slane %v7327_v45, 1 }
  0x77   : > { %1134 = vmatpush.msrb.mxu1 %v893_v49  ;;  %1110 = vmatpush.msrb.mxu0 %v902_v50 }
  0x78   : > { %1154 = vmatpush.msrb.mxu2 %v924_v52  ;;  %1179 = vmatpush.msrb.mxu3 %v905_v55 }
  0x79   : > { %1135 = vmatpush.msrb.mxu1 %v883_v53  ;;  %1111 = vmatpush.msrb.mxu0 %v892_v54  ;;  %v1463_v53 = vperm.slane %v7327_v45, 2 }
  0x7a   : > { %1155 = vmatpush.msrb.mxu2 %v914_v56  ;;  %1180 = vmatpush.msrb.mxu3 %v895_v59 }
  0x7b   : > { %1136 = vmatpush.msrb.mxu1 %v873_v57  ;;  %1112 = vmatpush.msrb.mxu0 %v882_v58 }
  0x7c   : > { %1156 = vmatpush.msrb.mxu2 %v904_v60  ;;  %1181 = vmatpush.msrb.mxu3 %v885_v63 }
  0x7d   : > { %1137 = vmatpush.msrb.mxu1 %v863_v61  ;;  %1113 = vmatpush.msrb.mxu0 %v872_v62  ;;  %v1573_v61 = vperm.slane %v7327_v45, 3 }
  0x7e   : > { %1157 = vmatpush.msrb.mxu2 %v894_v0  ;;  %1182 = vmatpush.msrb.mxu3 %v875_v3 }
  0x7f   : > { %1138 = vmatpush.msrb.mxu1 %v853_v1  ;;  %1114 = vmatpush.msrb.mxu0 %v862_v2 }
  0x80   : > { %1139 = vmatmul.f32.vlgmr.msrb.gmra.mxu1 %v7008_v8  ;;  %1183 = vmatpush.msrb.mxu3 %v865_v6 }
  0x81   : > { %1115 = vmatpush.msrb.mxu0 %v852_v4  ;;  %1215 = vmatpush.msra.mxu1 %v1007_v5 }
  0x82   : > { %1116 = vmatmul.f32.vlgmr.msrb.gmra.mxu0 %v7008_v8  ;;  %1158 = vmatpush.msrb.mxu2 %v884_v9  ;;  %v1793_v9 = vperm.slane %v7327_v45, 5 }
  0x83   : > { %1192 = vmatpush.msra.mxu0 %v1006_v7  ;;  %1184 = vmatpush.msrb.mxu3 %v855_v10 }
  0x84   : > { %1216 = vmatpush.msra.mxu1 %v997_v11  ;;  %1185 = vmatmul.f32.vlgmr.msrb.gmra.mxu3 %v7008_v8 }
  0x85   : > { %1193 = vmatpush.msra.mxu0 %v996_v12  ;;  %1159 = vmatpush.msrb.mxu2 %v874_v13 }
  0x86   : > { %1217 = vmatpush.msra.mxu1 %v987_v14 }
  0x87   : > { %1194 = vmatpush.msra.mxu0 %v986_v15  ;;  %1160 = vmatpush.msrb.mxu2 %v864_v16 }
  0x88   : > { %1218 = vmatpush.msra.mxu1 %v977_v17 }
  0x89   : > { %1195 = vmatpush.msra.mxu0 %v976_v18  ;;  %1142 = vmatmul.f32.gmra.mxu1 %v7051_v21 }
  0x8a   : > { %1119 = vmatmul.f32.gmra.mxu0 %v7051_v21  ;;  %1161 = vmatpush.msrb.mxu2 %v854_v19  ;;  %v1683_v19 = vperm.slane %v7327_v45, 4 }
  0x8b   : > { %1196 = vmatpush.msra.mxu0 %v966_v20  ;;  %1219 = vmatpush.msra.mxu1 %v967_v22  ;;  %v2013_v20 = vperm.slane %v7327_v45, 7 }
  0x8c   : > { %1162 = vmatmul.f32.vlgmr.msrb.gmra.mxu2 %v7008_v8  ;;  %1188 = vmatmul.f32.gmra.mxu3 %v7051_v21 }
  0x8d   : > { %1197 = vmatpush.msra.mxu0 %v956_v23  ;;  %1220 = vmatpush.msra.mxu1 %v957_v24 }
  0x8f   : > { %1198 = vmatpush.msra.mxu0 %v946_v25  ;;  %1221 = vmatpush.msra.mxu1 %v947_v26 }
  0x91   : > { %1199 = vmatpush.msra.mxu0 %v936_v27  ;;  %1222 = vmatpush.msra.mxu1 %v937_v28 }
  0x93   : > { %1200 = vmatpush.msra.mxu0 %v926_v29  ;;  %1223 = vmatpush.msra.mxu1 %v927_v30  ;;  %v1903_v30 = vperm.slane %v7327_v45, 6 }
  0x94   : > { %1165 = vmatmul.f32.gmra.mxu2 %v7051_v21 }
  0x95   : > { %1201 = vmatpush.msra.mxu0 %v916_v31  ;;  %1224 = vmatpush.msra.mxu1 %v917_v32 }
  0x97   : > { %1202 = vmatpush.msra.mxu0 %v906_v33  ;;  %1225 = vmatpush.msra.mxu1 %v907_v34  ;;  %v7382_v33 = vld [vmem:[%s10883_s6 + $0x8] sm:$0x3] }
  0x99   : > { %1203 = vmatpush.msra.mxu0 %v896_v35  ;;  %1226 = vmatpush.msra.mxu1 %v897_v36  ;;  %v2123_v35 = vperm.slane %v7382_v33, 0 }
  0x9b   : > { %1204 = vmatpush.msra.mxu0 %v886_v37  ;;  %1227 = vmatpush.msra.mxu1 %v887_v38 }
  0x9d   : > { %1205 = vmatpush.msra.mxu0 %v876_v39  ;;  %1228 = vmatpush.msra.mxu1 %v877_v40  ;;  %v2233_v40 = vperm.slane %v7382_v33, 1 }
  0x9f   : > { %1206 = vmatpush.msra.mxu0 %v866_v41  ;;  %1229 = vmatpush.msra.mxu1 %v867_v42 }
  0xa1   : > { %1207 = vmatpush.msra.mxu0 %v856_v43  ;;  %1230 = vmatpush.msra.mxu1 %v857_v44 }
  0xa2   : > { %1208 = vmatmul.f32.vlgmr.msra.gmra.mxu0 %v7008_v8  ;;  %1231 = vmatmul.f32.vlgmr.msra.gmra.mxu1 %v7008_v8  ;;  %v7334_v8 = vld [vmem:[%s10884_s29] sm:$0xff] }
  0xa3   : > { %v1249_v52 = vperm.slane %v7334_v8, 0  ;;  %v1470_v3 = vperm.slane %v7334_v8, 2  ;;  %v1580_v4 = vperm.slane %v7334_v8, 3  ;;  %v1800_v15 = vperm.slane %v7334_v8, 5 }
  0xa4   : > { %v1690_v26 = vperm.slane %v7334_v8, 4  ;;  %v2020_v33 = vperm.slane %v7334_v8, 7 }
  0xaa   : > { %1211 = vmatmul.f32.gmra.mxu0 %v7051_v21  ;;  %1234 = vmatmul.f32.gmra.mxu1 %v7051_v21  ;;  %v1360_v21 = vperm.slane %v7334_v8, 1 }
  0xdc   : > { %v1025_v48 = vpop.f32.mrf.mxu0  ;;  %v1048_v49 = vpop.f32.mrf.mxu1 }
  0xdd   : > { %v1243_v50 = vmul.f32 %v1242_v46, %v1025_v48  ;;  %v1354_v51 = vmul.f32 %v1353_v47, %v1048_v49  ;;  %v1361_v56 = vmul.f32 %v1360_v21, %v1048_v49  ;;  %v1250_v59 = vmul.f32 %v1249_v52, %v1025_v48 }
  0xdf   : > { %1245 = vadd.xlane.f32.xlu1 %v1243_v50  ;;  %1356 = vadd.xlane.f32.xlu0 %v1354_v51 }
  0xe3   : > { %v7339_v54 = vpop.f32.mrf.mxu3 }
  0xe4   : > { %v1028_v55 = vpop.f32.mrf.mxu0  ;;  %v1071_v57 = vpop.f32.mrf.mxu2  ;;  %v1574_v63 = vmul.f32 %v1573_v61, %v7339_v54 }
  0xe5   : > { %1344 = vmatpush.msra.mxu2 %v1028_v55  ;;  %v1051_v58 = vpop.f32.mrf.mxu1  ;;  %v1464_v60 = vmul.f32 %v1463_v53, %v1071_v57  ;;  %v1244_v1 = vmul.f32 %v1242_v46, %v1028_v55  ;;  %v1471_v5 = vmul.f32 %v1470_v3, %v1071_v57  ;;  %v1251_v16 = vmul.f32 %v1249_v52, %v1028_v55  ;;  %v7420_v55 = vld [vmem:[%s10884_s29 + $0x8] sm:$0x3] }
  0xe6   : > { %1454 = vmatpush.msra.mxu3 %v1051_v58  ;;  %v1355_v0 = vmul.f32 %v1353_v47, %v1051_v58  ;;  %v1362_v10 = vmul.f32 %v1360_v21, %v1051_v58  ;;  %v1910_v46 = vperm.slane %v7334_v8, 6  ;;  %v2240_v58 = vperm.slane %v7420_v55, 1 }
  0xe7   : > { %1252 = vadd.xlane.f32.xlu1 %v1250_v59  ;;  %1345 = vmatpush.msra.mxu2 %v1025_v48 }
  0xe8   : > { %1466 = vadd.xlane.f32.xlu2 %v1464_v60  ;;  %1363 = vadd.xlane.f32.xlu0 %v1361_v56 }
  0xe9   : > { %1455 = vmatpush.msra.mxu3 %v1048_v49 }
  0xeb   : > { %v1097_v62 = vpop.f32.mrf.mxu3 }
  0xec   : > { %1674 = vmatpush.msrb.mxu3 %v1097_v62  ;;  %v1582_v6 = vmul.f32 %v1580_v4, %v1097_v62  ;;  %v1575_v7 = vmul.f32 %v1573_v61, %v1097_v62 }
  0xed   : > { %v7343_v2 = vpop.f32.mrf.mxu2 }
  0xee   : > { %1675 = vmatpush.msrb.mxu3 %v7339_v54  ;;  %1564 = vmatpush.msrb.mxu2 %v7343_v2  ;;  %v1465_v11 = vmul.f32 %v1463_v53, %v7343_v2  ;;  %v1472_v45 = vmul.f32 %v1470_v3, %v7343_v2 }
  0xef   : > { %1576 = vadd.xlane.f32.xlu1 %v1574_v63 }
  0xf0   : > { %1358 = vadd.xlane.f32.xlu0 %v1355_v0  ;;  %1247 = vadd.xlane.f32.xlu2 %v1244_v1 }
  0xf1   : > { %1565 = vmatpush.msrb.mxu2 %v1071_v57 }
  0xf7   : > { %1473 = vadd.xlane.f32.xlu1 %v1471_v5 }
  0xf8   : > { %1585 = vadd.xlane.f32.xlu0 %v1582_v6  ;;  %1578 = vadd.xlane.f32.xlu2 %v1575_v7 }
  0xfd   : > { %v7355_v12 = vpop.f32.mrf.mxu1 }
  0xfe   : > { %v1794_v13 = vmul.f32 %v1793_v9, %v7355_v12  ;;  %v1801_v17 = vmul.f32 %v1800_v15, %v7355_v12 }
  0xff   : > { %1365 = vadd.xlane.f32.xlu1 %v1362_v10  ;;  %v1117_v14 = vpop.f32.mrf.mxu0 }
 0x100   : > { %1796 = vadd.xlane.f32.xlu0 %v1794_v13  ;;  %1468 = vadd.xlane.f32.xlu2 %v1465_v11  ;;  %v1684_v23 = vmul.f32 %v1683_v19, %v1117_v14  ;;  %v1691_v28 = vmul.f32 %v1690_v26, %v1117_v14 }
 0x106   : > { %v7368_v25 = vpop.f32.mrf.mxu1 }
 0x107   : > { %1254 = vadd.xlane.f32.xlu1 %v1251_v16  ;;  %v7360_v18 = vpop.f32.mrf.mxu0  ;;  %v7365_v22 = vpop.f32.mrf.mxu3  ;;  %v1795_v27 = vmul.f32 %v1793_v9, %v7368_v25  ;;  %v1802_v44 = vmul.f32 %v1800_v15, %v7368_v25 }
 0x108   : > { %1803 = vadd.xlane.f32.xlu0 %v1801_v17  ;;  %1784 = vmatpush.msrb.mxu0 %v7360_v18  ;;  %v2014_v24 = vmul.f32 %v2013_v20, %v7365_v22  ;;  %v1685_v32 = vmul.f32 %v1683_v19, %v7360_v18 }
 0x10a   : > { %1785 = vmatpush.msrb.mxu0 %v1117_v14 }
 0x10f   : > { %1686 = vadd.xlane.f32.xlu1 %v1684_v23  ;;  %v7374_v29 = vpop.f32.mrf.mxu2  ;;  %v7393_v39 = vpop.f32.mrf.mxu3 }
 0x110   : > { %2016 = vadd.xlane.f32.xlu0 %v2014_v24  ;;  %v1904_v31 = vmul.f32 %v1903_v30, %v7374_v29  ;;  %v2015_v42 = vmul.f32 %v2013_v20, %v7393_v39  ;;  %v7453_v24 = vld [vmem:[%s7450_s2 + $0x8] sm:$0xff] }
 0x111   : > { %vm847_vm0 = vcmp.gt.f32.partialorder %v7453_v24, 0.0  ;;  %v5962_v24 = vld [vmem:[%s10882_s26 + $0x5d0] sm:$0xff] }
 0x117   : > { %1693 = vadd.xlane.f32.xlu1 %v1691_v28  ;;  %v7384_v34 = vpop.f32.mrf.mxu2 }
 0x118   : > { %1798 = vadd.xlane.f32.xlu0 %v1795_v27  ;;  %v1905_v37 = vmul.f32 %v1903_v30, %v7384_v34  ;;  %v1912_v47 = vmul.f32 %v1910_v46, %v7384_v34 }
 0x11f   : > { %1906 = vadd.xlane.f32.xlu1 %v1904_v31  ;;  %v7387_v36 = vpop.f32.mrf.mxu0  ;;  %v1232_v41 = vpop.f32.mrf.mxu1 }
 0x120   : > { %1688 = vadd.xlane.f32.xlu0 %v1685_v32  ;;  %v2124_v38 = vmul.f32 %v2123_v35, %v7387_v36  ;;  %v2234_v43 = vmul.f32 %v2233_v40, %v1232_v41  ;;  %v2241_v60 = vmul.f32 %v2240_v58, %v1232_v41 }
 0x127   : > { %1908 = vadd.xlane.f32.xlu1 %v1905_v37  ;;  %v7411_v52 = vpop.f32.mrf.mxu0  ;;  %v7423_v59 = vpop.f32.mrf.mxu1 }
 0x128   : > { %2126 = vadd.xlane.f32.xlu0 %v2124_v38  ;;  %2224 = vmatpush.msra.mxu0 %v7411_v52  ;;  %v2125_v19 = vmul.f32 %v2123_v35, %v7411_v52  ;;  %v2242_v8 = vmul.f32 %v2240_v58, %v7423_v59 }
 0x129   : > { %2334 = vmatpush.msrb.mxu1 %v7423_v59 }
 0x12a   : > { %2225 = vmatpush.msra.mxu0 %v7387_v36 }
 0x12b   : > { %2335 = vmatpush.msrb.mxu1 %v1232_v41 }
 0x12f   : > { %2018 = vadd.xlane.f32.xlu1 %v2015_v42  ;;  %v7466_v42 = vld [vmem:[%s7450_s2] sm:$0xff] }
 0x130   : > { %2236 = vadd.xlane.f32.xlu0 %v2234_v43  ;;  %vm846_vm4 = vcmp.gt.f32.partialorder %v7466_v42, 0.0  ;;  %v5961_v42 = vld [vmem:[%s10882_s26 + $0x5c8] sm:$0xff] }
 0x137   : > { %1805 = vadd.xlane.f32.xlu1 %v1802_v44 }
 0x138   : > { %1475 = vadd.xlane.f32.xlu0 %v1472_v45 }
 0x13f   : > { %1915 = vadd.xlane.f32.xlu1 %v1912_v47 }
 0x147   : > { %2243 = vadd.xlane.f32.xlu1 %v2241_v60 }
 0x14f   : > { %2128 = vadd.xlane.f32.xlu1 %v2125_v19 }
 0x152   : > { %v1246_v48 = vpop.xlane.xlu1 %1245  ;;  %v1357_v49 = vpop.xlane.xlu0 %1356 }
 0x153   : > { %1367 = vxpose.xlu2.b32.start [1/2] (short) (narrow) %v1357_v49, 8  ;;  %v2235_v49 = vmul.f32 %v2233_v40, %v7423_v59 }
 0x15a   : > { %v7407_v50 = vpop.xlane.xlu1 %1252 }
 0x15b   : > { %v1467_v51 = vpop.xlane.xlu2 %1466  ;;  %v7409_v21 = vpop.xlane.xlu0 %1363 }
 0x161   : > { %1256 = vxpose.xlu0.b32.start [1/2] (short) (narrow) %v1246_v48, 8  ;;  %v1581_v48 = vmul.f32 %v1580_v4, %v7339_v54  ;;  %v1911_v4 = vmul.f32 %v1910_v46, %v7374_v29 }
 0x162   : > { %v7415_v53 = vpop.xlane.xlu1 %1576 }
 0x163   : > { %v1359_v56 = vpop.xlane.xlu0 %1358  ;;  %v1248_v57 = vpop.xlane.xlu2 %1247 }
 0x164   : > { %1368 = vxpose.xlu2.b32.end [2/2] (short) (narrow) %v1359_v56, 8  ;;  %v1692_v56 = vmul.f32 %v1690_v26, %v7360_v18  ;;  %v2021_v18 = vmul.f32 %v2020_v33, %v7365_v22  ;;  %v2130_v26 = vperm.slane %v7420_v55, 0 }
 0x166   : > { %v2131_v40 = vmul.f32 %v2130_v26, %v7387_v36 }
 0x169   : > { %1257 = vxpose.xlu0.b32.end [2/2] (short) (narrow) %v1248_v57, 8 }
 0x16a   : > { %v7428_v61 = vpop.xlane.xlu1 %1473 }
 0x16b   : > { %v7430_v62 = vpop.xlane.xlu0 %1585  ;;  %v7432_v63 = vpop.xlane.xlu2 %1578 }
 0x16c   : > { %1477 = vxpose.xlu2.b32.start [1/2] (short) (narrow) %v1467_v51, 8 }
 0x172   : > { %v1366_v0 = vpop.xlane.xlu1 %1365 }
 0x173   : > { %v1797_v1 = vpop.xlane.xlu0 %1796  ;;  %v1469_v2 = vpop.xlane.xlu2 %1468 }
 0x174   : > { %1478 = vxpose.xlu2.b32.end [2/2] (short) (narrow) %v1469_v2, 8  ;;  %1807 = vxpose.xlu0.b32.start [1/2] (short) (narrow) %v1797_v1, 8 }
 0x17a   : > { %v7434_v3 = vpop.xlane.xlu1 %1254 }
 0x17b   : > { %v7436_v5 = vpop.xlane.xlu0 %1803 }
 0x182   : > { %v7438_v6 = vpop.xlane.xlu1 %1686 }
 0x183   : > { %v2017_v7 = vpop.xlane.xlu0 %2016 }
 0x184   : > { %2027 = vxpose.xlu2.b32.start [1/2] (short) (narrow) %v2017_v7, 8 }
 0x18a   : > { %v7440_v9 = vpop.xlane.xlu1 %1693 }
 0x18b   : > { %v1799_v10 = vpop.xlane.xlu0 %1798 }
 0x18c   : > { %1808 = vxpose.xlu0.b32.end [2/2] (short) (narrow) %v1799_v10, 8 }
 0x192   : > { %v1907_v11 = vpop.xlane.xlu1 %1906 }
 0x193   : > { %v7442_v13 = vpop.xlane.xlu0 %1688 }
 0x194   : > { %1917 = vxpose.xlu0.b32.start [1/2] (short) (narrow) %v1907_v11, 8 }
 0x19a   : > { %v1909_v14 = vpop.xlane.xlu1 %1908 }
 0x19b   : > { %v7444_v15 = vpop.xlane.xlu0 %2126 }
 0x19c   : > { %1918 = vxpose.xlu0.b32.end [2/2] (short) (narrow) %v1909_v14, 8 }
 0x1a2   : > { %v2019_v16 = vpop.xlane.xlu1 %2018 }
 0x1a3   : > { %v2237_v17 = vpop.xlane.xlu0 %2236  ;;  %2028 = vxpose.xlu2.b32.end [2/2] (short) (narrow) %v2019_v16, 8 }
 0x1a4   : > { %2247 = vxpose.xlu0.b32.start [1/2] (short) (narrow) %v2237_v17, 8 }
 0x1aa   : > { %v7505_v2 = vpop.xlane.xlu1 %1805 }
 0x1ab   : > { %v7456_v31 = vpop.xlane.xlu0 %1475 }
 0x1f5   : > { %v1383_v20 = vpop.trf.xlu2 }
 0x1f6   : > { %v1399_v23 = vperm.slane %v1383_v20, 0 }
 0x1f8   : > { %v1401_v27 = vadd.f32 %v1399_v23, %v1366_v0 }
 0x1fa   : > { %vm1403_vm1 = vcmp.gt.f32.partialorder %v1401_v27, 0.0  ;;  %v1405_v28 = vmul.f32 0.2, %v1401_v27 }
 0x1fc   : > { %v1407_v30 = vsel %vm1403_vm1, %v1401_v27, %v1405_v28 }
 0x1fd   : > { %v7460_v32 = vsel %vm847_vm0, %v1407_v30, -1e+30 }
 0x1fe   : > { %v1413_v35 = vsel %vm1299_vm2, %v7460_v32, -inf }
 0x1ff   : > { %1414 = vmax.xlane.f32.xlu1 %v1413_v35 }
 0x205   : > { %v1272_v37 = vpop.trf.xlu0  ;;  %v1493_v59 = vpop.trf.xlu2 }
 0x206   : > { %v1288_v38 = vperm.slane %v1272_v37, 0 }
 0x208   : > { %v1289_v41 = vadd.f32 %v1288_v38, %v7407_v50  ;;  %v1400_v50 = vadd.f32 %v1399_v23, %v7409_v21  ;;  %v2022_v21 = vmul.f32 %v2020_v33, %v7393_v39  ;;  %v1290_v0 = vadd.f32 %v1288_v38, %v7434_v3 }
 0x20a   : > { %vm1291_vm3 = vcmp.gt.f32.partialorder %v1289_v41, 0.0  ;;  %v1293_v43 = vmul.f32 0.2, %v1289_v41  ;;  %v1404_v51 = vmul.f32 0.2, %v1400_v50  ;;  %vm1402_vm5 = vcmp.gt.f32.partialorder %v1400_v50, 0.0 }
 0x20b   : > { %v1294_v46 = vmul.f32 0.2, %v1290_v0  ;;  %vm1292_vm6 = vcmp.gt.f32.partialorder %v1290_v0, 0.0 }
 0x20c   : > { %v1295_v44 = vsel %vm1291_vm3, %v1289_v41, %v1293_v43  ;;  %v1406_v57 = vsel %vm1402_vm5, %v1400_v50, %v1404_v51 }
 0x20d   : > { %v7471_v45 = vsel %vm846_vm4, %v1295_v44, -1e+30  ;;  %v7487_v60 = vsel %vm846_vm4, %v1406_v57, -1e+30  ;;  %v1296_v1 = vsel %vm1292_vm6, %v1290_v0, %v1294_v46 }
 0x20e   : > { %v1300_v47 = vsel %vm1299_vm2, %v7471_v45, -inf  ;;  %v1410_v54 = vsel %vm1299_vm2, %v7487_v60, -inf  ;;  %v7509_v36 = vsel %vm847_vm0, %v1296_v1, -1e+30 }
 0x20f   : > { %1301 = vmax.xlane.f32.xlu1 %v1300_v47 }
 0x214   : > { %1583 = vadd.xlane.f32.xlu2 %v1581_v48 }
 0x21c   : > { %2238 = vadd.xlane.f32.xlu2 %v2235_v49 }
 0x224   : > { %1695 = vadd.xlane.f32.xlu2 %v1692_v56 }
 0x228   : > { %v1823_v43 = vpop.trf.xlu0 }
 0x229   : > { %v1839_v50 = vperm.slane %v1823_v43, 0 }
 0x22c   : > { %1411 = vmax.xlane.f32.xlu2 %v1410_v54 }
 0x234   : > { %1913 = vadd.xlane.f32.xlu2 %v1911_v4  ;;  %v7520_v3 = vpop.trf.xlu2 }
 0x235   : > { %v2059_v51 = vperm.slane %v7520_v3, 0 }
 0x23c   : > { %2023 = vadd.xlane.f32.xlu2 %v2021_v18 }
 0x244   : > { %2133 = vadd.xlane.f32.xlu2 %v2131_v40  ;;  %v1840_v40 = vadd.f32 %v1839_v50, %v7436_v5 }
 0x246   : > { %vm1842_vm14 = vcmp.gt.f32.partialorder %v1840_v40, 0.0 }
 0x249   : > { %1587 = vxpose.xlu1.b32.start [1/2] (short) (narrow) %v7415_v53, 8  ;;  %v1303_v53 = vsel %vm1299_vm2, %v7509_v36, -inf }
 0x24c   : > { %2025 = vadd.xlane.f32.xlu2 %v2022_v21 }
 0x251   : > { %1588 = vxpose.xlu1.b32.end [2/2] (short) (narrow) %v7432_v63, 8  ;;  %v7514_v63 = vpop.xlane.xlu1 %1915 }
 0x254   : > { %2245 = vadd.xlane.f32.xlu2 %v2242_v8 }
 0x259   : > { %1697 = vxpose.xlu1.b32.start [1/2] (short) (narrow) %v7438_v6, 8  ;;  %v7517_v55 = vpop.xlane.xlu1 %2243 }
 0x25c   : > { %1304 = vmax.xlane.f32.xlu2 %v1303_v53 }
 0x261   : > { %1698 = vxpose.xlu1.b32.end [2/2] (short) (narrow) %v7442_v13, 8  ;;  %v2129_v58 = vpop.xlane.xlu1 %2128  ;;  %v1509_v13 = vperm.slane %v1493_v59, 0 }
 0x269   : > { %2137 = vxpose.xlu1.b32.start [1/2] (short) (narrow) %v7444_v15, 8  ;;  %v1510_v15 = vadd.f32 %v1509_v13, %v7428_v61  ;;  %v1511_v61 = vadd.f32 %v1509_v13, %v7456_v31  ;;  %v2132_v31 = vmul.f32 %v2130_v26, %v7411_v52  ;;  %v1933_v13 = vpop.trf.xlu0 }
 0x26b   : > { %v1514_v28 = vmul.f32 0.2, %v1510_v15  ;;  %vm1512_vm8 = vcmp.gt.f32.partialorder %v1510_v15, 0.0  ;;  %v1515_v44 = vmul.f32 0.2, %v1511_v61  ;;  %vm1513_vm9 = vcmp.gt.f32.partialorder %v1511_v61, 0.0 }
 0x26d   : > { %v1516_v38 = vsel %vm1512_vm8, %v1510_v15, %v1514_v28  ;;  %v1517_v18 = vsel %vm1513_vm9, %v1511_v61, %v1515_v44 }
 0x26e   : > { %v7553_v46 = vsel %vm847_vm0, %v1517_v18, -1e+30 }
 0x26f   : > { %v1523_v5 = vsel %vm1299_vm2, %v7553_v46, -inf }
 0x271   : > { %2138 = vxpose.xlu1.b32.end [2/2] (short) (narrow) %v2129_v58, 8  ;;  %v1844_v58 = vmul.f32 0.2, %v1840_v40 }
 0x272   : > { %v7522_v6 = vpop.xlane.xlu1 %1414 }
 0x282   : > { %v7524_v14 = vpop.xlane.xlu1 %1301 }
 0x287   : > { %v1584_v7 = vpop.xlane.xlu2 %1583 }
 0x28f   : > { %v2239_v10 = vpop.xlane.xlu2 %2238 }
 0x290   : > { %2248 = vxpose.xlu0.b32.end [2/2] (short) (narrow) %v2239_v10, 8 }
 0x297   : > { %v1696_v11 = vpop.xlane.xlu2 %1695 }
 0x29f   : > { %v7526_v16 = vpop.xlane.xlu2 %1411 }
 0x2a7   : > { %v7530_v27 = vpop.xlane.xlu2 %1913 }
 0x2af   : > { %v2024_v47 = vpop.xlane.xlu2 %2023 }
 0x2b0   : > { %v2060_v54 = vadd.f32 %v2059_v51, %v2024_v47 }
 0x2b2   : > { %v2064_v8 = vmul.f32 0.2, %v2060_v54  ;;  %vm2062_vm13 = vcmp.gt.f32.partialorder %v2060_v54, 0.0 }
 0x2b4   : > { %v2066_v10 = vsel %vm2062_vm13, %v2060_v54, %v2064_v8 }
 0x2ed   : > { %v1603_v17 = vpop.trf.xlu1 }
 0x2ee   : > { %v1619_v19 = vperm.slane %v1603_v17, 0  ;;  %v1846_v17 = vsel %vm1842_vm14, %v1840_v40, %v1844_v58 }
 0x2f0   : > { %v1621_v20 = vadd.f32 %v1619_v19, %v7430_v62  ;;  %v1620_v41 = vadd.f32 %v1619_v19, %v1584_v7  ;;  %v7541_v62 = vsel %vm846_vm4, %v1516_v38, -1e+30  ;;  %v2134_v19 = vpop.xlane.xlu2 %2133 }
 0x2f1   : > { %v1520_v49 = vsel %vm1299_vm2, %v7541_v62, -inf }
 0x2f2   : > { %vm1623_vm7 = vcmp.gt.f32.partialorder %v1621_v20, 0.0  ;;  %v1625_v23 = vmul.f32 0.2, %v1621_v20  ;;  %v1624_v57 = vmul.f32 0.2, %v1620_v41  ;;  %vm1622_vm10 = vcmp.gt.f32.partialorder %v1620_v41, 0.0 }
 0x2f4   : > { %v1627_v30 = vsel %vm1623_vm7, %v1621_v20, %v1625_v23  ;;  %v1626_v0 = vsel %vm1622_vm10, %v1620_v41, %v1624_v57  ;;  %v7576_v20 = vsel %vm846_vm4, %v2066_v10, -1e+30  ;;  %v1949_v23 = vperm.slane %v1933_v13, 0 }
 0x2f5   : > { %v7534_v35 = vsel %vm847_vm0, %v1627_v30, -1e+30  ;;  %v7582_v30 = vsel %vm846_vm4, %v1846_v17, -1e+30  ;;  %v2070_v61 = vsel %vm1299_vm2, %v7576_v20, -inf }
 0x2f6   : > { %v1633_v37 = vsel %vm1299_vm2, %v7534_v35, -inf  ;;  %v1951_v41 = vadd.f32 %v1949_v23, %v7514_v63  ;;  %v1850_v44 = vsel %vm1299_vm2, %v7582_v30, -inf }
 0x2f7   : > { %1634 = vmax.xlane.f32.xlu2 %v1633_v37 }
 0x2f8   : > { %v1955_v63 = vmul.f32 0.2, %v1951_v41  ;;  %vm1953_vm3 = vcmp.gt.f32.partialorder %v1951_v41, 0.0 }
 0x2fd   : > { %v1713_v48 = vpop.trf.xlu1 }
 0x2fe   : > { %v1729_v56 = vperm.slane %v1713_v48, 0  ;;  %v1417_v48 = vsub.f32 %v7460_v32, %v7522_v6 }
 0x2ff   : > { %1521 = vmax.xlane.f32.xlu2 %v1520_v49  ;;  %v1950_v49 = vadd.f32 %v1949_v23, %v7530_v27 }
 0x300   : > { %v1730_v4 = vadd.f32 %v1729_v56, %v7440_v9  ;;  %v1731_v33 = vadd.f32 %v1729_v56, %v1696_v11  ;;  %v7561_v9 = vsel %vm846_vm4, %v1626_v0, -1e+30  ;;  %v1841_v11 = vadd.f32 %v1839_v50, %v7505_v2 }
 0x301   : > { %2135 = vadd.xlane.f32.xlu0 %v2132_v31  ;;  %v1630_v59 = vsel %vm1299_vm2, %v7561_v9, -inf  ;;  %v1416_v56 = vsub.f32 %v7487_v60, %v7526_v16  ;;  %v2026_v31 = vpop.xlane.xlu2 %2025  ;;  %v1420_v32 = vmul.f32 1.442695, %v1417_v48  ;;  %v1954_v6 = vmul.f32 0.2, %v1950_v49 }
 0x302   : > { %vm1732_vm11 = vcmp.gt.f32.partialorder %v1730_v4, 0.0  ;;  %v1734_v21 = vmul.f32 0.2, %v1730_v4  ;;  %v1735_v26 = vmul.f32 0.2, %v1731_v33  ;;  %vm1733_vm12 = vcmp.gt.f32.partialorder %v1731_v33, 0.0 }
 0x303   : > { %v1845_v2 = vmul.f32 0.2, %v1841_v11  ;;  %vm1843_vm15 = vcmp.gt.f32.partialorder %v1841_v11, 0.0  ;;  %vm1952_vm5 = vcmp.gt.f32.partialorder %v1950_v49, 0.0  ;;  %v1418_v60 = vmul.f32 1.442695, %v1416_v56 }
 0x304   : > { %v1736_v52 = vsel %vm1732_vm11, %v1730_v4, %v1734_v21  ;;  %v1737_v7 = vsel %vm1733_vm12, %v1731_v33, %v1735_v26  ;;  %v1957_v33 = vsel %vm1953_vm3, %v1951_v41, %v1955_v63  ;;  %6359 = vpow2.f32 %v1420_v32 }
 0x305   : > { %v7557_v1 = vsel %vm846_vm4, %v1736_v52, -1e+30  ;;  %v7572_v15 = vsel %vm847_vm0, %v1737_v7, -1e+30  ;;  %v1847_v47 = vsel %vm1843_vm15, %v1841_v11, %v1845_v2  ;;  %v1956_v18 = vsel %vm1952_vm5, %v1950_v49, %v1954_v6 }
 0x306   : > { %v1740_v53 = vsel %vm1299_vm2, %v7557_v1, -inf  ;;  %v1743_v38 = vsel %vm1299_vm2, %v7572_v15, -inf  ;;  %v7605_v4 = vsel %vm847_vm0, %v1847_v47, -1e+30  ;;  %v7613_v40 = vsel %vm847_vm0, %v1957_v33, -1e+30 }
 0x307   : > { %1524 = vmax.xlane.f32.xlu2 %v1523_v5  ;;  %1741 = vmax.xlane.f32.xlu1 %v1740_v53  ;;  %v1853_v16 = vsel %vm1299_vm2, %v7605_v4, -inf  ;;  %6361 = vpow2.f32 %v1418_v60  ;;  %v7617_v21 = vsel %vm846_vm4, %v1956_v18, -1e+30  ;;  %v1963_v0 = vsel %vm1299_vm2, %v7613_v40, -inf }
 0x308   : > { %v1960_v26 = vsel %vm1299_vm2, %v7617_v21, -inf  ;;  %v2061_v53 = vadd.f32 %v2059_v51, %v2026_v31  ;;  %v1306_v32 = vsub.f32 %v7471_v45, %v7524_v14 }
 0x309   : > { %1631 = vmax.xlane.f32.xlu0 %v1630_v59  ;;  %v2246_v8 = vpop.xlane.xlu2 %2245 }
 0x30a   : > { %v6360_v52 = vpop.eup %6359  ;;  %v2065_v7 = vmul.f32 0.2, %v2061_v53  ;;  %vm2063_vm6 = vcmp.gt.f32.partialorder %v2061_v53, 0.0 }
 0x30b   : > { %v7627_v58 = vsel %vm847_vm0, %v6360_v52, 0.0 }
 0x30c   : > { %v1427_v10 = vsel %vm1299_vm2, %v7627_v58, 0.0  ;;  %v2067_v3 = vsel %vm2063_vm6, %v2061_v53, %v2065_v7 }
 0x30d   : > { %v7578_v28 = vpop.trf.xlu1  ;;  %v6362_v5 = vpop.eup %6361  ;;  %v7640_v23 = vsel %vm847_vm0, %v2067_v3, -1e+30 }
 0x30e   : > { %v2169_v37 = vperm.slane %v7578_v28, 0  ;;  %v7631_v59 = vsel %vm846_vm4, %v6362_v5, 0.0  ;;  %v2073_v41 = vsel %vm1299_vm2, %v7640_v23, -inf }
 0x30f   : > { %1744 = vmax.xlane.f32.xlu2 %v1743_v38  ;;  %2071 = vmax.xlane.f32.xlu1 %v2070_v61  ;;  %v1424_v11 = vsel %vm1299_vm2, %v7631_v59, 0.0 }
 0x310   : > { %v2170_v43 = vadd.f32 %v2169_v37, %v2134_v19 }
 0x311   : > { %1851 = vmax.xlane.f32.xlu0 %v1850_v44  ;;  %v1305_v13 = vpop.xlane.xlu2 %1304 }
 0x312   : > { %vm2172_vm1 = vcmp.gt.f32.partialorder %v2170_v43, 0.0  ;;  %v2174_v50 = vmul.f32 0.2, %v2170_v43  ;;  %v1307_v51 = vsub.f32 %v7509_v36, %v1305_v13 }
 0x314   : > { %v2176_v57 = vsel %vm2172_vm1, %v2170_v43, %v2174_v50  ;;  %v1310_v61 = vmul.f32 1.442695, %v1307_v51 }
 0x315   : > { %v7601_v54 = vsel %vm846_vm4, %v2176_v57, -1e+30 }
 0x316   : > { %v2180_v27 = vsel %vm1299_vm2, %v7601_v54, -inf  ;;  %6363 = vpow2.f32 %v1310_v61 }
 0x317   : > { %2181 = vmax.xlane.f32.xlu2 %v2180_v27  ;;  %v1308_v27 = vmul.f32 1.442695, %v1306_v32 }
 0x319   : > { %1854 = vmax.xlane.f32.xlu0 %v1853_v16  ;;  %6365 = vpow2.f32 %v1308_v27 }
 0x31c   : > { %v6364_v56 = vpop.eup %6363 }
 0x31d   : > { %v7659_v57 = vsel %vm847_vm0, %v6364_v56, 0.0 }
 0x31e   : > { %v1317_v63 = vsel %vm1299_vm2, %v7659_v57, 0.0 }
 0x31f   : > { %1964 = vmax.xlane.f32.xlu2 %v1963_v0  ;;  %v6366_v28 = vpop.eup %6365 }
 0x321   : > { %1961 = vmax.xlane.f32.xlu0 %v1960_v26 }
 0x327   : > { %1428 = vadd.xlane.f32.xlu2 %v1427_v10  ;;  %v7679_v10 = vsel %vm846_vm4, %v6366_v28, 0.0 }
 0x328   : > { %v1314_v51 = vsel %vm1299_vm2, %v7679_v10, 0.0 }
 0x329   : > { %1425 = vadd.xlane.f32.xlu0 %v1424_v11 }
 0x32c   : > { %v2263_v17 = vpop.trf.xlu0 }
 0x32d   : > { %v2279_v19 = vperm.slane %v2263_v17, 0 }
 0x32f   : > { %v2280_v2 = vadd.f32 %v2279_v19, %v7517_v55  ;;  %v2281_v38 = vadd.f32 %v2279_v19, %v2246_v8 }
 0x331   : > { %2074 = vmax.xlane.f32.xlu0 %v2073_v41  ;;  %vm2282_vm7 = vcmp.gt.f32.partialorder %v2280_v2, 0.0  ;;  %v2284_v43 = vmul.f32 0.2, %v2280_v2  ;;  %vm2283_vm8 = vcmp.gt.f32.partialorder %v2281_v38, 0.0  ;;  %v2285_v44 = vmul.f32 0.2, %v2281_v38 }
 0x333   : > { %v2286_v47 = vsel %vm2282_vm7, %v2280_v2, %v2284_v43  ;;  %v2287_v36 = vsel %vm2283_vm8, %v2281_v38, %v2285_v44 }
 0x334   : > { %v7647_v48 = vsel %vm846_vm4, %v2286_v47, -1e+30  ;;  %v7653_v49 = vsel %vm847_vm0, %v2287_v36, -1e+30 }
 0x335   : > { %v2290_v55 = vsel %vm1299_vm2, %v7647_v48, -inf  ;;  %v2293_v50 = vsel %vm1299_vm2, %v7653_v49, -inf }
 0x336   : > { %2291 = vmax.xlane.f32.xlu1 %v2290_v55 }
 0x339   : > { %2294 = vmax.xlane.f32.xlu0 %v2293_v50 }
 0x341   : > { %1318 = vadd.xlane.f32.xlu0 %v1317_v63 }
 0x36a   : > { %v1635_v31 = vpop.xlane.xlu2 %1634 }
 0x36b   : > { %v1637_v33 = vsub.f32 %v7534_v35, %v1635_v31 }
 0x36d   : > { %v1640_v26 = vmul.f32 1.442695, %v1637_v33 }
 0x36f   : > { %6367 = vpow2.f32 %v1640_v26 }
 0x372   : > { %v1522_v6 = vpop.xlane.xlu2 %1521 }
 0x374   : > { %v2136_v60 = vpop.xlane.xlu0 %2135 }
 0x375   : > { %v2171_v16 = vadd.f32 %v2169_v37, %v2136_v60  ;;  %v1526_v37 = vsub.f32 %v7541_v62, %v1522_v6  ;;  %v6368_v62 = vpop.eup %6367 }
 0x376   : > { %v7692_v41 = vsel %vm847_vm0, %v6368_v62, 0.0 }
 0x377   : > { %v2175_v18 = vmul.f32 0.2, %v2171_v16  ;;  %vm2173_vm9 = vcmp.gt.f32.partialorder %v2171_v16, 0.0  ;;  %v1528_v11 = vmul.f32 1.442695, %v1526_v37 }
 0x379   : > { %v2177_v0 = vsel %vm2173_vm9, %v2171_v16, %v2175_v18 }
 0x37a   : > { %v1525_v8 = vpop.xlane.xlu2 %1524  ;;  %v7670_v52 = vsel %vm847_vm0, %v2177_v0, -1e+30  ;;  %v1742_v14 = vpop.xlane.xlu1 %1741 }
 0x37b   : > { %v2183_v45 = vsel %vm1299_vm2, %v7670_v52, -inf  ;;  %v1746_v53 = vsub.f32 %v7557_v1, %v1742_v14 }
 0x37c   : > { %v1632_v5 = vpop.xlane.xlu0 %1631  ;;  %2184 = vmax.xlane.f32.xlu1 %v2183_v45 }
 0x37d   : > { %v1636_v35 = vsub.f32 %v7561_v9, %v1632_v5  ;;  %v1748_v3 = vmul.f32 1.442695, %v1746_v53  ;;  %v1527_v9 = vsub.f32 %v7553_v46, %v1525_v8 }
 0x37f   : > { %v1638_v7 = vmul.f32 1.442695, %v1636_v35  ;;  %v1530_v43 = vmul.f32 1.442695, %v1527_v9 }
 0x381   : > { %6369 = vpow2.f32 %v1638_v7 }
 0x382   : > { %v1745_v13 = vpop.xlane.xlu2 %1744  ;;  %6371 = vpow2.f32 %v1528_v11  ;;  %v2072_v44 = vpop.xlane.xlu1 %2071 }
 0x383   : > { %6373 = vpow2.f32 %v1748_v3  ;;  %v1747_v2 = vsub.f32 %v7572_v15, %v1745_v13  ;;  %v1647_v15 = vsel %vm1299_vm2, %v7692_v41, 0.0  ;;  %v2076_v56 = vsub.f32 %v7576_v20, %v2072_v44 }
 0x384   : > { %v1852_v17 = vpop.xlane.xlu0 %1851  ;;  %1315 = vadd.xlane.f32.xlu1 %v1314_v51 }
 0x385   : > { %v1856_v1 = vsub.f32 %v7582_v30, %v1852_v17  ;;  %v1750_v36 = vmul.f32 1.442695, %v1747_v2  ;;  %v2078_v20 = vmul.f32 1.442695, %v2076_v56 }
 0x387   : > { %v6370_v19 = vpop.eup %6369  ;;  %v1858_v38 = vmul.f32 1.442695, %v1856_v1 }
 0x388   : > { %v7688_v61 = vsel %vm846_vm4, %v6370_v19, 0.0  ;;  %v6372_v47 = vpop.eup %6371 }
 0x389   : > { %6375 = vpow2.f32 %v1858_v38  ;;  %v1644_v46 = vsel %vm1299_vm2, %v7688_v61, 0.0  ;;  %v6374_v50 = vpop.eup %6373  ;;  %v7702_v31 = vsel %vm846_vm4, %v6372_v47, 0.0 }
 0x38a   : > { %v2182_v30 = vpop.xlane.xlu2 %2181  ;;  %1645 = vadd.xlane.f32.xlu2 %v1644_v46  ;;  %6377 = vpow2.f32 %v1530_v43  ;;  %v7711_v16 = vsel %vm846_vm4, %v6374_v50, 0.0  ;;  %v1534_v33 = vsel %vm1299_vm2, %v7702_v31, 0.0 }
 0x38b   : > { %6379 = vpow2.f32 %v1750_v36  ;;  %v2186_v6 = vsub.f32 %v7601_v54, %v2182_v30  ;;  %v1754_v8 = vsel %vm1299_vm2, %v7711_v16, 0.0 }
 0x38c   : > { %v1855_v55 = vpop.xlane.xlu0 %1854  ;;  %1648 = vadd.xlane.f32.xlu1 %v1647_v15 }
 0x38d   : > { %v1857_v63 = vsub.f32 %v7605_v4, %v1855_v55  ;;  %v2188_v0 = vmul.f32 1.442695, %v2186_v6 }
 0x38f   : > { %v6376_v32 = vpop.eup %6375  ;;  %v1860_v27 = vmul.f32 1.442695, %v1857_v63 }
 0x390   : > { %v7707_v60 = vsel %vm846_vm4, %v6376_v32, 0.0  ;;  %v6378_v54 = vpop.eup %6377 }
 0x391   : > { %6381 = vpow2.f32 %v1860_v27  ;;  %v1864_v4 = vsel %vm1299_vm2, %v7707_v60, 0.0  ;;  %v6380_v14 = vpop.eup %6379  ;;  %v7723_v28 = vsel %vm847_vm0, %v6378_v54, 0.0 }
 0x392   : > { %v1965_v18 = vpop.xlane.xlu2 %1964  ;;  %1865 = vadd.xlane.f32.xlu0 %v1864_v4  ;;  %1535 = vadd.xlane.f32.xlu2 %v1534_v33  ;;  %6383 = vpow2.f32 %v2078_v20  ;;  %v1537_v11 = vsel %vm1299_vm2, %v7723_v28, 0.0 }
 0x393   : > { %v1967_v26 = vsub.f32 %v7613_v40, %v1965_v18  ;;  %6385 = vpow2.f32 %v2188_v0  ;;  %v7731_v40 = vsel %vm847_vm0, %v6380_v14, 0.0 }
 0x394   : > { %v1962_v45 = vpop.xlane.xlu0 %1961  ;;  %1755 = vadd.xlane.f32.xlu1 %v1754_v8  ;;  %v1757_v3 = vsel %vm1299_vm2, %v7731_v40, 0.0 }
 0x395   : > { %v1966_v5 = vsub.f32 %v7617_v21, %v1962_v45  ;;  %v1970_v53 = vmul.f32 1.442695, %v1967_v26 }
 0x397   : > { %v6382_v37 = vpop.eup %6381  ;;  %v1968_v35 = vmul.f32 1.442695, %v1966_v5 }
 0x398   : > { %v7727_v7 = vsel %vm847_vm0, %v6382_v37, 0.0  ;;  %v6384_v13 = vpop.eup %6383 }
 0x399   : > { %6387 = vpow2.f32 %v1968_v35  ;;  %v1867_v21 = vsel %vm1299_vm2, %v7727_v7, 0.0  ;;  %v6386_v17 = vpop.eup %6385  ;;  %v7741_v62 = vsel %vm846_vm4, %v6384_v13, 0.0 }
 0x39a   : > { %1868 = vadd.xlane.f32.xlu0 %v1867_v21  ;;  %1538 = vadd.xlane.f32.xlu2 %v1537_v11  ;;  %6389 = vpow2.f32 %v1970_v53  ;;  %v1429_v1 = vpop.xlane.xlu2 %1428  ;;  %v7749_v2 = vsel %vm846_vm4, %v6386_v17, 0.0  ;;  %v2084_v43 = vsel %vm1299_vm2, %v7741_v62, 0.0 }
 0x39b   : > { %v2194_v30 = vsel %vm1299_vm2, %v7749_v2, 0.0 }
 0x39c   : > { %v1426_v51 = vpop.xlane.xlu0 %1425  ;;  %1758 = vadd.xlane.f32.xlu1 %v1757_v3 }
 0x39d   : > { %6391 = vrcp.f32 %v1426_v51 }
 0x39e   : > { %6393 = vrcp.f32 %v1429_v1 }
 0x39f   : > { %v6388_v9 = vpop.eup %6387 }
 0x3a0   : > { %v7745_v19 = vsel %vm846_vm4, %v6388_v9, 0.0  ;;  %v6390_v46 = vpop.eup %6389 }
 0x3a1   : > { %v1974_v38 = vsel %vm1299_vm2, %v7745_v19, 0.0  ;;  %v7762_v55 = vsel %vm847_vm0, %v6390_v46, 0.0 }
 0x3a2   : > { %1975 = vadd.xlane.f32.xlu2 %v1974_v38  ;;  %2085 = vadd.xlane.f32.xlu0 %v2084_v43 }
 0x3a3   : > { %v6392_v44 = vpop.eup %6391 }
 0x3a4   : > { %v1432_v47 = vmul.f32 %v6392_v44, %v7631_v59  ;;  %v2075_v36 = vpop.xlane.xlu0 %2074  ;;  %2195 = vadd.xlane.f32.xlu1 %v2194_v30  ;;  %v6394_v56 = vpop.eup %6393  ;;  %v1977_v59 = vsel %vm1299_vm2, %v7762_v55, 0.0 }
 0x3a5   : > { %v2077_v15 = vsub.f32 %v7640_v23, %v2075_v36  ;;  %v1433_v27 = vmul.f32 %v6394_v56, %v7627_v58 }
 0x3a6   : > { %5892 = vmatmul.msk.f32.vlgmr.msra.gmra.mxu3 %vm1299_vm2, %v1432_v47 }
 0x3a7   : > { %v2080_v50 = vmul.f32 1.442695, %v2077_v15  ;;  %1894 = vmatpush.msra.mxu3 %v7368_v25 }
 0x3a9   : > { %6395 = vpow2.f32 %v2080_v50  ;;  %1895 = vmatpush.msra.mxu3 %v7355_v12  ;;  %v2292_v63 = vpop.xlane.xlu1 %2291 }
 0x3aa   : > { %v2296_v32 = vsub.f32 %v7647_v48, %v2292_v63  ;;  %1978 = vadd.xlane.f32.xlu0 %v1977_v59  ;;  %v2537_v59 = vld [vmem:[%s10885_s28 + $0xf0] sm:$0xff] }
 0x3ac   : > { %v2298_v23 = vmul.f32 1.442695, %v2296_v32  ;;  %v2295_v6 = vpop.xlane.xlu0 %2294 }
 0x3ad   : > { %v2297_v20 = vsub.f32 %v7653_v49, %v2295_v6 }
 0x3ae   : > { %6397 = vpow2.f32 %v2298_v23  ;;  %5893 = vmatmul.msk.f32.gmra.mxu3 %vm1299_vm2, %v1433_v27  ;;  %v2534_v27 = vld [vmem:[%s10885_s28 + $0xd8] sm:$0xff] }
 0x3af   : > { %v6396_v25 = vpop.eup %6395  ;;  %v2300_v4 = vmul.f32 1.442695, %v2297_v20 }
 0x3b0   : > { %v7774_v12 = vsel %vm847_vm0, %v6396_v25, 0.0 }
 0x3b1   : > { %6399 = vpow2.f32 %v2300_v4  ;;  %v2087_v48 = vsel %vm1299_vm2, %v7774_v12, 0.0 }
 0x3b2   : > { %2088 = vadd.xlane.f32.xlu1 %v2087_v48  ;;  %v2533_v48 = vld [vmem:[%s10885_s28 + $0xd0] sm:$0xff] }
 0x3b4   : > { %v6398_v33 = vpop.eup %6397  ;;  %v1319_v37 = vpop.xlane.xlu0 %1318 }
 0x3b5   : > { %v7780_v58 = vsel %vm846_vm4, %v6398_v33, 0.0 }
 0x3b6   : > { %v2304_v49 = vsel %vm1299_vm2, %v7780_v58, 0.0 }
 0x3b7   : > { %v6400_v18 = vpop.eup %6399  ;;  %2305 = vadd.xlane.f32.xlu2 %v2304_v49  ;;  %v7855_v49 = vld [vmem:[%s10886_s1] sm:$0xff] }
 0x3b8   : > { %v7786_v54 = vsel %vm847_vm0, %v6400_v18, 0.0  ;;  %v2531_v18 = vld [vmem:[%s10885_s28 + $0xc0] sm:$0xff] }
 0x3b9   : > { %v2307_v0 = vsel %vm1299_vm2, %v7786_v54, 0.0 }
 0x3ba   : > { %2308 = vadd.xlane.f32.xlu0 %v2307_v0 }
 0x3ef   : > { %v2185_v8 = vpop.xlane.xlu1 %2184 }
 0x3f0   : > { %v2187_v26 = vsub.f32 %v7670_v52, %v2185_v8  ;;  %v2520_v8 = vld [vmem:[%s10885_s28 + $0x68] sm:$0xff] }
 0x3f2   : > { %v2190_v45 = vmul.f32 1.442695, %v2187_v26 }
 0x3f4   : > { %6401 = vpow2.f32 %v2190_v45 }
 0x3f7   : > { %v1316_v14 = vpop.xlane.xlu1 %1315 }
 0x3f8   : > { %6403 = vrcp.f32 %v1316_v14  ;;  %v2530_v14 = vld [vmem:[%s10885_s28 + $0xb8] sm:$0xff] }
 0x3f9   : > { %6405 = vrcp.f32 %v1319_v37 }
 0x3fa   : > { %v6402_v5 = vpop.eup %6401 }
 0x3fb   : > { %v7793_v35 = vsel %vm847_vm0, %v6402_v5, 0.0  ;;  %v2348_v5 = vperm.slane %v7855_v49, 1 }
 0x3fc   : > { %v2197_v53 = vsel %vm1299_vm2, %v7793_v35, 0.0 }
 0x3fd   : > { %v1646_v21 = vpop.xlane.xlu2 %1645  ;;  %2198 = vadd.xlane.f32.xlu2 %v2197_v53  ;;  %v2529_v53 = vld [vmem:[%s10885_s28 + $0xb0] sm:$0xff] }
 0x3fe   : > { %v6404_v11 = vpop.eup %6403  ;;  %6407 = vrcp.f32 %v1646_v21 }
 0x3ff   : > { %v1322_v52 = vmul.f32 %v6404_v11, %v7679_v10  ;;  %v1649_v13 = vpop.xlane.xlu1 %1648  ;;  %v6406_v3 = vpop.eup %6405  ;;  %v2528_v11 = vld [vmem:[%s10885_s28 + $0xa8] sm:$0xff] }
 0x400   : > { %6409 = vrcp.f32 %v1649_v13  ;;  %v1323_v10 = vmul.f32 %v6406_v3, %v7659_v57  ;;  %v2527_v3 = vld [vmem:[%s10885_s28 + $0xa0] sm:$0xff] }
 0x401   : > { %5890 = vmatmul.msk.f32.vlgmr.msra.gmra.mxu2 %vm1299_vm2, %v1322_v52 }
 0x402   : > { %2004 = vmatpush.msra.mxu2 %v7384_v34 }
 0x404   : > { %v6408_v51 = vpop.eup %6407  ;;  %2005 = vmatpush.msra.mxu2 %v7374_v29 }
 0x405   : > { %v1652_v17 = vmul.f32 %v6408_v51, %v7688_v61  ;;  %v1866_v9 = vpop.xlane.xlu0 %1865  ;;  %v1536_v1 = vpop.xlane.xlu2 %1535  ;;  %v2517_v51 = vld [vmem:[%s10885_s28 + $0x50] sm:$0xff] }
 0x406   : > { %6411 = vrcp.f32 %v1536_v1  ;;  %v6410_v34 = vpop.eup %6409 }
 0x407   : > { %5896 = vmatmul.msk.f32.vlgmr.msrb.gmra.mxu3 %vm1299_vm2, %v1652_v17  ;;  %v1756_v38 = vpop.xlane.xlu1 %1755  ;;  %v1653_v46 = vmul.f32 %v6410_v34, %v7692_v41 }
 0x408   : > { %2114 = vmatpush.msrb.mxu3 %v7393_v39  ;;  %6413 = vrcp.f32 %v1756_v38  ;;  %v2526_v38 = vld [vmem:[%s10885_s28 + $0x98] sm:$0xff] }
 0x409   : > { %5891 = vmatmul.msk.f32.gmra.mxu2 %vm1299_vm2, %v1323_v10  ;;  %6415 = vrcp.f32 %v1866_v9  ;;  %v2516_v10 = vld [vmem:[%s10885_s28 + $0x48] sm:$0xff] }
 0x40a   : > { %2115 = vmatpush.msrb.mxu3 %v7365_v22 }
 0x40c   : > { %v6412_v29 = vpop.eup %6411 }
 0x40d   : > { %v1869_v43 = vpop.xlane.xlu0 %1868  ;;  %v1539_v61 = vpop.xlane.xlu2 %1538  ;;  %v1542_v30 = vmul.f32 %v6412_v29, %v7702_v31  ;;  %v2538_v31 = vld [vmem:[%s10885_s28 + $0xf8] sm:$0xff] }
 0x40e   : > { %v6414_v44 = vpop.eup %6413  ;;  %6417 = vrcp.f32 %v1539_v61 }
 0x40f   : > { %v1762_v47 = vmul.f32 %v6414_v44, %v7711_v16  ;;  %5897 = vmatmul.msk.f32.gmra.mxu3 %vm1299_vm2, %v1653_v46  ;;  %v1759_v39 = vpop.xlane.xlu1 %1758  ;;  %v6416_v22 = vpop.eup %6415  ;;  %v2524_v44 = vld [vmem:[%s10885_s28 + $0x88] sm:$0xff] }
 0x410   : > { %6419 = vrcp.f32 %v1759_v39  ;;  %v1872_v36 = vmul.f32 %v6416_v22, %v7707_v60  ;;  %v2536_v60 = vld [vmem:[%s10885_s28 + $0xe8] sm:$0xff]  ;;  %v2514_v39 = vld [vmem:[%s10885_s28 + $0x38] sm:$0xff]  ;;  %v2523_v22 = vld [vmem:[%s10885_s28 + $0x80] sm:$0xff] }
 0x411   : > { %5894 = vmatmul.msk.f32.vlgmr.msrb.gmra.mxu2 %vm1299_vm2, %v1542_v30  ;;  %5898 = vmatmul.msk.f32.vlgmr.msrb.gmra.mxu0 %vm1299_vm2, %v1762_v47  ;;  %6421 = vrcp.f32 %v1869_v43  ;;  %v2525_v43 = vld [vmem:[%s10885_s28 + $0x90] sm:$0xff] }
 0x414   : > { %v6418_v57 = vpop.eup %6417 }
 0x415   : > { %v1976_v41 = vpop.xlane.xlu2 %1975  ;;  %v2086_v15 = vpop.xlane.xlu0 %2085  ;;  %v1543_v56 = vmul.f32 %v6418_v57, %v7723_v28  ;;  %v2535_v28 = vld [vmem:[%s10885_s28 + $0xe0] sm:$0xff] }
 0x416   : > { %v6420_v16 = vpop.eup %6419  ;;  %6423 = vrcp.f32 %v1976_v41 }
 0x417   : > { %5900 = vmatmul.msk.f32.vlgmr.msra.gmra.mxu3 %vm1299_vm2, %v1872_v36  ;;  %v2196_v50 = vpop.xlane.xlu1 %2195  ;;  %v1763_v63 = vmul.f32 %v6420_v16, %v7731_v40  ;;  %v6422_v32 = vpop.eup %6421  ;;  %v2513_v36 = vld [vmem:[%s10885_s28 + $0x30] sm:$0xff] }
 0x418   : > { %6425 = vrcp.f32 %v2196_v50  ;;  %2690 = vmatpush.msra.mxu3 %v2538_v31  ;;  %v1873_v6 = vmul.f32 %v6422_v32, %v7727_v7  ;;  %v2532_v7 = vld [vmem:[%s10885_s28 + $0xc8] sm:$0xff]  ;;  %v2511_v50 = vld [vmem:[%s10885_s28 + $0x20] sm:$0xff] }
 0x419   : > { %5895 = vmatmul.msk.f32.gmra.mxu2 %vm1299_vm2, %v1543_v56  ;;  %5899 = vmatmul.msk.f32.gmra.mxu0 %vm1299_vm2, %v1763_v63  ;;  %6427 = vrcp.f32 %v2086_v15  ;;  %v2512_v15 = vld [vmem:[%s10885_s28 + $0x28] sm:$0xff] }
 0x41a   : > { %2691 = vmatpush.msra.mxu3 %v2537_v59 }
 0x41c   : > { %v6424_v40 = vpop.eup %6423  ;;  %2692 = vmatpush.msra.mxu3 %v2536_v60 }
 0x41d   : > { %v1979_v23 = vpop.xlane.xlu0 %1978  ;;  %v1982_v25 = vmul.f32 %v6424_v40, %v7745_v19  ;;  %v2522_v19 = vld [vmem:[%s10885_s28 + $0x78] sm:$0xff]  ;;  %v2509_v40 = vld [vmem:[%s10885_s28 + $0x10] sm:$0xff] }
 0x41e   : > { %v6426_v20 = vpop.eup %6425  ;;  %6429 = vrcp.f32 %v1979_v23  ;;  %2693 = vmatpush.msra.mxu3 %v2535_v28  ;;  %2667 = vmatpush.msrb.mxu2 %v2522_v19  ;;  %v2510_v28 = vld [vmem:[%s10885_s28 + $0x18] sm:$0xff]  ;;  %v2508_v23 = vld [vmem:[%s10885_s28 + $0x8] sm:$0xff]  ;;  %v2569_v19 = vld [vmem:[%s10885_s28 + $0x1f0] sm:$0xff] }
 0x41f   : > { %v2202_v4 = vmul.f32 %v6426_v20, %v7749_v2  ;;  %5901 = vmatmul.msk.f32.gmra.mxu3 %vm1299_vm2, %v1873_v6  ;;  %v6428_v33 = vpop.eup %6427  ;;  %v2521_v2 = vld [vmem:[%s10885_s28 + $0x70] sm:$0xff]  ;;  %v2586_v20 = vld [vmem:[%s10885_s28 + $0x278] sm:$0xff] }
 0x420   : > { %2694 = vmatpush.msra.mxu3 %v2534_v27  ;;  %v2092_v26 = vmul.f32 %v6428_v33, %v7741_v62  ;;  %2668 = vmatpush.msrb.mxu2 %v2521_v2  ;;  %v2519_v62 = vld [vmem:[%s10885_s28 + $0x60] sm:$0xff]  ;;  %v2553_v6 = vld [vmem:[%s10885_s28 + $0x170] sm:$0xff] }
 0x421   : > { %5902 = vmatmul.msk.f32.vlgmr.msra.gmra.mxu2 %vm1299_vm2, %v1982_v25  ;;  %5906 = vmatmul.msk.f32.vlgmr.msra.gmra.mxu0 %vm1299_vm2, %v2202_v4  ;;  %v2507_v27 = vld [vmem:[%s10885_s28] sm:$0xff]  ;;  %v2585_v25 = vld [vmem:[%s10885_s28 + $0x270] sm:$0xff]  ;;  %v2552_v4 = vld [vmem:[%s10885_s28 + $0x168] sm:$0xff] }
 0x422   : > { %2695 = vmatpush.msra.mxu3 %v2533_v48  ;;  %2669 = vmatpush.msrb.mxu2 %v2520_v8  ;;  %v2584_v48 = vld [vmem:[%s10885_s28 + $0x268] sm:$0xff]  ;;  %v2551_v33 = vld [vmem:[%s10885_s28 + $0x160] sm:$0xff]  ;;  %v2582_v8 = vld [vmem:[%s10885_s28 + $0x258] sm:$0xff] }
 0x423   : > { %v2583_v2 = vld [vmem:[%s10885_s28 + $0x260] sm:$0xff] }
 0x424   : > { %v6430_v0 = vpop.eup %6429  ;;  %2696 = vmatpush.msra.mxu3 %v2532_v7  ;;  %2670 = vmatpush.msrb.mxu2 %v2519_v62  ;;  %v2570_v7 = vld [vmem:[%s10885_s28 + $0x1f8] sm:$0xff] }
 0x425   : > { %v2089_v45 = vpop.xlane.xlu1 %2088  ;;  %v1983_v37 = vmul.f32 %v6430_v0, %v7762_v55  ;;  %v2518_v55 = vld [vmem:[%s10885_s28 + $0x58] sm:$0xff]  ;;  %2736 = vmatpush.msra.mxu1 %v2570_v7  ;;  %v2568_v0 = vld [vmem:[%s10885_s28 + $0x1e8] sm:$0xff]  ;;  %v2615_v7 = vld [vmem:[%s10885_s28 + $0x360] sm:$0xff] }
 0x426   : > { %6431 = vrcp.f32 %v2089_v45  ;;  %2697 = vmatpush.msra.mxu3 %v2531_v18  ;;  %2671 = vmatpush.msrb.mxu2 %v2518_v55  ;;  %v2550_v18 = vld [vmem:[%s10885_s28 + $0x158] sm:$0xff]  ;;  %v2567_v45 = vld [vmem:[%s10885_s28 + $0x1e0] sm:$0xff]  ;;  %v2565_v55 = vld [vmem:[%s10885_s28 + $0x1d0] sm:$0xff] }
 0x427   : > { %5904 = vmatmul.msk.f32.vlgmr.msrb.gmra.mxu3 %vm1299_vm2, %v2092_v26  ;;  %2737 = vmatpush.msra.mxu1 %v2569_v19  ;;  %v2549_v26 = vld [vmem:[%s10885_s28 + $0x150] sm:$0xff]  ;;  %v2602_v62 = vld [vmem:[%s10885_s28 + $0x2f8] sm:$0xff] }
 0x428   : > { %2698 = vmatpush.msra.mxu3 %v2530_v14  ;;  %2672 = vmatpush.msrb.mxu2 %v2517_v51  ;;  %v2581_v14 = vld [vmem:[%s10885_s28 + $0x250] sm:$0xff]  ;;  %v2564_v51 = vld [vmem:[%s10885_s28 + $0x1c8] sm:$0xff] }
 0x429   : > { %v1457_v21 = vpop.f32.mrf.mxu3  ;;  %5903 = vmatmul.msk.f32.gmra.mxu2 %vm1299_vm2, %v1983_v37  ;;  %2738 = vmatpush.msra.mxu1 %v2568_v0  ;;  %v2580_v37 = vld [vmem:[%s10885_s28 + $0x248] sm:$0xff]  ;;  %v2589_v19 = vld [vmem:[%s10885_s28 + $0x290] sm:$0xff]  ;;  %v2347_v0 = vperm.slane %v7855_v49, 0 }
 0x42a   : > { %v2368_v52 = vadd.f32 %v2348_v5, %v1457_v21  ;;  %v2306_v13 = vpop.xlane.xlu2 %2305  ;;  %2699 = vmatpush.msra.mxu3 %v2529_v53  ;;  %2673 = vmatpush.msrb.mxu2 %v2516_v10  ;;  %v2566_v53 = vld [vmem:[%s10885_s28 + $0x1d8] sm:$0xff]  ;;  %v2547_v21 = vld [vmem:[%s10885_s28 + $0x140] sm:$0xff] }
 0x42b   : > { %6433 = vrcp.f32 %v2306_v13  ;;  %2739 = vmatpush.msra.mxu1 %v2567_v45  ;;  %v2546_v13 = vld [vmem:[%s10885_s28 + $0x138] sm:$0xff]  ;;  %v2599_v10 = vld [vmem:[%s10885_s28 + $0x2e0] sm:$0xff]  ;;  %v2632_v45 = vld [vmem:[%s10885_s28 + $0x3e8] sm:$0xff] }
 0x42c   : > { %v6432_v17 = vpop.eup %6431  ;;  %v2408_v9 = vmin.f32 %v2368_v52, 0.0  ;;  %2700 = vmatpush.msra.mxu3 %v2528_v11  ;;  %vm2388_vm10 = vcmp.gt.f32.partialorder %v2368_v52, 0.0  ;;  %v2579_v11 = vld [vmem:[%s10885_s28 + $0x240] sm:$0xff] }
 0x42d   : > { %v2093_v1 = vmul.f32 %v6432_v17, %v7774_v12  ;;  %v2309_v29 = vpop.xlane.xlu0 %2308  ;;  %v2515_v12 = vld [vmem:[%s10885_s28 + $0x40] sm:$0xff]  ;;  %2740 = vmatpush.msra.mxu1 %v2566_v53  ;;  %v2600_v17 = vld [vmem:[%s10885_s28 + $0x2e8] sm:$0xff] }
 0x42e   : > { %v2429_v34 = vmul.f32 1.442695, %v2408_v9  ;;  %2701 = vmatpush.msra.mxu3 %v2527_v3  ;;  %2674 = vmatpush.msrb.mxu2 %v2515_v12  ;;  %v2578_v3 = vld [vmem:[%s10885_s28 + $0x238] sm:$0xff]  ;;  %v2545_v9 = vld [vmem:[%s10885_s28 + $0x130] sm:$0xff] }
 0x42f   : > { %5905 = vmatmul.msk.f32.gmra.mxu3 %vm1299_vm2, %v2093_v1  ;;  %2741 = vmatpush.msra.mxu1 %v2565_v55  ;;  %v2577_v1 = vld [vmem:[%s10885_s28 + $0x230] sm:$0xff]  ;;  %v2598_v12 = vld [vmem:[%s10885_s28 + $0x2d8] sm:$0xff] }
 0x430   : > { %6435 = vpow2.f32 %v2429_v34  ;;  %2702 = vmatpush.msra.mxu3 %v2526_v38  ;;  %2675 = vmatpush.msrb.mxu2 %v2514_v39  ;;  %v2563_v38 = vld [vmem:[%s10885_s28 + $0x1c0] sm:$0xff]  ;;  %v2544_v34 = vld [vmem:[%s10885_s28 + $0x128] sm:$0xff]  ;;  %v2542_v39 = vld [vmem:[%s10885_s28 + $0x118] sm:$0xff] }
 0x431   : > { %v6434_v61 = vpop.eup %6433  ;;  %6437 = vrcp.f32 %v2309_v29  ;;  %v1460_v46 = vpop.f32.mrf.mxu3  ;;  %2742 = vmatpush.msra.mxu1 %v2564_v51  ;;  %v2576_v29 = vld [vmem:[%s10885_s28 + $0x228] sm:$0xff]  ;;  %v2630_v55 = vld [vmem:[%s10885_s28 + $0x3d8] sm:$0xff] }
 0x432   : > { %v2312_v30 = vmul.f32 %v6434_v61, %v7780_v58  ;;  %v2378_v47 = vadd.f32 %v2348_v5, %v1460_v46  ;;  %2703 = vmatpush.msra.mxu3 %v2525_v43  ;;  %2676 = vmatpush.msrb.mxu2 %v2513_v36  ;;  %v2548_v5 = vld [vmem:[%s10885_s28 + $0x148] sm:$0xff]  ;;  %v2562_v43 = vld [vmem:[%s10885_s28 + $0x1b8] sm:$0xff]  ;;  %v2543_v61 = vld [vmem:[%s10885_s28 + $0x120] sm:$0xff] }
 0x433   : > { %2743 = vmatpush.msra.mxu1 %v2563_v38  ;;  %v2575_v46 = vld [vmem:[%s10885_s28 + $0x220] sm:$0xff]  ;;  %v2596_v36 = vld [vmem:[%s10885_s28 + $0x2c8] sm:$0xff]  ;;  %v2610_v51 = vld [vmem:[%s10885_s28 + $0x338] sm:$0xff] }
 0x434   : > { %v2418_v57 = vmin.f32 %v2378_v47, 0.0  ;;  %5908 = vmatmul.msk.f32.vlgmr.msrb.gmra.mxu1 %vm1299_vm2, %v2312_v30  ;;  %2704 = vmatpush.msra.mxu3 %v2524_v44  ;;  %vm2398_vm11 = vcmp.gt.f32.partialorder %v2378_v47, 0.0  ;;  %v2561_v44 = vld [vmem:[%s10885_s28 + $0x1b0] sm:$0xff] }
 0x435   : > { %2677 = vmatpush.msrb.mxu2 %v2512_v15  ;;  %2744 = vmatpush.msra.mxu1 %v2562_v43  ;;  %v2597_v30 = vld [vmem:[%s10885_s28 + $0x2d0] sm:$0xff]  ;;  %v2559_v15 = vld [vmem:[%s10885_s28 + $0x1a0] sm:$0xff] }
 0x436   : > { %v6436_v58 = vpop.eup %6435  ;;  %v2449_v41 = vmul.f32 1.442695, %v2418_v57  ;;  %2705 = vmatpush.msra.mxu3 %v2523_v22  ;;  %v2574_v22 = vld [vmem:[%s10885_s28 + $0x218] sm:$0xff]  ;;  %v2560_v57 = vld [vmem:[%s10885_s28 + $0x1a8] sm:$0xff]  ;;  %v2609_v38 = vld [vmem:[%s10885_s28 + $0x330] sm:$0xff] }
 0x437   : > { %v6438_v31 = vpop.eup %6437  ;;  %v5911_v16 = vadd.f32 -1.0, %v6436_v58  ;;  %2678 = vmatpush.msrb.mxu2 %v2511_v50  ;;  %2745 = vmatpush.msra.mxu1 %v2561_v44  ;;  %v2541_v58 = vld [vmem:[%s10885_s28 + $0x110] sm:$0xff]  ;;  %v2572_v50 = vld [vmem:[%s10885_s28 + $0x208] sm:$0xff] }
 0x438   : > { %6439 = vpow2.f32 %v2449_v41  ;;  %v2313_v63 = vmul.f32 %v6438_v31, %v7786_v54  ;;  %v2554_v54 = vld [vmem:[%s10885_s28 + $0x178] sm:$0xff]  ;;  %2782 = vmatpush.msrb.mxu3 %v2602_v62  ;;  %v2573_v41 = vld [vmem:[%s10885_s28 + $0x210] sm:$0xff]  ;;  %v2595_v31 = vld [vmem:[%s10885_s28 + $0x2c0] sm:$0xff] }
 0x439   : > { %v2488_v56 = vsel %vm2388_vm10, %v2368_v52, %v5911_v16  ;;  %2679 = vmatpush.msrb.mxu2 %v2510_v28  ;;  %2713 = vmatpush.msrb.mxu0 %v2554_v54  ;;  %v2601_v52 = vld [vmem:[%s10885_s28 + $0x2f0] sm:$0xff]  ;;  %v2540_v16 = vld [vmem:[%s10885_s28 + $0x108] sm:$0xff]  ;;  %v2618_v54 = vld [vmem:[%s10885_s28 + $0x378] sm:$0xff] }
 0x43a   : > { %2706 = vmatmul.f32.vlgmr.msra.gmra.mxu3 %v2488_v56  ;;  %2746 = vmatpush.msra.mxu1 %v2560_v57  ;;  %v2558_v56 = vld [vmem:[%s10885_s28 + $0x198] sm:$0xff]  ;;  %v2557_v28 = vld [vmem:[%s10885_s28 + $0x190] sm:$0xff] }
 0x43b   : > { %2680 = vmatpush.msrb.mxu2 %v2509_v40  ;;  %2714 = vmatpush.msrb.mxu0 %v2553_v6  ;;  %v2593_v40 = vld [vmem:[%s10885_s28 + $0x2b0] sm:$0xff]  ;;  %v2556_v6 = vld [vmem:[%s10885_s28 + $0x188] sm:$0xff]  ;;  %v2666_v62 = vld [vmem:[%s10885_s28 + $0x4f8] sm:$0xff] }
 0x43c   : > { %5909 = vmatmul.msk.f32.gmra.mxu1 %vm1299_vm2, %v2313_v63  ;;  %2783 = vmatpush.msrb.mxu3 %v2601_v52  ;;  %v2594_v63 = vld [vmem:[%s10885_s28 + $0x2b8] sm:$0xff]  ;;  %v2665_v52 = vld [vmem:[%s10885_s28 + $0x4f0] sm:$0xff] }
 0x43d   : > { %2681 = vmatpush.msrb.mxu2 %v2508_v23  ;;  %2715 = vmatpush.msrb.mxu0 %v2552_v4  ;;  %v2616_v4 = vld [vmem:[%s10885_s28 + $0x368] sm:$0xff]  ;;  %v2626_v57 = vld [vmem:[%s10885_s28 + $0x3b8] sm:$0xff] }
 0x43e   : > { %v6440_v59 = vpop.eup %6439  ;;  %2784 = vmatpush.msrb.mxu3 %v2600_v17  ;;  %2747 = vmatpush.msra.mxu1 %v2559_v15  ;;  %v2629_v17 = vld [vmem:[%s10885_s28 + $0x3d0] sm:$0xff] }
 0x43f   : > { %v5921_v60 = vadd.f32 -1.0, %v6440_v59  ;;  %2682 = vmatpush.msrb.mxu2 %v2507_v27  ;;  %2716 = vmatpush.msrb.mxu0 %v2551_v33  ;;  %v2539_v59 = vld [vmem:[%s10885_s28 + $0x100] sm:$0xff]  ;;  %v2592_v27 = vld [vmem:[%s10885_s28 + $0x2a8] sm:$0xff]  ;;  %v2634_v33 = vld [vmem:[%s10885_s28 + $0x3f8] sm:$0xff] }
 0x440   : > { %2785 = vmatpush.msrb.mxu3 %v2599_v10  ;;  %2748 = vmatpush.msra.mxu1 %v2558_v56  ;;  %v2628_v10 = vld [vmem:[%s10885_s28 + $0x3c8] sm:$0xff] }
 0x441   : > { %v2498_v32 = vsel %vm2398_vm11, %v2378_v47, %v5921_v60  ;;  %2759 = vmatpush.msra.mxu2 %v2586_v20  ;;  %2717 = vmatpush.msrb.mxu0 %v2550_v18  ;;  %v2571_v60 = vld [vmem:[%s10885_s28 + $0x200] sm:$0xff]  ;;  %v2617_v20 = vld [vmem:[%s10885_s28 + $0x370] sm:$0xff]  ;;  %v2660_v56 = vld [vmem:[%s10885_s28 + $0x4c8] sm:$0xff] }
 0x442   : > { %2709 = vmatmul.f32.gmra.mxu3 %v2498_v32  ;;  %2749 = vmatpush.msra.mxu1 %v2557_v28  ;;  %v2633_v18 = vld [vmem:[%s10885_s28 + $0x3f0] sm:$0xff] }
 0x443   : > { %2760 = vmatpush.msra.mxu2 %v2585_v25  ;;  %2718 = vmatpush.msrb.mxu0 %v2549_v26  ;;  %v2591_v25 = vld [vmem:[%s10885_s28 + $0x2a0] sm:$0xff]  ;;  %v2613_v26 = vld [vmem:[%s10885_s28 + $0x350] sm:$0xff] }
 0x444   : > { %2786 = vmatpush.msrb.mxu3 %v2598_v12  ;;  %2750 = vmatpush.msra.mxu1 %v2556_v6  ;;  %v2351_v12 = vperm.slane %v7855_v49, 4  ;;  %v2605_v28 = vld [vmem:[%s10885_s28 + $0x310] sm:$0xff]  ;;  %v2659_v6 = vld [vmem:[%s10885_s28 + $0x4c0] sm:$0xff] }
 0x445   : > { %2761 = vmatpush.msra.mxu2 %v2584_v48  ;;  %2719 = vmatpush.msrb.mxu0 %v2548_v5  ;;  %v2590_v48 = vld [vmem:[%s10885_s28 + $0x298] sm:$0xff]  ;;  %v2612_v5 = vld [vmem:[%s10885_s28 + $0x348] sm:$0xff] }
 0x446   : > { %2787 = vmatpush.msrb.mxu3 %v2597_v30  ;;  %v2662_v30 = vld [vmem:[%s10885_s28 + $0x4d8] sm:$0xff] }
 0x447   : > { %2762 = vmatpush.msra.mxu2 %v2583_v2  ;;  %2720 = vmatpush.msrb.mxu0 %v2547_v21  ;;  %v2614_v2 = vld [vmem:[%s10885_s28 + $0x358] sm:$0xff] }
 0x448   : > { %2788 = vmatpush.msrb.mxu3 %v2596_v36 }
 0x449   : > { %2763 = vmatpush.msra.mxu2 %v2582_v8  ;;  %2721 = vmatpush.msrb.mxu0 %v2546_v13  ;;  %v2588_v8 = vld [vmem:[%s10885_s28 + $0x288] sm:$0xff] }
 0x44a   : > { %2789 = vmatpush.msrb.mxu3 %v2595_v31 }
 0x44b   : > { %2764 = vmatpush.msra.mxu2 %v2581_v14  ;;  %2722 = vmatpush.msrb.mxu0 %v2545_v9  ;;  %v2587_v14 = vld [vmem:[%s10885_s28 + $0x280] sm:$0xff]  ;;  %v2664_v9 = vld [vmem:[%s10885_s28 + $0x4e8] sm:$0xff] }
 0x44c   : > { %2790 = vmatpush.msrb.mxu3 %v2594_v63 }
 0x44d   : > { %2765 = vmatpush.msra.mxu2 %v2580_v37  ;;  %2723 = vmatpush.msrb.mxu0 %v2544_v34  ;;  %v2631_v37 = vld [vmem:[%s10885_s28 + $0x3e0] sm:$0xff] }
 0x44e   : > { %2791 = vmatpush.msrb.mxu3 %v2593_v40  ;;  %v2624_v40 = vld [vmem:[%s10885_s28 + $0x3a8] sm:$0xff] }
 0x44f   : > { %2766 = vmatpush.msra.mxu2 %v2579_v11  ;;  %2724 = vmatpush.msrb.mxu0 %v2543_v61  ;;  %v2611_v11 = vld [vmem:[%s10885_s28 + $0x340] sm:$0xff]  ;;  %v2608_v61 = vld [vmem:[%s10885_s28 + $0x328] sm:$0xff] }
 0x450   : > { %2792 = vmatpush.msrb.mxu3 %v2592_v27 }
 0x451   : > { %2767 = vmatpush.msra.mxu2 %v2578_v3  ;;  %2725 = vmatpush.msrb.mxu0 %v2542_v39  ;;  %v2350_v3 = vperm.slane %v7855_v49, 3 }
 0x452   : > { %2793 = vmatpush.msrb.mxu3 %v2591_v25  ;;  %v2604_v25 = vld [vmem:[%s10885_s28 + $0x308] sm:$0xff] }
 0x453   : > { %2768 = vmatpush.msra.mxu2 %v2577_v1  ;;  %2726 = vmatpush.msrb.mxu0 %v2541_v58  ;;  %v2661_v58 = vld [vmem:[%s10885_s28 + $0x4d0] sm:$0xff] }
 0x454   : > { %2794 = vmatpush.msrb.mxu3 %v2590_v48 }
 0x455   : > { %2769 = vmatpush.msra.mxu2 %v2576_v29  ;;  %2727 = vmatpush.msrb.mxu0 %v2540_v16  ;;  %v2663_v29 = vld [vmem:[%s10885_s28 + $0x4e0] sm:$0xff]  ;;  %v2606_v16 = vld [vmem:[%s10885_s28 + $0x318] sm:$0xff] }
 0x456   : > { %2795 = vmatpush.msrb.mxu3 %v2589_v19 }
 0x457   : > { %2770 = vmatpush.msra.mxu2 %v2575_v46  ;;  %2728 = vmatpush.msrb.mxu0 %v2539_v59  ;;  %v2627_v46 = vld [vmem:[%s10885_s28 + $0x3c0] sm:$0xff] }
 0x458   : > { %2796 = vmatpush.msrb.mxu3 %v2588_v8  ;;  %v2622_v8 = vld [vmem:[%s10885_s28 + $0x398] sm:$0xff] }
 0x459   : > { %2771 = vmatpush.msra.mxu2 %v2574_v22  ;;  %2805 = vmatpush.msra.mxu0 %v2618_v54  ;;  %v2607_v22 = vld [vmem:[%s10885_s28 + $0x320] sm:$0xff] }
 0x45a   : > { %2797 = vmatpush.msrb.mxu3 %v2587_v14  ;;  %v2648_v14 = vld [vmem:[%s10885_s28 + $0x468] sm:$0xff] }
 0x45b   : > { %2772 = vmatpush.msra.mxu2 %v2573_v41  ;;  %2806 = vmatpush.msra.mxu0 %v2617_v20 }
 0x45c   : > { %2874 = vmatpush.msra.mxu3 %v2666_v62 }
 0x45d   : > { %2773 = vmatpush.msra.mxu2 %v2572_v50  ;;  %2807 = vmatpush.msra.mxu0 %v2616_v4  ;;  %v2625_v50 = vld [vmem:[%s10885_s28 + $0x3b0] sm:$0xff]  ;;  %v2623_v4 = vld [vmem:[%s10885_s28 + $0x3a0] sm:$0xff] }
 0x45e   : > { %2875 = vmatpush.msra.mxu3 %v2665_v52 }
 0x45f   : > { %2774 = vmatpush.msra.mxu2 %v2571_v60  ;;  %2808 = vmatpush.msra.mxu0 %v2615_v7 }
 0x460   : > { %2876 = vmatpush.msra.mxu3 %v2664_v9  ;;  %v2647_v9 = vld [vmem:[%s10885_s28 + $0x460] sm:$0xff] }
 0x461   : > { %2809 = vmatpush.msra.mxu0 %v2614_v2 }
 0x462   : > { %2877 = vmatpush.msra.mxu3 %v2663_v29 }
 0x463   : > { %2810 = vmatpush.msra.mxu0 %v2613_v26 }
 0x464   : > { %2878 = vmatpush.msra.mxu3 %v2662_v30 }
 0x465   : > { %2811 = vmatpush.msra.mxu0 %v2612_v5  ;;  %v2657_v5 = vld [vmem:[%s10885_s28 + $0x4b0] sm:$0xff] }
 0x466   : > { %2879 = vmatpush.msra.mxu3 %v2661_v58 }
 0x467   : > { %2812 = vmatpush.msra.mxu0 %v2611_v11  ;;  %v8293_v11 = vld [vmem:[%s10886_s1 + $0x8] sm:$0x3] }
 0x468   : > { %2880 = vmatpush.msra.mxu3 %v2660_v56  ;;  %v2355_v29 = vperm.slane %v8293_v11, 0 }
 0x469   : > { %2813 = vmatpush.msra.mxu0 %v2610_v51 }
 0x46a   : > { %2881 = vmatpush.msra.mxu3 %v2659_v6 }
 0x46b   : > { %2814 = vmatpush.msra.mxu0 %v2609_v38 }
 0x46d   : > { %2815 = vmatpush.msra.mxu0 %v2608_v61 }
 0x46f   : > { %2816 = vmatpush.msra.mxu0 %v2607_v22  ;;  %v2654_v22 = vld [vmem:[%s10885_s28 + $0x498] sm:$0xff] }
 0x470   : > { %v2199_v47 = vpop.xlane.xlu2 %2198 }
 0x471   : > { %6441 = vrcp.f32 %v2199_v47  ;;  %2817 = vmatpush.msra.mxu0 %v2606_v16 }
 0x473   : > { %2818 = vmatpush.msra.mxu0 %v2605_v28 }
 0x475   : > { %2819 = vmatpush.msra.mxu0 %v2604_v25 }
 0x477   : > { %v6442_v32 = vpop.eup %6441 }
 0x478   : > { %v2203_v23 = vmul.f32 %v6442_v32, %v7793_v35  ;;  %v2555_v35 = vld [vmem:[%s10885_s28 + $0x180] sm:$0xff]  ;;  %v2349_v32 = vperm.slane %v7855_v49, 2 }
 0x479   : > { %2751 = vmatpush.msra.mxu1 %v2555_v35  ;;  %v2650_v35 = vld [vmem:[%s10885_s28 + $0x478] sm:$0xff] }
 0x47a   : > { %5907 = vmatmul.msk.f32.gmra.mxu0 %vm1299_vm2, %v2203_v23 }
 0x47b   : > { %2828 = vmatpush.msrb.mxu1 %v2634_v33  ;;  %v2658_v33 = vld [vmem:[%s10885_s28 + $0x4b8] sm:$0xff] }
 0x47c   : > { %2882 = vmatpush.msra.mxu3 %v2658_v33  ;;  %v2642_v33 = vld [vmem:[%s10885_s28 + $0x438] sm:$0xff] }
 0x47d   : > { %2829 = vmatpush.msrb.mxu1 %v2633_v18  ;;  %v2649_v18 = vld [vmem:[%s10885_s28 + $0x470] sm:$0xff] }
 0x47e   : > { %2883 = vmatpush.msra.mxu3 %v2657_v5 }
 0x47f   : > { %2830 = vmatpush.msrb.mxu1 %v2632_v45  ;;  %v2352_v45 = vperm.slane %v7855_v49, 5 }
 0x481   : > { %2831 = vmatpush.msrb.mxu1 %v2631_v37 }
 0x483   : > { %2832 = vmatpush.msrb.mxu1 %v2630_v55  ;;  %v2621_v55 = vld [vmem:[%s10885_s28 + $0x390] sm:$0xff] }
 0x484   : > { %v1347_v53 = vpop.f32.mrf.mxu2 }
 0x485   : > { %v8168_v21 = vadd.f32 %v2347_v0, %v1347_v53  ;;  %2833 = vmatpush.msrb.mxu1 %v2629_v17 }
 0x487   : > { %v2407_v13 = vmin.f32 %v8168_v21, 0.0  ;;  %2834 = vmatpush.msrb.mxu1 %v2628_v10  ;;  %vm2387_vm12 = vcmp.gt.f32.partialorder %v8168_v21, 0.0 }
 0x489   : > { %v2427_v1 = vmul.f32 1.442695, %v2407_v13  ;;  %2835 = vmatpush.msrb.mxu1 %v2627_v46  ;;  %v2656_v13 = vld [vmem:[%s10885_s28 + $0x4a8] sm:$0xff] }
 0x48a   : > { %v1677_v34 = vpop.f32.mrf.mxu3  ;;  %2884 = vmatpush.msra.mxu3 %v2656_v13 }
 0x48b   : > { %6443 = vpow2.f32 %v2427_v1  ;;  %v8199_v43 = vadd.f32 %v2350_v3, %v1677_v34  ;;  %2836 = vmatpush.msrb.mxu1 %v2626_v57  ;;  %v2620_v1 = vld [vmem:[%s10885_s28 + $0x388] sm:$0xff] }
 0x48c   : > { %v1350_v44 = vpop.f32.mrf.mxu2 }
 0x48d   : > { %v2410_v47 = vmin.f32 %v8199_v43, 0.0  ;;  %v8212_v39 = vadd.f32 %v2347_v0, %v1350_v44  ;;  %2837 = vmatpush.msrb.mxu1 %v2625_v50  ;;  %v2603_v0 = vld [vmem:[%s10885_s28 + $0x300] sm:$0xff]  ;;  %vm2390_vm13 = vcmp.gt.f32.partialorder %v8199_v43, 0.0 }
 0x48e   : > { %v1787_v36 = vpop.f32.mrf.mxu0  ;;  %2820 = vmatpush.msra.mxu0 %v2603_v0  ;;  %v2619_v44 = vld [vmem:[%s10885_s28 + $0x380] sm:$0xff] }
 0x48f   : > { %v2433_v41 = vmul.f32 1.442695, %v2410_v47  ;;  %v2417_v15 = vmin.f32 %v8212_v39, 0.0  ;;  %v8226_v31 = vadd.f32 %v2351_v12, %v1787_v36  ;;  %2838 = vmatpush.msrb.mxu1 %v2624_v40  ;;  %vm2397_vm14 = vcmp.gt.f32.partialorder %v8212_v39, 0.0  ;;  %v2652_v40 = vld [vmem:[%s10885_s28 + $0x488] sm:$0xff] }
 0x491   : > { %v6444_v63 = vpop.eup %6443  ;;  %6445 = vpow2.f32 %v2433_v41  ;;  %v2447_v59 = vmul.f32 1.442695, %v2417_v15  ;;  %v2411_v60 = vmin.f32 %v8226_v31, 0.0  ;;  %2839 = vmatpush.msrb.mxu1 %v2623_v4  ;;  %v2645_v41 = vld [vmem:[%s10885_s28 + $0x450] sm:$0xff]  ;;  %vm2391_vm1 = vcmp.gt.f32.partialorder %v8226_v31, 0.0 }
 0x492   : > { %v1680_v54 = vpop.f32.mrf.mxu3  ;;  %v5910_v23 = vadd.f32 -1.0, %v6444_v63 }
 0x493   : > { %v2435_v27 = vmul.f32 1.442695, %v2411_v60  ;;  %v8248_v20 = vadd.f32 %v2350_v3, %v1680_v54  ;;  %6447 = vpow2.f32 %v2447_v59  ;;  %2840 = vmatpush.msrb.mxu1 %v2622_v8  ;;  %v2644_v59 = vld [vmem:[%s10885_s28 + $0x448] sm:$0xff] }
 0x494   : > { %v1567_v48 = vpop.f32.mrf.mxu2  ;;  %v2487_v7 = vsel %vm2387_vm12, %v8168_v21, %v5910_v23 }
 0x495   : > { %v2420_v19 = vmin.f32 %v8248_v20, 0.0  ;;  %v8267_v2 = vadd.f32 %v2349_v32, %v1567_v48  ;;  %2683 = vmatmul.f32.vlgmr.msrb.gmra.mxu2 %v2487_v7  ;;  %6449 = vpow2.f32 %v2435_v27  ;;  %2841 = vmatpush.msrb.mxu1 %v2621_v55  ;;  %vm2400_vm15 = vcmp.gt.f32.partialorder %v8248_v20, 0.0  ;;  %v2643_v27 = vld [vmem:[%s10885_s28 + $0x440] sm:$0xff] }
 0x496   : > { %v1790_v26 = vpop.f32.mrf.mxu0  ;;  %2851 = vmatpush.msrb.mxu2 %v2650_v35 }
 0x497   : > { %v6446_v37 = vpop.eup %6445  ;;  %v2453_v53 = vmul.f32 1.442695, %v2420_v19  ;;  %v2409_v62 = vmin.f32 %v8267_v2, 0.0  ;;  %v8288_v21 = vadd.f32 %v2351_v12, %v1790_v26  ;;  %v2655_v12 = vld [vmem:[%s10885_s28 + $0x4a0] sm:$0xff]  ;;  %2842 = vmatpush.msrb.mxu1 %v2620_v1  ;;  %vm2389_vm3 = vcmp.gt.f32.partialorder %v8267_v2, 0.0 }
 0x498   : > { %2852 = vmatpush.msrb.mxu2 %v2649_v18  ;;  %v5913_v52 = vadd.f32 -1.0, %v6446_v37  ;;  %2885 = vmatpush.msra.mxu3 %v2655_v12  ;;  %v2354_v37 = vperm.slane %v7855_v49, 7 }
 0x499   : > { %v6448_v3 = vpop.eup %6447  ;;  %v2431_v51 = vmul.f32 1.442695, %v2409_v62  ;;  %v2421_v17 = vmin.f32 %v8288_v21, 0.0  ;;  %6451 = vpow2.f32 %v2453_v53  ;;  %2843 = vmatpush.msrb.mxu1 %v2619_v44  ;;  %v2640_v53 = vld [vmem:[%s10885_s28 + $0x428] sm:$0xff]  ;;  %vm2401_vm7 = vcmp.gt.f32.partialorder %v8288_v21, 0.0  ;;  %v2637_v44 = vld [vmem:[%s10885_s28 + $0x410] sm:$0xff] }
 0x49a   : > { %v1897_v38 = vpop.f32.mrf.mxu3  ;;  %2853 = vmatpush.msrb.mxu2 %v2648_v14  ;;  %v2490_v10 = vsel %vm2390_vm13, %v8199_v43, %v5913_v52  ;;  %v5920_v34 = vadd.f32 -1.0, %v6448_v3  ;;  %v2646_v43 = vld [vmem:[%s10885_s28 + $0x458] sm:$0xff]  ;;  %2886 = vmatpush.msra.mxu3 %v2654_v22  ;;  %v2641_v14 = vld [vmem:[%s10885_s28 + $0x430] sm:$0xff]  ;;  %v2639_v3 = vld [vmem:[%s10885_s28 + $0x420] sm:$0xff] }
 0x49b   : > { %6453 = vpow2.f32 %v2431_v51  ;;  %v2455_v61 = vmul.f32 1.442695, %v2421_v17  ;;  %v8316_v46 = vadd.f32 %v2352_v45, %v1897_v38  ;;  %2752 = vmatmul.f32.vlgmr.msra.gmra.mxu1 %v2490_v10  ;;  %v6450_v57 = vpop.eup %6449  ;;  %v2638_v38 = vld [vmem:[%s10885_s28 + $0x418] sm:$0xff] }
 0x49c   : > { %v1570_v30 = vpop.f32.mrf.mxu2  ;;  %2854 = vmatpush.msrb.mxu2 %v2647_v9  ;;  %v2497_v47 = vsel %vm2397_vm14, %v8212_v39, %v5920_v34  ;;  %v2653_v39 = vld [vmem:[%s10885_s28 + $0x490] sm:$0xff]  ;;  %v5914_v28 = vadd.f32 -1.0, %v6450_v57 }
 0x49d   : > { %v2412_v36 = vmin.f32 %v8316_v46, 0.0  ;;  %v8332_v58 = vadd.f32 %v2349_v32, %v1570_v30  ;;  %2686 = vmatmul.f32.gmra.mxu2 %v2497_v47  ;;  %6455 = vpow2.f32 %v2455_v61  ;;  %v2353_v32 = vperm.slane %v7855_v49, 6  ;;  %2887 = vmatpush.msra.mxu3 %v2653_v39  ;;  %v2635_v39 = vld [vmem:[%s10885_s28 + $0x400] sm:$0xff] }
 0x49e   : > { %v2227_v15 = vpop.f32.mrf.mxu0  ;;  %2855 = vmatpush.msrb.mxu2 %v2646_v43  ;;  %v2491_v0 = vsel %vm2391_vm1, %v8226_v31, %v5914_v28  ;;  %vm2392_vm5 = vcmp.gt.f32.partialorder %v8316_v46, 0.0  ;;  %v2356_v30 = vperm.slane %v8293_v11, 1 }
 0x49f   : > { %v6452_v16 = vpop.eup %6451  ;;  %v2437_v50 = vmul.f32 1.442695, %v2412_v36  ;;  %v2419_v56 = vmin.f32 %v8332_v58, 0.0  ;;  %v8343_v63 = vadd.f32 %v2355_v29, %v2227_v15  ;;  %2888 = vmatpush.msra.mxu3 %v2652_v40  ;;  %vm2399_vm6 = vcmp.gt.f32.partialorder %v8332_v58, 0.0 }
 0x4a0   : > { %2856 = vmatpush.msrb.mxu2 %v2645_v41  ;;  %v5923_v60 = vadd.f32 -1.0, %v6452_v16 }
 0x4a1   : > { %v6454_v54 = vpop.eup %6453  ;;  %6457 = vpow2.f32 %v2437_v50  ;;  %v2451_v23 = vmul.f32 1.442695, %v2419_v56  ;;  %v2415_v6 = vmin.f32 %v8343_v63, 0.0  ;;  %vm2395_vm10 = vcmp.gt.f32.partialorder %v8343_v63, 0.0 }
 0x4a2   : > { %v1900_v35 = vpop.f32.mrf.mxu3  ;;  %2857 = vmatpush.msrb.mxu2 %v2644_v59  ;;  %v2500_v25 = vsel %vm2400_vm15, %v8248_v20, %v5923_v60  ;;  %v5912_v4 = vadd.f32 -1.0, %v6454_v54  ;;  %v2651_v20 = vld [vmem:[%s10885_s28 + $0x480] sm:$0xff] }
 0x4a3   : > { %v2443_v48 = vmul.f32 1.442695, %v2415_v6  ;;  %v8361_v7 = vadd.f32 %v2352_v45, %v1900_v35  ;;  %2755 = vmatmul.f32.gmra.mxu1 %v2500_v25  ;;  %6459 = vpow2.f32 %v2451_v23  ;;  %v6456_v8 = vpop.eup %6455  ;;  %2889 = vmatpush.msra.mxu3 %v2651_v20 }
 0x4a4   : > { %v2007_v19 = vpop.f32.mrf.mxu2  ;;  %2858 = vmatpush.msrb.mxu2 %v2643_v27  ;;  %v2489_v18 = vsel %vm2389_vm3, %v8267_v2, %v5912_v4  ;;  %v5924_v55 = vadd.f32 -1.0, %v6456_v8 }
 0x4a5   : > { %v2422_v26 = vmin.f32 %v8361_v7, 0.0  ;;  %v8375_v45 = vadd.f32 %v2353_v32, %v2007_v19  ;;  %2729 = vmatmul.f32.vlgmr.msrb.gmra.mxu0 %v2489_v18  ;;  %2775 = vmatmul.f32.vlgmr.msra.gmra.mxu2 %v2491_v0  ;;  %6461 = vpow2.f32 %v2443_v48  ;;  %vm2402_vm8 = vcmp.gt.f32.partialorder %v8361_v7, 0.0 }
 0x4a6   : > { %2859 = vmatpush.msrb.mxu2 %v2642_v33  ;;  %v2501_v12 = vsel %vm2401_vm7, %v8288_v21, %v5924_v55  ;;  %v2636_v21 = vld [vmem:[%s10885_s28 + $0x408] sm:$0xff] }
 0x4a7   : > { %v6458_v5 = vpop.eup %6457  ;;  %v2457_v2 = vmul.f32 1.442695, %v2422_v26  ;;  %v2413_v31 = vmin.f32 %v8375_v45, 0.0  ;;  %vm2393_vm9 = vcmp.gt.f32.partialorder %v8375_v45, 0.0 }
 0x4a8   : > { %2860 = vmatpush.msrb.mxu2 %v2641_v14  ;;  %v5915_v62 = vadd.f32 -1.0, %v6458_v5 }
 0x4a9   : > { %v6460_v52 = vpop.eup %6459  ;;  %v2439_v13 = vmul.f32 1.442695, %v2413_v31  ;;  %6463 = vpow2.f32 %v2457_v2 }
 0x4aa   : > { %v2117_v51 = vpop.f32.mrf.mxu3  ;;  %2861 = vmatpush.msrb.mxu2 %v2640_v53  ;;  %v2492_v17 = vsel %vm2392_vm5, %v8316_v46, %v5915_v62  ;;  %v5922_v9 = vadd.f32 -1.0, %v6460_v52 }
 0x4ab   : > { %6465 = vpow2.f32 %v2439_v13  ;;  %v2374_v1 = vadd.f32 %v2354_v37, %v2117_v51  ;;  %2798 = vmatmul.f32.vlgmr.msrb.gmra.mxu3 %v2492_v17  ;;  %v6462_v61 = vpop.eup %6461 }
 0x4ac   : > { %v2010_v10 = vpop.f32.mrf.mxu2  ;;  %2862 = vmatpush.msrb.mxu2 %v2639_v3  ;;  %v2499_v34 = vsel %vm2399_vm6, %v8332_v58, %v5922_v9  ;;  %v5918_v49 = vadd.f32 -1.0, %v6462_v61 }
 0x4ad   : > { %v2414_v46 = vmin.f32 %v2374_v1, 0.0  ;;  %v2383_v43 = vadd.f32 %v2353_v32, %v2010_v10  ;;  %2732 = vmatmul.f32.gmra.mxu0 %v2499_v34  ;;  %2778 = vmatmul.f32.gmra.mxu2 %v2501_v12  ;;  %vm2394_vm11 = vcmp.gt.f32.partialorder %v2374_v1, 0.0 }
 0x4ae   : > { %2863 = vmatpush.msrb.mxu2 %v2638_v38  ;;  %v2495_v40 = vsel %vm2395_vm10, %v8343_v63, %v5918_v49 }
 0x4af   : > { %v6464_v47 = vpop.eup %6463  ;;  %v2441_v22 = vmul.f32 1.442695, %v2414_v46  ;;  %v2423_v57 = vmin.f32 %v2383_v43, 0.0  ;;  %vm2403_vm12 = vcmp.gt.f32.partialorder %v2383_v43, 0.0 }
 0x4b0   : > { %2864 = vmatpush.msrb.mxu2 %v2637_v44  ;;  %v5925_v36 = vadd.f32 -1.0, %v6464_v47 }
 0x4b1   : > { %v6466_v58 = vpop.eup %6465  ;;  %6467 = vpow2.f32 %v2441_v22  ;;  %v2459_v41 = vmul.f32 1.442695, %v2423_v57  ;;  %v2337_v15 = vpop.f32.mrf.mxu1 }
 0x4b2   : > { %v2376_v16 = vadd.f32 %v2356_v30, %v2337_v15  ;;  %v2120_v50 = vpop.f32.mrf.mxu3  ;;  %2865 = vmatpush.msrb.mxu2 %v2636_v21  ;;  %v2502_v56 = vsel %vm2402_vm8, %v8361_v7, %v5925_v36  ;;  %v5916_v59 = vadd.f32 -1.0, %v6466_v58 }
 0x4b3   : > { %v2384_v60 = vadd.f32 %v2354_v37, %v2120_v50  ;;  %2801 = vmatmul.f32.gmra.mxu3 %v2502_v56  ;;  %6469 = vpow2.f32 %v2459_v41 }
 0x4b4   : > { %v2416_v32 = vmin.f32 %v2376_v16, 0.0  ;;  %2866 = vmatpush.msrb.mxu2 %v2635_v39  ;;  %v2493_v28 = vsel %vm2393_vm9, %v8375_v45, %v5916_v59  ;;  %vm2396_vm13 = vcmp.gt.f32.partialorder %v2376_v16, 0.0  ;;  %v6353_v59 = vld [vmem:[%s10843_s9] ss:$0 sm:$0xff] }
 0x4b5   : > { %v2424_v54 = vmin.f32 %v2384_v60, 0.0  ;;  %2821 = vmatmul.f32.vlgmr.msra.gmra.mxu0 %v2493_v28  ;;  %2867 = vmatmul.f32.vlgmr.msrb.gmra.mxu2 %v2495_v40  ;;  %vm2404_vm14 = vcmp.gt.f32.partialorder %v2384_v60, 0.0 }
 0x4b6   : > { %v2445_v23 = vmul.f32 1.442695, %v2416_v32 }
 0x4b7   : > { %v6468_v6 = vpop.eup %6467  ;;  %v2461_v27 = vmul.f32 1.442695, %v2424_v54 }
 0x4b8   : > { %6471 = vpow2.f32 %v2445_v23  ;;  %v5917_v35 = vadd.f32 -1.0, %v6468_v6 }
 0x4b9   : > { %v6470_v25 = vpop.eup %6469  ;;  %v2340_v4 = vpop.f32.mrf.mxu1  ;;  %6473 = vpow2.f32 %v2461_v27 }
 0x4ba   : > { %v2386_v48 = vadd.f32 %v2356_v30, %v2340_v4  ;;  %v2494_v7 = vsel %vm2394_vm11, %v2374_v1, %v5917_v35  ;;  %v5926_v33 = vadd.f32 -1.0, %v6470_v25 }
 0x4bb   : > { %2844 = vmatmul.f32.vlgmr.msrb.gmra.mxu1 %v2494_v7 }
 0x4bc   : > { %v2426_v20 = vmin.f32 %v2386_v48, 0.0  ;;  %v2503_v19 = vsel %vm2403_vm12, %v2383_v43, %v5926_v33  ;;  %vm2406_vm15 = vcmp.gt.f32.partialorder %v2386_v48, 0.0 }
 0x4bd   : > { %2824 = vmatmul.f32.gmra.mxu0 %v2503_v19  ;;  %v2707_v51 = vpop.f32.mrf.mxu3 }
 0x4be   : > { %v6472_v63 = vpop.eup %6471  ;;  %v2465_v18 = vmul.f32 1.442695, %v2426_v20 }
 0x4bf   : > { %v6474_v0 = vpop.eup %6473  ;;  %v5919_v8 = vadd.f32 -1.0, %v6472_v63  ;;  %v6087_v63 = vld [vmem:[%s10882_s26 + $0x9b8] sm:$0xff] }
 0x4c0   : > { %v5927_v26 = vadd.f32 -1.0, %v6474_v0  ;;  %6475 = vpow2.f32 %v2465_v18  ;;  %v6077_v18 = vld [vmem:[%s10882_s26 + $0x968] sm:$0xff]  ;;  %3256 = vmatpush.msra.mxu2 %v6087_v63  ;;  %v6067_v0 = vld [vmem:[%s10882_s26 + $0x918] sm:$0xff] }
 0x4c1   : > { %v2496_v45 = vsel %vm2396_vm13, %v2376_v16, %v5919_v8  ;;  %v6057_v8 = vld [vmem:[%s10882_s26 + $0x8c8] sm:$0xff]  ;;  %v5991_v63 = vld [vmem:[%s10882_s26 + $0x6b8] sm:$0xff] }
 0x4c2   : > { %2890 = vmatmul.f32.vlgmr.msra.gmra.mxu3 %v2496_v45  ;;  %v2504_v14 = vsel %vm2404_vm14, %v2384_v60, %v5927_v26  ;;  %v6354_v60 = vld [vmem:[%s10842_s8] ss:$0 sm:$0xff]  ;;  %3257 = vmatpush.msra.mxu2 %v6077_v18  ;;  %v6047_v26 = vld [vmem:[%s10882_s26 + $0x878] sm:$0xff]  ;;  %v6037_v45 = vld [vmem:[%s10882_s26 + $0x828] sm:$0xff] }
 0x4c3   : > { %2847 = vmatmul.f32.gmra.mxu1 %v2504_v14  ;;  %v6027_v14 = vld [vmem:[%s10882_s26 + $0x7d8] sm:$0xff]  ;;  %v5978_v18 = vld [vmem:[%s10882_s26 + $0x650] sm:$0xff] }
 0x4c4   : > { %3258 = vmatpush.msra.mxu2 %v6067_v0 }
 0x4c5   : > { %v2710_v9 = vpop.f32.mrf.mxu3 }
 0x4c6   : > { %v6476_v5 = vpop.eup %6475  ;;  %3259 = vmatpush.msra.mxu2 %v6057_v8  ;;  %v5981_v8 = vld [vmem:[%s10882_s26 + $0x668] sm:$0xff] }
 0x4c7   : > { %v5929_v2 = vadd.f32 -1.0, %v6476_v5  ;;  %v6017_v5 = vld [vmem:[%s10882_s26 + $0x788] sm:$0xff] }
 0x4c8   : > { %3260 = vmatpush.msra.mxu2 %v6047_v26 }
 0x4c9   : > { %v2506_v31 = vsel %vm2406_vm15, %v2386_v48, %v5929_v2  ;;  %v6007_v2 = vld [vmem:[%s10882_s26 + $0x738] sm:$0xff] }
 0x4ca   : > { %2893 = vmatmul.f32.gmra.mxu3 %v2506_v31  ;;  %3261 = vmatpush.msra.mxu2 %v6037_v45  ;;  %v5997_v31 = vld [vmem:[%s10882_s26 + $0x6e8] sm:$0xff]  ;;  %v5968_v45 = vld [vmem:[%s10882_s26 + $0x600] sm:$0xff] }
 0x4cc   : > { %3262 = vmatpush.msra.mxu2 %v6027_v14 }
 0x4ce   : > { %3263 = vmatpush.msra.mxu2 %v6017_v5  ;;  %v5971_v5 = vld [vmem:[%s10882_s26 + $0x618] sm:$0xff] }
 0x4d0   : > { %3264 = vmatpush.msra.mxu2 %v6007_v2  ;;  %v5958_v2 = vld [vmem:[%s10882_s26 + $0x5b0] sm:$0xff] }
 0x4d2   : > { %3265 = vmatpush.msra.mxu2 %v5997_v31  ;;  %v5948_v31 = vld [vmem:[%s10882_s26 + $0x560] sm:$0xff] }
 0x4f7   : > { %v2230_v37 = vpop.f32.mrf.mxu0 }
 0x4f8   : > { %v2385_v53 = vadd.f32 %v2355_v29, %v2230_v37 }
 0x4fa   : > { %v2425_v62 = vmin.f32 %v2385_v53, 0.0  ;;  %vm2405_vm1 = vcmp.gt.f32.partialorder %v2385_v53, 0.0 }
 0x4fc   : > { %v2463_v55 = vmul.f32 1.442695, %v2425_v62  ;;  %v5977_v62 = vld [vmem:[%s10882_s26 + $0x648] sm:$0xff] }
 0x4fe   : > { %6477 = vpow2.f32 %v2463_v55  ;;  %v5967_v55 = vld [vmem:[%s10882_s26 + $0x5f8] sm:$0xff] }
 0x504   : > { %v6478_v52 = vpop.eup %6477 }
 0x505   : > { %v5928_v13 = vadd.f32 -1.0, %v6478_v52  ;;  %v5957_v52 = vld [vmem:[%s10882_s26 + $0x5a8] sm:$0xff] }
 0x507   : > { %v2505_v3 = vsel %vm2405_vm1, %v2385_v53, %v5928_v13  ;;  %v5987_v53 = vld [vmem:[%s10882_s26 + $0x698] sm:$0xff] }
 0x508   : > { %2870 = vmatmul.f32.gmra.mxu2 %v2505_v3  ;;  %v5947_v13 = vld [vmem:[%s10882_s26 + $0x558] sm:$0xff]  ;;  %v5937_v3 = vld [vmem:[%s10882_s26 + $0x508] sm:$0xff] }
 0x509   : > { %3266 = vmatpush.msra.mxu2 %v5987_v53 }
 0x50b   : > { %3267 = vmatpush.msra.mxu2 %v5977_v62  ;;  %v5938_v62 = vld [vmem:[%s10882_s26 + $0x510] sm:$0xff] }
 0x50d   : > { %3268 = vmatpush.msra.mxu2 %v5967_v55  ;;  %v5941_v55 = vld [vmem:[%s10882_s26 + $0x528] sm:$0xff] }
 0x50f   : > { %3269 = vmatpush.msra.mxu2 %v5957_v52  ;;  %v6095_v52 = vld [vmem:[%s10882_s26 + $0x9f8] sm:$0xff] }
 0x511   : > { %3270 = vmatpush.msra.mxu2 %v5947_v13  ;;  %v6085_v13 = vld [vmem:[%s10882_s26 + $0x9a8] sm:$0xff] }
 0x513   : > { %3271 = vmatpush.msra.mxu2 %v5937_v3  ;;  %v6075_v3 = vld [vmem:[%s10882_s26 + $0x958] sm:$0xff] }
 0x518   : > { %v2684_v17 = vpop.f32.mrf.mxu2  ;;  %v2753_v10 = vpop.f32.mrf.mxu1 }
 0x519   : > { %v2708_v47 = vadd.f32 %v2707_v51, %v2684_v17  ;;  %v8472_v51 = vld [vmem:[%s7005_s4 + $0x10] sm:$0xff]  ;;  %v8476_v17 = vld [vmem:[%s7005_s4 + $0x18] sm:$0xff] }
 0x51a   : > { %3272 = vmatmul.f32.vlgmr.msra.gmra.mxu2 %v8472_v51 }
 0x520   : > { %v2687_v1 = vpop.f32.mrf.mxu2  ;;  %v2756_v11 = vpop.f32.mrf.mxu1 }
 0x521   : > { %v2711_v38 = vadd.f32 %v2710_v9, %v2687_v1 }
 0x522   : > { %v2730_v34 = vpop.f32.mrf.mxu0  ;;  %3275 = vmatmul.f32.gmra.mxu2 %v8476_v17 }
 0x523   : > { %v2731_v22 = vadd.f32 %v2730_v34, %v2708_v47 }
 0x525   : > { %v2754_v36 = vadd.f32 %v2753_v10, %v2731_v22 }
 0x528   : > { %v2776_v12 = vpop.f32.mrf.mxu2 }
 0x529   : > { %v2777_v49 = vadd.f32 %v2776_v12, %v2754_v36  ;;  %v8499_v36 = vld [vmem:[%s10883_s6 + $0x10] sm:$0xff] }
 0x52a   : > { %v2733_v61 = vpop.f32.mrf.mxu0 }
 0x52b   : > { %v2734_v46 = vadd.f32 %v2733_v61, %v2711_v38 }
 0x52d   : > { %v2757_v29 = vadd.f32 %v2756_v11, %v2734_v46 }
 0x52e   : > { %v2799_v43 = vpop.f32.mrf.mxu3 }
 0x52f   : > { %v2800_v41 = vadd.f32 %v2799_v43, %v2777_v49  ;;  %v6091_v49 = vld [vmem:[%s10882_s26 + $0x9d8] sm:$0xff] }
 0x530   : > { %v2779_v44 = vpop.f32.mrf.mxu2  ;;  %3348 = vmatpush.msrb.mxu2 %v6091_v49  ;;  %v5965_v49 = vld [vmem:[%s10882_s26 + $0x5e8] sm:$0xff] }
 0x531   : > { %v2780_v30 = vadd.f32 %v2779_v44, %v2757_v29 }
 0x532   : > { %v2822_v58 = vpop.f32.mrf.mxu0 }
 0x533   : > { %v2823_v39 = vadd.f32 %v2822_v58, %v2800_v41  ;;  %v6068_v58 = vld [vmem:[%s10882_s26 + $0x920] sm:$0xff]  ;;  %v6081_v41 = vld [vmem:[%s10882_s26 + $0x988] sm:$0xff] }
 0x534   : > { %3349 = vmatpush.msrb.mxu2 %v6081_v41  ;;  %v3689_v41 = vperm.slane %v8499_v36, 2 }
 0x536   : > { %v2802_v57 = vpop.f32.mrf.mxu3 }
 0x537   : > { %v2803_v21 = vadd.f32 %v2802_v57, %v2780_v30  ;;  %v6088_v57 = vld [vmem:[%s10882_s26 + $0x9c0] sm:$0xff] }
 0x538   : > { %v2845_v15 = vpop.f32.mrf.mxu1  ;;  %v2868_v50 = vpop.f32.mrf.mxu2  ;;  %3279 = vmatpush.msrb.mxu3 %v6088_v57 }
 0x539   : > { %v2846_v16 = vadd.f32 %v2845_v15, %v2823_v39  ;;  %v6071_v15 = vld [vmem:[%s10882_s26 + $0x938] sm:$0xff]  ;;  %v3579_v39 = vperm.slane %v8499_v36, 1 }
 0x53a   : > { %v2825_v23 = vpop.f32.mrf.mxu0  ;;  %3350 = vmatpush.msrb.mxu2 %v6071_v15 }
 0x53b   : > { %v2869_v56 = vadd.f32 %v2868_v50, %v2846_v16  ;;  %v2826_v27 = vadd.f32 %v2825_v23, %v2803_v21  ;;  %v6078_v21 = vld [vmem:[%s10882_s26 + $0x970] sm:$0xff] }
 0x53c   : > { %3280 = vmatpush.msrb.mxu3 %v6078_v21  ;;  %v6058_v16 = vld [vmem:[%s10882_s26 + $0x8d0] sm:$0xff] }
 0x53e   : > { %3281 = vmatpush.msrb.mxu3 %v6068_v58 }
 0x540   : > { %v2848_v6 = vpop.f32.mrf.mxu1  ;;  %3282 = vmatpush.msrb.mxu3 %v6058_v16 }
 0x541   : > { %v2849_v35 = vadd.f32 %v2848_v6, %v2826_v27  ;;  %v6028_v6 = vld [vmem:[%s10882_s26 + $0x7e0] sm:$0xff]  ;;  %v6031_v27 = vld [vmem:[%s10882_s26 + $0x7f8] sm:$0xff] }
 0x545   : > { %v2891_v32 = vpop.f32.mrf.mxu3 }
 0x546   : > { %v2892_v28 = vadd.f32 %v2891_v32, %v2869_v56  ;;  %v6061_v56 = vld [vmem:[%s10882_s26 + $0x8e8] sm:$0xff]  ;;  %v6051_v32 = vld [vmem:[%s10882_s26 + $0x898] sm:$0xff] }
 0x547   : > { %3351 = vmatpush.msrb.mxu2 %v6061_v56  ;;  %v5955_v56 = vld [vmem:[%s10882_s26 + $0x598] sm:$0xff] }
 0x548   : > { %v2911_v40 = vmul.f32 %v6353_v59, %v2892_v28  ;;  %v2902_v54 = vmul.f32 %v6354_v60, %v2892_v28 }
 0x549   : > { %3352 = vmatpush.msrb.mxu2 %v6051_v32  ;;  %v4019_v32 = vperm.slane %v8499_v36, 5 }
 0x54a   : > { %2913 = vadd.xlane.f32.xlu0 %v2911_v40  ;;  %2904 = vadd.xlane.f32.xlu1 %v2902_v54  ;;  %v6041_v54 = vld [vmem:[%s10882_s26 + $0x848] sm:$0xff] }
 0x54b   : > { %3353 = vmatpush.msrb.mxu2 %v6041_v54  ;;  %v6092_v54 = vld [vmem:[%s10882_s26 + $0x9e0] sm:$0xff] }
 0x54d   : > { %v2894_v48 = vpop.f32.mrf.mxu3  ;;  %3354 = vmatpush.msrb.mxu2 %v6031_v27  ;;  %v6072_v27 = vld [vmem:[%s10882_s26 + $0x940] sm:$0xff] }
 0x58b   : > { %v2871_v25 = vpop.f32.mrf.mxu2 }
 0x58c   : > { %v2872_v4 = vadd.f32 %v2871_v25, %v2849_v35  ;;  %v6018_v25 = vld [vmem:[%s10882_s26 + $0x790] sm:$0xff] }
 0x58e   : > { %v2895_v7 = vadd.f32 %v2894_v48, %v2872_v4  ;;  %v6021_v4 = vld [vmem:[%s10882_s26 + $0x7a8] sm:$0xff]  ;;  %v6008_v48 = vld [vmem:[%s10882_s26 + $0x740] sm:$0xff] }
 0x58f   : > { %3355 = vmatpush.msrb.mxu2 %v6021_v4 }
 0x590   : > { %3008 = vmatpush.msrb.mxu0 %v2895_v7  ;;  %v2912_v33 = vmul.f32 %v6353_v59, %v2895_v7  ;;  %v2903_v20 = vmul.f32 %v6354_v60, %v2895_v7  ;;  %v6048_v60 = vld [vmem:[%s10882_s26 + $0x880] sm:$0xff]  ;;  %v6011_v7 = vld [vmem:[%s10882_s26 + $0x758] sm:$0xff] }
 0x591   : > { %3283 = vmatpush.msrb.mxu3 %v6048_v60  ;;  %3356 = vmatpush.msrb.mxu2 %v6011_v7  ;;  %v6032_v7 = vld [vmem:[%s10882_s26 + $0x800] sm:$0xff] }
 0x592   : > { %3009 = vmatpush.msrb.mxu0 %v2892_v28  ;;  %2915 = vadd.xlane.f32.xlu1 %v2912_v33  ;;  %v6038_v28 = vld [vmem:[%s10882_s26 + $0x830] sm:$0xff] }
 0x593   : > { %2906 = vadd.xlane.f32.xlu2 %v2903_v20  ;;  %3284 = vmatpush.msrb.mxu3 %v6038_v28  ;;  %v5998_v33 = vld [vmem:[%s10882_s26 + $0x6f0] sm:$0xff]  ;;  %v6001_v20 = vld [vmem:[%s10882_s26 + $0x708] sm:$0xff] }
 0x594   : > { %3357 = vmatpush.msrb.mxu2 %v6001_v20  ;;  %v6022_v20 = vld [vmem:[%s10882_s26 + $0x7b0] sm:$0xff] }
 0x595   : > { %3285 = vmatpush.msrb.mxu3 %v6028_v6 }
 0x596   : > { %3358 = vmatpush.msrb.mxu2 %v5991_v63 }
 0x597   : > { %3286 = vmatpush.msrb.mxu3 %v6018_v25  ;;  %v6062_v25 = vld [vmem:[%s10882_s26 + $0x8f0] sm:$0xff] }
 0x598   : > { %3359 = vmatpush.msrb.mxu2 %v5981_v8 }
 0x599   : > { %3287 = vmatpush.msrb.mxu3 %v6008_v48  ;;  %v6052_v48 = vld [vmem:[%s10882_s26 + $0x8a0] sm:$0xff] }
 0x59a   : > { %3360 = vmatpush.msrb.mxu2 %v5971_v5  ;;  %v5952_v5 = vld [vmem:[%s10882_s26 + $0x580] sm:$0xff] }
 0x59b   : > { %3288 = vmatpush.msrb.mxu3 %v5998_v33 }
 0x59c   : > { %3361 = vmatpush.msrb.mxu2 %v5961_v42 }
 0x59d   : > { %v8488_v22 = vpop.f32.mrf.mxu2 }
 0x59e   : > { %v3580_v53 = vmul.f32 %v3579_v39, %v8488_v22 }
 0x5a5   : > { %v8517_v50 = vpop.f32.mrf.mxu2 }
 0x5a6   : > { %v3581_v59 = vmul.f32 %v3579_v39, %v8517_v50 }
 0x5bd   : > { %v2905_v19 = vpop.xlane.xlu1 %2904  ;;  %v2914_v38 = vpop.xlane.xlu0 %2913 }
 0x5be   : > { %2917 = vxpose.xlu2.b32.start [1/2] (short) (narrow) %v2905_v19, 8  ;;  %v5988_v19 = vld [vmem:[%s10882_s26 + $0x6a0] sm:$0xff] }
 0x5bf   : > { %3289 = vmatpush.msrb.mxu3 %v5988_v19  ;;  %v6012_v19 = vld [vmem:[%s10882_s26 + $0x760] sm:$0xff] }
 0x5c1   : > { %3290 = vmatpush.msrb.mxu3 %v5978_v18  ;;  %v6002_v18 = vld [vmem:[%s10882_s26 + $0x710] sm:$0xff] }
 0x5c3   : > { %3291 = vmatpush.msrb.mxu3 %v5968_v45 }
 0x5c5   : > { %3292 = vmatpush.msrb.mxu3 %v5958_v2  ;;  %v5942_v2 = vld [vmem:[%s10882_s26 + $0x530] sm:$0xff] }
 0x5c7   : > { %3293 = vmatpush.msrb.mxu3 %v5948_v31  ;;  %v6086_v31 = vld [vmem:[%s10882_s26 + $0x9b0] sm:$0xff] }
 0x5c8   : > { %3233 = vmatpush.msra.mxu0 %v6086_v31  ;;  %v3027_v31 = vld [vmem:[%s10845_s11 + $0x8] sm:$0xff] }
 0x5c9   : > { %3294 = vmatpush.msrb.mxu3 %v5938_v62  ;;  %v6056_v62 = vld [vmem:[%s10882_s26 + $0x8c0] sm:$0xff] }
 0x5ca   : > { %3295 = vmatmul.f32.vlgmr.msrb.gmra.mxu3 %v8472_v51 }
 0x5cb   : > { %3371 = vmatpush.msra.mxu3 %v6092_v54  ;;  %v6050_v54 = vld [vmem:[%s10882_s26 + $0x890] sm:$0xff] }
 0x5d2   : > { %3298 = vmatmul.f32.gmra.mxu3 %v8476_v17 }
 0x605   : > { %v2916_v10 = vpop.xlane.xlu1 %2915 }
 0x606   : > { %v2907_v37 = vpop.xlane.xlu2 %2906 }
 0x607   : > { %2918 = vxpose.xlu2.b32.end [2/2] (short) (narrow) %v2907_v37, 8  ;;  %v5951_v37 = vld [vmem:[%s10882_s26 + $0x578] sm:$0xff] }
 0x608   : > { %3362 = vmatpush.msrb.mxu2 %v5951_v37  ;;  %v6076_v37 = vld [vmem:[%s10882_s26 + $0x960] sm:$0xff] }
 0x609   : > { %3234 = vmatpush.msra.mxu0 %v6076_v37  ;;  %v5940_v37 = vld [vmem:[%s10882_s26 + $0x520] sm:$0xff] }
 0x60a   : > { %3363 = vmatpush.msrb.mxu2 %v5941_v55  ;;  %v6046_v55 = vld [vmem:[%s10882_s26 + $0x870] sm:$0xff] }
 0x60b   : > { %3364 = vmatmul.f32.vlgmr.msrb.gmra.mxu2 %v8472_v51 }
 0x60c   : > { %3440 = vmatpush.msra.mxu2 %v6095_v52  ;;  %v6036_v52 = vld [vmem:[%s10882_s26 + $0x820] sm:$0xff] }
 0x60e   : > { %3441 = vmatpush.msra.mxu2 %v6085_v13  ;;  %v6026_v13 = vld [vmem:[%s10882_s26 + $0x7d0] sm:$0xff] }
 0x610   : > { %3442 = vmatpush.msra.mxu2 %v6075_v3  ;;  %v6016_v3 = vld [vmem:[%s10882_s26 + $0x780] sm:$0xff] }
 0x613   : > { %3367 = vmatmul.f32.gmra.mxu2 %v8476_v17 }
 0x64d   : > { %v8647_v15 = vpop.f32.mrf.mxu3 }
 0x64e   : > { %v3690_v39 = vmul.f32 %v3689_v41, %v8647_v15 }
 0x68e   : > { %v8650_v16 = vpop.f32.mrf.mxu2 }
 0x68f   : > { %v4020_v33 = vmul.f32 %v4019_v32, %v8650_v16 }
 0x696   : > { %v8658_v60 = vpop.f32.mrf.mxu2 }
 0x697   : > { %v4021_v28 = vmul.f32 %v4019_v32, %v8658_v60 }
 0x698   : > { %v2933_v9 = vpop.trf.xlu2 }
 0x699   : > { %v2949_v1 = vperm.slane %v2933_v9, 0  ;;  %v6065_v9 = vld [vmem:[%s10882_s26 + $0x908] sm:$0xff] }
 0x69a   : > { %3443 = vmatpush.msra.mxu2 %v6065_v9  ;;  %v6006_v9 = vld [vmem:[%s10882_s26 + $0x730] sm:$0xff] }
 0x69b   : > { %v2950_v34 = vadd.f32 %v2949_v1, %v2914_v38  ;;  %v2951_v12 = vadd.f32 %v2949_v1, %v2916_v10  ;;  %v6055_v1 = vld [vmem:[%s10882_s26 + $0x8b8] sm:$0xff]  ;;  %v6045_v38 = vld [vmem:[%s10882_s26 + $0x868] sm:$0xff] }
 0x69c   : > { %3444 = vmatpush.msra.mxu2 %v6055_v1  ;;  %v6035_v10 = vld [vmem:[%s10882_s26 + $0x818] sm:$0xff]  ;;  %v5996_v1 = vld [vmem:[%s10882_s26 + $0x6e0] sm:$0xff] }
 0x69d   : > { %vm2953_vm3 = vcmp.gt.f32.partialorder %v2951_v12, 0.0  ;;  %v2955_v61 = vmul.f32 0.2, %v2951_v12  ;;  %vm2952_vm5 = vcmp.gt.f32.partialorder %v2950_v34, 0.0  ;;  %v2954_v46 = vmul.f32 0.2, %v2950_v34 }
 0x69e   : > { %3445 = vmatpush.msra.mxu2 %v6045_v38  ;;  %v5986_v38 = vld [vmem:[%s10882_s26 + $0x690] sm:$0xff] }
 0x69f   : > { %v2957_v11 = vsel %vm2953_vm3, %v2951_v12, %v2955_v61  ;;  %v2956_v29 = vsel %vm2952_vm5, %v2950_v34, %v2954_v46  ;;  %v6025_v34 = vld [vmem:[%s10882_s26 + $0x7c8] sm:$0xff]  ;;  %v6015_v12 = vld [vmem:[%s10882_s26 + $0x778] sm:$0xff] }
 0x6a0   : > { %v8481_v43 = vsel %vm847_vm0, %v2957_v11, -1e+30  ;;  %v2958_v44 = vsel %vm846_vm4, %v2956_v29, -1e+30  ;;  %3446 = vmatpush.msra.mxu2 %v6035_v10  ;;  %v6005_v46 = vld [vmem:[%s10882_s26 + $0x728] sm:$0xff]  ;;  %v5995_v11 = vld [vmem:[%s10882_s26 + $0x6d8] sm:$0xff] }
 0x6a1   : > { %v2963_v30 = vsel %vm1299_vm2, %v8481_v43, -inf  ;;  %v2960_v47 = vsel %vm1299_vm2, %v2958_v44, -inf  ;;  %v5985_v29 = vld [vmem:[%s10882_s26 + $0x688] sm:$0xff] }
 0x6a2   : > { %2964 = vmax.xlane.f32.xlu1 %v2963_v30  ;;  %2961 = vmax.xlane.f32.xlu0 %v2960_v47  ;;  %v5975_v47 = vld [vmem:[%s10882_s26 + $0x638] sm:$0xff] }
 0x6a3   : > { %3447 = vmatpush.msra.mxu2 %v6025_v34  ;;  %v5976_v34 = vld [vmem:[%s10882_s26 + $0x640] sm:$0xff] }
 0x6a5   : > { %3448 = vmatpush.msra.mxu2 %v6015_v12  ;;  %v5966_v12 = vld [vmem:[%s10882_s26 + $0x5f0] sm:$0xff] }
 0x6a7   : > { %3449 = vmatpush.msra.mxu2 %v6005_v46  ;;  %v5946_v46 = vld [vmem:[%s10882_s26 + $0x550] sm:$0xff] }
 0x6a9   : > { %3450 = vmatpush.msra.mxu2 %v5995_v11  ;;  %v5936_v11 = vld [vmem:[%s10882_s26 + $0x500] sm:$0xff] }
 0x6aa   : > { %3584 = vadd.xlane.f32.xlu1 %v3581_v59  ;;  %v5945_v59 = vld [vmem:[%s10882_s26 + $0x548] sm:$0xff] }
 0x6ab   : > { %3451 = vmatpush.msra.mxu2 %v5985_v29 }
 0x6ad   : > { %3452 = vmatpush.msra.mxu2 %v5975_v47  ;;  %v3041_v47 = vld [vmem:[%s10845_s11 + $0x78] sm:$0xff] }
 0x6ae   : > { %3043 = vmatpush.msra.mxu1 %v3041_v47  ;;  %v6039_v47 = vld [vmem:[%s10882_s26 + $0x838] sm:$0xff] }
 0x6af   : > { %3453 = vmatpush.msra.mxu2 %v5965_v49  ;;  %v6070_v49 = vld [vmem:[%s10882_s26 + $0x930] sm:$0xff] }
 0x6b1   : > { %3454 = vmatpush.msra.mxu2 %v5955_v56 }
 0x6b3   : > { %3455 = vmatpush.msra.mxu2 %v5945_v59 }
 0x6b4   : > { %3456 = vmatmul.f32.vlgmr.msra.gmra.mxu2 %v8472_v51 }
 0x6b5   : > { %4120 = vmatpush.msrb.mxu2 %v8658_v60 }
 0x6b7   : > { %4121 = vmatpush.msrb.mxu2 %v8650_v16 }
 0x6bc   : > { %3459 = vmatmul.f32.gmra.mxu2 %v8476_v17 }
 0x715   : > { %v2962_v40 = vpop.xlane.xlu0 %2961 }
 0x716   : > { %v2966_v23 = vsub.f32 %v2958_v44, %v2962_v40  ;;  %v2965_v44 = vpop.xlane.xlu1 %2964  ;;  %v8666_v40 = vpop.f32.mrf.mxu3 }
 0x717   : > { %v2967_v6 = vsub.f32 %v8481_v43, %v2965_v44  ;;  %v6042_v43 = vld [vmem:[%s10882_s26 + $0x850] sm:$0xff] }
 0x718   : > { %v2968_v35 = vmul.f32 1.442695, %v2966_v23  ;;  %v6082_v23 = vld [vmem:[%s10882_s26 + $0x990] sm:$0xff] }
 0x719   : > { %3372 = vmatpush.msra.mxu3 %v6082_v23  ;;  %v2970_v4 = vmul.f32 1.442695, %v2967_v6  ;;  %v3037_v23 = vld [vmem:[%s10845_s11 + $0x58] sm:$0xff] }
 0x71a   : > { %6479 = vpow2.f32 %v2968_v35  ;;  %v3691_v35 = vmul.f32 %v3689_v41, %v8666_v40 }
 0x71b   : > { %3373 = vmatpush.msra.mxu3 %v6072_v27  ;;  %v4129_v27 = vperm.slane %v8499_v36, 6 }
 0x71d   : > { %3374 = vmatpush.msra.mxu3 %v6062_v25  ;;  %v3036_v25 = vld [vmem:[%s10845_s11 + $0x50] sm:$0xff] }
 0x71e   : > { %v3585_v58 = vpop.xlane.xlu1 %3584 }
 0x71f   : > { %3375 = vmatpush.msra.mxu3 %v6052_v48 }
 0x720   : > { %v6480_v0 = vpop.eup %6479 }
 0x721   : > { %v2972_v26 = vsel %vm846_vm4, %v6480_v0, 0.0  ;;  %3376 = vmatpush.msra.mxu3 %v6042_v43  ;;  %v5992_v0 = vld [vmem:[%s10882_s26 + $0x6c0] sm:$0xff]  ;;  %v3035_v43 = vld [vmem:[%s10845_s11 + $0x48] sm:$0xff] }
 0x722   : > { %v2974_v14 = vsel %vm1299_vm2, %v2972_v26, 0.0 }
 0x723   : > { %2975 = vadd.xlane.f32.xlu0 %v2974_v14  ;;  %3377 = vmatpush.msra.mxu3 %v6032_v7  ;;  %v5972_v14 = vld [vmem:[%s10882_s26 + $0x620] sm:$0xff] }
 0x724   : > { %v6020_v7 = vld [vmem:[%s10882_s26 + $0x7a0] sm:$0xff] }
 0x725   : > { %3378 = vmatpush.msra.mxu3 %v6022_v20  ;;  %v6010_v20 = vld [vmem:[%s10882_s26 + $0x750] sm:$0xff] }
 0x727   : > { %3379 = vmatpush.msra.mxu3 %v6012_v19  ;;  %v3033_v19 = vld [vmem:[%s10845_s11 + $0x38] sm:$0xff] }
 0x729   : > { %3380 = vmatpush.msra.mxu3 %v6002_v18  ;;  %v3032_v18 = vld [vmem:[%s10845_s11 + $0x30] sm:$0xff] }
 0x72b   : > { %3582 = vadd.xlane.f32.xlu0 %v3580_v53  ;;  %3381 = vmatpush.msra.mxu3 %v5992_v0  ;;  %v6066_v53 = vld [vmem:[%s10882_s26 + $0x910] sm:$0xff] }
 0x72c   : > { %3235 = vmatpush.msra.mxu0 %v6066_v53  ;;  %v5990_v0 = vld [vmem:[%s10882_s26 + $0x6b0] sm:$0xff] }
 0x72d   : > { %v8883_v53 = vld [vmem:[%s10884_s29 + $0x10] sm:$0xff] }
 0x72e   : > { %3236 = vmatpush.msra.mxu0 %v6056_v62  ;;  %v3026_v62 = vld [vmem:[%s10845_s11] sm:$0xff] }
 0x730   : > { %3237 = vmatpush.msra.mxu0 %v6046_v55  ;;  %v6094_v55 = vld [vmem:[%s10882_s26 + $0x9f0] sm:$0xff] }
 0x732   : > { %3238 = vmatpush.msra.mxu0 %v6036_v52  ;;  %v6089_v52 = vld [vmem:[%s10882_s26 + $0x9c8] sm:$0xff] }
 0x733   : > { %3692 = vadd.xlane.f32.xlu0 %v3690_v39  ;;  %v6060_v39 = vld [vmem:[%s10882_s26 + $0x8e0] sm:$0xff] }
 0x734   : > { %3239 = vmatpush.msra.mxu0 %v6026_v13 }
 0x736   : > { %3240 = vmatpush.msra.mxu0 %v6016_v3  ;;  %v6084_v3 = vld [vmem:[%s10882_s26 + $0x9a0] sm:$0xff] }
 0x737   : > { %v8894_v13 = vpop.f32.mrf.mxu2 }
 0x738   : > { %3241 = vmatpush.msra.mxu0 %v6006_v9  ;;  %v6079_v9 = vld [vmem:[%s10882_s26 + $0x978] sm:$0xff] }
 0x73a   : > { %3242 = vmatpush.msra.mxu0 %v5996_v1  ;;  %v3586_v1 = vperm.slane %v8883_v53, 1 }
 0x73b   : > { %4024 = vadd.xlane.f32.xlu0 %v4021_v28  ;;  %v3038_v28 = vld [vmem:[%s10845_s11 + $0x60] sm:$0xff] }
 0x73c   : > { %3243 = vmatpush.msra.mxu0 %v5986_v38  ;;  %v6074_v38 = vld [vmem:[%s10882_s26 + $0x950] sm:$0xff] }
 0x73e   : > { %3244 = vmatpush.msra.mxu0 %v5976_v34  ;;  %v6069_v34 = vld [vmem:[%s10882_s26 + $0x928] sm:$0xff] }
 0x740   : > { %3245 = vmatpush.msra.mxu0 %v5966_v12  ;;  %v6064_v12 = vld [vmem:[%s10882_s26 + $0x900] sm:$0xff] }
 0x796   : > { %v2976_v61 = vpop.xlane.xlu0 %2975 }
 0x797   : > { %6481 = vrcp.f32 %v2976_v61  ;;  %v5956_v61 = vld [vmem:[%s10882_s26 + $0x5a0] sm:$0xff] }
 0x798   : > { %6483 = vpow2.f32 %v2970_v4  ;;  %3246 = vmatpush.msra.mxu0 %v5956_v61  ;;  %v6030_v4 = vld [vmem:[%s10882_s26 + $0x7f0] sm:$0xff]  ;;  %v6059_v61 = vld [vmem:[%s10882_s26 + $0x8d8] sm:$0xff] }
 0x79a   : > { %3247 = vmatpush.msra.mxu0 %v5946_v46  ;;  %v3587_v46 = vmul.f32 %v3586_v1, %v8488_v22 }
 0x79c   : > { %3248 = vmatpush.msra.mxu0 %v5936_v11  ;;  %v6054_v11 = vld [vmem:[%s10882_s26 + $0x8b0] sm:$0xff] }
 0x79d   : > { %v6482_v30 = vpop.eup %6481 }
 0x79e   : > { %v2982_v57 = vmul.f32 %v6482_v30, %v2972_v26  ;;  %v3583_v21 = vpop.xlane.xlu0 %3582  ;;  %v6484_v63 = vpop.eup %6483  ;;  %v5982_v26 = vld [vmem:[%s10882_s26 + $0x670] sm:$0xff] }
 0x79f   : > { %3593 = vxpose.xlu1.b32.start [1/2] (short) (narrow) %v3583_v21, 8  ;;  %v8706_v8 = vsel %vm847_vm0, %v6484_v63, 0.0  ;;  %3382 = vmatpush.msra.mxu3 %v5982_v26  ;;  %v6090_v30 = vld [vmem:[%s10882_s26 + $0x9d0] sm:$0xff]  ;;  %v6000_v63 = vld [vmem:[%s10882_s26 + $0x700] sm:$0xff] }
 0x7a0   : > { %5930 = vmatmul.msk.f32.vlgmr.msrb.gmra.mxu0 %vm1299_vm2, %v2982_v57  ;;  %v2977_v45 = vsel %vm1299_vm2, %v8706_v8, 0.0  ;;  %v6080_v57 = vld [vmem:[%s10882_s26 + $0x980] sm:$0xff]  ;;  %v3040_v21 = vld [vmem:[%s10845_s11 + $0x70] sm:$0xff] }
 0x7a1   : > { %3383 = vmatpush.msra.mxu3 %v5972_v14  ;;  %3325 = vmatpush.msrb.mxu0 %v6090_v30  ;;  %v5980_v26 = vld [vmem:[%s10882_s26 + $0x660] sm:$0xff]  ;;  %v5970_v14 = vld [vmem:[%s10882_s26 + $0x610] sm:$0xff]  ;;  %v8926_v30 = vpop.f32.mrf.mxu2 }
 0x7a2   : > { %3044 = vmatpush.msra.mxu1 %v3040_v21  ;;  %4560 = vmatpush.msra.mxu2 %v8926_v30  ;;  %v6029_v21 = vld [vmem:[%s10882_s26 + $0x7e8] sm:$0xff] }
 0x7a3   : > { %3384 = vmatpush.msra.mxu3 %v5962_v24  ;;  %3326 = vmatpush.msrb.mxu0 %v6080_v57  ;;  %v3029_v24 = vld [vmem:[%s10845_s11 + $0x18] sm:$0xff]  ;;  %v6034_v57 = vld [vmem:[%s10882_s26 + $0x810] sm:$0xff] }
 0x7a4   : > { %4561 = vmatpush.msra.mxu2 %v8894_v13 }
 0x7a5   : > { %3385 = vmatpush.msra.mxu3 %v5952_v5  ;;  %3327 = vmatpush.msrb.mxu0 %v6070_v49  ;;  %v5960_v5 = vld [vmem:[%s10882_s26 + $0x5c0] sm:$0xff]  ;;  %v3588_v49 = vmul.f32 %v3586_v1, %v8517_v50 }
 0x7a6   : > { %v3693_v42 = vpop.xlane.xlu0 %3692 }
 0x7a7   : > { %3594 = vxpose.xlu1.b32.end [2/2] (short) (narrow) %v3585_v58, 8  ;;  %3386 = vmatpush.msra.mxu3 %v5942_v2  ;;  %v3039_v58 = vld [vmem:[%s10845_s11 + $0x68] sm:$0xff]  ;;  %v3028_v2 = vld [vmem:[%s10845_s11 + $0x10] sm:$0xff] }
 0x7a8   : > { %3387 = vmatmul.f32.vlgmr.msra.gmra.mxu3 %v8472_v51  ;;  %3703 = vxpose.xlu2.b32.start [1/2] (short) (narrow) %v3693_v42, 8  ;;  %v5950_v42 = vld [vmem:[%s10882_s26 + $0x570] sm:$0xff] }
 0x7a9   : > { %3045 = vmatpush.msra.mxu1 %v3039_v58  ;;  %3328 = vmatpush.msrb.mxu0 %v6060_v39  ;;  %v6024_v58 = vld [vmem:[%s10882_s26 + $0x7c0] sm:$0xff]  ;;  %v6014_v39 = vld [vmem:[%s10882_s26 + $0x770] sm:$0xff] }
 0x7ab   : > { %3046 = vmatpush.msra.mxu1 %v3038_v28  ;;  %3329 = vmatpush.msrb.mxu0 %v6050_v54  ;;  %v5999_v28 = vld [vmem:[%s10882_s26 + $0x6f8] sm:$0xff] }
 0x7ad   : > { %3047 = vmatpush.msra.mxu1 %v3037_v23  ;;  %v5994_v23 = vld [vmem:[%s10882_s26 + $0x6d0] sm:$0xff] }
 0x7ae   : > { %v4025_v41 = vpop.xlane.xlu0 %4024 }
 0x7af   : > { %3048 = vmatpush.msra.mxu1 %v3036_v25  ;;  %v5984_v25 = vld [vmem:[%s10882_s26 + $0x680] sm:$0xff] }
 0x7b0   : > { %3390 = vmatmul.f32.gmra.mxu3 %v8476_v17 }
 0x7b1   : > { %3049 = vmatpush.msra.mxu1 %v3035_v43  ;;  %v3696_v43 = vperm.slane %v8883_v53, 2 }
 0x807   : > { %3694 = vadd.xlane.f32.xlu1 %v3691_v35  ;;  %v6040_v35 = vld [vmem:[%s10882_s26 + $0x840] sm:$0xff] }
 0x808   : > { %3330 = vmatpush.msrb.mxu0 %v6040_v35  ;;  %v5989_v35 = vld [vmem:[%s10882_s26 + $0x6a8] sm:$0xff] }
 0x80a   : > { %3331 = vmatpush.msrb.mxu0 %v6030_v4  ;;  %v5974_v4 = vld [vmem:[%s10882_s26 + $0x630] sm:$0xff] }
 0x80c   : > { %3332 = vmatpush.msrb.mxu0 %v6020_v7  ;;  %v5964_v7 = vld [vmem:[%s10882_s26 + $0x5e0] sm:$0xff] }
 0x80e   : > { %3333 = vmatpush.msrb.mxu0 %v6010_v20  ;;  %v5954_v20 = vld [vmem:[%s10882_s26 + $0x590] sm:$0xff] }
 0x80f   : > { %4022 = vadd.xlane.f32.xlu1 %v4020_v33  ;;  %v3034_v33 = vld [vmem:[%s10845_s11 + $0x40] sm:$0xff] }
 0x810   : > { %3050 = vmatpush.msra.mxu1 %v3034_v33  ;;  %3334 = vmatpush.msrb.mxu0 %v6000_v63  ;;  %v5959_v33 = vld [vmem:[%s10882_s26 + $0x5b8] sm:$0xff]  ;;  %v5949_v63 = vld [vmem:[%s10882_s26 + $0x568] sm:$0xff] }
 0x812   : > { %3051 = vmatpush.msra.mxu1 %v3033_v19  ;;  %3335 = vmatpush.msrb.mxu0 %v5990_v0  ;;  %v8995_v19 = vld [vmem:[%s10883_s6 + $0x18] sm:$0x3]  ;;  %v5944_v0 = vld [vmem:[%s10882_s26 + $0x540] sm:$0xff] }
 0x814   : > { %3052 = vmatpush.msra.mxu1 %v3032_v18  ;;  %3336 = vmatpush.msrb.mxu0 %v5980_v26  ;;  %v3697_v18 = vmul.f32 %v3696_v43, %v8647_v15  ;;  %v4459_v26 = vperm.slane %v8995_v19, 1 }
 0x816   : > { %3337 = vmatpush.msrb.mxu0 %v5970_v14 }
 0x817   : > { %2978 = vadd.xlane.f32.xlu1 %v2977_v45  ;;  %v3030_v45 = vld [vmem:[%s10845_s11 + $0x20] sm:$0xff] }
 0x818   : > { %3338 = vmatpush.msrb.mxu0 %v5960_v5  ;;  %v4461_v5 = vmul.f32 %v4459_v26, %v8926_v30 }
 0x81a   : > { %3339 = vmatpush.msrb.mxu0 %v5950_v42 }
 0x81c   : > { %3340 = vmatpush.msrb.mxu0 %v5940_v37 }
 0x81d   : > { %v3011_v14 = vpop.f32.mrf.mxu0 }
 0x82b   : > { %v8811_v6 = vpop.f32.mrf.mxu3 }
 0x82c   : > { %v4130_v48 = vmul.f32 %v4129_v27, %v8811_v6 }
 0x82e   : > { %4132 = vadd.xlane.f32.xlu0 %v4130_v48  ;;  %v5969_v48 = vld [vmem:[%s10882_s26 + $0x608] sm:$0xff] }
 0x843   : > { %v8760_v10 = vpop.trf.xlu1 }
 0x87a   : > { %v3695_v29 = vpop.xlane.xlu1 %3694 }
 0x87b   : > { %3704 = vxpose.xlu2.b32.end [2/2] (short) (narrow) %v3695_v29, 8  ;;  %v6049_v29 = vld [vmem:[%s10882_s26 + $0x888] sm:$0xff] }
 0x882   : > { %v4023_v44 = vpop.xlane.xlu1 %4022 }
 0x883   : > { %4033 = vxpose.xlu1.b32.start [1/2] (short) (narrow) %v4023_v44, 8  ;;  %v6044_v44 = vld [vmem:[%s10882_s26 + $0x860] sm:$0xff] }
 0x88a   : > { %v2979_v56 = vpop.xlane.xlu1 %2978 }
 0x88b   : > { %6485 = vrcp.f32 %v2979_v56  ;;  %4034 = vxpose.xlu1.b32.end [2/2] (short) (narrow) %v4025_v41, 8  ;;  %v6019_v41 = vld [vmem:[%s10882_s26 + $0x798] sm:$0xff]  ;;  %v8950_v56 = vpop.f32.mrf.mxu3 }
 0x88c   : > { %v4131_v54 = vmul.f32 %v4129_v27, %v8950_v56  ;;  %v5979_v27 = vld [vmem:[%s10882_s26 + $0x658] sm:$0xff] }
 0x891   : > { %v6486_v59 = vpop.eup %6485 }
 0x892   : > { %v2983_v32 = vmul.f32 %v6486_v59, %v8706_v8  ;;  %v3031_v8 = vld [vmem:[%s10845_s11 + $0x28] sm:$0xff] }
 0x893   : > { %3053 = vmatpush.msra.mxu1 %v3031_v8  ;;  %v6009_v59 = vld [vmem:[%s10882_s26 + $0x748] sm:$0xff]  ;;  %v5939_v8 = vld [vmem:[%s10882_s26 + $0x518] sm:$0xff] }
 0x894   : > { %5931 = vmatmul.msk.f32.gmra.mxu0 %vm1299_vm2, %v2983_v32  ;;  %v6004_v32 = vld [vmem:[%s10882_s26 + $0x720] sm:$0xff] }
 0x895   : > { %3054 = vmatpush.msra.mxu1 %v3030_v45  ;;  %v4460_v45 = vmul.f32 %v4459_v26, %v8894_v13  ;;  %v3909_v26 = vperm.slane %v8499_v36, 4 }
 0x897   : > { %3055 = vmatpush.msra.mxu1 %v3029_v24  ;;  %v6355_v24 = vld [vmem:[%s10844_s10] ss:$0 sm:$0xff] }
 0x899   : > { %3056 = vmatpush.msra.mxu1 %v3028_v2  ;;  %v3012_v2 = vadd.f32 %v6355_v24, %v3011_v14  ;;  %v3916_v14 = vperm.slane %v8883_v53, 4 }
 0x89b   : > { %3057 = vmatpush.msra.mxu1 %v3027_v31  ;;  %v3017_v37 = vmax.f32 %v3012_v2, 0.0 }
 0x89c   : > { %3249 = vmatmul.f32.vlgmr.msra.gmra.mxu0 %v8472_v51 }
 0x89d   : > { %3058 = vmatpush.msra.mxu1 %v3026_v62  ;;  %3417 = vmatpush.msra.mxu0 %v6094_v55  ;;  %v4026_v55 = vperm.slane %v8883_v53, 5 }
 0x89f   : > { %3302 = vmatpush.msrb.mxu1 %v6089_v52  ;;  %3418 = vmatpush.msra.mxu0 %v6084_v3  ;;  %v4027_v1 = vmul.f32 %v4026_v55, %v8650_v16  ;;  %v6083_v16 = vld [vmem:[%s10882_s26 + $0x998] sm:$0xff] }
 0x8a1   : > { %3303 = vmatpush.msrb.mxu1 %v6079_v9  ;;  %3419 = vmatpush.msra.mxu0 %v6074_v38 }
 0x8a3   : > { %3304 = vmatpush.msrb.mxu1 %v6069_v34  ;;  %3420 = vmatpush.msra.mxu0 %v6064_v12 }
 0x8a4   : > { %3252 = vmatmul.f32.gmra.mxu0 %v8476_v17 }
 0x8a5   : > { %3305 = vmatpush.msrb.mxu1 %v6059_v61  ;;  %3421 = vmatpush.msra.mxu0 %v6054_v11  ;;  %v3698_v11 = vmul.f32 %v3696_v43, %v8666_v40 }
 0x8a7   : > { %3306 = vmatpush.msrb.mxu1 %v6049_v29  ;;  %3422 = vmatpush.msra.mxu0 %v6044_v44  ;;  %v6093_v44 = vld [vmem:[%s10882_s26 + $0x9e8] sm:$0xff] }
 0x8a9   : > { %3307 = vmatpush.msrb.mxu1 %v6039_v47  ;;  %3423 = vmatpush.msra.mxu0 %v6034_v57  ;;  %v6073_v47 = vld [vmem:[%s10882_s26 + $0x948] sm:$0xff]  ;;  %v6063_v57 = vld [vmem:[%s10882_s26 + $0x8f8] sm:$0xff] }
 0x8ab   : > { %3308 = vmatpush.msrb.mxu1 %v6029_v21  ;;  %3424 = vmatpush.msra.mxu0 %v6024_v58  ;;  %v6053_v21 = vld [vmem:[%s10882_s26 + $0x8a8] sm:$0xff] }
 0x8ac   : > { %3341 = vmatmul.f32.vlgmr.msrb.gmra.mxu0 %v8472_v51  ;;  %v6013_v58 = vld [vmem:[%s10882_s26 + $0x768] sm:$0xff] }
 0x8ad   : > { %3309 = vmatpush.msrb.mxu1 %v6019_v41  ;;  %3425 = vmatpush.msra.mxu0 %v6014_v39  ;;  %v6003_v41 = vld [vmem:[%s10882_s26 + $0x718] sm:$0xff]  ;;  %v5993_v39 = vld [vmem:[%s10882_s26 + $0x6c8] sm:$0xff] }
 0x8af   : > { %3310 = vmatpush.msrb.mxu1 %v6009_v59  ;;  %3426 = vmatpush.msra.mxu0 %v6004_v32  ;;  %v5983_v59 = vld [vmem:[%s10882_s26 + $0x678] sm:$0xff]  ;;  %v5973_v32 = vld [vmem:[%s10882_s26 + $0x628] sm:$0xff] }
 0x8b1   : > { %3311 = vmatpush.msrb.mxu1 %v5999_v28  ;;  %3427 = vmatpush.msra.mxu0 %v5994_v23  ;;  %v5963_v28 = vld [vmem:[%s10882_s26 + $0x5d8] sm:$0xff] }
 0x8b2   : > { %v5943_v23 = vld [vmem:[%s10882_s26 + $0x538] sm:$0xff] }
 0x8b3   : > { %3312 = vmatpush.msrb.mxu1 %v5989_v35  ;;  %3428 = vmatpush.msra.mxu0 %v5984_v25  ;;  %v4133_v35 = vpop.xlane.xlu0 %4132 }
 0x8b4   : > { %3344 = vmatmul.f32.gmra.mxu0 %v8476_v17  ;;  %4143 = vxpose.xlu2.b32.start [1/2] (short) (narrow) %v4133_v35, 8 }
 0x8b5   : > { %3313 = vmatpush.msrb.mxu1 %v5979_v27  ;;  %3429 = vmatpush.msra.mxu0 %v5974_v4  ;;  %v9087_v27 = vld [vmem:[%s10884_s29 + $0x18] sm:$0x3] }
 0x8b6   : > { %v4466_v4 = vperm.slane %v9087_v27, 1 }
 0x8b7   : > { %3314 = vmatpush.msrb.mxu1 %v5969_v48  ;;  %3430 = vmatpush.msra.mxu0 %v5964_v7 }
 0x8b8   : > { %v4467_v48 = vmul.f32 %v4466_v4, %v8894_v13  ;;  %v4468_v43 = vmul.f32 %v4466_v4, %v8926_v30 }
 0x8b9   : > { %3315 = vmatpush.msrb.mxu1 %v5959_v33  ;;  %3431 = vmatpush.msra.mxu0 %v5954_v20  ;;  %v3476_v33 = vperm.slane %v8883_v53, 0 }
 0x8bb   : > { %3316 = vmatpush.msrb.mxu1 %v5949_v63  ;;  %3432 = vmatpush.msra.mxu0 %v5944_v0 }
 0x8bc   : > { %3433 = vmatmul.f32.vlgmr.msra.gmra.mxu0 %v8472_v51 }
 0x8bd   : > { %3317 = vmatpush.msrb.mxu1 %v5939_v8 }
 0x8c4   : > { %3436 = vmatmul.f32.gmra.mxu0 %v8476_v17 }
 0x8eb   : > { %3589 = vadd.xlane.f32.xlu1 %v3587_v46 }
 0x8f3   : > { %3591 = vadd.xlane.f32.xlu1 %v3588_v49  ;;  %v6023_v49 = vld [vmem:[%s10882_s26 + $0x7b8] sm:$0xff] }
 0x8fb   : > { %4134 = vadd.xlane.f32.xlu1 %v4131_v54  ;;  %v5953_v54 = vld [vmem:[%s10882_s26 + $0x588] sm:$0xff] }
 0x903   : > { %3699 = vadd.xlane.f32.xlu1 %v3697_v18 }
 0x90b   : > { %4462 = vadd.xlane.f32.xlu1 %v4460_v45 }
 0x911   : > { %v3014_v42 = vpop.f32.mrf.mxu0 }
 0x912   : > { %v3015_v31 = vadd.f32 %v6355_v24, %v3014_v42 }
 0x913   : > { %4464 = vadd.xlane.f32.xlu1 %v4461_v5 }
 0x914   : > { %v3018_v62 = vmax.f32 %v3015_v31, 0.0 }
 0x916   : > { %v3019_v52 = vmax.f32 %v3017_v37, %v3018_v62  ;;  %v4349_v37 = vperm.slane %v8995_v19, 0 }
 0x918   : > { %v3020_v3 = vrot.slane %v3019_v52, 4 }
 0x919   : > { %v9016_v9 = vpop.f32.mrf.mxu0 }
 0x91a   : > { %v3021_v38 = vmax.f32 %v3019_v52, %v3020_v3  ;;  %v3477_v13 = vmul.f32 %v3476_v33, %v9016_v9 }
 0x91b   : > { %4029 = vadd.xlane.f32.xlu1 %v4027_v1 }
 0x91c   : > { %v3022_v34 = vrot.slane %v3021_v38, 2 }
 0x91e   : > { %v3023_v12 = vmax.f32 %v3021_v38, %v3022_v34 }
 0x920   : > { %v3024_v61 = vrot.slane %v3023_v12, 1 }
 0x921   : > { %v9021_v46 = vpop.f32.mrf.mxu0 }
 0x922   : > { %3570 = vmatpush.msrb.mxu3 %v9021_v46  ;;  %v3025_v29 = vmax.f32 %v3023_v12, %v3024_v61  ;;  %v3719_v12 = vpop.trf.xlu2 }
 0x923   : > { %3701 = vadd.xlane.f32.xlu1 %v3698_v11  ;;  %v3735_v61 = vperm.slane %v3719_v12, 0 }
 0x924   : > { %3059 = vmatmul.f32.vlgmr.msra.gmra.mxu1 %v3025_v29  ;;  %3571 = vmatpush.msrb.mxu3 %v9016_v9 }
 0x925   : > { %3394 = vmatpush.msra.mxu1 %v6093_v44  ;;  %v3806_v44 = vperm.slane %v8883_v53, 3 }
 0x926   : > { %3790 = vmatpush.msra.mxu3 %v8666_v40  ;;  %v6043_v40 = vld [vmem:[%s10882_s26 + $0x858] sm:$0xff] }
 0x927   : > { %3395 = vmatpush.msra.mxu1 %v6083_v16  ;;  %v9082_v25 = vpop.trf.xlu1  ;;  %v3799_v16 = vperm.slane %v8499_v36, 3 }
 0x928   : > { %3791 = vmatpush.msra.mxu3 %v8647_v15  ;;  %v6033_v15 = vld [vmem:[%s10882_s26 + $0x808] sm:$0xff] }
 0x929   : > { %3396 = vmatpush.msra.mxu1 %v6073_v47  ;;  %v3342_v0 = vpop.f32.mrf.mxu0 }
 0x92a   : > { %v3917_v5 = vmul.f32 %v3916_v14, %v3342_v0  ;;  %v9111_v52 = vmul.f32 %v3909_v26, %v3342_v0 }
 0x92b   : > { %3397 = vmatpush.msra.mxu1 %v6063_v57  ;;  %4469 = vadd.xlane.f32.xlu1 %v4467_v48  ;;  %v9137_v48 = vld [vmem:[%s7450_s2 + $0x10] sm:$0xff] }
 0x92c   : > { %3318 = vmatmul.f32.vlgmr.msrb.gmra.mxu1 %v8472_v51  ;;  %vm3070_vm4 = vcmp.gt.f32.partialorder %v9137_v48, 0.0  ;;  %v6319_v48 = vld [vmem:[%s10845_s11 + $0xe0] sm:$0xff] }
 0x92d   : > { %3398 = vmatpush.msra.mxu1 %v6053_v21 }
 0x92f   : > { %3399 = vmatpush.msra.mxu1 %v6043_v40 }
 0x931   : > { %3400 = vmatpush.msra.mxu1 %v6033_v15  ;;  %v3345_v8 = vpop.f32.mrf.mxu0 }
 0x932   : > { %v3911_v45 = vmul.f32 %v3909_v26, %v3345_v8  ;;  %v3918_v2 = vmul.f32 %v3916_v14, %v3345_v8 }
 0x933   : > { %3401 = vmatpush.msra.mxu1 %v6023_v49  ;;  %4471 = vadd.xlane.f32.xlu1 %v4468_v43  ;;  %v4028_v43 = vmul.f32 %v4026_v55, %v8658_v60  ;;  %v9163_v55 = vld [vmem:[%s7450_s2 + $0x18] sm:$0xff]  ;;  %s838_s2 = scalar_lea.vmem %s10890_s27, %s5889_s20  ;;  %s10892_s20 = sld [smem:[#allocation17_spill]] }
 0x934   : > { %3321 = vmatmul.f32.gmra.mxu1 %v8476_v17  ;;  %vm3071_vm8 = vcmp.gt.f32.partialorder %v9163_v55, 0.0  ;;  %v6320_v55 = vld [vmem:[%s10845_s11 + $0xe8] sm:$0xff] }
 0x935   : > { %3402 = vmatpush.msra.mxu1 %v6013_v58  ;;  %v6615_v58 = vld [vmem:[%s10883_s6 + $0x10] sm:$0xff] }
 0x937   : > { %3403 = vmatpush.msra.mxu1 %v6003_v41  ;;  %v4239_v41 = vperm.slane %v6615_v58, 7 }
 0x939   : > { %3404 = vmatpush.msra.mxu1 %v5993_v39  ;;  %v9107_v31 = vpop.f32.mrf.mxu0  ;;  %v4246_v39 = vperm.slane %v8883_v53, 7  ;;  %s841_s23 = scalar_lea.vmem %s10892_s20, %s10897_s30 }
 0x93a   : > { %v4350_v62 = vmul.f32 %v4349_v37, %v9107_v31 }
 0x93b   : > { %3405 = vmatpush.msra.mxu1 %v5983_v59 }
 0x93d   : > { %3406 = vmatpush.msra.mxu1 %v5973_v32 }
 0x93f   : > { %3407 = vmatpush.msra.mxu1 %v5963_v28 }
 0x941   : > { %3408 = vmatpush.msra.mxu1 %v5953_v54  ;;  %v9116_v1 = vpop.f32.mrf.mxu0 }
 0x942   : > { %v4351_v38 = vmul.f32 %v4349_v37, %v9116_v1 }
 0x943   : > { %3409 = vmatpush.msra.mxu1 %v5943_v23 }
 0x944   : > { %3410 = vmatmul.f32.vlgmr.msra.gmra.mxu1 %v8472_v51  ;;  %v3469_v51 = vperm.slane %v8499_v36, 0 }
 0x945   : > { %3680 = vmatpush.msrb.mxu1 %v8517_v50 }
 0x946   : > { %v3471_v20 = vmul.f32 %v3469_v51, %v9021_v46 }
 0x947   : > { %3681 = vmatpush.msrb.mxu1 %v8488_v22  ;;  %v3625_v22 = vperm.slane %v8760_v10, 0  ;;  %v3478_v10 = vmul.f32 %v3476_v33, %v9021_v46 }
 0x948   : > { %3474 = vadd.xlane.f32.xlu1 %v3471_v20 }
 0x949   : > { %4010 = vmatpush.msra.mxu1 %v3345_v8 }
 0x94b   : > { %4011 = vmatpush.msra.mxu1 %v3342_v0 }
 0x94c   : > { %3413 = vmatmul.f32.gmra.mxu1 %v8476_v17  ;;  %v3470_v17 = vmul.f32 %v3469_v51, %v9016_v9  ;;  %v4356_v9 = vperm.slane %v9087_v27, 0 }
 0x94e   : > { %3472 = vadd.xlane.f32.xlu0 %v3470_v17  ;;  %v4358_v34 = vmul.f32 %v4356_v9, %v9116_v1  ;;  %v4136_v17 = vperm.slane %v8883_v53, 6 }
 0x950   : > { %3481 = vadd.xlane.f32.xlu1 %v3478_v10  ;;  %v4137_v33 = vmul.f32 %v4136_v17, %v8811_v6 }
 0x956   : > { %3479 = vadd.xlane.f32.xlu0 %v3477_v13 }
 0x958   : > { %3919 = vadd.xlane.f32.xlu1 %v3917_v5 }
 0x95e   : > { %v3590_v50 = vpop.xlane.xlu1 %3589  ;;  %3914 = vadd.xlane.f32.xlu0 %v3911_v45 }
 0x95f   : > { %v9095_v7 = vadd.f32 %v3625_v22, %v3590_v50 }
 0x960   : > { %4354 = vadd.xlane.f32.xlu1 %v4351_v38 }
 0x961   : > { %v3630_v20 = vmul.f32 0.2, %v9095_v7  ;;  %vm3628_vm6 = vcmp.gt.f32.partialorder %v9095_v7, 0.0 }
 0x963   : > { %v3632_v0 = vsel %vm3628_vm6, %v9095_v7, %v3630_v20 }
 0x964   : > { %v9159_v60 = vsel %vm3070_vm4, %v3632_v0, -1e+30 }
 0x965   : > { %v3636_v10 = vsel %vm1299_vm2, %v9159_v60, -inf }
 0x966   : > { %v3592_v63 = vpop.xlane.xlu1 %3591  ;;  %3921 = vadd.xlane.f32.xlu0 %v3918_v2 }
 0x967   : > { %v9100_v18 = vadd.f32 %v3625_v22, %v3592_v63  ;;  %v4138_v63 = vmul.f32 %v4136_v17, %v8950_v56  ;;  %v4065_v17 = vperm.slane %v9082_v25, 0 }
 0x969   : > { %v3631_v53 = vmul.f32 0.2, %v9100_v18  ;;  %vm3629_vm7 = vcmp.gt.f32.partialorder %v9100_v18, 0.0 }
 0x96e   : > { %v4135_v30 = vpop.xlane.xlu1 %4134  ;;  %4352 = vadd.xlane.f32.xlu0 %v4350_v62 }
 0x96f   : > { %4144 = vxpose.xlu2.b32.end [2/2] (short) (narrow) %v4135_v30, 8  ;;  %v3633_v30 = vsel %vm3629_vm7, %v9100_v18, %v3631_v53  ;;  %v4357_v18 = vmul.f32 %v4356_v9, %v9107_v31 }
 0x970   : > { %v9174_v26 = vsel %vm3071_vm8, %v3633_v30, -1e+30 }
 0x971   : > { %v3639_v45 = vsel %vm1299_vm2, %v9174_v26, -inf }
 0x976   : > { %v3700_v24 = vpop.xlane.xlu1 %3699  ;;  %4361 = vadd.xlane.f32.xlu0 %v4358_v34 }
 0x977   : > { %v3736_v28 = vadd.f32 %v3735_v61, %v3700_v24 }
 0x979   : > { %v3740_v54 = vmul.f32 0.2, %v3736_v28  ;;  %vm3738_vm0 = vcmp.gt.f32.partialorder %v3736_v28, 0.0 }
 0x97b   : > { %v3742_v51 = vsel %vm3738_vm0, %v3736_v28, %v3740_v54 }
 0x97c   : > { %v9142_v22 = vsel %vm3070_vm4, %v3742_v51, -1e+30 }
 0x97d   : > { %v3746_v50 = vsel %vm1299_vm2, %v9142_v22, -inf }
 0x97e   : > { %v9105_v42 = vpop.xlane.xlu1 %4462 }
 0x986   : > { %v9113_v3 = vpop.xlane.xlu1 %4464 }
 0x98e   : > { %v9122_v19 = vpop.xlane.xlu1 %4029 }
 0x996   : > { %v3702_v46 = vpop.xlane.xlu1 %3701 }
 0x997   : > { %v9124_v11 = vadd.f32 %v3735_v61, %v3702_v46 }
 0x999   : > { %vm3739_vm15 = vcmp.gt.f32.partialorder %v9124_v11, 0.0 }
 0x99e   : > { %v9154_v13 = vpop.xlane.xlu1 %4469 }
 0x9a1   : > { %v9126_v29 = vpop.f32.mrf.mxu1 }
 0x9a6   : > { %v9170_v8 = vpop.xlane.xlu1 %4471 }
 0x9a9   : > { %v3319_v47 = vpop.f32.mrf.mxu1 }
 0x9aa   : > { %v3800_v57 = vmul.f32 %v3799_v16, %v3319_v47  ;;  %v3807_v21 = vmul.f32 %v3806_v44, %v3319_v47 }
 0x9ac   : > { %3809 = vadd.xlane.f32.xlu0 %v3807_v21  ;;  %3802 = vadd.xlane.f32.xlu1 %v3800_v57 }
 0x9b1   : > { %v3322_v40 = vpop.f32.mrf.mxu1 }
 0x9b2   : > { %v3801_v15 = vmul.f32 %v3799_v16, %v3322_v40  ;;  %3900 = vmatpush.msrb.mxu0 %v3322_v40  ;;  %v3808_v49 = vmul.f32 %v3806_v44, %v3322_v40 }
 0x9b4   : > { %3804 = vadd.xlane.f32.xlu0 %v3801_v15  ;;  %3901 = vmatpush.msrb.mxu0 %v3319_v47 }
 0x9bb   : > { %v3475_v14 = vpop.xlane.xlu1 %3474 }
 0x9c1   : > { %v3411_v36 = vpop.f32.mrf.mxu1  ;;  %v3473_v7 = vpop.xlane.xlu0 %3472 }
 0x9c2   : > { %v4240_v59 = vmul.f32 %v4239_v41, %v3411_v36  ;;  %v9134_v32 = vmul.f32 %v4246_v39, %v3411_v36 }
 0x9c3   : > { %v3482_v2 = vpop.xlane.xlu1 %3481 }
 0x9c4   : > { %4242 = vadd.xlane.f32.xlu0 %v4240_v59 }
 0x9c9   : > { %v3414_v23 = vpop.f32.mrf.mxu1  ;;  %v3480_v24 = vpop.xlane.xlu0 %3479 }
 0x9ca   : > { %v4248_v35 = vmul.f32 %v4246_v39, %v3414_v23  ;;  %v4241_v4 = vmul.f32 %v4239_v41, %v3414_v23  ;;  %4340 = vmatpush.msra.mxu0 %v3414_v23 }
 0x9cb   : > { %v9186_v62 = vpop.xlane.xlu1 %3919 }
 0x9cc   : > { %4244 = vadd.xlane.f32.xlu0 %v4241_v4  ;;  %4251 = vadd.xlane.f32.xlu1 %v4248_v35 }
 0x9cd   : > { %4341 = vmatpush.msra.mxu0 %v3411_v36 }
 0x9d1   : > { %v3915_v5 = vpop.xlane.xlu0 %3914 }
 0x9d4   : > { %3747 = vmax.xlane.f32.xlu0 %v3746_v50 }
 0x9d9   : > { %v9184_v37 = vpop.xlane.xlu0 %3921 }
 0x9e0   : > { %4031 = vadd.xlane.f32.xlu2 %v4028_v43 }
 0x9e1   : > { %v4353_v38 = vpop.xlane.xlu0 %4352 }
 0x9e8   : > { %4139 = vadd.xlane.f32.xlu2 %v4137_v33 }
 0x9e9   : > { %v9192_v46 = vpop.xlane.xlu0 %4361 }
 0x9f0   : > { %4141 = vadd.xlane.f32.xlu2 %v4138_v63 }
 0x9f8   : > { %3637 = vmax.xlane.f32.xlu2 %v3636_v10 }
 0x9fd   : > { %3483 = vxpose.xlu0.b32.start [1/2] (short) (narrow) %v3473_v7, 8 }
 0xa00   : > { %3640 = vmax.xlane.f32.xlu2 %v3639_v45 }
 0xa05   : > { %3484 = vxpose.xlu0.b32.end [2/2] (short) (narrow) %v3475_v14, 8 }
 0xa06   : > { %4473 = vxpose.xlu1.b32.start [1/2] (short) (narrow) %v9105_v42, 8  ;;  %v4355_v42 = vpop.xlane.xlu1 %4354 }
 0xa08   : > { %3912 = vadd.xlane.f32.xlu2 %v9111_v52  ;;  %v4159_v52 = vpop.trf.xlu2 }
 0xa0e   : > { %4474 = vxpose.xlu1.b32.end [2/2] (short) (narrow) %v9113_v3, 8  ;;  %v4175_v3 = vperm.slane %v4159_v52, 0  ;;  %v4066_v52 = vadd.f32 %v4065_v17, %v9122_v19  ;;  %v3741_v19 = vmul.f32 0.2, %v9124_v11 }
 0xa10   : > { %4359 = vadd.xlane.f32.xlu2 %v4357_v18  ;;  %vm4068_vm14 = vcmp.gt.f32.partialorder %v4066_v52, 0.0 }
 0xa18   : > { %3811 = vadd.xlane.f32.xlu2 %v3808_v49 }
 0xa1f   : > { %v9198_v47 = vpop.xlane.xlu0 %3809  ;;  %v3803_v50 = vpop.xlane.xlu1 %3802 }
 0xa27   : > { %v3805_v21 = vpop.xlane.xlu0 %3804 }
 0xa37   : > { %v4243_v40 = vpop.xlane.xlu0 %4242 }
 0xa3f   : > { %v4245_v15 = vpop.xlane.xlu0 %4244  ;;  %v9215_v43 = vpop.xlane.xlu1 %4251 }
 0xa41   : > { %4363 = vxpose.xlu2.b32.start [1/2] (short) (narrow) %v4353_v38, 8 }
 0xa47   : > { %v9200_v49 = vpop.xlane.xlu0 %3747 }
 0xa49   : > { %4364 = vxpose.xlu2.b32.end [2/2] (short) (narrow) %v4355_v42, 8 }
 0xa53   : > { %v4032_v34 = vpop.xlane.xlu2 %4031 }
 0xa54   : > { %v4067_v33 = vadd.f32 %v4065_v17, %v4032_v34 }
 0xa56   : > { %v4071_v63 = vmul.f32 0.2, %v4067_v33  ;;  %vm4069_vm11 = vcmp.gt.f32.partialorder %v4067_v33, 0.0 }
 0xa58   : > { %v4073_v10 = vsel %vm4069_vm11, %v4067_v33, %v4071_v63 }
 0xa59   : > { %v9226_v30 = vsel %vm3071_vm8, %v4073_v10, -1e+30 }
 0xa5a   : > { %v4079_v25 = vsel %vm1299_vm2, %v9226_v30, -inf }
 0xa5b   : > { %v4140_v12 = vpop.xlane.xlu2 %4139 }
 0xa5c   : > { %v9188_v61 = vadd.f32 %v4175_v3, %v4140_v12 }
 0xa5e   : > { %vm4178_vm3 = vcmp.gt.f32.partialorder %v9188_v61, 0.0 }
 0xa63   : > { %v4142_v27 = vpop.xlane.xlu2 %4141 }
 0xa64   : > { %v9190_v9 = vadd.f32 %v4175_v3, %v4142_v27  ;;  %v4070_v27 = vmul.f32 0.2, %v4066_v52 }
 0xa66   : > { %vm4179_vm0 = vcmp.gt.f32.partialorder %v9190_v9, 0.0 }
 0xa6b   : > { %v9194_v44 = vpop.xlane.xlu2 %3637 }
 0xa73   : > { %v9196_v16 = vpop.xlane.xlu2 %3640 }
 0xa7b   : > { %v3913_v57 = vpop.xlane.xlu2 %3912 }
 0xa7c   : > { %3923 = vxpose.xlu0.b32.start [1/2] (short) (narrow) %v3913_v57, 8 }
 0xa84   : > { %3924 = vxpose.xlu0.b32.end [2/2] (short) (narrow) %v3915_v5, 8 }
 0xa8c   : > { %4253 = vxpose.xlu0.b32.start [1/2] (short) (narrow) %v4243_v40, 8 }
 0xa94   : > { %4254 = vxpose.xlu0.b32.end [2/2] (short) (narrow) %v4245_v15, 8 }
 0xaa1   : > { %v3499_v58 = vpop.trf.xlu0 }
 0xaa2   : > { %v3515_v41 = vperm.slane %v3499_v58, 0 }
 0xaa4   : > { %v3516_v39 = vadd.f32 %v3515_v41, %v3480_v24  ;;  %v3517_v59 = vadd.f32 %v3515_v41, %v3482_v2  ;;  %v3743_v41 = vsel %vm3739_vm15, %v9124_v11, %v3741_v19 }
 0xaa6   : > { %v3520_v36 = vmul.f32 0.2, %v3516_v39  ;;  %vm3518_vm9 = vcmp.gt.f32.partialorder %v3516_v39, 0.0  ;;  %v3521_v23 = vmul.f32 0.2, %v3517_v59  ;;  %vm3519_vm10 = vcmp.gt.f32.partialorder %v3517_v59, 0.0 }
 0xaa8   : > { %v3522_v28 = vsel %vm3518_vm9, %v3516_v39, %v3520_v36  ;;  %v3523_v4 = vsel %vm3519_vm10, %v3517_v59, %v3521_v23  ;;  %v9258_v39 = vsel %vm3071_vm8, %v3743_v41, -1e+30 }
 0xaa9   : > { %v9205_v54 = vsel %vm3070_vm4, %v3522_v28, -1e+30  ;;  %v9211_v51 = vsel %vm3071_vm8, %v3523_v4, -1e+30  ;;  %v3749_v28 = vsel %vm1299_vm2, %v9258_v39, -inf }
 0xaaa   : > { %v3526_v35 = vsel %vm1299_vm2, %v9205_v54, -inf  ;;  %v9218_v20 = vpop.trf.xlu1 }
 0xaab   : > { %v4505_v0 = vperm.slane %v9218_v20, 0 }
 0xaad   : > { %v4506_v53 = vadd.f32 %v4505_v0, %v9154_v13  ;;  %v4360_v13 = vpop.xlane.xlu2 %4359 }
 0xaaf   : > { %v4510_v7 = vmul.f32 0.2, %v4506_v53  ;;  %vm4508_vm12 = vcmp.gt.f32.partialorder %v4506_v53, 0.0 }
 0xab1   : > { %v4512_v45 = vsel %vm4508_vm12, %v4506_v53, %v4510_v7 }
 0xab2   : > { %v9232_v14 = vsel %vm3070_vm4, %v4512_v45, -1e+30 }
 0xab3   : > { %v4516_v18 = vsel %vm1299_vm2, %v9232_v14, -inf }
 0xab5   : > { %v3812_v38 = vpop.xlane.xlu2 %3811 }
 0xaba   : > { %4249 = vadd.xlane.f32.xlu2 %v9134_v32  ;;  %v3529_v32 = vsel %vm1299_vm2, %v9211_v51, -inf }
 0xac2   : > { %3527 = vmax.xlane.f32.xlu2 %v3526_v35 }
 0xaca   : > { %3530 = vmax.xlane.f32.xlu2 %v3529_v32 }
 0xada   : > { %v9238_v3 = vpop.trf.xlu2 }
 0xadb   : > { %v4395_v11 = vperm.slane %v9238_v3, 0 }
 0xadd   : > { %v4397_v19 = vadd.f32 %v4395_v11, %v9192_v46 }
 0xadf   : > { %v4401_v46 = vmul.f32 0.2, %v4397_v19  ;;  %vm4399_vm10 = vcmp.gt.f32.partialorder %v4397_v19, 0.0 }
 0xaf3   : > { %3813 = vxpose.xlu2.b32.start [1/2] (short) (narrow) %v3803_v50, 8  ;;  %v4396_v50 = vadd.f32 %v4395_v11, %v4360_v13 }
 0xaf5   : > { %v4400_v10 = vmul.f32 0.2, %v4396_v50  ;;  %vm4398_vm5 = vcmp.gt.f32.partialorder %v4396_v50, 0.0 }
 0xaf7   : > { %v4402_v13 = vsel %vm4398_vm5, %v4396_v50, %v4400_v10  ;;  %v4403_v50 = vsel %vm4399_vm10, %v4397_v19, %v4401_v46 }
 0xafb   : > { %3814 = vxpose.xlu2.b32.end [2/2] (short) (narrow) %v3805_v21, 8  ;;  %v4072_v21 = vsel %vm4068_vm14, %v4066_v52, %v4070_v27  ;;  %v9288_v52 = vsel %vm3070_vm4, %v4402_v13, -1e+30 }
 0xafc   : > { %v9248_v40 = vsel %vm3070_vm4, %v4072_v21, -1e+30 }
 0xafd   : > { %v4076_v15 = vsel %vm1299_vm2, %v9248_v40, -inf }
 0xb05   : > { %4080 = vmax.xlane.f32.xlu0 %v4079_v25 }
 0xb0d   : > { %4517 = vmax.xlane.f32.xlu0 %v4516_v18 }
 0xb20   : > { %v3939_v24 = vpop.trf.xlu0 }
 0xb21   : > { %v3955_v5 = vperm.slane %v3939_v24, 0 }
 0xb23   : > { %v3956_v2 = vadd.f32 %v3955_v5, %v9186_v62  ;;  %v3957_v58 = vadd.f32 %v3955_v5, %v9184_v37  ;;  %v4180_v37 = vmul.f32 0.2, %v9188_v61 }
 0xb25   : > { %v3960_v42 = vmul.f32 0.2, %v3956_v2  ;;  %vm3958_vm13 = vcmp.gt.f32.partialorder %v3956_v2, 0.0  ;;  %v3961_v36 = vmul.f32 0.2, %v3957_v58  ;;  %vm3959_vm1 = vcmp.gt.f32.partialorder %v3957_v58, 0.0 }
 0xb26   : > { %v4182_v17 = vsel %vm4178_vm3, %v9188_v61, %v4180_v37 }
 0xb27   : > { %v3962_v34 = vsel %vm3958_vm13, %v3956_v2, %v3960_v42  ;;  %v3963_v23 = vsel %vm3959_vm1, %v3957_v58, %v3961_v36  ;;  %v9277_v53 = vsel %vm3070_vm4, %v4182_v17, -1e+30  ;;  %v4181_v2 = vmul.f32 0.2, %v9190_v9 }
 0xb28   : > { %v9242_v12 = vsel %vm3070_vm4, %v3962_v34, -1e+30  ;;  %v9264_v35 = vsel %vm3071_vm8, %v3963_v23, -1e+30  ;;  %v4186_v25 = vsel %vm1299_vm2, %v9277_v53, -inf  ;;  %v3643_v42 = vsub.f32 %v9174_v26, %v9196_v16 }
 0xb29   : > { %v3966_v57 = vsel %vm1299_vm2, %v9242_v12, -inf  ;;  %v3969_v4 = vsel %vm1299_vm2, %v9264_v35, -inf  ;;  %v4183_v16 = vsel %vm4179_vm0, %v9190_v9, %v4181_v2  ;;  %v3642_v36 = vsub.f32 %v9159_v60, %v9194_v44 }
 0xb2a   : > { %v9313_v9 = vsel %vm3071_vm8, %v4183_v16, -1e+30 }
 0xb2b   : > { %v3644_v11 = vmul.f32 1.442695, %v3642_v36  ;;  %v4189_v44 = vsel %vm1299_vm2, %v9313_v9, -inf }
 0xb2d   : > { %v4250_v62 = vpop.xlane.xlu2 %4249 }
 0xb30   : > { %v4269_v33 = vpop.trf.xlu0 }
 0xb31   : > { %v4285_v7 = vperm.slane %v4269_v33, 0  ;;  %v3752_v33 = vsub.f32 %v9142_v22, %v9200_v49 }
 0xb33   : > { %v4286_v61 = vadd.f32 %v4285_v7, %v4250_v62  ;;  %v3646_v62 = vmul.f32 1.442695, %v3643_v42  ;;  %v3754_v49 = vmul.f32 1.442695, %v3752_v33 }
 0xb35   : > { %v3528_v59 = vpop.xlane.xlu2 %3527  ;;  %v4290_v27 = vmul.f32 0.2, %v4286_v61  ;;  %vm4288_vm9 = vcmp.gt.f32.partialorder %v4286_v61, 0.0 }
 0xb36   : > { %v3532_v63 = vsub.f32 %v9205_v54, %v3528_v59  ;;  %v4287_v59 = vadd.f32 %v4285_v7, %v9215_v43  ;;  %v9336_v7 = vsel %vm3071_vm8, %v4403_v50, -1e+30 }
 0xb38   : > { %v3534_v45 = vmul.f32 1.442695, %v3532_v63  ;;  %v4291_v60 = vmul.f32 0.2, %v4287_v59  ;;  %vm4289_vm11 = vcmp.gt.f32.partialorder %v4287_v59, 0.0  ;;  %v4507_v63 = vadd.f32 %v4505_v0, %v9170_v8 }
 0xb39   : > { %v4409_v8 = vsel %vm1299_vm2, %v9336_v7, -inf }
 0xb3a   : > { %6487 = vpow2.f32 %v3534_v45  ;;  %v4293_v10 = vsel %vm4289_vm11, %v4287_v59, %v4291_v60  ;;  %vm4509_vm12 = vcmp.gt.f32.partialorder %v4507_v63, 0.0 }
 0xb3b   : > { %6489 = vpow2.f32 %v3646_v62  ;;  %v9342_v45 = vsel %vm3071_vm8, %v4293_v10, -1e+30 }
 0xb3c   : > { %6491 = vpow2.f32 %v3644_v11 }
 0xb3d   : > { %v9271_v32 = vpop.xlane.xlu2 %3530  ;;  %6493 = vpow2.f32 %v3754_v49 }
 0xb40   : > { %v6488_v41 = vpop.eup %6487 }
 0xb41   : > { %v9321_v37 = vsel %vm3070_vm4, %v6488_v41, 0.0  ;;  %v6490_v17 = vpop.eup %6489 }
 0xb42   : > { %v9346_v22 = vsel %vm3071_vm8, %v6490_v17, 0.0  ;;  %v6492_v20 = vpop.eup %6491 }
 0xb43   : > { %v9356_v13 = vsel %vm3070_vm4, %v6492_v20, 0.0 }
 0xb6c   : > { %3967 = vmax.xlane.f32.xlu2 %v3966_v57  ;;  %v4406_v57 = vsel %vm1299_vm2, %v9288_v52, -inf }
 0xb74   : > { %4077 = vmax.xlane.f32.xlu2 %v4076_v15 }
 0xb78   : > { %v4081_v60 = vpop.xlane.xlu0 %4080 }
 0xb7c   : > { %3750 = vmax.xlane.f32.xlu2 %v3749_v28  ;;  %v4292_v28 = vsel %vm4288_vm9, %v4286_v61, %v4290_v27 }
 0xb7d   : > { %v9317_v23 = vsel %vm3070_vm4, %v4292_v28, -1e+30 }
 0xb7e   : > { %v4296_v43 = vsel %vm1299_vm2, %v9317_v23, -inf }
 0xb84   : > { %3970 = vmax.xlane.f32.xlu2 %v3969_v4  ;;  %v3540_v4 = vsel %vm1299_vm2, %v9321_v37, 0.0 }
 0xb8c   : > { %4187 = vmax.xlane.f32.xlu2 %v4186_v25  ;;  %v3829_v18 = vpop.trf.xlu2  ;;  %v3533_v25 = vsub.f32 %v9211_v51, %v9271_v32  ;;  %v4299_v51 = vsel %vm1299_vm2, %v9342_v45, -inf  ;;  %v3653_v32 = vsel %vm1299_vm2, %v9346_v22, 0.0 }
 0xb8d   : > { %v3845_v24 = vperm.slane %v3829_v18, 0  ;;  %v4511_v18 = vmul.f32 0.2, %v4507_v63 }
 0xb8e   : > { %v3536_v0 = vmul.f32 1.442695, %v3533_v25 }
 0xb8f   : > { %v3846_v54 = vadd.f32 %v3845_v24, %v9198_v47  ;;  %v3847_v5 = vadd.f32 %v3845_v24, %v3812_v38  ;;  %v4513_v24 = vsel %vm4509_vm12, %v4507_v63, %v4511_v18  ;;  %v4518_v63 = vpop.xlane.xlu0 %4517 }
 0xb90   : > { %6495 = vpow2.f32 %v3536_v0  ;;  %v9360_v61 = vsel %vm3071_vm8, %v4513_v24, -1e+30 }
 0xb91   : > { %v3850_v34 = vmul.f32 0.2, %v3846_v54  ;;  %v3851_v3 = vmul.f32 0.2, %v3847_v5  ;;  %vm3849_vm6 = vcmp.gt.f32.partialorder %v3847_v5, 0.0  ;;  %vm3848_vm7 = vcmp.gt.f32.partialorder %v3846_v54, 0.0 }
 0xb92   : > { %v4519_v2 = vsel %vm1299_vm2, %v9360_v61, -inf }
 0xb93   : > { %v3853_v47 = vsel %vm3849_vm6, %v3847_v5, %v3851_v3  ;;  %v3852_v38 = vsel %vm3848_vm7, %v3846_v54, %v3850_v34  ;;  %v3650_v54 = vsel %vm1299_vm2, %v9356_v13, 0.0  ;;  %v6494_v5 = vpop.eup %6493 }
 0xb94   : > { %4407 = vmax.xlane.f32.xlu2 %v4406_v57  ;;  %v9294_v21 = vsel %vm3071_vm8, %v3853_v47, -1e+30  ;;  %v9298_v26 = vsel %vm3070_vm4, %v3852_v38, -1e+30  ;;  %v9368_v34 = vsel %vm3070_vm4, %v6494_v5, 0.0 }
 0xb95   : > { %v3859_v15 = vsel %vm1299_vm2, %v9294_v21, -inf  ;;  %v3856_v58 = vsel %vm1299_vm2, %v9298_v26, -inf  ;;  %v3760_v27 = vsel %vm1299_vm2, %v9368_v34, 0.0 }
 0xb96   : > { %3860 = vmax.xlane.f32.xlu0 %v3859_v15  ;;  %3857 = vmax.xlane.f32.xlu1 %v3856_v58  ;;  %v6496_v42 = vpop.eup %6495 }
 0xb97   : > { %v9372_v3 = vsel %vm3071_vm8, %v6496_v42, 0.0 }
 0xb98   : > { %v3543_v57 = vsel %vm1299_vm2, %v9372_v3, 0.0 }
 0xb9c   : > { %4190 = vmax.xlane.f32.xlu2 %v4189_v44 }
 0xb9e   : > { %4297 = vmax.xlane.f32.xlu0 %v4296_v43  ;;  %3541 = vadd.xlane.f32.xlu1 %v3540_v4 }
 0xba4   : > { %4410 = vmax.xlane.f32.xlu2 %v4409_v8 }
 0xba6   : > { %4300 = vmax.xlane.f32.xlu0 %v4299_v51  ;;  %3654 = vadd.xlane.f32.xlu1 %v3653_v32  ;;  %v4083_v32 = vsub.f32 %v9226_v30, %v4081_v60 }
 0xbac   : > { %3651 = vadd.xlane.f32.xlu2 %v3650_v54 }
 0xbae   : > { %4520 = vmax.xlane.f32.xlu0 %v4519_v2  ;;  %v4086_v2 = vmul.f32 1.442695, %v4083_v32 }
 0xbb4   : > { %3761 = vadd.xlane.f32.xlu2 %v3760_v27  ;;  %v4522_v27 = vsub.f32 %v9232_v14, %v4518_v63 }
 0xbb6   : > { %3544 = vadd.xlane.f32.xlu0 %v3543_v57 }
 0xbdf   : > { %v3968_v47 = vpop.xlane.xlu2 %3967 }
 0xbe0   : > { %v3972_v38 = vsub.f32 %v9242_v12, %v3968_v47 }
 0xbe2   : > { %v3974_v16 = vmul.f32 1.442695, %v3972_v38 }
 0xbe4   : > { %6497 = vpow2.f32 %v3974_v16 }
 0xbe7   : > { %v4078_v62 = vpop.xlane.xlu2 %4077 }
 0xbe8   : > { %v4082_v19 = vsub.f32 %v9248_v40, %v4078_v62  ;;  %v4524_v62 = vmul.f32 1.442695, %v4522_v27 }
 0xbea   : > { %v6498_v15 = vpop.eup %6497  ;;  %v4084_v58 = vmul.f32 1.442695, %v4082_v19 }
 0xbeb   : > { %v9382_v41 = vsel %vm3070_vm4, %v6498_v15, 0.0 }
 0xbec   : > { %6499 = vpow2.f32 %v4084_v58  ;;  %v3980_v36 = vsel %vm1299_vm2, %v9382_v41, 0.0 }
 0xbed   : > { %3981 = vadd.xlane.f32.xlu1 %v3980_v36 }
 0xbef   : > { %v3751_v59 = vpop.xlane.xlu2 %3750 }
 0xbf0   : > { %v3753_v28 = vsub.f32 %v9258_v39, %v3751_v59 }
 0xbf2   : > { %v6500_v12 = vpop.eup %6499  ;;  %v3756_v46 = vmul.f32 1.442695, %v3753_v28 }
 0xbf3   : > { %v9389_v11 = vsel %vm3070_vm4, %v6500_v12, 0.0 }
 0xbf4   : > { %6501 = vpow2.f32 %v3756_v46  ;;  %v4090_v40 = vsel %vm1299_vm2, %v9389_v11, 0.0 }
 0xbf5   : > { %4091 = vadd.xlane.f32.xlu2 %v4090_v40 }
 0xbf7   : > { %v3971_v44 = vpop.xlane.xlu2 %3970 }
 0xbf8   : > { %v3973_v43 = vsub.f32 %v9264_v35, %v3971_v44 }
 0xbfa   : > { %v6502_v4 = vpop.eup %6501  ;;  %v3976_v50 = vmul.f32 1.442695, %v3973_v43 }
 0xbfb   : > { %v9396_v39 = vsel %vm3071_vm8, %v6502_v4, 0.0 }
 0xbfc   : > { %6503 = vpow2.f32 %v3976_v50  ;;  %v3763_v17 = vsel %vm1299_vm2, %v9396_v39, 0.0 }
 0xbfd   : > { %3764 = vadd.xlane.f32.xlu0 %v3763_v17 }
 0xbff   : > { %v4188_v33 = vpop.xlane.xlu2 %4187 }
 0xc00   : > { %v4192_v18 = vsub.f32 %v9277_v53, %v4188_v33 }
 0xc02   : > { %v6504_v10 = vpop.eup %6503  ;;  %v4194_v5 = vmul.f32 1.442695, %v4192_v18 }
 0xc03   : > { %v9402_v25 = vsel %vm3071_vm8, %v6504_v10, 0.0 }
 0xc04   : > { %v3983_v35 = vsel %vm1299_vm2, %v9402_v25, 0.0 }
 0xc05   : > { %3984 = vadd.xlane.f32.xlu2 %v3983_v35 }
 0xc07   : > { %v4408_v49 = vpop.xlane.xlu2 %4407 }
 0xc08   : > { %v4412_v30 = vsub.f32 %v9288_v52, %v4408_v49 }
 0xc09   : > { %v3861_v8 = vpop.xlane.xlu0 %3860  ;;  %v3858_v20 = vpop.xlane.xlu1 %3857 }
 0xc0a   : > { %v3863_v0 = vsub.f32 %v9294_v21, %v3861_v8  ;;  %v3862_v51 = vsub.f32 %v9298_v26, %v3858_v20  ;;  %v4414_v58 = vmul.f32 1.442695, %v4412_v30 }
 0xc0c   : > { %v3866_v24 = vmul.f32 1.442695, %v3863_v0  ;;  %v3864_v54 = vmul.f32 1.442695, %v3862_v51 }
 0xc0e   : > { %6505 = vpow2.f32 %v3866_v24 }
 0xc0f   : > { %6507 = vpow2.f32 %v3864_v54  ;;  %v4191_v42 = vpop.xlane.xlu2 %4190 }
 0xc10   : > { %6509 = vpow2.f32 %v4194_v5  ;;  %v4193_v47 = vsub.f32 %v9313_v9, %v4191_v42 }
 0xc11   : > { %v4298_v57 = vpop.xlane.xlu0 %4297  ;;  %v3542_v53 = vpop.xlane.xlu1 %3541 }
 0xc12   : > { %v4302_v21 = vsub.f32 %v9317_v23, %v4298_v57  ;;  %6511 = vrcp.f32 %v3542_v53  ;;  %v4196_v14 = vmul.f32 1.442695, %v4193_v47 }
 0xc13   : > { %6513 = vpow2.f32 %v4086_v2 }
 0xc14   : > { %v6506_v26 = vpop.eup %6505  ;;  %v4304_v38 = vmul.f32 1.442695, %v4302_v21 }
 0xc15   : > { %v6508_v16 = vpop.eup %6507  ;;  %v9416_v19 = vsel %vm3071_vm8, %v6506_v26, 0.0 }
 0xc16   : > { %6515 = vpow2.f32 %v4304_v38  ;;  %v3873_v15 = vsel %vm1299_vm2, %v9416_v19, 0.0  ;;  %v9422_v9 = vsel %vm3070_vm4, %v6508_v16, 0.0  ;;  %v6510_v23 = vpop.eup %6509 }
 0xc17   : > { %3874 = vadd.xlane.f32.xlu1 %v3873_v15  ;;  %v3870_v52 = vsel %vm1299_vm2, %v9422_v9, 0.0  ;;  %v4411_v36 = vpop.xlane.xlu2 %4410  ;;  %6517 = vpow2.f32 %v4524_v62  ;;  %v9432_v44 = vsel %vm3070_vm4, %v6510_v23, 0.0 }
 0xc18   : > { %v6512_v59 = vpop.eup %6511  ;;  %3871 = vadd.xlane.f32.xlu0 %v3870_v52  ;;  %6519 = vpow2.f32 %v4196_v14  ;;  %v4413_v40 = vsub.f32 %v9336_v7, %v4411_v36  ;;  %v4200_v50 = vsel %vm1299_vm2, %v9432_v44, 0.0 }
 0xc19   : > { %v6514_v28 = vpop.eup %6513  ;;  %v3548_v12 = vmul.f32 %v6512_v59, %v9321_v37  ;;  %v4301_v46 = vpop.xlane.xlu0 %4300  ;;  %6521 = vpow2.f32 %v4414_v58 }
 0xc1a   : > { %v4303_v60 = vsub.f32 %v9342_v45, %v4301_v46  ;;  %v9437_v4 = vsel %vm3071_vm8, %v6514_v28, 0.0  ;;  %v4416_v7 = vmul.f32 1.442695, %v4413_v40  ;;  %v6155_v28 = vld [vmem:[%s10885_s28 + $0x568] sm:$0xff] }
 0xc1b   : > { %6100 = vmatmul.msk.f32.vlgmr.msrb.gmra.mxu3 %vm1299_vm2, %v3548_v12  ;;  %v6154_v12 = vld [vmem:[%s10885_s28 + $0x560] sm:$0xff] }
 0xc1c   : > { %v6516_v43 = vpop.eup %6515  ;;  %4230 = vmatpush.msrb.mxu3 %v8950_v56  ;;  %v4306_v33 = vmul.f32 1.442695, %v4303_v60  ;;  %v4093_v56 = vsel %vm1299_vm2, %v9437_v4, 0.0  ;;  %v6153_v60 = vld [vmem:[%s10885_s28 + $0x558] sm:$0xff] }
 0xc1d   : > { %v9441_v37 = vsel %vm3070_vm4, %v6516_v43, 0.0  ;;  %v6518_v17 = vpop.eup %6517  ;;  %v6152_v43 = vld [vmem:[%s10885_s28 + $0x550] sm:$0xff] }
 0xc1e   : > { %4231 = vmatpush.msrb.mxu3 %v8811_v6  ;;  %v4310_v45 = vsel %vm1299_vm2, %v9441_v37, 0.0  ;;  %v6520_v10 = vpop.eup %6519  ;;  %v3655_v6 = vpop.xlane.xlu1 %3654  ;;  %v9453_v8 = vsel %vm3070_vm4, %v6518_v17, 0.0  ;;  %v6149_v17 = vld [vmem:[%s10885_s28 + $0x538] sm:$0xff] }
 0xc1f   : > { %4311 = vadd.xlane.f32.xlu2 %v4310_v45  ;;  %4201 = vadd.xlane.f32.xlu1 %v4200_v50  ;;  %v3652_v63 = vpop.xlane.xlu2 %3651  ;;  %v6522_v35 = vpop.eup %6521  ;;  %v9457_v20 = vsel %vm3071_vm8, %v6520_v10, 0.0  ;;  %v6145_v10 = vld [vmem:[%s10885_s28 + $0x518] sm:$0xff] }
 0xc20   : > { %4094 = vadd.xlane.f32.xlu0 %v4093_v56  ;;  %6523 = vrcp.f32 %v3652_v63  ;;  %v9461_v51 = vsel %vm3070_vm4, %v6522_v35, 0.0  ;;  %v4203_v24 = vsel %vm1299_vm2, %v9457_v20, 0.0  ;;  %v6147_v56 = vld [vmem:[%s10885_s28 + $0x528] sm:$0xff] }
 0xc21   : > { %v4521_v49 = vpop.xlane.xlu0 %4520  ;;  %6525 = vpow2.f32 %v4416_v7  ;;  %v4420_v5 = vsel %vm1299_vm2, %v9461_v51, 0.0  ;;  %v6151_v7 = vld [vmem:[%s10885_s28 + $0x548] sm:$0xff] }
 0xc22   : > { %v4523_v18 = vsub.f32 %v9360_v61, %v4521_v49  ;;  %6527 = vpow2.f32 %v4306_v33  ;;  %v4530_v61 = vsel %vm1299_vm2, %v9453_v8, 0.0  ;;  %v6148_v33 = vld [vmem:[%s10885_s28 + $0x530] sm:$0xff] }
 0xc23   : > { %6529 = vrcp.f32 %v3655_v6  ;;  %v6144_v49 = vld [vmem:[%s10885_s28 + $0x510] sm:$0xff]  ;;  %v6143_v6 = vld [vmem:[%s10885_s28 + $0x508] sm:$0xff] }
 0xc24   : > { %v4526_v0 = vmul.f32 1.442695, %v4523_v18  ;;  %v6142_v18 = vld [vmem:[%s10885_s28 + $0x500] sm:$0xff] }
 0xc26   : > { %v6524_v32 = vpop.eup %6523  ;;  %6531 = vpow2.f32 %v4526_v0 }
 0xc27   : > { %v3658_v54 = vmul.f32 %v6524_v32, %v9356_v13  ;;  %4531 = vadd.xlane.f32.xlu1 %v4530_v61  ;;  %4204 = vadd.xlane.f32.xlu2 %v4203_v24  ;;  %v6526_v2 = vpop.eup %6525  ;;  %v3762_v21 = vpop.xlane.xlu2 %3761  ;;  %v6189_v24 = vld [vmem:[%s10885_s28 + $0x678] sm:$0xff] }
 0xc28   : > { %4421 = vadd.xlane.f32.xlu0 %v4420_v5  ;;  %v6528_v42 = vpop.eup %6527  ;;  %v9474_v53 = vsel %vm3071_vm8, %v6526_v2, 0.0  ;;  %v6173_v2 = vld [vmem:[%s10885_s28 + $0x5f8] sm:$0xff] }
 0xc29   : > { %v3545_v27 = vpop.xlane.xlu0 %3544  ;;  %6102 = vmatmul.msk.f32.vlgmr.msrb.gmra.mxu1 %vm1299_vm2, %v3658_v54  ;;  %v6530_v57 = vpop.eup %6529  ;;  %v9479_v47 = vsel %vm3071_vm8, %v6528_v42, 0.0  ;;  %v4423_v26 = vsel %vm1299_vm2, %v9474_v53, 0.0  ;;  %v6188_v42 = vld [vmem:[%s10885_s28 + $0x670] sm:$0xff] }
 0xc2a   : > { %6533 = vrcp.f32 %v3545_v27  ;;  %4450 = vmatpush.msrb.mxu1 %v9116_v1  ;;  %v4313_v38 = vsel %vm1299_vm2, %v9479_v47, 0.0  ;;  %v6172_v27 = vld [vmem:[%s10885_s28 + $0x5f0] sm:$0xff] }
 0xc2b   : > { %6535 = vrcp.f32 %v3762_v21  ;;  %v9576_v21 = vld [vmem:[%s10886_s1 + $0xa] sm:$0xff] }
 0xc2c   : > { %v6532_v13 = vpop.eup %6531  ;;  %4451 = vmatpush.msrb.mxu1 %v9107_v31  ;;  %v3659_v31 = vmul.f32 %v6530_v57, %v9346_v22  ;;  %v6171_v57 = vld [vmem:[%s10885_s28 + $0x5e8] sm:$0xff] }
 0xc2d   : > { %v9483_v30 = vsel %vm3071_vm8, %v6532_v13, 0.0 }
 0xc2e   : > { %v4533_v1 = vsel %vm1299_vm2, %v9483_v30, 0.0 }
 0xc2f   : > { %4534 = vadd.xlane.f32.xlu2 %v4533_v1  ;;  %4424 = vadd.xlane.f32.xlu1 %v4423_v26  ;;  %v6186_v1 = vld [vmem:[%s10885_s28 + $0x660] sm:$0xff] }
 0xc30   : > { %v6534_v16 = vpop.eup %6533  ;;  %4314 = vadd.xlane.f32.xlu0 %v4313_v38  ;;  %v6170_v38 = vld [vmem:[%s10885_s28 + $0x5e0] sm:$0xff] }
 0xc31   : > { %6103 = vmatmul.msk.f32.gmra.mxu1 %vm1299_vm2, %v3659_v31  ;;  %v3549_v62 = vmul.f32 %v6534_v16, %v9372_v3  ;;  %v6536_v14 = vpop.eup %6535 }
 0xc32   : > { %v3768_v15 = vmul.f32 %v6536_v14, %v9368_v34  ;;  %v6157_v34 = vld [vmem:[%s10885_s28 + $0x578] sm:$0xff] }
 0xc33   : > { %6101 = vmatmul.msk.f32.gmra.mxu3 %vm1299_vm2, %v3549_v62 }
 0xc3b   : > { %6104 = vmatmul.msk.f32.vlgmr.msra.gmra.mxu3 %vm1299_vm2, %v3768_v15  ;;  %v6185_v15 = vld [vmem:[%s10885_s28 + $0x658] sm:$0xff] }
 0xc3c   : > { %4895 = vmatpush.msra.mxu3 %v6157_v34  ;;  %v6167_v34 = vld [vmem:[%s10885_s28 + $0x5c8] sm:$0xff] }
 0xc60   : > { %v3982_v23 = vpop.xlane.xlu1 %3981 }
 0xc61   : > { %6537 = vrcp.f32 %v3982_v23 }
 0xc67   : > { %v6538_v58 = vpop.eup %6537 }
 0xc68   : > { %v3988_v52 = vmul.f32 %v6538_v58, %v9382_v41  ;;  %v4092_v22 = vpop.xlane.xlu2 %4091  ;;  %v6156_v41 = vld [vmem:[%s10885_s28 + $0x570] sm:$0xff] }
 0xc69   : > { %6539 = vrcp.f32 %v4092_v22  ;;  %4896 = vmatpush.msra.mxu3 %v6156_v41  ;;  %v4574_v22 = vperm.slane %v9576_v21, 0 }
 0xc6a   : > { %6108 = vmatmul.msk.f32.vlgmr.msra.gmra.mxu1 %vm1299_vm2, %v3988_v52 }
 0xc6b   : > { %4897 = vmatpush.msra.mxu3 %v6155_v28  ;;  %4941 = vmatpush.msra.mxu1 %v6189_v24  ;;  %v6182_v28 = vld [vmem:[%s10885_s28 + $0x640] sm:$0xff] }
 0xc6d   : > { %4898 = vmatpush.msra.mxu3 %v6154_v12  ;;  %4942 = vmatpush.msra.mxu1 %v6188_v42  ;;  %v6177_v42 = vld [vmem:[%s10885_s28 + $0x618] sm:$0xff] }
 0xc6f   : > { %v6540_v36 = vpop.eup %6539  ;;  %4899 = vmatpush.msra.mxu3 %v6153_v60 }
 0xc70   : > { %v4098_v59 = vmul.f32 %v6540_v36, %v9389_v11  ;;  %v3765_v3 = vpop.xlane.xlu0 %3764  ;;  %v6184_v36 = vld [vmem:[%s10885_s28 + $0x650] sm:$0xff] }
 0xc71   : > { %6541 = vrcp.f32 %v3765_v3  ;;  %4900 = vmatpush.msra.mxu3 %v6152_v43 }
 0xc72   : > { %6110 = vmatmul.msk.f32.vlgmr.msrb.gmra.mxu2 %vm1299_vm2, %v4098_v59 }
 0xc73   : > { %4901 = vmatpush.msra.mxu3 %v6151_v7  ;;  %v4575_v7 = vperm.slane %v9576_v21, 1 }
 0xc77   : > { %v6542_v11 = vpop.eup %6541 }
 0xc78   : > { %v3985_v46 = vpop.xlane.xlu2 %3984  ;;  %v3769_v40 = vmul.f32 %v6542_v11, %v9396_v39  ;;  %v6150_v39 = vld [vmem:[%s10885_s28 + $0x540] sm:$0xff] }
 0xc79   : > { %6543 = vrcp.f32 %v3985_v46  ;;  %4902 = vmatpush.msra.mxu3 %v6150_v39  ;;  %v6166_v46 = vld [vmem:[%s10885_s28 + $0x5c0] sm:$0xff] }
 0xc7a   : > { %6105 = vmatmul.msk.f32.gmra.mxu3 %vm1299_vm2, %v3769_v40 }
 0xc7b   : > { %4903 = vmatpush.msra.mxu3 %v6149_v17 }
 0xc7d   : > { %4904 = vmatpush.msra.mxu3 %v6148_v33 }
 0xc7f   : > { %v6544_v45 = vpop.eup %6543  ;;  %4905 = vmatpush.msra.mxu3 %v6147_v56 }
 0xc80   : > { %v3989_v50 = vmul.f32 %v6544_v45, %v9402_v25  ;;  %v6146_v25 = vld [vmem:[%s10885_s28 + $0x520] sm:$0xff]  ;;  %v6181_v45 = vld [vmem:[%s10885_s28 + $0x638] sm:$0xff] }
 0xc81   : > { %4906 = vmatpush.msra.mxu3 %v6146_v25 }
 0xc82   : > { %6109 = vmatmul.msk.f32.gmra.mxu1 %vm1299_vm2, %v3989_v50 }
 0xc83   : > { %4907 = vmatpush.msra.mxu3 %v6145_v10  ;;  %v6180_v10 = vld [vmem:[%s10885_s28 + $0x630] sm:$0xff] }
 0xc85   : > { %4908 = vmatpush.msra.mxu3 %v6144_v49  ;;  %v6163_v49 = vld [vmem:[%s10885_s28 + $0x5a8] sm:$0xff] }
 0xc87   : > { %4909 = vmatpush.msra.mxu3 %v6143_v6  ;;  %v6178_v6 = vld [vmem:[%s10885_s28 + $0x620] sm:$0xff] }
 0xc89   : > { %4910 = vmatpush.msra.mxu3 %v6142_v18 }
 0xc8a   : > { %v3875_v63 = vpop.xlane.xlu1 %3874 }
 0xc8b   : > { %v3872_v35 = vpop.xlane.xlu0 %3871 }
 0xc8c   : > { %6545 = vrcp.f32 %v3872_v35 }
 0xc8d   : > { %6547 = vrcp.f32 %v3875_v63  ;;  %v6165_v63 = vld [vmem:[%s10885_s28 + $0x5b8] sm:$0xff] }
 0xc92   : > { %v6546_v0 = vpop.eup %6545  ;;  %v4202_v32 = vpop.xlane.xlu1 %4201 }
 0xc93   : > { %v4312_v61 = vpop.xlane.xlu2 %4311  ;;  %v3878_v54 = vmul.f32 %v6546_v0, %v9422_v9  ;;  %v4095_v5 = vpop.xlane.xlu0 %4094  ;;  %6549 = vrcp.f32 %v4202_v32  ;;  %v6187_v9 = vld [vmem:[%s10885_s28 + $0x668] sm:$0xff] }
 0xc94   : > { %6551 = vrcp.f32 %v4095_v5  ;;  %4943 = vmatpush.msra.mxu1 %v6187_v9  ;;  %v6548_v13 = vpop.eup %6547 }
 0xc95   : > { %6106 = vmatmul.msk.f32.vlgmr.msrb.gmra.mxu0 %vm1299_vm2, %v3878_v54  ;;  %6553 = vrcp.f32 %v4312_v61  ;;  %v3879_v58 = vmul.f32 %v6548_v13, %v9416_v19  ;;  %v6168_v19 = vld [vmem:[%s10885_s28 + $0x5d0] sm:$0xff] }
 0xc96   : > { %4918 = vmatpush.msrb.mxu0 %v6173_v2  ;;  %4944 = vmatpush.msra.mxu1 %v6186_v1  ;;  %v6162_v2 = vld [vmem:[%s10885_s28 + $0x5a0] sm:$0xff] }
 0xc98   : > { %4919 = vmatpush.msrb.mxu0 %v6172_v27  ;;  %4945 = vmatpush.msra.mxu1 %v6185_v15  ;;  %v6174_v15 = vld [vmem:[%s10885_s28 + $0x600] sm:$0xff] }
 0xc99   : > { %v6550_v26 = vpop.eup %6549 }
 0xc9a   : > { %v6552_v31 = vpop.eup %6551  ;;  %v4208_v16 = vmul.f32 %v6550_v26, %v9432_v44  ;;  %v4532_v62 = vpop.xlane.xlu1 %4531  ;;  %4920 = vmatpush.msrb.mxu0 %v6171_v57  ;;  %v6169_v44 = vld [vmem:[%s10885_s28 + $0x5d8] sm:$0xff]  ;;  %4946 = vmatpush.msra.mxu1 %v6184_v36  ;;  %v6176_v57 = vld [vmem:[%s10885_s28 + $0x610] sm:$0xff] }
 0xc9b   : > { %v4205_v14 = vpop.xlane.xlu2 %4204  ;;  %6555 = vrcp.f32 %v4532_v62  ;;  %v4422_v23 = vpop.xlane.xlu0 %4421  ;;  %v4099_v52 = vmul.f32 %v6552_v31, %v9437_v4  ;;  %v6183_v4 = vld [vmem:[%s10885_s28 + $0x648] sm:$0xff]  ;;  %v6221_v31 = vld [vmem:[%s10885_s28 + $0x778] sm:$0xff] }
 0xc9c   : > { %6557 = vrcp.f32 %v4422_v23  ;;  %6112 = vmatmul.msk.f32.vlgmr.msrb.gmra.mxu3 %vm1299_vm2, %v4208_v16  ;;  %4921 = vmatpush.msrb.mxu0 %v6170_v38  ;;  %v6554_v41 = vpop.eup %6553  ;;  %v6175_v38 = vld [vmem:[%s10885_s28 + $0x608] sm:$0xff]  ;;  %v6220_v16 = vld [vmem:[%s10885_s28 + $0x770] sm:$0xff] }
 0xc9d   : > { %6559 = vrcp.f32 %v4205_v14  ;;  %6107 = vmatmul.msk.f32.gmra.mxu0 %vm1299_vm2, %v3879_v58  ;;  %6111 = vmatmul.msk.f32.gmra.mxu2 %vm1299_vm2, %v4099_v52  ;;  %v4318_v50 = vmul.f32 %v6554_v41, %v9441_v37  ;;  %v6159_v14 = vld [vmem:[%s10885_s28 + $0x588] sm:$0xff]  ;;  %v6216_v41 = vld [vmem:[%s10885_s28 + $0x750] sm:$0xff] }
 0xc9e   : > { %v3573_v59 = vpop.f32.mrf.mxu3  ;;  %4922 = vmatpush.msrb.mxu0 %v6169_v44  ;;  %4947 = vmatpush.msra.mxu1 %v6183_v4  ;;  %v6219_v23 = vld [vmem:[%s10885_s28 + $0x768] sm:$0xff]  ;;  %v6158_v44 = vld [vmem:[%s10885_s28 + $0x580] sm:$0xff] }
 0xc9f   : > { %v9608_v3 = vadd.f32 %v4574_v22, %v3573_v59  ;;  %4987 = vmatpush.msrb.mxu3 %v6221_v31  ;;  %v6227_v31 = vld [vmem:[%s10885_s28 + $0x7a8] sm:$0xff] }
 0xca0   : > { %4923 = vmatpush.msrb.mxu0 %v6168_v19  ;;  %4948 = vmatpush.msra.mxu1 %v6182_v28  ;;  %v6218_v19 = vld [vmem:[%s10885_s28 + $0x760] sm:$0xff] }
 0xca1   : > { %v6556_v11 = vpop.eup %6555  ;;  %v4634_v12 = vmin.f32 %v9608_v3, 0.0  ;;  %vm4614_vm13 = vcmp.gt.f32.partialorder %v9608_v3, 0.0  ;;  %4988 = vmatpush.msrb.mxu3 %v6220_v16  ;;  %v6201_v16 = vld [vmem:[%s10885_s28 + $0x6d8] sm:$0xff] }
 0xca2   : > { %v6558_v40 = vpop.eup %6557  ;;  %v4538_v60 = vmul.f32 %v6556_v11, %v9453_v8  ;;  %v4425_v43 = vpop.xlane.xlu1 %4424  ;;  %4924 = vmatpush.msrb.mxu0 %v6167_v34  ;;  %4949 = vmatpush.msra.mxu1 %v6181_v45  ;;  %v6215_v11 = vld [vmem:[%s10885_s28 + $0x748] sm:$0xff]  ;;  %v6213_v45 = vld [vmem:[%s10885_s28 + $0x738] sm:$0xff] }
 0xca3   : > { %v6560_v39 = vpop.eup %6559  ;;  %v4428_v17 = vmul.f32 %v6558_v40, %v9461_v51  ;;  %v4654_v33 = vmul.f32 1.442695, %v4634_v12  ;;  %v4315_v56 = vpop.xlane.xlu0 %4314  ;;  %6561 = vrcp.f32 %v4425_v43  ;;  %v6179_v51 = vld [vmem:[%s10885_s28 + $0x628] sm:$0xff]  ;;  %4989 = vmatpush.msrb.mxu3 %v6219_v23  ;;  %v4576_v40 = vperm.slane %v9576_v21, 2  ;;  %v6280_v23 = vld [vmem:[%s10885_s28 + $0x950] sm:$0xff] }
 0xca4   : > { %v4535_v25 = vpop.xlane.xlu2 %4534  ;;  %6563 = vrcp.f32 %v4315_v56  ;;  %v4209_v8 = vmul.f32 %v6560_v39, %v9457_v20  ;;  %4925 = vmatpush.msrb.mxu0 %v6166_v46  ;;  %v6164_v20 = vld [vmem:[%s10885_s28 + $0x5b0] sm:$0xff]  ;;  %4950 = vmatpush.msra.mxu1 %v6180_v10 }
 0xca5   : > { %6565 = vpow2.f32 %v4654_v33  ;;  %6114 = vmatmul.msk.f32.vlgmr.msra.gmra.mxu0 %vm1299_vm2, %v4318_v50  ;;  %6116 = vmatmul.msk.f32.vlgmr.msrb.gmra.mxu1 %vm1299_vm2, %v4428_v17 }
 0xca6   : > { %6567 = vrcp.f32 %v4535_v25  ;;  %6113 = vmatmul.msk.f32.gmra.mxu3 %vm1299_vm2, %v4209_v8  ;;  %6118 = vmatmul.msk.f32.vlgmr.msra.gmra.mxu2 %vm1299_vm2, %v4538_v60  ;;  %v3683_v37 = vpop.f32.mrf.mxu1  ;;  %v6212_v8 = vld [vmem:[%s10885_s28 + $0x730] sm:$0xff] }
 0xca7   : > { %v4595_v35 = vadd.f32 %v4575_v7, %v3683_v37  ;;  %4926 = vmatpush.msrb.mxu0 %v6165_v63  ;;  %4951 = vmatpush.msra.mxu1 %v6179_v51  ;;  %v6237_v63 = vld [vmem:[%s10885_s28 + $0x7f8] sm:$0xff]  ;;  %v6211_v37 = vld [vmem:[%s10885_s28 + $0x728] sm:$0xff] }
 0xca8   : > { %4990 = vmatpush.msrb.mxu3 %v6218_v19  ;;  %v4578_v19 = vperm.slane %v9576_v21, 4 }
 0xca9   : > { %v6562_v18 = vpop.eup %6561  ;;  %v4635_v0 = vmin.f32 %v4595_v35, 0.0  ;;  %4927 = vmatpush.msrb.mxu0 %v6164_v20  ;;  %4952 = vmatpush.msra.mxu1 %v6178_v6  ;;  %vm4615_vm14 = vcmp.gt.f32.partialorder %v4595_v35, 0.0  ;;  %v6236_v20 = vld [vmem:[%s10885_s28 + $0x7f0] sm:$0xff] }
 0xcaa   : > { %v6564_v32 = vpop.eup %6563  ;;  %v4429_v61 = vmul.f32 %v6562_v18, %v9474_v53  ;;  %v6209_v18 = vld [vmem:[%s10885_s28 + $0x718] sm:$0xff] }
 0xcab   : > { %v6566_v24 = vpop.eup %6565  ;;  %v4656_v54 = vmul.f32 1.442695, %v4635_v0  ;;  %v4319_v5 = vmul.f32 %v6564_v32, %v9479_v47  ;;  %4928 = vmatpush.msrb.mxu0 %v6163_v49  ;;  %v6161_v47 = vld [vmem:[%s10885_s28 + $0x598] sm:$0xff]  ;;  %4953 = vmatpush.msra.mxu1 %v6177_v42  ;;  %v6235_v49 = vld [vmem:[%s10885_s28 + $0x7e8] sm:$0xff]  ;;  %v6234_v0 = vld [vmem:[%s10885_s28 + $0x7e0] sm:$0xff] }
 0xcac   : > { %v6568_v27 = vpop.eup %6567  ;;  %v6122_v9 = vadd.f32 -1.0, %v6566_v24  ;;  %v6208_v32 = vld [vmem:[%s10885_s28 + $0x710] sm:$0xff]  ;;  %v6207_v24 = vld [vmem:[%s10885_s28 + $0x708] sm:$0xff]  ;;  %v6205_v42 = vld [vmem:[%s10885_s28 + $0x6f8] sm:$0xff] }
 0xcad   : > { %6569 = vpow2.f32 %v4656_v54  ;;  %6115 = vmatmul.msk.f32.gmra.mxu0 %vm1299_vm2, %v4319_v5  ;;  %6117 = vmatmul.msk.f32.gmra.mxu1 %vm1299_vm2, %v4429_v61  ;;  %v4539_v53 = vmul.f32 %v6568_v27, %v9483_v30  ;;  %v6160_v30 = vld [vmem:[%s10885_s28 + $0x590] sm:$0xff]  ;;  %v6233_v61 = vld [vmem:[%s10885_s28 + $0x7d8] sm:$0xff]  ;;  %v6206_v5 = vld [vmem:[%s10885_s28 + $0x700] sm:$0xff] }
 0xcae   : > { %v4714_v13 = vsel %vm4614_vm13, %v9608_v3, %v6122_v9  ;;  %v3686_v1 = vpop.f32.mrf.mxu1  ;;  %4929 = vmatpush.msrb.mxu0 %v6162_v2  ;;  %4954 = vmatpush.msra.mxu1 %v6176_v57  ;;  %v6217_v3 = vld [vmem:[%s10885_s28 + $0x758] sm:$0xff]  ;;  %v6232_v54 = vld [vmem:[%s10885_s28 + $0x7d0] sm:$0xff]  ;;  %v6231_v2 = vld [vmem:[%s10885_s28 + $0x7c8] sm:$0xff] }
 0xcaf   : > { %6119 = vmatmul.msk.f32.gmra.mxu2 %vm1299_vm2, %v4539_v53  ;;  %v4605_v26 = vadd.f32 %v4575_v7, %v3686_v1  ;;  %4911 = vmatmul.f32.vlgmr.msra.gmra.mxu3 %v4714_v13  ;;  %v6285_v27 = vld [vmem:[%s10885_s28 + $0x978] sm:$0xff]  ;;  %v6230_v9 = vld [vmem:[%s10885_s28 + $0x7c0] sm:$0xff]  ;;  %v6204_v53 = vld [vmem:[%s10885_s28 + $0x6f0] sm:$0xff] }
 0xcb0   : > { %4930 = vmatpush.msrb.mxu0 %v6161_v47  ;;  %4955 = vmatpush.msra.mxu1 %v6175_v38  ;;  %v6284_v47 = vld [vmem:[%s10885_s28 + $0x970] sm:$0xff]  ;;  %v6229_v57 = vld [vmem:[%s10885_s28 + $0x7b8] sm:$0xff]  ;;  %v6203_v13 = vld [vmem:[%s10885_s28 + $0x6e8] sm:$0xff] }
 0xcb1   : > { %v4645_v62 = vmin.f32 %v4605_v26, 0.0  ;;  %4991 = vmatpush.msrb.mxu3 %v6217_v3  ;;  %vm4625_vm15 = vcmp.gt.f32.partialorder %v4605_v26, 0.0  ;;  %4964 = vmatpush.msrb.mxu2 %v6205_v42  ;;  %v6283_v1 = vld [vmem:[%s10885_s28 + $0x968] sm:$0xff]  ;;  %v6282_v38 = vld [vmem:[%s10885_s28 + $0x960] sm:$0xff]  ;;  %v5328_v42 = vld [vmem:[%s10847_s13 + $0xf0] sm:$0xff] }
 0xcb2   : > { %4931 = vmatpush.msrb.mxu0 %v6160_v30  ;;  %4956 = vmatpush.msra.mxu1 %v6174_v15  ;;  %v6202_v30 = vld [vmem:[%s10885_s28 + $0x6e0] sm:$0xff]  ;;  %v6200_v15 = vld [vmem:[%s10885_s28 + $0x6d0] sm:$0xff]  ;;  %v6223_v3 = vld [vmem:[%s10885_s28 + $0x788] sm:$0xff] }
 0xcb3   : > { %v6570_v58 = vpop.eup %6569  ;;  %v4676_v52 = vmul.f32 1.442695, %v4645_v62  ;;  %4992 = vmatpush.msrb.mxu3 %v6216_v41  ;;  %4965 = vmatpush.msrb.mxu2 %v6204_v53  ;;  %v6281_v62 = vld [vmem:[%s10885_s28 + $0x958] sm:$0xff] }
 0xcb4   : > { %v6123_v36 = vadd.f32 -1.0, %v6570_v58  ;;  %4932 = vmatpush.msrb.mxu0 %v6159_v14  ;;  %v6226_v14 = vld [vmem:[%s10885_s28 + $0x7a0] sm:$0xff]  ;;  %v6225_v58 = vld [vmem:[%s10885_s28 + $0x798] sm:$0xff] }
 0xcb5   : > { %6571 = vpow2.f32 %v4676_v52  ;;  %4993 = vmatpush.msrb.mxu3 %v6215_v11  ;;  %4966 = vmatpush.msrb.mxu2 %v6203_v13  ;;  %v6199_v52 = vld [vmem:[%s10885_s28 + $0x6c8] sm:$0xff]  ;;  %v6277_v41 = vld [vmem:[%s10885_s28 + $0x938] sm:$0xff]  ;;  %v6266_v13 = vld [vmem:[%s10885_s28 + $0x8e0] sm:$0xff] }
 0xcb6   : > { %v4715_v4 = vsel %vm4615_vm14, %v4595_v35, %v6123_v36  ;;  %v3576_v59 = vpop.f32.mrf.mxu3  ;;  %4933 = vmatpush.msrb.mxu0 %v6158_v44  ;;  %v6210_v35 = vld [vmem:[%s10885_s28 + $0x720] sm:$0xff]  ;;  %v6279_v44 = vld [vmem:[%s10885_s28 + $0x948] sm:$0xff]  ;;  %v6224_v36 = vld [vmem:[%s10885_s28 + $0x790] sm:$0xff] }
 0xcb7   : > { %v4604_v34 = vadd.f32 %v4574_v22, %v3576_v59  ;;  %4934 = vmatmul.f32.vlgmr.msrb.gmra.mxu0 %v4715_v4  ;;  %v6214_v22 = vld [vmem:[%s10885_s28 + $0x740] sm:$0xff]  ;;  %4967 = vmatpush.msrb.mxu2 %v6202_v30 }
 0xcb8   : > { %4994 = vmatpush.msrb.mxu3 %v6214_v22  ;;  %5010 = vmatpush.msra.mxu0 %v6237_v63  ;;  %v6198_v4 = vld [vmem:[%s10885_s28 + $0x6c0] sm:$0xff]  ;;  %v6195_v22 = vld [vmem:[%s10885_s28 + $0x6a8] sm:$0xff] }
 0xcb9   : > { %v4644_v28 = vmin.f32 %v4604_v34, 0.0  ;;  %vm4624_vm1 = vcmp.gt.f32.partialorder %v4604_v34, 0.0  ;;  %4968 = vmatpush.msrb.mxu2 %v6201_v16  ;;  %v6278_v59 = vld [vmem:[%s10885_s28 + $0x940] sm:$0xff]  ;;  %v6271_v63 = vld [vmem:[%s10885_s28 + $0x908] sm:$0xff]  ;;  %v6300_v16 = vld [vmem:[%s10885_s28 + $0x9f0] sm:$0xff] }
 0xcba   : > { %4995 = vmatpush.msrb.mxu3 %v6213_v45  ;;  %5011 = vmatpush.msra.mxu0 %v6236_v20  ;;  %v6194_v45 = vld [vmem:[%s10885_s28 + $0x6a0] sm:$0xff] }
 0xcbb   : > { %v6572_v12 = vpop.eup %6571  ;;  %v4674_v46 = vmul.f32 1.442695, %v4644_v28  ;;  %4969 = vmatpush.msrb.mxu2 %v6200_v15  ;;  %v6222_v28 = vld [vmem:[%s10885_s28 + $0x780] sm:$0xff] }
 0xcbc   : > { %v6133_v60 = vadd.f32 -1.0, %v6572_v12  ;;  %4996 = vmatpush.msrb.mxu3 %v6212_v8  ;;  %5012 = vmatpush.msra.mxu0 %v6235_v49  ;;  %v6196_v12 = vld [vmem:[%s10885_s28 + $0x6b0] sm:$0xff]  ;;  %v6191_v8 = vld [vmem:[%s10885_s28 + $0x688] sm:$0xff] }
 0xcbd   : > { %6573 = vpow2.f32 %v4674_v46  ;;  %4970 = vmatpush.msrb.mxu2 %v6199_v52  ;;  %v6276_v46 = vld [vmem:[%s10885_s28 + $0x930] sm:$0xff] }
 0xcbe   : > { %v3793_v43 = vpop.f32.mrf.mxu3  ;;  %v4725_v7 = vsel %vm4625_vm15, %v4605_v26, %v6133_v60  ;;  %4997 = vmatpush.msrb.mxu3 %v6211_v37  ;;  %5013 = vmatpush.msra.mxu0 %v6234_v0  ;;  %v6228_v26 = vld [vmem:[%s10885_s28 + $0x7b0] sm:$0xff]  ;;  %v6253_v37 = vld [vmem:[%s10885_s28 + $0x878] sm:$0xff] }
 0xcbf   : > { %v4596_v39 = vadd.f32 %v4576_v40, %v3793_v43  ;;  %4937 = vmatmul.f32.gmra.mxu0 %v4725_v7  ;;  %4971 = vmatpush.msrb.mxu2 %v6198_v4  ;;  %v6275_v43 = vld [vmem:[%s10885_s28 + $0x928] sm:$0xff]  ;;  %v6269_v0 = vld [vmem:[%s10885_s28 + $0x8f8] sm:$0xff]  ;;  %v6246_v4 = vld [vmem:[%s10885_s28 + $0x840] sm:$0xff] }
 0xcc0   : > { %4998 = vmatpush.msrb.mxu3 %v6210_v35  ;;  %5014 = vmatpush.msra.mxu0 %v6233_v61  ;;  %v6270_v35 = vld [vmem:[%s10885_s28 + $0x900] sm:$0xff]  ;;  %v5329_v61 = vld [vmem:[%s10847_s13 + $0xf8] sm:$0xff] }
 0xcc1   : > { %v4636_v50 = vmin.f32 %v4596_v39, 0.0  ;;  %vm4616_vm3 = vcmp.gt.f32.partialorder %v4596_v39, 0.0  ;;  %5033 = vmatpush.msrb.mxu1 %v6253_v37  ;;  %v6259_v37 = vld [vmem:[%s10885_s28 + $0x8a8] sm:$0xff] }
 0xcc2   : > { %4999 = vmatpush.msrb.mxu3 %v6209_v18  ;;  %5015 = vmatpush.msra.mxu0 %v6232_v54  ;;  %v6252_v18 = vld [vmem:[%s10885_s28 + $0x870] sm:$0xff]  ;;  %v6251_v54 = vld [vmem:[%s10885_s28 + $0x868] sm:$0xff] }
 0xcc3   : > { %v6574_v17 = vpop.eup %6573  ;;  %v4658_v33 = vmul.f32 1.442695, %v4636_v50  ;;  %5034 = vmatpush.msrb.mxu1 %v6252_v18  ;;  %v6258_v18 = vld [vmem:[%s10885_s28 + $0x8a0] sm:$0xff] }
 0xcc4   : > { %v6132_v56 = vadd.f32 -1.0, %v6574_v17  ;;  %5000 = vmatpush.msrb.mxu3 %v6208_v32  ;;  %5016 = vmatpush.msra.mxu0 %v6231_v2  ;;  %v6193_v17 = vld [vmem:[%s10885_s28 + $0x698] sm:$0xff] }
 0xcc5   : > { %6575 = vpow2.f32 %v4658_v33  ;;  %v6273_v33 = vld [vmem:[%s10885_s28 + $0x918] sm:$0xff]  ;;  %5035 = vmatpush.msrb.mxu1 %v6251_v54 }
 0xcc6   : > { %v4724_v25 = vsel %vm4624_vm1, %v4604_v34, %v6132_v56  ;;  %5001 = vmatpush.msrb.mxu3 %v6207_v24  ;;  %5017 = vmatpush.msra.mxu0 %v6230_v9  ;;  %v6197_v34 = vld [vmem:[%s10885_s28 + $0x6b8] sm:$0xff]  ;;  %v6192_v56 = vld [vmem:[%s10885_s28 + $0x690] sm:$0xff]  ;;  %v6267_v9 = vld [vmem:[%s10885_s28 + $0x8e8] sm:$0xff] }
 0xcc7   : > { %4914 = vmatmul.f32.gmra.mxu3 %v4724_v25  ;;  %4972 = vmatpush.msrb.mxu2 %v6197_v34  ;;  %v6272_v25 = vld [vmem:[%s10885_s28 + $0x910] sm:$0xff] }
 0xcc8   : > { %5002 = vmatpush.msrb.mxu3 %v6206_v5  ;;  %5018 = vmatpush.msra.mxu0 %v6229_v57  ;;  %v6268_v5 = vld [vmem:[%s10885_s28 + $0x8f0] sm:$0xff]  ;;  %v6249_v57 = vld [vmem:[%s10885_s28 + $0x858] sm:$0xff] }
 0xcc9   : > { %4973 = vmatpush.msrb.mxu2 %v6196_v12  ;;  %v6245_v12 = vld [vmem:[%s10885_s28 + $0x838] sm:$0xff] }
 0xcca   : > { %5079 = vmatpush.msra.mxu3 %v6285_v27  ;;  %5019 = vmatpush.msra.mxu0 %v6228_v26  ;;  %v6250_v27 = vld [vmem:[%s10885_s28 + $0x860] sm:$0xff] }
 0xccb   : > { %v6576_v10 = vpop.eup %6575  ;;  %4974 = vmatpush.msrb.mxu2 %v6195_v22  ;;  %5036 = vmatpush.msrb.mxu1 %v6250_v27  ;;  %v5326_v26 = vld [vmem:[%s10847_s13 + $0xe0] sm:$0xff]  ;;  %v6297_v22 = vld [vmem:[%s10885_s28 + $0x9d8] sm:$0xff] }
 0xccc   : > { %v6124_v51 = vadd.f32 -1.0, %v6576_v10  ;;  %5080 = vmatpush.msra.mxu3 %v6284_v47  ;;  %5020 = vmatpush.msra.mxu0 %v6227_v31  ;;  %v4579_v10 = vperm.slane %v9576_v21, 5  ;;  %v5327_v47 = vld [vmem:[%s10847_s13 + $0xe8] sm:$0xff]  ;;  %v6265_v31 = vld [vmem:[%s10885_s28 + $0x8d8] sm:$0xff] }
 0xccd   : > { %4975 = vmatpush.msrb.mxu2 %v6194_v45  ;;  %5037 = vmatpush.msrb.mxu1 %v6249_v57  ;;  %v6244_v45 = vld [vmem:[%s10885_s28 + $0x830] sm:$0xff] }
 0xcce   : > { %v4716_v6 = vsel %vm4616_vm3, %v4596_v39, %v6124_v51  ;;  %5081 = vmatpush.msra.mxu3 %v6283_v1  ;;  %5021 = vmatpush.msra.mxu0 %v6226_v14  ;;  %v6274_v39 = vld [vmem:[%s10885_s28 + $0x920] sm:$0xff]  ;;  %v6301_v1 = vld [vmem:[%s10885_s28 + $0x9f8] sm:$0xff]  ;;  %v6256_v57 = vld [vmem:[%s10885_s28 + $0x890] sm:$0xff] }
 0xccf   : > { %4957 = vmatmul.f32.vlgmr.msra.gmra.mxu1 %v4716_v6  ;;  %4976 = vmatpush.msrb.mxu2 %v6193_v17  ;;  %v6190_v51 = vld [vmem:[%s10885_s28 + $0x680] sm:$0xff]  ;;  %v5325_v14 = vld [vmem:[%s10847_s13 + $0xd8] sm:$0xff] }
 0xcd0   : > { %5082 = vmatpush.msra.mxu3 %v6282_v38  ;;  %5022 = vmatpush.msra.mxu0 %v6225_v58  ;;  %v6248_v38 = vld [vmem:[%s10885_s28 + $0x850] sm:$0xff]  ;;  %v5321_v17 = vld [vmem:[%s10847_s13 + $0xb8] sm:$0xff] }
 0xcd1   : > { %4977 = vmatpush.msrb.mxu2 %v6192_v56  ;;  %5038 = vmatpush.msrb.mxu1 %v6248_v38  ;;  %v6264_v58 = vld [vmem:[%s10885_s28 + $0x8d0] sm:$0xff]  ;;  %v6255_v38 = vld [vmem:[%s10885_s28 + $0x888] sm:$0xff] }
 0xcd2   : > { %5083 = vmatpush.msra.mxu3 %v6281_v62  ;;  %5023 = vmatpush.msra.mxu0 %v6224_v36  ;;  %v5324_v36 = vld [vmem:[%s10847_s13 + $0xd0] sm:$0xff] }
 0xcd3   : > { %4978 = vmatpush.msrb.mxu2 %v6191_v8  ;;  %v6260_v56 = vld [vmem:[%s10885_s28 + $0x8b0] sm:$0xff] }
 0xcd4   : > { %5084 = vmatpush.msra.mxu3 %v6280_v23  ;;  %5024 = vmatpush.msra.mxu0 %v6223_v3  ;;  %v6247_v23 = vld [vmem:[%s10885_s28 + $0x848] sm:$0xff]  ;;  %v5320_v8 = vld [vmem:[%s10847_s13 + $0xb0] sm:$0xff] }
 0xcd5   : > { %4979 = vmatpush.msrb.mxu2 %v6190_v51  ;;  %5039 = vmatpush.msrb.mxu1 %v6247_v23  ;;  %v6294_v51 = vld [vmem:[%s10885_s28 + $0x9c0] sm:$0xff] }
 0xcd6   : > { %5085 = vmatpush.msra.mxu3 %v6279_v44  ;;  %5025 = vmatpush.msra.mxu0 %v6222_v28  ;;  %v5323_v28 = vld [vmem:[%s10847_s13 + $0xc8] sm:$0xff] }
 0xcd7   : > { %5056 = vmatpush.msra.mxu2 %v6269_v0  ;;  %5040 = vmatpush.msrb.mxu1 %v6246_v4  ;;  %v6286_v4 = vld [vmem:[%s10885_s28 + $0x980] sm:$0xff] }
 0xcd8   : > { %5086 = vmatpush.msra.mxu3 %v6278_v59  ;;  %5102 = vmatpush.msrb.mxu0 %v6301_v1  ;;  %v6263_v59 = vld [vmem:[%s10885_s28 + $0x8c8] sm:$0xff]  ;;  %v5316_v1 = vld [vmem:[%s10847_s13 + $0x90] sm:$0xff] }
 0xcd9   : > { %5057 = vmatpush.msra.mxu2 %v6268_v5  ;;  %5041 = vmatpush.msrb.mxu1 %v6245_v12  ;;  %v6240_v5 = vld [vmem:[%s10885_s28 + $0x810] sm:$0xff]  ;;  %v4581_v12 = vperm.slane %v9576_v21, 7 }
 0xcda   : > { %5087 = vmatpush.msra.mxu3 %v6277_v41  ;;  %5103 = vmatpush.msrb.mxu0 %v6300_v16 }
 0xcdb   : > { %5058 = vmatpush.msra.mxu2 %v6267_v9  ;;  %5042 = vmatpush.msrb.mxu1 %v6244_v45  ;;  %v4577_v9 = vperm.slane %v9576_v21, 3 }
 0xcdc   : > { %5088 = vmatpush.msra.mxu3 %v6276_v46  ;;  %v6262_v46 = vld [vmem:[%s10885_s28 + $0x8c0] sm:$0xff] }
 0xcdd   : > { %5059 = vmatpush.msra.mxu2 %v6266_v13  ;;  %v6291_v13 = vld [vmem:[%s10885_s28 + $0x9a8] sm:$0xff] }
 0xcde   : > { %5089 = vmatpush.msra.mxu3 %v6275_v43  ;;  %v5322_v43 = vld [vmem:[%s10847_s13 + $0xc0] sm:$0xff] }
 0xcdf   : > { %5060 = vmatpush.msra.mxu2 %v6265_v31  ;;  %v6290_v31 = vld [vmem:[%s10885_s28 + $0x9a0] sm:$0xff] }
 0xce0   : > { %5090 = vmatpush.msra.mxu3 %v6274_v39  ;;  %v6261_v39 = vld [vmem:[%s10885_s28 + $0x8b8] sm:$0xff] }
 0xce1   : > { %5061 = vmatpush.msra.mxu2 %v6264_v58  ;;  %v5314_v58 = vld [vmem:[%s10847_s13 + $0x80] sm:$0xff] }
 0xce2   : > { %5091 = vmatpush.msra.mxu3 %v6273_v33  ;;  %v6243_v33 = vld [vmem:[%s10885_s28 + $0x828] sm:$0xff] }
 0xce3   : > { %5062 = vmatpush.msra.mxu2 %v6263_v59  ;;  %5043 = vmatpush.msrb.mxu1 %v6243_v33 }
 0xce4   : > { %5092 = vmatpush.msra.mxu3 %v6272_v25  ;;  %v6295_v25 = vld [vmem:[%s10885_s28 + $0x9c8] sm:$0xff] }
 0xce5   : > { %5063 = vmatpush.msra.mxu2 %v6262_v46 }
 0xce6   : > { %5093 = vmatpush.msra.mxu3 %v6271_v63  ;;  %v6242_v63 = vld [vmem:[%s10885_s28 + $0x820] sm:$0xff] }
 0xce7   : > { %v4013_v11 = vpop.f32.mrf.mxu1  ;;  %5064 = vmatpush.msra.mxu2 %v6261_v39  ;;  %5044 = vmatpush.msrb.mxu1 %v6242_v63 }
 0xce8   : > { %v4598_v60 = vadd.f32 %v4578_v19, %v4013_v11  ;;  %5094 = vmatpush.msra.mxu3 %v6270_v35  ;;  %v5319_v35 = vld [vmem:[%s10847_s13 + $0xa8] sm:$0xff] }
 0xce9   : > { %5065 = vmatpush.msra.mxu2 %v6260_v56 }
 0xcea   : > { %v4638_v7 = vmin.f32 %v4598_v60, 0.0  ;;  %vm4618_vm5 = vcmp.gt.f32.partialorder %v4598_v60, 0.0 }
 0xceb   : > { %5066 = vmatpush.msra.mxu2 %v6259_v37 }
 0xcec   : > { %v4662_v50 = vmul.f32 1.442695, %v4638_v7 }
 0xced   : > { %5067 = vmatpush.msra.mxu2 %v6258_v18 }
 0xcee   : > { %6577 = vpow2.f32 %v4662_v50  ;;  %v6296_v50 = vld [vmem:[%s10885_s28 + $0x9d0] sm:$0xff] }
 0xcf4   : > { %v6578_v20 = vpop.eup %6577 }
 0xcf5   : > { %v6126_v49 = vadd.f32 -1.0, %v6578_v20  ;;  %v4123_v6 = vpop.f32.mrf.mxu2 }
 0xcf6   : > { %v9897_v32 = vadd.f32 %v4579_v10, %v4123_v6  ;;  %v6241_v6 = vld [vmem:[%s10885_s28 + $0x818] sm:$0xff] }
 0xcf7   : > { %v4718_v24 = vsel %vm4618_vm5, %v4598_v60, %v6126_v49  ;;  %5045 = vmatpush.msrb.mxu1 %v6241_v6 }
 0xcf8   : > { %v4639_v2 = vmin.f32 %v9897_v32, 0.0  ;;  %5003 = vmatmul.f32.vlgmr.msrb.gmra.mxu3 %v4718_v24  ;;  %vm4619_vm0 = vcmp.gt.f32.partialorder %v9897_v32, 0.0 }
 0xcf9   : > { %5464 = vmatpush.msrb.mxu3 %v5329_v61  ;;  %v5318_v61 = vld [vmem:[%s10847_s13 + $0xa0] sm:$0xff]  ;;  %5046 = vmatpush.msrb.mxu1 %v6240_v5 }
 0xcfa   : > { %v4664_v53 = vmul.f32 1.442695, %v4639_v2  ;;  %v6257_v2 = vld [vmem:[%s10885_s28 + $0x898] sm:$0xff] }
 0xcfb   : > { %5465 = vmatpush.msrb.mxu3 %v5328_v42  ;;  %v6292_v42 = vld [vmem:[%s10885_s28 + $0x9b0] sm:$0xff]  ;;  %5068 = vmatpush.msra.mxu2 %v6257_v2 }
 0xcfc   : > { %6579 = vpow2.f32 %v4664_v53  ;;  %v5317_v53 = vld [vmem:[%s10847_s13 + $0x98] sm:$0xff] }
 0xcfd   : > { %v3796_v30 = vpop.f32.mrf.mxu3  ;;  %5466 = vmatpush.msrb.mxu3 %v5327_v47  ;;  %v6239_v47 = vld [vmem:[%s10885_s28 + $0x808] sm:$0xff]  ;;  %5069 = vmatpush.msra.mxu2 %v6256_v57 }
 0xcfe   : > { %v9944_v62 = vadd.f32 %v4576_v40, %v3796_v30  ;;  %v6299_v40 = vld [vmem:[%s10885_s28 + $0x9e8] sm:$0xff]  ;;  %5047 = vmatpush.msrb.mxu1 %v6239_v47 }
 0xcff   : > { %v4016_v15 = vpop.f32.mrf.mxu1  ;;  %5467 = vmatpush.msrb.mxu3 %v5326_v26  ;;  %5104 = vmatpush.msrb.mxu0 %v6299_v40  ;;  %v6238_v26 = vld [vmem:[%s10885_s28 + $0x800] sm:$0xff]  ;;  %v6288_v40 = vld [vmem:[%s10885_s28 + $0x990] sm:$0xff] }
 0xd00   : > { %v4646_v52 = vmin.f32 %v9944_v62, 0.0  ;;  %v9961_v44 = vadd.f32 %v4578_v19, %v4016_v15  ;;  %v6298_v19 = vld [vmem:[%s10885_s28 + $0x9e0] sm:$0xff]  ;;  %vm4626_vm6 = vcmp.gt.f32.partialorder %v9944_v62, 0.0  ;;  %5048 = vmatpush.msrb.mxu1 %v6238_v26  ;;  %v6289_v15 = vld [vmem:[%s10885_s28 + $0x998] sm:$0xff]  ;;  %5070 = vmatpush.msra.mxu2 %v6255_v38 }
 0xd01   : > { %5468 = vmatpush.msrb.mxu3 %v5325_v14  ;;  %5105 = vmatpush.msrb.mxu0 %v6298_v19  ;;  %v6254_v14 = vld [vmem:[%s10885_s28 + $0x880] sm:$0xff]  ;;  %v4580_v19 = vperm.slane %v9576_v21, 6 }
 0xd02   : > { %v6580_v3 = vpop.eup %6579  ;;  %v4678_v34 = vmul.f32 1.442695, %v4646_v52  ;;  %v4648_v41 = vmin.f32 %v9961_v44, 0.0  ;;  %vm4628_vm7 = vcmp.gt.f32.partialorder %v9961_v44, 0.0  ;;  %5071 = vmatpush.msra.mxu2 %v6254_v14 }
 0xd03   : > { %v6127_v11 = vadd.f32 -1.0, %v6580_v3  ;;  %5469 = vmatpush.msrb.mxu3 %v5324_v36  ;;  %5106 = vmatpush.msrb.mxu0 %v6297_v22  ;;  %v10104_v3 = vld [vmem:[%s10886_s1 + $0x12] sm:$0x3] }
 0xd04   : > { %6581 = vpow2.f32 %v4678_v34  ;;  %v4682_v60 = vmul.f32 1.442695, %v4648_v41  ;;  %v4582_v46 = vperm.slane %v10104_v3, 0 }
 0xd05   : > { %v4719_v7 = vsel %vm4619_vm0, %v9897_v32, %v6127_v11  ;;  %5470 = vmatpush.msrb.mxu3 %v5323_v28  ;;  %5107 = vmatpush.msrb.mxu0 %v6296_v50  ;;  %v6293_v32 = vld [vmem:[%s10885_s28 + $0x9b8] sm:$0xff] }
 0xd06   : > { %6583 = vpow2.f32 %v4682_v60  ;;  %5026 = vmatmul.f32.vlgmr.msra.gmra.mxu0 %v4719_v7 }
 0xd07   : > { %5471 = vmatpush.msrb.mxu3 %v5322_v43  ;;  %5108 = vmatpush.msrb.mxu0 %v6295_v25 }
 0xd09   : > { %5472 = vmatpush.msrb.mxu3 %v5321_v17  ;;  %5109 = vmatpush.msrb.mxu0 %v6294_v51  ;;  %v4583_v51 = vperm.slane %v10104_v3, 1 }
 0xd0a   : > { %v6582_v20 = vpop.eup %6581 }
 0xd0b   : > { %v6134_v49 = vadd.f32 -1.0, %v6582_v20  ;;  %5473 = vmatpush.msrb.mxu3 %v5320_v8  ;;  %5110 = vmatpush.msrb.mxu0 %v6293_v32 }
 0xd0c   : > { %v6584_v0 = vpop.eup %6583 }
 0xd0d   : > { %v4726_v24 = vsel %vm4626_vm6, %v9944_v62, %v6134_v49  ;;  %v6136_v54 = vadd.f32 -1.0, %v6584_v0  ;;  %5474 = vmatpush.msrb.mxu3 %v5319_v35  ;;  %5111 = vmatpush.msrb.mxu0 %v6292_v42  ;;  %v5315_v62 = vld [vmem:[%s10847_s13 + $0x88] sm:$0xff] }
 0xd0e   : > { %4960 = vmatmul.f32.gmra.mxu1 %v4726_v24 }
 0xd0f   : > { %v4728_v27 = vsel %vm4628_vm7, %v9961_v44, %v6136_v54  ;;  %5475 = vmatpush.msrb.mxu3 %v5318_v61  ;;  %5112 = vmatpush.msrb.mxu0 %v6291_v13  ;;  %v6287_v44 = vld [vmem:[%s10885_s28 + $0x988] sm:$0xff] }
 0xd10   : > { %5006 = vmatmul.f32.gmra.mxu3 %v4728_v27 }
 0xd11   : > { %5476 = vmatpush.msrb.mxu3 %v5317_v53  ;;  %5113 = vmatpush.msrb.mxu0 %v6290_v31 }
 0xd12   : > { %v3903_v30 = vpop.f32.mrf.mxu0 }
 0xd13   : > { %v4597_v16 = vadd.f32 %v4577_v9, %v3903_v30  ;;  %5477 = vmatpush.msrb.mxu3 %v5316_v1  ;;  %5114 = vmatpush.msrb.mxu0 %v6289_v15 }
 0xd15   : > { %v4637_v23 = vmin.f32 %v4597_v16, 0.0  ;;  %5478 = vmatpush.msrb.mxu3 %v5315_v62  ;;  %5115 = vmatpush.msrb.mxu0 %v6288_v40  ;;  %vm4617_vm9 = vcmp.gt.f32.partialorder %v4597_v16, 0.0 }
 0xd17   : > { %v4660_v52 = vmul.f32 1.442695, %v4637_v23  ;;  %5479 = vmatpush.msrb.mxu3 %v5314_v58  ;;  %5116 = vmatpush.msrb.mxu0 %v6287_v44  ;;  %v5393_v44 = vld [vmem:[%s10847_s13 + $0x2f8] sm:$0xff] }
 0xd19   : > { %6585 = vpow2.f32 %v4660_v52  ;;  %5117 = vmatpush.msrb.mxu0 %v6286_v4 }
 0xd1a   : > { %v3906_v36 = vpop.f32.mrf.mxu0 }
 0xd1b   : > { %v4607_v59 = vadd.f32 %v4577_v9, %v3906_v36 }
 0xd1d   : > { %v4647_v34 = vmin.f32 %v4607_v59, 0.0  ;;  %vm4627_vm10 = vcmp.gt.f32.partialorder %v4607_v59, 0.0 }
 0xd1f   : > { %v6586_v41 = vpop.eup %6585  ;;  %v4680_v28 = vmul.f32 1.442695, %v4647_v34  ;;  %v4233_v11 = vpop.f32.mrf.mxu3  ;;  %v5391_v34 = vld [vmem:[%s10847_s13 + $0x2e8] sm:$0xff] }
 0xd20   : > { %v6125_v60 = vadd.f32 -1.0, %v6586_v41  ;;  %v4126_v22 = vpop.f32.mrf.mxu2  ;;  %v4600_v43 = vadd.f32 %v4580_v19, %v4233_v11 }
 0xd21   : > { %6587 = vpow2.f32 %v4680_v28  ;;  %v4609_v7 = vadd.f32 %v4579_v10, %v4126_v22 }
 0xd22   : > { %v4717_v45 = vsel %vm4617_vm9, %v4597_v16, %v6125_v60  ;;  %v4640_v39 = vmin.f32 %v4600_v43, 0.0  ;;  %v4343_v50 = vpop.f32.mrf.mxu0  ;;  %v4453_v17 = vpop.f32.mrf.mxu1  ;;  %vm4620_vm11 = vcmp.gt.f32.partialorder %v4600_v43, 0.0  ;;  %v5390_v60 = vld [vmem:[%s10847_s13 + $0x2e0] sm:$0xff] }
 0xd23   : > { %v4649_v33 = vmin.f32 %v4609_v7, 0.0  ;;  %v4601_v56 = vadd.f32 %v4581_v12, %v4343_v50  ;;  %v4602_v25 = vadd.f32 %v4582_v46, %v4453_v17  ;;  %4980 = vmatmul.f32.vlgmr.msrb.gmra.mxu2 %v4717_v45  ;;  %vm4629_vm12 = vcmp.gt.f32.partialorder %v4609_v7, 0.0  ;;  %v5389_v17 = vld [vmem:[%s10847_s13 + $0x2d8] sm:$0xff] }
 0xd24   : > { %v4666_v8 = vmul.f32 1.442695, %v4640_v39 }
 0xd25   : > { %v4684_v63 = vmul.f32 1.442695, %v4649_v33  ;;  %v4641_v37 = vmin.f32 %v4601_v56, 0.0  ;;  %v4642_v20 = vmin.f32 %v4602_v25, 0.0  ;;  %vm4621_vm13 = vcmp.gt.f32.partialorder %v4601_v56, 0.0 }
 0xd26   : > { %6589 = vpow2.f32 %v4666_v8  ;;  %vm4622_vm14 = vcmp.gt.f32.partialorder %v4602_v25, 0.0 }
 0xd27   : > { %v6588_v35 = vpop.eup %6587  ;;  %6591 = vpow2.f32 %v4684_v63  ;;  %v4668_v49 = vmul.f32 1.442695, %v4641_v37  ;;  %v4670_v21 = vmul.f32 1.442695, %v4642_v20  ;;  %v5387_v63 = vld [vmem:[%s10847_s13 + $0x2c8] sm:$0xff]  ;;  %v5386_v20 = vld [vmem:[%s10847_s13 + $0x2c0] sm:$0xff] }
 0xd28   : > { %v6135_v10 = vadd.f32 -1.0, %v6588_v35 }
 0xd29   : > { %6593 = vpow2.f32 %v4668_v49  ;;  %v4236_v6 = vpop.f32.mrf.mxu3  ;;  %v4563_v18 = vpop.f32.mrf.mxu2  ;;  %v5385_v49 = vld [vmem:[%s10847_s13 + $0x2b8] sm:$0xff] }
 0xd2a   : > { %6595 = vpow2.f32 %v4670_v21  ;;  %v10111_v0 = vadd.f32 %v4580_v19, %v4236_v6  ;;  %v10113_v32 = vadd.f32 %v4583_v51, %v4563_v18  ;;  %v4346_v61 = vpop.f32.mrf.mxu0  ;;  %v4456_v24 = vpop.f32.mrf.mxu1  ;;  %v4727_v54 = vsel %vm4627_vm10, %v4607_v59, %v6135_v10  ;;  %v5392_v59 = vld [vmem:[%s10847_s13 + $0x2f0] sm:$0xff]  ;;  %v5383_v10 = vld [vmem:[%s10847_s13 + $0x2a8] sm:$0xff]  ;;  %v5382_v6 = vld [vmem:[%s10847_s13 + $0x2a0] sm:$0xff] }
 0xd2b   : > { %v10115_v5 = vadd.f32 %v4581_v12, %v4346_v61  ;;  %v10117_v2 = vadd.f32 %v4582_v46, %v4456_v24  ;;  %4983 = vmatmul.f32.gmra.mxu2 %v4727_v54  ;;  %v5384_v21 = vld [vmem:[%s10847_s13 + $0x2b0] sm:$0xff]  ;;  %v5381_v18 = vld [vmem:[%s10847_s13 + $0x298] sm:$0xff]  ;;  %v5378_v61 = vld [vmem:[%s10847_s13 + $0x280] sm:$0xff] }
 0xd2c   : > { %v6590_v42 = vpop.eup %6589  ;;  %v4650_v27 = vmin.f32 %v10111_v0, 0.0  ;;  %v4643_v9 = vmin.f32 %v10113_v32, 0.0  ;;  %vm4630_vm15 = vcmp.gt.f32.partialorder %v10111_v0, 0.0  ;;  %vm4623_vm1 = vcmp.gt.f32.partialorder %v10113_v32, 0.0  ;;  %v5619_v24 = vld [vmem:[%s10849_s15 + $0x78] sm:$0xff] }
 0xd2d   : > { %v6592_v53 = vpop.eup %6591  ;;  %v6128_v47 = vadd.f32 -1.0, %v6590_v42  ;;  %v4651_v57 = vmin.f32 %v10115_v5, 0.0  ;;  %v4652_v13 = vmin.f32 %v10117_v2, 0.0  ;;  %vm4631_vm3 = vcmp.gt.f32.partialorder %v10115_v5, 0.0  ;;  %v5616_v42 = vld [vmem:[%s10849_s15 + $0x60] sm:$0xff] }
 0xd2e   : > { %v4686_v1 = vmul.f32 1.442695, %v4650_v27  ;;  %v4672_v26 = vmul.f32 1.442695, %v4643_v9  ;;  %v6137_v30 = vadd.f32 -1.0, %v6592_v53  ;;  %vm4632_vm5 = vcmp.gt.f32.partialorder %v10117_v2, 0.0 }
 0xd2f   : > { %v6594_v38 = vpop.eup %6593  ;;  %v4720_v31 = vsel %vm4620_vm11, %v4600_v43, %v6128_v47  ;;  %v4688_v16 = vmul.f32 1.442695, %v4651_v57  ;;  %v4690_v62 = vmul.f32 1.442695, %v4652_v13  ;;  %v5615_v27 = vld [vmem:[%s10849_s15 + $0x58] sm:$0xff]  ;;  %v5614_v9 = vld [vmem:[%s10849_s15 + $0x50] sm:$0xff] }
 0xd30   : > { %v6596_v14 = vpop.eup %6595  ;;  %v6129_v15 = vadd.f32 -1.0, %v6594_v38  ;;  %6597 = vpow2.f32 %v4686_v1  ;;  %v4729_v23 = vsel %vm4629_vm12, %v4609_v7, %v6137_v30  ;;  %5049 = vmatmul.f32.vlgmr.msrb.gmra.mxu1 %v4720_v31  ;;  %v5613_v53 = vld [vmem:[%s10849_s15 + $0x48] sm:$0xff]  ;;  %v5612_v47 = vld [vmem:[%s10849_s15 + $0x40] sm:$0xff]  ;;  %v5611_v57 = vld [vmem:[%s10849_s15 + $0x38] sm:$0xff] }
 0xd31   : > { %v6130_v58 = vadd.f32 -1.0, %v6596_v14  ;;  %6599 = vpow2.f32 %v4672_v26  ;;  %5029 = vmatmul.f32.gmra.mxu0 %v4729_v23  ;;  %v5610_v13 = vld [vmem:[%s10849_s15 + $0x30] sm:$0xff]  ;;  %v5609_v1 = vld [vmem:[%s10849_s15 + $0x28] sm:$0xff]  ;;  %v5608_v26 = vld [vmem:[%s10849_s15 + $0x20] sm:$0xff] }
 0xd32   : > { %v4721_v40 = vsel %vm4621_vm13, %v4601_v56, %v6129_v15  ;;  %6601 = vpow2.f32 %v4688_v16  ;;  %v4566_v52 = vpop.f32.mrf.mxu2  ;;  %v5388_v56 = vld [vmem:[%s10847_s13 + $0x2d0] sm:$0xff]  ;;  %v5607_v30 = vld [vmem:[%s10849_s15 + $0x18] sm:$0xff]  ;;  %v3042_v38 = vld [vmem:[%s10846_s12] sm:$0x1] }
 0xd33   : > { %v4722_v36 = vsel %vm4622_vm14, %v4602_v25, %v6130_v58  ;;  %6603 = vpow2.f32 %v4690_v62  ;;  %v4613_v4 = vadd.f32 %v4583_v51, %v4566_v52  ;;  %5072 = vmatmul.f32.vlgmr.msra.gmra.mxu2 %v4721_v40  ;;  %v10165_v25 = vld [vmem:[%s838_s2] sm:$0xff]  ;;  %v5606_v31 = vld [vmem:[%s10849_s15 + $0x10] sm:$0xff]  ;;  %v3061_v16 = vadd.f32 %v9126_v29, %v3042_v38  ;;  %v5605_v62 = vld [vmem:[%s10849_s15 + $0x8] sm:$0xff]  ;;  %v4912_v58 = vpop.f32.mrf.mxu3 }
 0xd34   : > { %5095 = vmatmul.f32.vlgmr.msra.gmra.mxu3 %v4722_v36  ;;  %v5429_v51 = vperm.slane %v10165_v25, 1  ;;  %v5433_v54 = vperm.slane %v10165_v25, 5  ;;  %v5604_v14 = vld [vmem:[%s10849_s15] sm:$0xff]  ;;  %v4935_v23 = vpop.f32.mrf.mxu0 }
 0xd35   : > { %v4653_v19 = vmin.f32 %v4613_v4, 0.0  ;;  %5544 = vmatpush.msra.mxu3 %v5393_v44  ;;  %vm4633_vm0 = vcmp.gt.f32.partialorder %v4613_v4, 0.0  ;;  %v3063_v15 = vmax.f32 %v3061_v16, 0.0  ;;  %v4936_v29 = vadd.f32 %v4935_v23, %v4912_v58 }
 0xd36   : > { %v6598_v3 = vpop.eup %6597 }
 0xd37   : > { %v6600_v41 = vpop.eup %6599  ;;  %v4692_v28 = vmul.f32 1.442695, %v4653_v19  ;;  %5545 = vmatpush.msra.mxu3 %v5392_v59  ;;  %v6138_v11 = vadd.f32 -1.0, %v6598_v3 }
 0xd38   : > { %v6602_v12 = vpop.eup %6601  ;;  %v6131_v46 = vadd.f32 -1.0, %v6600_v41 }
 0xd39   : > { %v6604_v22 = vpop.eup %6603  ;;  %6605 = vpow2.f32 %v4692_v28  ;;  %5546 = vmatpush.msra.mxu3 %v5391_v34  ;;  %v4730_v43 = vsel %vm4630_vm15, %v10111_v0, %v6138_v11  ;;  %v6139_v7 = vadd.f32 -1.0, %v6602_v12  ;;  %v5380_v0 = vld [vmem:[%s10847_s13 + $0x290] sm:$0xff] }
 0xd3a   : > { %v4723_v45 = vsel %vm4623_vm1, %v10113_v32, %v6131_v46  ;;  %5052 = vmatmul.f32.gmra.mxu1 %v4730_v43  ;;  %v6140_v39 = vadd.f32 -1.0, %v6604_v22  ;;  %v5379_v32 = vld [vmem:[%s10847_s13 + $0x288] sm:$0xff] }
 0xd3b   : > { %5118 = vmatmul.f32.vlgmr.msrb.gmra.mxu0 %v4723_v45  ;;  %5547 = vmatpush.msra.mxu3 %v5390_v60  ;;  %v4731_v50 = vsel %vm4631_vm3, %v10115_v5, %v6139_v7  ;;  %v5618_v5 = vld [vmem:[%s10849_s15 + $0x70] sm:$0xff] }
 0xd3c   : > { %5075 = vmatmul.f32.gmra.mxu2 %v4731_v50  ;;  %v4732_v33 = vsel %vm4632_vm5, %v10117_v2, %v6140_v39  ;;  %v5617_v2 = vld [vmem:[%s10849_s15 + $0x68] sm:$0xff]  ;;  %v4938_v40 = vpop.f32.mrf.mxu0 }
 0xd3d   : > { %5098 = vmatmul.f32.gmra.mxu3 %v4732_v33 }
 0xd3e   : > { %5548 = vmatpush.msra.mxu3 %v5389_v17 }
 0xd3f   : > { %v6606_v8 = vpop.eup %6605 }
 0xd40   : > { %5549 = vmatpush.msra.mxu3 %v5388_v56  ;;  %v6141_v37 = vadd.f32 -1.0, %v6606_v8 }
 0xd42   : > { %5550 = vmatpush.msra.mxu3 %v5387_v63  ;;  %v4733_v35 = vsel %vm4633_vm0, %v4613_v4, %v6141_v37  ;;  %v6356_v63 = vld [vmem:[%s10843_s9 + $0x1] ss:$0 sm:$0xff] }
 0xd43   : > { %5121 = vmatmul.f32.gmra.mxu0 %v4733_v35  ;;  %v6357_v37 = vld [vmem:[%s10842_s8 + $0x1] ss:$0 sm:$0xff] }
 0xd44   : > { %5551 = vmatpush.msra.mxu3 %v5386_v20 }
 0xd45   : > { %5480 = vmatmul.f32.vlgmr.msrb.gmra.mxu3 %v5429_v51 }
 0xd46   : > { %5552 = vmatpush.msra.mxu3 %v5385_v49 }
 0xd48   : > { %5553 = vmatpush.msra.mxu3 %v5384_v21 }
 0xd4a   : > { %5554 = vmatpush.msra.mxu3 %v5383_v10  ;;  %v4915_v52 = vpop.f32.mrf.mxu3 }
 0xd4b   : > { %v4939_v46 = vadd.f32 %v4938_v40, %v4915_v52 }
 0xd4c   : > { %5555 = vmatpush.msra.mxu3 %v5382_v6  ;;  %v4958_v44 = vpop.f32.mrf.mxu1 }
 0xd4d   : > { %v4959_v19 = vadd.f32 %v4958_v44, %v4936_v29 }
 0xd4e   : > { %5556 = vmatpush.msra.mxu3 %v5381_v18 }
 0xd50   : > { %5557 = vmatpush.msra.mxu3 %v5380_v0 }
 0xd52   : > { %5558 = vmatpush.msra.mxu3 %v5379_v32 }
 0xd54   : > { %5559 = vmatpush.msra.mxu3 %v5378_v61 }
 0xd55   : > { %5560 = vmatmul.f32.vlgmr.msra.gmra.mxu3 %v5433_v54 }
 0xd56   : > { %5656 = vmatpush.msrb.mxu3 %v5619_v24 }
 0xd58   : > { %5657 = vmatpush.msrb.mxu3 %v5618_v5 }
 0xd5a   : > { %5658 = vmatpush.msrb.mxu3 %v5617_v2 }
 0xd5c   : > { %5659 = vmatpush.msrb.mxu3 %v5616_v42 }
 0xd5e   : > { %5660 = vmatpush.msrb.mxu3 %v5615_v27 }
 0xd60   : > { %5661 = vmatpush.msrb.mxu3 %v5614_v9 }
 0xd62   : > { %5662 = vmatpush.msrb.mxu3 %v5613_v53 }
 0xd64   : > { %5663 = vmatpush.msrb.mxu3 %v5612_v47 }
 0xd66   : > { %5664 = vmatpush.msrb.mxu3 %v5611_v57 }
 0xd68   : > { %5665 = vmatpush.msrb.mxu3 %v5610_v13 }
 0xd6a   : > { %5666 = vmatpush.msrb.mxu3 %v5609_v1 }
 0xd6c   : > { %5667 = vmatpush.msrb.mxu3 %v5608_v26 }
 0xd6e   : > { %5668 = vmatpush.msrb.mxu3 %v5607_v30 }
 0xd70   : > { %5669 = vmatpush.msrb.mxu3 %v5606_v31 }
 0xd72   : > { %5670 = vmatpush.msrb.mxu3 %v5605_v62 }
 0xd74   : > { %5671 = vmatpush.msrb.mxu3 %v5604_v14 }
 0xd75   : > { %5672 = vmatmul.f32.vlgmr.msrb.gmra.mxu3 %v3063_v15 }
 0xd7b   : > { %v5004_v4 = vpop.f32.mrf.mxu3 }
 0xd83   : > { %v5027_v59 = vpop.f32.mrf.mxu0 }
 0xd8b   : > { %v4961_v3 = vpop.f32.mrf.mxu1 }
 0xd8c   : > { %v4962_v22 = vadd.f32 %v4961_v3, %v4939_v46  ;;  %v6317_v46 = vld [vmem:[%s10845_s11 + $0xd0] sm:$0xff] }
 0xd93   : > { %v5007_v28 = vpop.f32.mrf.mxu3 }
 0xda6   : > { %v4981_v36 = vpop.f32.mrf.mxu2 }
 0xda7   : > { %v4982_v34 = vadd.f32 %v4981_v36, %v4959_v19 }
 0xda9   : > { %v5005_v11 = vadd.f32 %v5004_v4, %v4982_v34  ;;  %v6322_v34 = vld [vmem:[%s10845_s11 + $0xf8] sm:$0xff] }
 0xdaa   : > { %5276 = vmatpush.msrb.mxu2 %v6322_v34  ;;  %v5333_v34 = vld [vmem:[%s10847_s13 + $0x118] sm:$0xff] }
 0xdab   : > { %v5028_v43 = vadd.f32 %v5027_v59, %v5005_v11  ;;  %v6318_v11 = vld [vmem:[%s10845_s11 + $0xd8] sm:$0xff] }
 0xdad   : > { %v5050_v60 = vpop.f32.mrf.mxu1 }
 0xdae   : > { %v4984_v41 = vpop.f32.mrf.mxu2  ;;  %v5030_v12 = vpop.f32.mrf.mxu0  ;;  %v5051_v45 = vadd.f32 %v5050_v60, %v5028_v43  ;;  %v6316_v60 = vld [vmem:[%s10845_s11 + $0xc8] sm:$0xff] }
 0xdaf   : > { %v4985_v7 = vadd.f32 %v4984_v41, %v4962_v22  ;;  %v6321_v41 = vld [vmem:[%s10845_s11 + $0xf0] sm:$0xff]  ;;  %v6315_v22 = vld [vmem:[%s10845_s11 + $0xc0] sm:$0xff] }
 0xdb0   : > { %5277 = vmatpush.msrb.mxu2 %v6321_v41  ;;  %v5347_v41 = vld [vmem:[%s10847_s13 + $0x188] sm:$0xff] }
 0xdb1   : > { %v5008_v33 = vadd.f32 %v5007_v28, %v4985_v7  ;;  %v5313_v28 = vld [vmem:[%s10847_s13 + $0x78] sm:$0xff] }
 0xdb2   : > { %5278 = vmatpush.msrb.mxu2 %v6320_v55  ;;  %v6314_v7 = vld [vmem:[%s10845_s11 + $0xb8] sm:$0xff]  ;;  %v5298_v55 = vld [vmem:[%s10847_s13] sm:$0xff] }
 0xdb3   : > { %v5031_v35 = vadd.f32 %v5030_v12, %v5008_v33  ;;  %v5312_v12 = vld [vmem:[%s10847_s13 + $0x70] sm:$0xff] }
 0xdb4   : > { %5279 = vmatpush.msrb.mxu2 %v6319_v48  ;;  %v5332_v48 = vld [vmem:[%s10847_s13 + $0x110] sm:$0xff] }
 0xdb6   : > { %v5073_v39 = vpop.f32.mrf.mxu2  ;;  %5280 = vmatpush.msrb.mxu2 %v6318_v11  ;;  %v5377_v11 = vld [vmem:[%s10847_s13 + $0x278] sm:$0xff] }
 0xdb7   : > { %v5074_v50 = vadd.f32 %v5073_v39, %v5051_v45  ;;  %v5096_v17 = vpop.f32.mrf.mxu3  ;;  %v5053_v20 = vpop.f32.mrf.mxu1  ;;  %v6313_v45 = vld [vmem:[%s10845_s11 + $0xb0] sm:$0xff] }
 0xdb8   : > { %v5119_v8 = vpop.f32.mrf.mxu0  ;;  %v5054_v10 = vadd.f32 %v5053_v20, %v5031_v35  ;;  %5281 = vmatpush.msrb.mxu2 %v6317_v46  ;;  %v5361_v35 = vld [vmem:[%s10847_s13 + $0x1f8] sm:$0xff]  ;;  %v5376_v46 = vld [vmem:[%s10847_s13 + $0x270] sm:$0xff] }
 0xdb9   : > { %v5097_v56 = vadd.f32 %v5096_v17, %v5074_v50  ;;  %v6312_v50 = vld [vmem:[%s10845_s11 + $0xa8] sm:$0xff]  ;;  %v6311_v17 = vld [vmem:[%s10845_s11 + $0xa0] sm:$0xff] }
 0xdba   : > { %5282 = vmatpush.msrb.mxu2 %v6316_v60  ;;  %v5330_v60 = vld [vmem:[%s10847_s13 + $0x100] sm:$0xff] }
 0xdbb   : > { %v5120_v51 = vadd.f32 %v5119_v8, %v5097_v56  ;;  %v6310_v8 = vld [vmem:[%s10845_s11 + $0x98] sm:$0xff] }
 0xdbc   : > { %5283 = vmatpush.msrb.mxu2 %v6315_v22  ;;  %v5375_v22 = vld [vmem:[%s10847_s13 + $0x268] sm:$0xff] }
 0xdbd   : > { %v5141_v49 = vmul.f32 %v6356_v63, %v5120_v51  ;;  %v5132_v21 = vmul.f32 %v6357_v37, %v5120_v51 }
 0xdbe   : > { %5284 = vmatpush.msrb.mxu2 %v6314_v7 }
 0xdbf   : > { %v5076_v6 = vpop.f32.mrf.mxu2  ;;  %5143 = vadd.xlane.f32.xlu2 %v5141_v49  ;;  %5134 = vadd.xlane.f32.xlu0 %v5132_v21  ;;  %v5360_v21 = vld [vmem:[%s10847_s13 + $0x1f0] sm:$0xff] }
 0xdc0   : > { %v5077_v18 = vadd.f32 %v5076_v6, %v5054_v10  ;;  %v5099_v0 = vpop.f32.mrf.mxu3  ;;  %v5122_v61 = vpop.f32.mrf.mxu0  ;;  %5285 = vmatpush.msrb.mxu2 %v6313_v45  ;;  %v5311_v10 = vld [vmem:[%s10847_s13 + $0x68] sm:$0xff]  ;;  %v5345_v6 = vld [vmem:[%s10847_s13 + $0x178] sm:$0xff]  ;;  %v5374_v45 = vld [vmem:[%s10847_s13 + $0x260] sm:$0xff] }
 0xdc1   : > { %5484 = vmatpush.msra.mxu0 %v5345_v6  ;;  %v5403_v6 = vld [vmem:[%s10847_s13 + $0x348] sm:$0xff] }
 0xdc2   : > { %v5100_v32 = vadd.f32 %v5099_v0, %v5077_v18  ;;  %5286 = vmatpush.msrb.mxu2 %v6312_v50  ;;  %v5359_v18 = vld [vmem:[%s10847_s13 + $0x1e8] sm:$0xff]  ;;  %v5310_v0 = vld [vmem:[%s10847_s13 + $0x60] sm:$0xff]  ;;  %v5373_v50 = vld [vmem:[%s10847_s13 + $0x258] sm:$0xff] }
 0xdc4   : > { %v5123_v24 = vadd.f32 %v5122_v61, %v5100_v32  ;;  %5287 = vmatpush.msrb.mxu2 %v6311_v17  ;;  %v5344_v32 = vld [vmem:[%s10847_s13 + $0x170] sm:$0xff]  ;;  %v5358_v61 = vld [vmem:[%s10847_s13 + $0x1e0] sm:$0xff]  ;;  %v5407_v17 = vld [vmem:[%s10847_s13 + $0x368] sm:$0xff] }
 0xdc5   : > { %5485 = vmatpush.msra.mxu0 %v5344_v32  ;;  %v5368_v32 = vld [vmem:[%s10847_s13 + $0x230] sm:$0xff] }
 0xdc6   : > { %5239 = vmatpush.msra.mxu1 %v5123_v24  ;;  %v5142_v54 = vmul.f32 %v6356_v63, %v5123_v24  ;;  %v5133_v5 = vmul.f32 %v6357_v37, %v5123_v24  ;;  %v6309_v63 = vld [vmem:[%s10845_s11 + $0x90] sm:$0xff]  ;;  %5288 = vmatpush.msrb.mxu2 %v6310_v8  ;;  %v6308_v37 = vld [vmem:[%s10845_s11 + $0x88] sm:$0xff]  ;;  %v5309_v24 = vld [vmem:[%s10847_s13 + $0x58] sm:$0xff] }
 0xdc7   : > { %v5406_v8 = vld [vmem:[%s10847_s13 + $0x360] sm:$0xff] }
 0xdc8   : > { %5240 = vmatpush.msra.mxu1 %v5120_v51  ;;  %5145 = vadd.xlane.f32.xlu0 %v5142_v54  ;;  %v6307_v51 = vld [vmem:[%s10845_s11 + $0x80] sm:$0xff]  ;;  %v5343_v54 = vld [vmem:[%s10847_s13 + $0x168] sm:$0xff] }
 0xdc9   : > { %5136 = vadd.xlane.f32.xlu1 %v5133_v5  ;;  %5289 = vmatpush.msrb.mxu2 %v6309_v63  ;;  %v5357_v5 = vld [vmem:[%s10847_s13 + $0x1d8] sm:$0xff]  ;;  %v5371_v63 = vld [vmem:[%s10847_s13 + $0x248] sm:$0xff] }
 0xdca   : > { %5444 = vmatpush.msrb.mxu1 %v5313_v28  ;;  %5486 = vmatpush.msra.mxu0 %v5343_v54  ;;  %v5346_v28 = vld [vmem:[%s10847_s13 + $0x180] sm:$0xff]  ;;  %v5367_v54 = vld [vmem:[%s10847_s13 + $0x228] sm:$0xff] }
 0xdcb   : > { %5290 = vmatpush.msrb.mxu2 %v6308_v37  ;;  %v5405_v37 = vld [vmem:[%s10847_s13 + $0x358] sm:$0xff] }
 0xdcc   : > { %5445 = vmatpush.msrb.mxu1 %v5312_v12  ;;  %v5331_v12 = vld [vmem:[%s10847_s13 + $0x108] sm:$0xff] }
 0xdcd   : > { %5291 = vmatpush.msrb.mxu2 %v6307_v51 }
 0xdce   : > { %5446 = vmatpush.msrb.mxu1 %v5311_v10  ;;  %v5369_v10 = vld [vmem:[%s10847_s13 + $0x238] sm:$0xff] }
 0xdcf   : > { %5504 = vmatpush.msra.mxu2 %v5361_v35  ;;  %v5370_v35 = vld [vmem:[%s10847_s13 + $0x240] sm:$0xff] }
 0xdd0   : > { %5447 = vmatpush.msrb.mxu1 %v5310_v0 }
 0xdd1   : > { %5505 = vmatpush.msra.mxu2 %v5360_v21 }
 0xdd2   : > { %5448 = vmatpush.msrb.mxu1 %v5309_v24 }
 0xdd3   : > { %5506 = vmatpush.msra.mxu2 %v5359_v18 }
 0xdd5   : > { %5507 = vmatpush.msra.mxu2 %v5358_v61  ;;  %v5402_v61 = vld [vmem:[%s10847_s13 + $0x340] sm:$0xff] }
 0xdd7   : > { %5508 = vmatpush.msra.mxu2 %v5357_v5  ;;  %v5401_v5 = vld [vmem:[%s10847_s13 + $0x338] sm:$0xff] }
 0xe32   : > { %v5135_v2 = vpop.xlane.xlu0 %5134  ;;  %v5144_v53 = vpop.xlane.xlu2 %5143 }
 0xe33   : > { %5147 = vxpose.xlu1.b32.start [1/2] (short) (narrow) %v5135_v2, 8  ;;  %v5308_v2 = vld [vmem:[%s10847_s13 + $0x50] sm:$0xff] }
 0xe34   : > { %5449 = vmatpush.msrb.mxu1 %v5308_v2 }
 0xe3b   : > { %v5146_v47 = vpop.xlane.xlu0 %5145 }
 0xe3c   : > { %v5137_v42 = vpop.xlane.xlu1 %5136 }
 0xe3d   : > { %5148 = vxpose.xlu1.b32.end [2/2] (short) (narrow) %v5137_v42, 8  ;;  %v5342_v42 = vld [vmem:[%s10847_s13 + $0x160] sm:$0xff] }
 0xe3e   : > { %5487 = vmatpush.msra.mxu0 %v5342_v42  ;;  %v5366_v42 = vld [vmem:[%s10847_s13 + $0x220] sm:$0xff] }
 0xed9   : > { %v5163_v27 = vpop.trf.xlu1 }
 0xeda   : > { %v5179_v9 = vperm.slane %v5163_v27, 0  ;;  %v5356_v27 = vld [vmem:[%s10847_s13 + $0x1d0] sm:$0xff] }
 0xedb   : > { %5509 = vmatpush.msra.mxu2 %v5356_v27  ;;  %v5400_v27 = vld [vmem:[%s10847_s13 + $0x330] sm:$0xff] }
 0xedc   : > { %v5180_v57 = vadd.f32 %v5179_v9, %v5144_v53  ;;  %v5181_v13 = vadd.f32 %v5179_v9, %v5146_v47  ;;  %v5307_v9 = vld [vmem:[%s10847_s13 + $0x48] sm:$0xff]  ;;  %v5341_v53 = vld [vmem:[%s10847_s13 + $0x158] sm:$0xff] }
 0xedd   : > { %v5355_v47 = vld [vmem:[%s10847_s13 + $0x1c8] sm:$0xff]  ;;  %5450 = vmatpush.msrb.mxu1 %v5307_v9  ;;  %5488 = vmatpush.msra.mxu0 %v5341_v53  ;;  %v5428_v53 = vperm.slane %v10165_v25, 0 }
 0xede   : > { %v5184_v1 = vmul.f32 0.2, %v5180_v57  ;;  %v5185_v26 = vmul.f32 0.2, %v5181_v13  ;;  %vm5183_vm6 = vcmp.gt.f32.partialorder %v5181_v13, 0.0  ;;  %vm5182_vm7 = vcmp.gt.f32.partialorder %v5180_v57, 0.0  ;;  %5510 = vmatpush.msra.mxu2 %v5355_v47 }
 0xedf   : > { %v5365_v47 = vld [vmem:[%s10847_s13 + $0x218] sm:$0xff] }
 0xee0   : > { %v5187_v30 = vsel %vm5183_vm6, %v5181_v13, %v5185_v26  ;;  %v5186_v38 = vsel %vm5182_vm7, %v5180_v57, %v5184_v1  ;;  %v5306_v57 = vld [vmem:[%s10847_s13 + $0x40] sm:$0xff]  ;;  %v5340_v13 = vld [vmem:[%s10847_s13 + $0x150] sm:$0xff]  ;;  %v5305_v26 = vld [vmem:[%s10847_s13 + $0x38] sm:$0xff] }
 0xee1   : > { %v5189_v31 = vsel %vm3071_vm8, %v5187_v30, -1e+30  ;;  %v5188_v16 = vsel %vm3070_vm4, %v5186_v38, -1e+30  ;;  %v5354_v1 = vld [vmem:[%s10847_s13 + $0x1c0] sm:$0xff]  ;;  %5451 = vmatpush.msrb.mxu1 %v5306_v57  ;;  %5489 = vmatpush.msra.mxu0 %v5340_v13  ;;  %v5339_v30 = vld [vmem:[%s10847_s13 + $0x148] sm:$0xff] }
 0xee2   : > { %v5193_v62 = vsel %vm1299_vm2, %v5189_v31, -inf  ;;  %v5190_v14 = vsel %vm1299_vm2, %v5188_v16, -inf  ;;  %5511 = vmatpush.msra.mxu2 %v5354_v1  ;;  %v5353_v38 = vld [vmem:[%s10847_s13 + $0x1b8] sm:$0xff]  ;;  %v5399_v57 = vld [vmem:[%s10847_s13 + $0x328] sm:$0xff]  ;;  %v5364_v1 = vld [vmem:[%s10847_s13 + $0x210] sm:$0xff] }
 0xee3   : > { %5194 = vmax.xlane.f32.xlu0 %v5193_v62  ;;  %5191 = vmax.xlane.f32.xlu2 %v5190_v14  ;;  %v5352_v62 = vld [vmem:[%s10847_s13 + $0x1b0] sm:$0xff]  ;;  %v5303_v14 = vld [vmem:[%s10847_s13 + $0x28] sm:$0xff] }
 0xee4   : > { %5452 = vmatpush.msrb.mxu1 %v5305_v26  ;;  %5490 = vmatpush.msra.mxu0 %v5339_v30  ;;  %v5398_v26 = vld [vmem:[%s10847_s13 + $0x320] sm:$0xff] }
 0xee5   : > { %5512 = vmatpush.msra.mxu2 %v5353_v38  ;;  %v5430_v38 = vperm.slane %v10165_v25, 2 }
 0xee7   : > { %5513 = vmatpush.msra.mxu2 %v5352_v62 }
 0xf56   : > { %v5195_v15 = vpop.xlane.xlu0 %5194  ;;  %v5192_v23 = vpop.xlane.xlu2 %5191 }
 0xf57   : > { %v5197_v58 = vsub.f32 %v5189_v31, %v5195_v15  ;;  %v5196_v40 = vsub.f32 %v5188_v16, %v5192_v23  ;;  %v5304_v31 = vld [vmem:[%s10847_s13 + $0x30] sm:$0xff]  ;;  %v5338_v16 = vld [vmem:[%s10847_s13 + $0x140] sm:$0xff]  ;;  %v5337_v15 = vld [vmem:[%s10847_s13 + $0x138] sm:$0xff] }
 0xf58   : > { %5453 = vmatpush.msrb.mxu1 %v5304_v31  ;;  %5491 = vmatpush.msra.mxu0 %v5338_v16  ;;  %v5351_v23 = vld [vmem:[%s10847_s13 + $0x1a8] sm:$0xff]  ;;  %v5397_v16 = vld [vmem:[%s10847_s13 + $0x318] sm:$0xff] }
 0xf59   : > { %v5200_v52 = vmul.f32 1.442695, %v5197_v58  ;;  %v5198_v44 = vmul.f32 1.442695, %v5196_v40  ;;  %5514 = vmatpush.msra.mxu2 %v5351_v23  ;;  %v5302_v58 = vld [vmem:[%s10847_s13 + $0x20] sm:$0xff]  ;;  %v5336_v40 = vld [vmem:[%s10847_s13 + $0x130] sm:$0xff] }
 0xf5a   : > { %5454 = vmatpush.msrb.mxu1 %v5303_v14  ;;  %5492 = vmatpush.msra.mxu0 %v5337_v15  ;;  %v5363_v31 = vld [vmem:[%s10847_s13 + $0x208] sm:$0xff]  ;;  %v5362_v14 = vld [vmem:[%s10847_s13 + $0x200] sm:$0xff]  ;;  %v5396_v15 = vld [vmem:[%s10847_s13 + $0x310] sm:$0xff] }
 0xf5b   : > { %6607 = vpow2.f32 %v5200_v52  ;;  %v5350_v52 = vld [vmem:[%s10847_s13 + $0x1a0] sm:$0xff] }
 0xf5c   : > { %6609 = vpow2.f32 %v5198_v44  ;;  %5455 = vmatpush.msrb.mxu1 %v5302_v58  ;;  %5493 = vmatpush.msra.mxu0 %v5336_v40  ;;  %v5301_v44 = vld [vmem:[%s10847_s13 + $0x18] sm:$0xff]  ;;  %v5432_v40 = vperm.slane %v10165_v25, 4 }
 0xf5d   : > { %5515 = vmatpush.msra.mxu2 %v5350_v52  ;;  %v5425_v58 = vld [vmem:[%s10847_s13 + $0x3f8] sm:$0xff]  ;;  %v5424_v52 = vld [vmem:[%s10847_s13 + $0x3f0] sm:$0xff] }
 0xf5e   : > { %5456 = vmatpush.msrb.mxu1 %v5301_v44  ;;  %v5395_v44 = vld [vmem:[%s10847_s13 + $0x308] sm:$0xff] }
 0xf61   : > { %v6608_v36 = vpop.eup %6607 }
 0xf62   : > { %v6610_v29 = vpop.eup %6609  ;;  %v5203_v4 = vsel %vm3071_vm8, %v6608_v36, 0.0  ;;  %v5335_v36 = vld [vmem:[%s10847_s13 + $0x128] sm:$0xff] }
 0xf63   : > { %v5207_v59 = vsel %vm1299_vm2, %v5203_v4, 0.0  ;;  %v5202_v19 = vsel %vm3070_vm4, %v6610_v29, 0.0  ;;  %v5349_v29 = vld [vmem:[%s10847_s13 + $0x198] sm:$0xff]  ;;  %5494 = vmatpush.msra.mxu0 %v5335_v36  ;;  %v5394_v36 = vld [vmem:[%s10847_s13 + $0x300] sm:$0xff] }
 0xf64   : > { %5208 = vadd.xlane.f32.xlu0 %v5207_v59  ;;  %v5204_v3 = vsel %vm1299_vm2, %v5202_v19, 0.0  ;;  %5516 = vmatpush.msra.mxu2 %v5349_v29  ;;  %v5334_v59 = vld [vmem:[%s10847_s13 + $0x120] sm:$0xff]  ;;  %v5434_v29 = vperm.slane %v10165_v25, 6 }
 0xf65   : > { %5205 = vadd.xlane.f32.xlu2 %v5204_v3  ;;  %5495 = vmatpush.msra.mxu0 %v5334_v59  ;;  %v5299_v3 = vld [vmem:[%s10847_s13 + $0x8] sm:$0xff]  ;;  %v5634_v59 = vld [vmem:[%s10850_s16 + $0x70] sm:$0xff] }
 0xf67   : > { %5496 = vmatpush.msra.mxu0 %v5333_v34  ;;  %v5422_v34 = vld [vmem:[%s10847_s13 + $0x3e0] sm:$0xff] }
 0xf69   : > { %5497 = vmatpush.msra.mxu0 %v5332_v48  ;;  %v5421_v48 = vld [vmem:[%s10847_s13 + $0x3d8] sm:$0xff] }
 0xf6b   : > { %5498 = vmatpush.msra.mxu0 %v5331_v12  ;;  %v5630_v12 = vld [vmem:[%s10850_s16 + $0x50] sm:$0xff] }
 0xf6d   : > { %5499 = vmatpush.msra.mxu0 %v5330_v60  ;;  %v5629_v60 = vld [vmem:[%s10850_s16 + $0x48] sm:$0xff] }
 0xf6e   : > { %5500 = vmatmul.f32.vlgmr.msra.gmra.mxu0 %v5430_v38  ;;  %v5426_v38 = vld [vmem:[%s10848_s14] sm:$0x1] }
 0xfd7   : > { %v5209_v39 = vpop.xlane.xlu0 %5208 }
 0xfd8   : > { %v5206_v43 = vpop.xlane.xlu2 %5205 }
 0xfd9   : > { %6611 = vrcp.f32 %v5206_v43  ;;  %v5409_v43 = vld [vmem:[%s10847_s13 + $0x378] sm:$0xff] }
 0xfda   : > { %6613 = vrcp.f32 %v5209_v39  ;;  %5564 = vmatpush.msrb.mxu0 %v5409_v43  ;;  %v5408_v39 = vld [vmem:[%s10847_s13 + $0x370] sm:$0xff]  ;;  %v5628_v43 = vld [vmem:[%s10850_s16 + $0x40] sm:$0xff] }
 0xfdc   : > { %5565 = vmatpush.msrb.mxu0 %v5408_v39  ;;  %v5416_v39 = vld [vmem:[%s10847_s13 + $0x3b0] sm:$0xff] }
 0xfde   : > { %5566 = vmatpush.msrb.mxu0 %v5407_v17  ;;  %v5415_v17 = vld [vmem:[%s10847_s13 + $0x3a8] sm:$0xff] }
 0xfdf   : > { %v6612_v33 = vpop.eup %6611 }
 0xfe0   : > { %v5212_v56 = vmul.f32 %v6612_v33, %v5202_v19  ;;  %v6614_v20 = vpop.eup %6613  ;;  %v5348_v19 = vld [vmem:[%s10847_s13 + $0x190] sm:$0xff]  ;;  %v6358_v33 = vld [vmem:[%s10844_s10 + $0x1] ss:$0 sm:$0xff]  ;;  %5567 = vmatpush.msrb.mxu0 %v5406_v8 }
 0xfe1   : > { %v5213_v49 = vmul.f32 %v6614_v20, %v5203_v4  ;;  %v5300_v4 = vld [vmem:[%s10847_s13 + $0x10] sm:$0xff]  ;;  %5517 = vmatpush.msra.mxu2 %v5348_v19  ;;  %v5423_v19 = vld [vmem:[%s10847_s13 + $0x3e8] sm:$0xff]  ;;  %v5624_v8 = vld [vmem:[%s10850_s16 + $0x20] sm:$0xff] }
 0xfe2   : > { %6305 = vmatmul.msk.f32.vlgmr.msra.gmra.mxu1 %vm1299_vm2, %v5212_v56  ;;  %v5372_v56 = vld [vmem:[%s10847_s13 + $0x250] sm:$0xff]  ;;  %5568 = vmatpush.msrb.mxu0 %v5405_v37  ;;  %v5623_v37 = vld [vmem:[%s10850_s16 + $0x18] sm:$0xff] }
 0xfe3   : > { %5457 = vmatpush.msrb.mxu1 %v5300_v4  ;;  %5518 = vmatpush.msra.mxu2 %v5347_v41  ;;  %v5635_v4 = vld [vmem:[%s10850_s16 + $0x78] sm:$0xff]  ;;  %v5431_v41 = vperm.slane %v10165_v25, 3 }
 0xfe5   : > { %5458 = vmatpush.msrb.mxu1 %v5299_v3  ;;  %5519 = vmatpush.msra.mxu2 %v5346_v28  ;;  %v5633_v3 = vld [vmem:[%s10850_s16 + $0x68] sm:$0xff]  ;;  %v5631_v28 = vld [vmem:[%s10850_s16 + $0x58] sm:$0xff] }
 0xfe7   : > { %5459 = vmatpush.msrb.mxu1 %v5298_v55  ;;  %v5632_v55 = vld [vmem:[%s10850_s16 + $0x60] sm:$0xff] }
 0xfe9   : > { %5524 = vmatpush.msra.mxu1 %v5377_v11  ;;  %v5420_v11 = vld [vmem:[%s10847_s13 + $0x3d0] sm:$0xff] }
 0xfea   : > { %6306 = vmatmul.msk.f32.gmra.mxu1 %vm1299_vm2, %v5213_v49  ;;  %v5404_v49 = vld [vmem:[%s10847_s13 + $0x350] sm:$0xff]  ;;  %vm5791_vm2 = vcmask 0  }
 0xfeb   : > { %5525 = vmatpush.msra.mxu1 %v5376_v46  ;;  %5569 = vmatpush.msrb.mxu0 %v5404_v49  ;;  %v5419_v46 = vld [vmem:[%s10847_s13 + $0x3c8] sm:$0xff]  ;;  %v5435_v49 = vperm.slane %v10165_v25, 7  ;;  %v5620_v25 = vld [vmem:[%s10850_s16] sm:$0xff] }
 0xfed   : > { %5526 = vmatpush.msra.mxu1 %v5375_v22  ;;  %5570 = vmatpush.msrb.mxu0 %v5403_v6  ;;  %v5418_v22 = vld [vmem:[%s10847_s13 + $0x3c0] sm:$0xff]  ;;  %v5691_v6 = vld [vmem:[%s10851_s17 + $0x78] sm:$0xff] }
 0xfef   : > { %5527 = vmatpush.msra.mxu1 %v5374_v45  ;;  %5571 = vmatpush.msrb.mxu0 %v5402_v61  ;;  %v5627_v45 = vld [vmem:[%s10850_s16 + $0x38] sm:$0xff] }
 0xff0   : > { %v5687_v61 = vld [vmem:[%s10851_s17 + $0x58] sm:$0xff] }
 0xff1   : > { %5528 = vmatpush.msra.mxu1 %v5373_v50  ;;  %5572 = vmatpush.msrb.mxu0 %v5401_v5  ;;  %v5626_v50 = vld [vmem:[%s10850_s16 + $0x30] sm:$0xff]  ;;  %v5684_v5 = vld [vmem:[%s10851_s17 + $0x40] sm:$0xff] }
 0xff2   : > { %5460 = vmatmul.f32.vlgmr.msrb.gmra.mxu1 %v5428_v53  ;;  %v5679_v53 = vld [vmem:[%s10851_s17 + $0x18] sm:$0xff] }
 0xff3   : > { %5529 = vmatpush.msra.mxu1 %v5372_v56  ;;  %5573 = vmatpush.msrb.mxu0 %v5400_v27  ;;  %v5414_v56 = vld [vmem:[%s10847_s13 + $0x3a0] sm:$0xff]  ;;  %v5681_v27 = vld [vmem:[%s10851_s17 + $0x28] sm:$0xff] }
 0xff5   : > { %5530 = vmatpush.msra.mxu1 %v5371_v63  ;;  %5574 = vmatpush.msrb.mxu0 %v5399_v57  ;;  %v5413_v63 = vld [vmem:[%s10847_s13 + $0x398] sm:$0xff]  ;;  %v6323_v57 = vld [vmem:[%s10846_s12 + $0x1] sm:$0x1] }
 0xff7   : > { %5531 = vmatpush.msra.mxu1 %v5370_v35  ;;  %5575 = vmatpush.msrb.mxu0 %v5398_v26  ;;  %v5410_v35 = vld [vmem:[%s10847_s13 + $0x380] sm:$0xff] }
 0xff9   : > { %5532 = vmatpush.msra.mxu1 %v5369_v10  ;;  %5576 = vmatpush.msrb.mxu0 %v5397_v16  ;;  %v5621_v10 = vld [vmem:[%s10850_s16 + $0x8] sm:$0xff] }
 0xffb   : > { %5533 = vmatpush.msra.mxu1 %v5368_v32  ;;  %5577 = vmatpush.msrb.mxu0 %v5396_v15  ;;  %v5688_v32 = vld [vmem:[%s10851_s17 + $0x60] sm:$0xff] }
 0xffd   : > { %5534 = vmatpush.msra.mxu1 %v5367_v54  ;;  %5578 = vmatpush.msrb.mxu0 %v5395_v44  ;;  %v5685_v54 = vld [vmem:[%s10851_s17 + $0x48] sm:$0xff] }
 0xfff   : > { %5535 = vmatpush.msra.mxu1 %v5366_v42  ;;  %5579 = vmatpush.msrb.mxu0 %v5394_v36  ;;  %v5682_v42 = vld [vmem:[%s10851_s17 + $0x30] sm:$0xff] }
0x1000   : > { %5580 = vmatmul.f32.vlgmr.msrb.gmra.mxu0 %v5434_v29 }
0x1001   : > { %5536 = vmatpush.msra.mxu1 %v5365_v47  ;;  %5692 = vmatpush.msra.mxu0 %v5691_v6  ;;  %v5678_v47 = vld [vmem:[%s10851_s17 + $0x10] sm:$0xff]  ;;  %v5759_v6 = vld [vmem:[%s10855_s21 + $0x28] sm:$0xff] }
0x1003   : > { %5537 = vmatpush.msra.mxu1 %v5364_v1 }
0x1005   : > { %5538 = vmatpush.msra.mxu1 %v5363_v31 }
0x1007   : > { %5539 = vmatpush.msra.mxu1 %v5362_v14  ;;  %v5481_v14 = vpop.f32.mrf.mxu3 }
0x1008   : > { %5540 = vmatmul.f32.vlgmr.msra.gmra.mxu1 %v5432_v40 }
0x1009   : > { %5636 = vmatpush.msrb.mxu1 %v5635_v4 }
0x100b   : > { %5637 = vmatpush.msrb.mxu1 %v5634_v59 }
0x100d   : > { %5638 = vmatpush.msrb.mxu1 %v5633_v3 }
0x100f   : > { %5639 = vmatpush.msrb.mxu1 %v5632_v55  ;;  %v5561_v29 = vpop.f32.mrf.mxu3  ;;  %v5730_v55 = vld [vmem:[%s10853_s19 + $0x70] sm:$0xff] }
0x1011   : > { %5640 = vmatpush.msrb.mxu1 %v5631_v28  ;;  %v5728_v28 = vld [vmem:[%s10853_s19 + $0x60] sm:$0xff] }
0x1013   : > { %5641 = vmatpush.msrb.mxu1 %v5630_v12  ;;  %v5726_v12 = vld [vmem:[%s10853_s19 + $0x50] sm:$0xff] }
0x1015   : > { %5642 = vmatpush.msrb.mxu1 %v5629_v60  ;;  %v5724_v60 = vld [vmem:[%s10853_s19 + $0x40] sm:$0xff] }
0x1017   : > { %5643 = vmatpush.msrb.mxu1 %v5628_v43  ;;  %v5722_v43 = vld [vmem:[%s10853_s19 + $0x30] sm:$0xff] }
0x1019   : > { %5644 = vmatpush.msrb.mxu1 %v5627_v45  ;;  %v5720_v45 = vld [vmem:[%s10853_s19 + $0x20] sm:$0xff] }
0x101b   : > { %5645 = vmatpush.msrb.mxu1 %v5626_v50  ;;  %v5718_v50 = vld [vmem:[%s10853_s19 + $0x10] sm:$0xff] }
0x105f   : > { %v5242_v7 = vpop.f32.mrf.mxu1 }
0x1060   : > { %v5243_v20 = vadd.f32 %v6358_v33, %v5242_v7  ;;  %v5417_v7 = vld [vmem:[%s10847_s13 + $0x3b8] sm:$0xff] }
0x1062   : > { %v5248_v18 = vmax.f32 %v5243_v20, 0.0  ;;  %v5412_v20 = vld [vmem:[%s10847_s13 + $0x390] sm:$0xff] }
0x1067   : > { %v5245_v51 = vpop.f32.mrf.mxu1 }
0x1068   : > { %v5246_v21 = vadd.f32 %v6358_v33, %v5245_v51  ;;  %v5625_v33 = vld [vmem:[%s10850_s16 + $0x28] sm:$0xff] }
0x1069   : > { %5646 = vmatpush.msrb.mxu1 %v5625_v33  ;;  %v5411_v51 = vld [vmem:[%s10847_s13 + $0x388] sm:$0xff]  ;;  %v5716_v33 = vld [vmem:[%s10853_s19] sm:$0xff] }
0x106a   : > { %v5249_v0 = vmax.f32 %v5246_v21, 0.0  ;;  %v5622_v21 = vld [vmem:[%s10850_s16 + $0x10] sm:$0xff] }
0x106b   : > { %5647 = vmatpush.msrb.mxu1 %v5624_v8  ;;  %v5768_v8 = vld [vmem:[%s10855_s21 + $0x70] sm:$0xff] }
0x106c   : > { %v5250_v24 = vmax.f32 %v5248_v18, %v5249_v0  ;;  %v5690_v18 = vld [vmem:[%s10851_s17 + $0x70] sm:$0xff]  ;;  %v5689_v0 = vld [vmem:[%s10851_s17 + $0x68] sm:$0xff] }
0x106d   : > { %5648 = vmatpush.msrb.mxu1 %v5623_v37  ;;  %5693 = vmatpush.msra.mxu0 %v5690_v18  ;;  %v5766_v37 = vld [vmem:[%s10855_s21 + $0x60] sm:$0xff] }
0x106e   : > { %v5251_v2 = vrot.slane %v5250_v24, 4 }
0x106f   : > { %5649 = vmatpush.msrb.mxu1 %v5622_v21  ;;  %5694 = vmatpush.msra.mxu0 %v5689_v0  ;;  %v5461_v31 = vpop.f32.mrf.mxu1  ;;  %v5761_v21 = vld [vmem:[%s10855_s21 + $0x38] sm:$0xff] }
0x1070   : > { %v5252_v9 = vmax.f32 %v5250_v24, %v5251_v2  ;;  %v5686_v24 = vld [vmem:[%s10851_s17 + $0x50] sm:$0xff]  ;;  %v5683_v2 = vld [vmem:[%s10851_s17 + $0x38] sm:$0xff] }
0x1071   : > { %5650 = vmatpush.msrb.mxu1 %v5621_v10  ;;  %5695 = vmatpush.msra.mxu0 %v5688_v32  ;;  %v5760_v10 = vld [vmem:[%s10855_s21 + $0x30] sm:$0xff]  ;;  %v5757_v0 = vld [vmem:[%s10855_s21 + $0x18] sm:$0xff]  ;;  %v5673_v32 = vpop.f32.mrf.mxu3 }
0x1072   : > { %v5253_v13 = vrot.slane %v5252_v9, 2 }
0x1073   : > { %5651 = vmatpush.msrb.mxu1 %v5620_v25  ;;  %5696 = vmatpush.msra.mxu0 %v5687_v61  ;;  %v5758_v25 = vld [vmem:[%s10855_s21 + $0x20] sm:$0xff] }
0x1074   : > { %v5254_v30 = vmax.f32 %v5252_v9, %v5253_v13  ;;  %v5680_v9 = vld [vmem:[%s10851_s17 + $0x20] sm:$0xff]  ;;  %v5677_v13 = vld [vmem:[%s10851_s17 + $0x8] sm:$0xff] }
0x1075   : > { %5697 = vmatpush.msra.mxu0 %v5686_v24 }
0x1076   : > { %v5255_v62 = vrot.slane %v5254_v30, 1 }
0x1077   : > { %5698 = vmatpush.msra.mxu0 %v5685_v54  ;;  %v5713_v54 = vld [vmem:[%s10852_s18] sm:$0x1] }
0x1078   : > { %v5256_v23 = vmax.f32 %v5254_v30, %v5255_v62  ;;  %v5676_v30 = vld [vmem:[%s10851_s17] sm:$0xff]  ;;  %v5462_v62 = vadd.f32 %v5461_v31, %v5426_v38 }
0x1079   : > { %5699 = vmatpush.msra.mxu0 %v5684_v5 }
0x107a   : > { %5292 = vmatmul.f32.vlgmr.msrb.gmra.mxu2 %v5256_v23  ;;  %v5482_v15 = vadd.f32 %v5481_v14, %v5462_v62  ;;  %v5501_v23 = vpop.f32.mrf.mxu0 }
0x107b   : > { %5584 = vmatpush.msrb.mxu2 %v5425_v58  ;;  %5700 = vmatpush.msra.mxu0 %v5683_v2 }
0x107c   : > { %v5502_v58 = vadd.f32 %v5501_v23, %v5482_v15 }
0x107d   : > { %5585 = vmatpush.msrb.mxu2 %v5424_v52  ;;  %5701 = vmatpush.msra.mxu0 %v5682_v42 }
0x107f   : > { %5586 = vmatpush.msrb.mxu2 %v5423_v19  ;;  %5702 = vmatpush.msra.mxu0 %v5681_v27  ;;  %v5756_v27 = vld [vmem:[%s10855_s21 + $0x10] sm:$0xff] }
0x1081   : > { %5587 = vmatpush.msrb.mxu2 %v5422_v34  ;;  %5703 = vmatpush.msra.mxu0 %v5680_v9  ;;  %v5755_v9 = vld [vmem:[%s10855_s21 + $0x8] sm:$0xff] }
0x1082   : > { %5520 = vmatmul.f32.vlgmr.msra.gmra.mxu2 %v5431_v41  ;;  %v5581_v59 = vpop.f32.mrf.mxu0  ;;  %v5731_v41 = vld [vmem:[%s10853_s19 + $0x78] sm:$0xff] }
0x1083   : > { %5588 = vmatpush.msrb.mxu2 %v5421_v48  ;;  %5704 = vmatpush.msra.mxu0 %v5679_v53  ;;  %v5729_v48 = vld [vmem:[%s10853_s19 + $0x68] sm:$0xff]  ;;  %v5754_v53 = vld [vmem:[%s10855_s21] sm:$0xff] }
0x1085   : > { %5589 = vmatpush.msrb.mxu2 %v5420_v11  ;;  %5705 = vmatpush.msra.mxu0 %v5678_v47  ;;  %v5541_v44 = vpop.f32.mrf.mxu1  ;;  %v5727_v11 = vld [vmem:[%s10853_s19 + $0x58] sm:$0xff]  ;;  %v5732_v47 = vld [vmem:[%s10891_s25] sm:$0x1] }
0x1087   : > { %5590 = vmatpush.msrb.mxu2 %v5419_v46  ;;  %5706 = vmatpush.msra.mxu0 %v5677_v13  ;;  %v5725_v46 = vld [vmem:[%s10853_s19 + $0x48] sm:$0xff] }
0x1089   : > { %5591 = vmatpush.msrb.mxu2 %v5418_v22  ;;  %5707 = vmatpush.msra.mxu0 %v5676_v30  ;;  %v5723_v22 = vld [vmem:[%s10853_s19 + $0x38] sm:$0xff] }
0x108b   : > { %5592 = vmatpush.msrb.mxu2 %v5417_v7  ;;  %v5721_v7 = vld [vmem:[%s10853_s19 + $0x28] sm:$0xff] }
0x108d   : > { %5593 = vmatpush.msrb.mxu2 %v5416_v39  ;;  %v5719_v39 = vld [vmem:[%s10853_s19 + $0x18] sm:$0xff] }
0x108f   : > { %5594 = vmatpush.msrb.mxu2 %v5415_v17  ;;  %v5717_v17 = vld [vmem:[%s10853_s19 + $0x8] sm:$0xff] }
0x1091   : > { %5595 = vmatpush.msrb.mxu2 %v5414_v56  ;;  %v5769_v56 = vld [vmem:[%s10855_s21 + $0x78] sm:$0xff] }
0x1092   : > { %5771 = vmatpush.msra.mxu1 %v5769_v56 }
0x1093   : > { %5596 = vmatpush.msrb.mxu2 %v5413_v63  ;;  %v5767_v63 = vld [vmem:[%s10855_s21 + $0x68] sm:$0xff] }
0x1094   : > { %5772 = vmatpush.msra.mxu1 %v5768_v8 }
0x1095   : > { %5597 = vmatpush.msrb.mxu2 %v5412_v20  ;;  %v5765_v20 = vld [vmem:[%s10855_s21 + $0x58] sm:$0xff] }
0x1096   : > { %5773 = vmatpush.msra.mxu1 %v5767_v63 }
0x1097   : > { %5598 = vmatpush.msrb.mxu2 %v5411_v51  ;;  %v5764_v51 = vld [vmem:[%s10855_s21 + $0x50] sm:$0xff] }
0x1098   : > { %5774 = vmatpush.msra.mxu1 %v5766_v37 }
0x1099   : > { %5599 = vmatpush.msrb.mxu2 %v5410_v35  ;;  %v5763_v35 = vld [vmem:[%s10855_s21 + $0x48] sm:$0xff] }
0x109a   : > { %5600 = vmatmul.f32.vlgmr.msrb.gmra.mxu2 %v5435_v49  ;;  %5775 = vmatpush.msra.mxu1 %v5765_v20  ;;  %v5762_v49 = vld [vmem:[%s10855_s21 + $0x40] sm:$0xff] }
0x109b   : > { %5733 = vmatpush.msra.mxu2 %v5731_v41 }
0x109c   : > { %5776 = vmatpush.msra.mxu1 %v5764_v51 }
0x109d   : > { %5734 = vmatpush.msra.mxu2 %v5730_v55 }
0x109e   : > { %5777 = vmatpush.msra.mxu1 %v5763_v35 }
0x109f   : > { %5735 = vmatpush.msra.mxu2 %v5729_v48 }
0x10a0   : > { %5778 = vmatpush.msra.mxu1 %v5762_v49 }
0x10a1   : > { %5736 = vmatpush.msra.mxu2 %v5728_v28 }
0x10a2   : > { %5779 = vmatpush.msra.mxu1 %v5761_v21 }
0x10a3   : > { %5737 = vmatpush.msra.mxu2 %v5727_v11 }
0x10a4   : > { %5780 = vmatpush.msra.mxu1 %v5760_v10 }
0x10a5   : > { %5738 = vmatpush.msra.mxu2 %v5726_v12 }
0x10a6   : > { %5781 = vmatpush.msra.mxu1 %v5759_v6 }
0x10a7   : > { %5739 = vmatpush.msra.mxu2 %v5725_v46 }
0x10a8   : > { %5782 = vmatpush.msra.mxu1 %v5758_v25 }
0x10a9   : > { %5740 = vmatpush.msra.mxu2 %v5724_v60 }
0x10aa   : > { %5783 = vmatpush.msra.mxu1 %v5757_v0 }
0x10ab   : > { %5741 = vmatpush.msra.mxu2 %v5723_v22 }
0x10ac   : > { %5784 = vmatpush.msra.mxu1 %v5756_v27 }
0x10ad   : > { %5742 = vmatpush.msra.mxu2 %v5722_v43 }
0x10ae   : > { %5785 = vmatpush.msra.mxu1 %v5755_v9 }
0x10af   : > { %5743 = vmatpush.msra.mxu2 %v5721_v7 }
0x10b0   : > { %5786 = vmatpush.msra.mxu1 %v5754_v53 }
0x10b1   : > { %5744 = vmatpush.msra.mxu2 %v5720_v45 }
0x10b3   : > { %5745 = vmatpush.msra.mxu2 %v5719_v39 }
0x10b5   : > { %5746 = vmatpush.msra.mxu2 %v5718_v50 }
0x10b7   : > { %5747 = vmatpush.msra.mxu2 %v5717_v17 }
0x10b9   : > { %5748 = vmatpush.msra.mxu2 %v5716_v33 }
0x10fd   : > { %v5293_v1 = vpop.f32.mrf.mxu2 }
0x10fe   : > { %v5294_v26 = vadd.f32 %v6323_v57, %v5293_v1 }
0x1100   : > { %v5296_v16 = vmax.f32 %v5294_v26, 0.0  ;;  %v5770_v26 = vld [vmem:[#allocation2] sm:$0x1] }
0x1102   : > { %5652 = vmatmul.f32.vlgmr.msrb.gmra.mxu1 %v5296_v16 }
0x1105   : > { %v5521_v40 = vpop.f32.mrf.mxu2 }
0x1106   : > { %v5522_v52 = vadd.f32 %v5521_v40, %v5502_v58 }
0x1108   : > { %v5542_v36 = vadd.f32 %v5541_v44, %v5522_v52 }
0x110a   : > { %v5562_v4 = vadd.f32 %v5561_v29, %v5542_v36 }
0x110c   : > { %v5582_v19 = vadd.f32 %v5581_v59, %v5562_v4 }
0x111d   : > { %v5601_v3 = vpop.f32.mrf.mxu2 }
0x111e   : > { %v5602_v34 = vadd.f32 %v5601_v3, %v5582_v19 }
0x1120   : > { %5708 = vmatmul.f32.vlgmr.msra.gmra.mxu0 %v5602_v34 }
0x117f   : > { %v5653_v18 = vpop.f32.mrf.mxu1 }
0x1180   : > { %v5674_v61 = vadd.f32 %v5673_v32, %v5653_v18 }
0x119d   : > { %v5709_v24 = vpop.f32.mrf.mxu0 }
0x119e   : > { %v5712_v5 = vadd.f32 %v5709_v24, %v5674_v61 }
0x11a0   : > { %v5714_v2 = vadd.f32 %v5713_v54, %v5712_v5 }
0x11a2   : > { %v5715_v42 = vmax.f32 %v5714_v2, 0.0 }
0x11a4   : > { %5749 = vmatmul.f32.vlgmr.msra.gmra.mxu2 %v5715_v42 }
0x1227   : > { %v5750_v57 = vpop.f32.mrf.mxu2 }
0x1228   : > { %v5751_v13 = vadd.f32 %v5750_v57, %v5732_v47 }
0x122a   : > { %v5753_v1 = vmax.f32 %v5751_v13, 0.0 }
0x122c   : > { %5787 = vmatmul.f32.vlgmr.msra.gmra.mxu1 %v5753_v1 }
0x12a9   : > { %v5788_v30 = vpop.f32.mrf.mxu1 }
0x12aa   : > { %v5789_v38 = vadd.f32 %v5788_v30, %v5770_v26 }
0x12ac   : > { %5792 = vst.msk [vmem:[%s841_s23] sm:$0x1] %vm5791_vm2, %v5789_v38 }
0x12ad PF: > { %s10893_s5 = sld [smem:[#allocation6_spill]] }
0x12ae   : > { %s10894_s24 = sld [smem:[#allocation5_spill]] }
0x12af   : > { %s10895_s25 = sld [smem:[#allocation7_spill]] }
0x12b3   : > { %p32_p9 = scmp.ge.s32.totalorder %s10893_s5, 4  }
0x12b5   :  { %34 = sbr.rel (!%p32_p9) target bundleno = 13 (0xd), region = 246 }

</bundles_post_ra>
